<compile_context>
chip_gen: v7x
topology: tpu7x:2x2x1
jax: 0.10.0
libtpu: 0.0.40
codegen_flags: <defaults>
</compile_context>

<pallas_src>
import functools

import jax
import jax.numpy as jnp
from jax.experimental import pallas as pl
from jax.experimental.pallas import tpu as pltpu


# ---------------------------------------------------------------------------
# Fused  sum_p(A_p @ W_p) + bias  ->  Mish  [-> + residual]   Pallas kernel
# ---------------------------------------------------------------------------
def _mish(y):
    # softplus(y) = max(y, 0) + log(1 + exp(-|y|))   (numerically stable)
    sp = jnp.maximum(y, 0.0) + jnp.log(1.0 + jnp.exp(-jnp.abs(y)))
    return y * jnp.tanh(sp)


def _make_kernel(n_pairs, has_residual):
    def kernel(*refs):
        aw_refs = refs[: 2 * n_pairs]
        b_ref = refs[2 * n_pairs]
        idx = 2 * n_pairs + 1
        if has_residual:
            r_ref = refs[idx]
            idx += 1
        else:
            r_ref = None
        o_ref = refs[idx]
        acc_ref = refs[idx + 1]

        k = pl.program_id(2)

        @pl.when(k == 0)
        def _():
            acc_ref[...] = jnp.zeros_like(acc_ref)

        for p in range(n_pairs):  # bf16 x bf16 -> f32 accumulate on the MXU
            acc_ref[...] += jnp.dot(
                aw_refs[2 * p][...], aw_refs[2 * p + 1][...],
                preferred_element_type=jnp.float32,
            )

        @pl.when(k == pl.num_programs(2) - 1)
        def _():
            y = acc_ref[...] + b_ref[...]            # folded-BN bias
            y = _mish(y)                             # Mish activation
            if r_ref is not None:
                y = y + r_ref[...].astype(jnp.float32)   # residual shortcut
            o_ref[...] = y.astype(o_ref.dtype)

    return kernel


def _round_up(x, m):
    return (x + m - 1) // m * m


def _pick_tk(K, cap=1536):
    """Largest lane-aligned K tile <= cap that divides K (or the full K)."""
    if K <= cap:
        return K
    for tk in (1536, 1280, 1152, 1024, 896, 768, 640, 512, 384, 256, 128):
        if K % tk == 0:
            return tk
    return K  # fallback: single (full-extent) K block


def fused_conv_bn_mish(a_list, w_list, bias, residual=None):
    """sum_p(A_p @ W_p) + bias -> Mish [-> + residual], one pallas_call.

    A_p : (M, K) activation / im2col patch matrix (cast to bf16 here)
    W_p : (K, Cout) weights with BN scale pre-folded (bf16)
    bias: (Cout,) f32
    """
    n_pairs = len(a_list)
    M, K = a_list[0].shape
    Cout = w_list[0].shape[1]
    for a, w in zip(a_list, w_list):
        assert a.shape == (M, K)
        assert w.shape == (K, Cout)
    assert Cout % 128 == 0

    # Tiling: keep the output lane dim >= 128, keep a j axis of extent >= 2
    # (v7x megacore), cap tm so large M stays within the (8,128) rule & VMEM.
    tm = min(256, _round_up(M, 8))
    m_pad = _round_up(M, tm)
    tk = _pick_tk(K)
    tn = Cout // 2 if Cout % 256 == 0 else Cout

    def prep_a(a):
        a = a.astype(jnp.bfloat16)
        if m_pad != M:
            a = jnp.pad(a, ((0, m_pad - M), (0, 0)))
        return a

    args, in_specs = [], []
    for a, w in zip(a_list, w_list):
        args += [prep_a(a), w.astype(jnp.bfloat16)]
        in_specs += [
            pl.BlockSpec((tm, tk), lambda i, j, k: (i, k)),
            pl.BlockSpec((tk, tn), lambda i, j, k: (k, j)),
        ]
    args.append(bias.reshape(1, Cout).astype(jnp.float32))
    in_specs.append(pl.BlockSpec((1, tn), lambda i, j, k: (0, j)))
    if residual is not None:
        r = residual.astype(jnp.float32)
        if m_pad != M:
            r = jnp.pad(r, ((0, m_pad - M), (0, 0)))
        args.append(r)
        in_specs.append(pl.BlockSpec((tm, tn), lambda i, j, k: (i, j)))

    # Explicit scoped-VMEM budget: double-buffered streams + f32 accumulator.
    blk_bytes = 2 * (n_pairs * (tm * tk + tk * tn) * 2       # bf16 A/W buffers
                     + tm * tn * 4 + tn * 4                  # out + bias
                     + (tm * tn * 4 if residual is not None else 0))
    blk_bytes += tm * tn * 4                                 # accumulator
    vmem_limit = min(100 << 20, max(2 * blk_bytes + (4 << 20), 32 << 20))

    out = pl.pallas_call(
        _make_kernel(n_pairs, residual is not None),
        out_shape=jax.ShapeDtypeStruct((m_pad, Cout), jnp.float32),
        grid_spec=pltpu.PrefetchScalarGridSpec(
            num_scalar_prefetch=0,
            grid=(m_pad // tm, Cout // tn, K // tk),
            in_specs=in_specs,
            out_specs=pl.BlockSpec((tm, tn), lambda i, j, k: (i, j)),
            scratch_shapes=[pltpu.VMEM((tm, tn), jnp.float32)],
        ),
        compiler_params=pltpu.CompilerParams(
            dimension_semantics=("parallel", "parallel", "arbitrary"),
            vmem_limit_bytes=vmem_limit,
        ),
    )(*args)
    return out[:M] if m_pad != M else out


# ---------------------------------------------------------------------------
# Glue: im2col for 3x3 convs (pad=1), NHWC helpers
# ---------------------------------------------------------------------------
def im2col_3x3(x, stride):
    """x:(N,H,W,C) -> patches:(N,Ho,Wo,9*C) matching PyTorch conv (pad=1)."""
    N, H, W, C = x.shape
    xp = jnp.pad(x, ((0, 0), (1, 1), (1, 1), (0, 0)))
    Ho = (H + 2 - 3) // stride + 1
    Wo = (W + 2 - 3) // stride + 1
    cols = []
    for dh in range(3):
        for dw in range(3):
            sl = xp[:, dh:dh + (Ho - 1) * stride + 1:stride,
                    dw:dw + (Wo - 1) * stride + 1:stride, :]
            cols.append(sl)
    return jnp.concatenate(cols, axis=-1), Ho, Wo


def conv_cba(x_nhwc, p, ksize, stride, residual=None):
    """Conv_Bn_Activation('mish') on NHWC input via the fused Pallas kernel."""
    N, H, W, C = x_nhwc.shape
    if ksize == 1:
        a = x_nhwc.reshape(N * H * W, C)
        Ho, Wo = H, W
    else:
        a, Ho, Wo = im2col_3x3(x_nhwc, stride)
        a = a.reshape(N * Ho * Wo, 9 * C)
    r = None if residual is None else residual.reshape(N * Ho * Wo, -1)
    out = fused_conv_bn_mish([a], [p["w"]], p["bias"], residual=r)
    return out.reshape(N, Ho, Wo, -1)


# ---------------------------------------------------------------------------
# Parameters (deterministic synthetic init, BatchNorm folded / eval mode)
# ---------------------------------------------------------------------------
def make_cba_params(key, cin, cout, ksize):
    kw, kg, kb, km, kv = jax.random.split(key, 5)
    fan_in = cin * ksize * ksize
    if ksize == 1:
        w = jax.random.normal(kw, (cin, cout), jnp.float32) / jnp.sqrt(fan_in)
    else:
        w = jax.random.normal(kw, (ksize, ksize, cin, cout), jnp.float32)
        w = (w / jnp.sqrt(fan_in)).reshape(ksize * ksize * cin, cout)
    gamma = 1.0 + 0.1 * jax.random.normal(kg, (cout,), jnp.float32)
    beta = 0.1 * jax.random.normal(kb, (cout,), jnp.float32)
    mean = 0.1 * jax.random.normal(km, (cout,), jnp.float32)
    var = 1.0 + 0.1 * jax.random.uniform(kv, (cout,), jnp.float32)
    eps = 1e-5
    scale = gamma / jnp.sqrt(var + eps)
    bias = beta - mean * scale
    # Fold BN scale into the weight columns, quantize jointly to bf16.
    w_folded = (w * scale[None, :]).astype(jnp.bfloat16)
    return {"w": w_folded, "bias": bias.astype(jnp.float32)}


def make_downsample5_params(key, ch_in=512):
    ch = ch_in            # 512
    ch2 = 2 * ch_in       # 1024
    keys = jax.random.split(key, 16)
    p = {}
    p["conv1"] = make_cba_params(keys[0], ch, ch2, 3)
    conv2 = make_cba_params(keys[1], ch2, ch, 1)
    conv3 = make_cba_params(keys[2], ch2, ch, 1)
    # conv2 and conv3 both read x1 -> fuse into one matmul (concat columns).
    p["conv23"] = {"w": jnp.concatenate([conv2["w"], conv3["w"]], axis=1),
                   "bias": jnp.concatenate([conv2["bias"], conv3["bias"]])}
    for i in range(4):
        p[f"res{i}_a"] = make_cba_params(keys[3 + 2 * i], ch, ch, 1)
        p[f"res{i}_b"] = make_cba_params(keys[4 + 2 * i], ch, ch, 3)
    p["conv4"] = make_cba_params(keys[11], ch, ch, 1)
    conv5 = make_cba_params(keys[12], ch2, ch2, 1)
    # conv5 reads cat([x4, x2]) over channels -> split K, no activation concat.
    p["conv5_a"] = conv5["w"][:ch]      # rows applied to x4's channels
    p["conv5_b"] = conv5["w"][ch:]      # rows applied to x2's channels
    p["conv5_bias"] = conv5["bias"]
    return p


# ---------------------------------------------------------------------------
# DownSample5 forward
# ---------------------------------------------------------------------------
def downsample5_forward(x_nchw, params, ch=512):
    x = jnp.transpose(x_nchw, (0, 2, 3, 1))                   # NCHW -> NHWC

    x1 = conv_cba(x, params["conv1"], ksize=3, stride=2)      # (N,Ho,Wo,1024)
    x23 = conv_cba(x1, params["conv23"], ksize=1, stride=1)   # fused conv2+conv3
    x2, x3 = x23[..., :ch], x23[..., ch:]                     # 512 each

    r = x3
    for i in range(4):                                        # ResBlock x4
        h = conv_cba(r, params[f"res{i}_a"], ksize=1, stride=1)
        r = conv_cba(h, params[f"res{i}_b"], ksize=3, stride=1, residual=r)

    x4 = conv_cba(r, params["conv4"], ksize=1, stride=1)      # 512

    # conv5 on cat([x4, x2], channels): two K-partial matmuls in one kernel.
    N, Ho, Wo, _ = x4.shape
    a4 = x4.reshape(N * Ho * Wo, -1)
    a2 = x2.reshape(N * Ho * Wo, -1)
    x5 = fused_conv_bn_mish([a4, a2],
                            [params["conv5_a"], params["conv5_b"]],
                            params["conv5_bias"])
    x5 = x5.reshape(N, Ho, Wo, -1)

    return jnp.transpose(x5, (0, 3, 1, 2))                    # back to NCHW


# ---------------------------------------------------------------------------
if __name__ == "__main__":
    key = jax.random.PRNGKey(0)
    pkey, xkey = jax.random.split(key)

    params = make_downsample5_params(pkey, ch_in=512)

    # Small but shape-consistent input: batch=1, C=512 (fixed by module), 8x8.
    x = jax.random.normal(xkey, (1, 512, 8, 8), jnp.float32)

    fwd = jax.jit(functools.partial(downsample5_forward, params=params))
    out = jax.block_until_ready(fwd(x))

    assert out.shape == (1, 1024, 4, 4), out.shape
    assert bool(jnp.all(jnp.isfinite(out)))
    print("KERNEL_OK")
</pallas_src>

<mosaic_0001>
module attributes {stable_mosaic.version = 11 : i64} {
  func.func @kernel(%arg0: i32, %arg1: i32, %arg2: i32, %arg3: memref<16x1536xbf16, #tpu.memory_space<vmem>>, %arg4: memref<1536x512xbf16, #tpu.memory_space<vmem>>, %arg5: memref<1x512xf32, #tpu.memory_space<vmem>>, %arg6: memref<16x512xf32, #tpu.memory_space<vmem>>, %arg7: memref<16x512xf32, #tpu.memory_space<vmem>>) attributes {dimension_semantics = [#tpu.dimension_semantics<parallel>, #tpu.dimension_semantics<parallel>, #tpu.dimension_semantics<arbitrary>], iteration_bounds = array<i64: 1, 2, 3>, scalar_prefetch = 0 : i64, scratch_operands = 1 : i64, tpu.core_type = #tpu.core_type<tc>, window_params = [{transform_indices = @transform_0, window_bounds = array<i64: 16, 1536>}, {transform_indices = @transform_1, window_bounds = array<i64: 1536, 512>}, {transform_indices = @transform_2, window_bounds = array<i64: 1, 512>}, {transform_indices = @transform_3, window_bounds = array<i64: 16, 512>}]} {
    %c0_i32 = arith.constant 0 : i32
    %0 = arith.cmpi eq, %arg2, %c0_i32 : i32
    %1 = arith.extui %0 : i1 to i32
    %c0_i32_0 = arith.constant 0 : i32
    %2 = arith.cmpi ne, %1, %c0_i32_0 : i32
    scf.if %2 {
      %cst_9 = arith.constant 0.000000e+00 : f32
      %12 = vector.broadcast %cst_9 : f32 to vector<16x512xf32>
      %c0_10 = arith.constant 0 : index
      %c0_11 = arith.constant 0 : index
      %13 = vector.load %arg7[%c0_10, %c0_11] : memref<16x512xf32, #tpu.memory_space<vmem>>, vector<16x512xf32>
      tpu.vector_store %arg7[%c0_10, %c0_11], %12 {strides = array<i32>} : memref<16x512xf32, #tpu.memory_space<vmem>>, vector<16x512xf32>,
    } else {
    }
    %c0 = arith.constant 0 : index
    %c0_1 = arith.constant 0 : index
    %3 = vector.load %arg7[%c0, %c0_1] : memref<16x512xf32, #tpu.memory_space<vmem>>, vector<16x512xf32>
    %c0_2 = arith.constant 0 : index
    %c0_3 = arith.constant 0 : index
    %4 = vector.load %arg3[%c0_2, %c0_3] : memref<16x1536xbf16, #tpu.memory_space<vmem>>, vector<16x1536xbf16>
    %c0_4 = arith.constant 0 : index
    %c0_5 = arith.constant 0 : index
    %5 = vector.load %arg4[%c0_4, %c0_5] : memref<1536x512xbf16, #tpu.memory_space<vmem>>, vector<1536x512xbf16>
    %cst = arith.constant dense<0.000000e+00> : vector<16x512xf32>
    %6 = tpu.matmul %4, %5, %cst {dimension_numbers = #tpu.dot_dimension_numbers<[1], [0], [0], [1], [0, 0, 1, 1], [], []>} : vector<16x1536xbf16>, vector<1536x512xbf16>, vector<16x512xf32> -> vector<16x512xf32>
    %7 = arith.addf %3, %6 : vector<16x512xf32>
    %c0_6 = arith.constant 0 : index
    %c0_7 = arith.constant 0 : index
    %8 = vector.load %arg7[%c0_6, %c0_7] : memref<16x512xf32, #tpu.memory_space<vmem>>, vector<16x512xf32>
    tpu.vector_store %arg7[%c0_6, %c0_7], %7 {strides = array<i32>} : memref<16x512xf32, #tpu.memory_space<vmem>>, vector<16x512xf32>,
    %c2_i32 = arith.constant 2 : i32
    %9 = arith.cmpi eq, %arg2, %c2_i32 : i32
    %10 = arith.extui %9 : i1 to i32
    %c0_i32_8 = arith.constant 0 : i32
    %11 = arith.cmpi ne, %10, %c0_i32_8 : i32
    scf.if %11 {
      %c0_9 = arith.constant 0 : index
      %c0_10 = arith.constant 0 : index
      %12 = vector.load %arg7[%c0_9, %c0_10] : memref<16x512xf32, #tpu.memory_space<vmem>>, vector<16x512xf32>
      %c0_11 = arith.constant 0 : index
      %c0_12 = arith.constant 0 : index
      %13 = vector.load %arg5[%c0_11, %c0_12] : memref<1x512xf32, #tpu.memory_space<vmem>>, vector<1x512xf32>
      %14 = vector.broadcast %13 : vector<1x512xf32> to vector<16x512xf32>
      %15 = arith.addf %12, %14 : vector<16x512xf32>
      %cst_13 = arith.constant 0.000000e+00 : f32
      %16 = vector.broadcast %cst_13 : f32 to vector<16x512xf32>
      %17 = arith.maximumf %15, %16 : vector<16x512xf32>
      %18 = math.absf %15 : vector<16x512xf32>
      %cst_14 = arith.constant 0.000000e+00 : f32
      %19 = vector.broadcast %cst_14 : f32 to vector<16x512xf32>
      %20 = arith.subf %19, %18 : vector<16x512xf32>
      %21 = math.exp %20 : vector<16x512xf32>
      %cst_15 = arith.constant 1.000000e+00 : f32
      %22 = vector.broadcast %cst_15 : f32 to vector<16x512xf32>
      %23 = arith.addf %22, %21 : vector<16x512xf32>
      %24 = math.log %23 : vector<16x512xf32>
      %25 = arith.addf %17, %24 : vector<16x512xf32>
      %26 = math.tanh %25 : vector<16x512xf32>
      %27 = arith.mulf %15, %26 : vector<16x512xf32>
      %c0_16 = arith.constant 0 : index
      %c0_17 = arith.constant 0 : index
      %28 = vector.load %arg6[%c0_16, %c0_17] : memref<16x512xf32, #tpu.memory_space<vmem>>, vector<16x512xf32>
      tpu.vector_store %arg6[%c0_16, %c0_17], %27 {strides = array<i32>} : memref<16x512xf32, #tpu.memory_space<vmem>>, vector<16x512xf32>,
    } else {
    }
    return
  }
  func.func @transform_0(%arg0: i32, %arg1: i32, %arg2: i32) -> (i32, i32) {
    %c0_i32 = arith.constant 0 : i32
    return %arg0, %arg2 : i32, i32
  }
  func.func @transform_1(%arg0: i32, %arg1: i32, %arg2: i32) -> (i32, i32) {
    %c0_i32 = arith.constant 0 : i32
    return %arg2, %arg1 : i32, i32
  }
  func.func @transform_2(%arg0: i32, %arg1: i32, %arg2: i32) -> (i32, i32) {
    %c0_i32 = arith.constant 0 : i32
    %c0_i32_0 = arith.constant 0 : i32
    return %c0_i32, %arg1 : i32, i32
  }
  func.func @transform_3(%arg0: i32, %arg1: i32, %arg2: i32) -> (i32, i32) {
    %c0_i32 = arith.constant 0 : i32
    return %arg0, %arg1 : i32, i32
  }
}

module attributes {stable_mosaic.version = 11 : i64} {
  func.func @kernel(%arg0: i32, %arg1: i32, %arg2: i32, %arg3: memref<16x1024xbf16, #tpu.memory_space<vmem>>, %arg4: memref<1024x512xbf16, #tpu.memory_space<vmem>>, %arg5: memref<1x512xf32, #tpu.memory_space<vmem>>, %arg6: memref<16x512xf32, #tpu.memory_space<vmem>>, %arg7: memref<16x512xf32, #tpu.memory_space<vmem>>) attributes {dimension_semantics = [#tpu.dimension_semantics<parallel>, #tpu.dimension_semantics<parallel>, #tpu.dimension_semantics<arbitrary>], iteration_bounds = array<i64: 1, 2, 1>, scalar_prefetch = 0 : i64, scratch_operands = 1 : i64, tpu.core_type = #tpu.core_type<tc>, window_params = [{transform_indices = @transform_0, window_bounds = array<i64: 16, 1024>}, {transform_indices = @transform_1, window_bounds = array<i64: 1024, 512>}, {transform_indices = @transform_2, window_bounds = array<i64: 1, 512>}, {transform_indices = @transform_3, window_bounds = array<i64: 16, 512>}]} {
    %c0_i32 = arith.constant 0 : i32
    %0 = arith.cmpi eq, %arg2, %c0_i32 : i32
    %1 = arith.extui %0 : i1 to i32
    %c0_i32_0 = arith.constant 0 : i32
    %2 = arith.cmpi ne, %1, %c0_i32_0 : i32
    scf.if %2 {
      %cst_10 = arith.constant 0.000000e+00 : f32
      %12 = vector.broadcast %cst_10 : f32 to vector<16x512xf32>
      %c0_11 = arith.constant 0 : index
      %c0_12 = arith.constant 0 : index
      %13 = vector.load %arg7[%c0_11, %c0_12] : memref<16x512xf32, #tpu.memory_space<vmem>>, vector<16x512xf32>
      tpu.vector_store %arg7[%c0_11, %c0_12], %12 {strides = array<i32>} : memref<16x512xf32, #tpu.memory_space<vmem>>, vector<16x512xf32>,
    } else {
    }
    %c0 = arith.constant 0 : index
    %c0_1 = arith.constant 0 : index
    %3 = vector.load %arg7[%c0, %c0_1] : memref<16x512xf32, #tpu.memory_space<vmem>>, vector<16x512xf32>
    %c0_2 = arith.constant 0 : index
    %c0_3 = arith.constant 0 : index
    %4 = vector.load %arg3[%c0_2, %c0_3] : memref<16x1024xbf16, #tpu.memory_space<vmem>>, vector<16x1024xbf16>
    %c0_4 = arith.constant 0 : index
    %c0_5 = arith.constant 0 : index
    %5 = vector.load %arg4[%c0_4, %c0_5] : memref<1024x512xbf16, #tpu.memory_space<vmem>>, vector<1024x512xbf16>
    %cst = arith.constant dense<0.000000e+00> : vector<16x512xf32>
    %6 = tpu.matmul %4, %5, %cst {dimension_numbers = #tpu.dot_dimension_numbers<[1], [0], [0], [1], [0, 0, 1, 1], [], []>} : vector<16x1024xbf16>, vector<1024x512xbf16>, vector<16x512xf32> -> vector<16x512xf32>
    %7 = arith.addf %3, %6 : vector<16x512xf32>
    %c0_6 = arith.constant 0 : index
    %c0_7 = arith.constant 0 : index
    %8 = vector.load %arg7[%c0_6, %c0_7] : memref<16x512xf32, #tpu.memory_space<vmem>>, vector<16x512xf32>
    tpu.vector_store %arg7[%c0_6, %c0_7], %7 {strides = array<i32>} : memref<16x512xf32, #tpu.memory_space<vmem>>, vector<16x512xf32>,
    %c0_i32_8 = arith.constant 0 : i32
    %9 = arith.cmpi eq, %arg2, %c0_i32_8 : i32
    %10 = arith.extui %9 : i1 to i32
    %c0_i32_9 = arith.constant 0 : i32
    %11 = arith.cmpi ne, %10, %c0_i32_9 : i32
    scf.if %11 {
      %c0_10 = arith.constant 0 : index
      %c0_11 = arith.constant 0 : index
      %12 = vector.load %arg7[%c0_10, %c0_11] : memref<16x512xf32, #tpu.memory_space<vmem>>, vector<16x512xf32>
      %c0_12 = arith.constant 0 : index
      %c0_13 = arith.constant 0 : index
      %13 = vector.load %arg5[%c0_12, %c0_13] : memref<1x512xf32, #tpu.memory_space<vmem>>, vector<1x512xf32>
      %14 = vector.broadcast %13 : vector<1x512xf32> to vector<16x512xf32>
      %15 = arith.addf %12, %14 : vector<16x512xf32>
      %cst_14 = arith.constant 0.000000e+00 : f32
      %16 = vector.broadcast %cst_14 : f32 to vector<16x512xf32>
      %17 = arith.maximumf %15, %16 : vector<16x512xf32>
      %18 = math.absf %15 : vector<16x512xf32>
      %cst_15 = arith.constant 0.000000e+00 : f32
      %19 = vector.broadcast %cst_15 : f32 to vector<16x512xf32>
      %20 = arith.subf %19, %18 : vector<16x512xf32>
      %21 = math.exp %20 : vector<16x512xf32>
      %cst_16 = arith.constant 1.000000e+00 : f32
      %22 = vector.broadcast %cst_16 : f32 to vector<16x512xf32>
      %23 = arith.addf %22, %21 : vector<16x512xf32>
      %24 = math.log %23 : vector<16x512xf32>
      %25 = arith.addf %17, %24 : vector<16x512xf32>
      %26 = math.tanh %25 : vector<16x512xf32>
      %27 = arith.mulf %15, %26 : vector<16x512xf32>
      %c0_17 = arith.constant 0 : index
      %c0_18 = arith.constant 0 : index
      %28 = vector.load %arg6[%c0_17, %c0_18] : memref<16x512xf32, #tpu.memory_space<vmem>>, vector<16x512xf32>
      tpu.vector_store %arg6[%c0_17, %c0_18], %27 {strides = array<i32>} : memref<16x512xf32, #tpu.memory_space<vmem>>, vector<16x512xf32>,
    } else {
    }
    return
  }
  func.func @transform_0(%arg0: i32, %arg1: i32, %arg2: i32) -> (i32, i32) {
    %c0_i32 = arith.constant 0 : i32
    return %arg0, %arg2 : i32, i32
  }
  func.func @transform_1(%arg0: i32, %arg1: i32, %arg2: i32) -> (i32, i32) {
    %c0_i32 = arith.constant 0 : i32
    return %arg2, %arg1 : i32, i32
  }
  func.func @transform_2(%arg0: i32, %arg1: i32, %arg2: i32) -> (i32, i32) {
    %c0_i32 = arith.constant 0 : i32
    %c0_i32_0 = arith.constant 0 : i32
    return %c0_i32, %arg1 : i32, i32
  }
  func.func @transform_3(%arg0: i32, %arg1: i32, %arg2: i32) -> (i32, i32) {
    %c0_i32 = arith.constant 0 : i32
    return %arg0, %arg1 : i32, i32
  }
}

module attributes {stable_mosaic.version = 11 : i64} {
  func.func @kernel(%arg0: i32, %arg1: i32, %arg2: i32, %arg3: memref<16x512xbf16, #tpu.memory_space<vmem>>, %arg4: memref<512x256xbf16, #tpu.memory_space<vmem>>, %arg5: memref<1x256xf32, #tpu.memory_space<vmem>>, %arg6: memref<16x256xf32, #tpu.memory_space<vmem>>, %arg7: memref<16x256xf32, #tpu.memory_space<vmem>>) attributes {dimension_semantics = [#tpu.dimension_semantics<parallel>, #tpu.dimension_semantics<parallel>, #tpu.dimension_semantics<arbitrary>], iteration_bounds = array<i64: 1, 2, 1>, scalar_prefetch = 0 : i64, scratch_operands = 1 : i64, tpu.core_type = #tpu.core_type<tc>, window_params = [{transform_indices = @transform_0, window_bounds = array<i64: 16, 512>}, {transform_indices = @transform_1, window_bounds = array<i64: 512, 256>}, {transform_indices = @transform_2, window_bounds = array<i64: 1, 256>}, {transform_indices = @transform_3, window_bounds = array<i64: 16, 256>}]} {
    %c0_i32 = arith.constant 0 : i32
    %0 = arith.cmpi eq, %arg2, %c0_i32 : i32
    %1 = arith.extui %0 : i1 to i32
    %c0_i32_0 = arith.constant 0 : i32
    %2 = arith.cmpi ne, %1, %c0_i32_0 : i32
    scf.if %2 {
      %cst_10 = arith.constant 0.000000e+00 : f32
      %12 = vector.broadcast %cst_10 : f32 to vector<16x256xf32>
      %c0_11 = arith.constant 0 : index
      %c0_12 = arith.constant 0 : index
      %13 = vector.load %arg7[%c0_11, %c0_12] : memref<16x256xf32, #tpu.memory_space<vmem>>, vector<16x256xf32>
      tpu.vector_store %arg7[%c0_11, %c0_12], %12 {strides = array<i32>} : memref<16x256xf32, #tpu.memory_space<vmem>>, vector<16x256xf32>,
    } else {
    }
    %c0 = arith.constant 0 : index
    %c0_1 = arith.constant 0 : index
    %3 = vector.load %arg7[%c0, %c0_1] : memref<16x256xf32, #tpu.memory_space<vmem>>, vector<16x256xf32>
    %c0_2 = arith.constant 0 : index
    %c0_3 = arith.constant 0 : index
    %4 = vector.load %arg3[%c0_2, %c0_3] : memref<16x512xbf16, #tpu.memory_space<vmem>>, vector<16x512xbf16>
    %c0_4 = arith.constant 0 : index
    %c0_5 = arith.constant 0 : index
    %5 = vector.load %arg4[%c0_4, %c0_5] : memref<512x256xbf16, #tpu.memory_space<vmem>>, vector<512x256xbf16>
    %cst = arith.constant dense<0.000000e+00> : vector<16x256xf32>
    %6 = tpu.matmul %4, %5, %cst {dimension_numbers = #tpu.dot_dimension_numbers<[1], [0], [0], [1], [0, 0, 1, 1], [], []>} : vector<16x512xbf16>, vector<512x256xbf16>, vector<16x256xf32> -> vector<16x256xf32>
    %7 = arith.addf %3, %6 : vector<16x256xf32>
    %c0_6 = arith.constant 0 : index
    %c0_7 = arith.constant 0 : index
    %8 = vector.load %arg7[%c0_6, %c0_7] : memref<16x256xf32, #tpu.memory_space<vmem>>, vector<16x256xf32>
    tpu.vector_store %arg7[%c0_6, %c0_7], %7 {strides = array<i32>} : memref<16x256xf32, #tpu.memory_space<vmem>>, vector<16x256xf32>,
    %c0_i32_8 = arith.constant 0 : i32
    %9 = arith.cmpi eq, %arg2, %c0_i32_8 : i32
    %10 = arith.extui %9 : i1 to i32
    %c0_i32_9 = arith.constant 0 : i32
    %11 = arith.cmpi ne, %10, %c0_i32_9 : i32
    scf.if %11 {
      %c0_10 = arith.constant 0 : index
      %c0_11 = arith.constant 0 : index
      %12 = vector.load %arg7[%c0_10, %c0_11] : memref<16x256xf32, #tpu.memory_space<vmem>>, vector<16x256xf32>
      %c0_12 = arith.constant 0 : index
      %c0_13 = arith.constant 0 : index
      %13 = vector.load %arg5[%c0_12, %c0_13] : memref<1x256xf32, #tpu.memory_space<vmem>>, vector<1x256xf32>
      %14 = vector.broadcast %13 : vector<1x256xf32> to vector<16x256xf32>
      %15 = arith.addf %12, %14 : vector<16x256xf32>
      %cst_14 = arith.constant 0.000000e+00 : f32
      %16 = vector.broadcast %cst_14 : f32 to vector<16x256xf32>
      %17 = arith.maximumf %15, %16 : vector<16x256xf32>
      %18 = math.absf %15 : vector<16x256xf32>
      %cst_15 = arith.constant 0.000000e+00 : f32
      %19 = vector.broadcast %cst_15 : f32 to vector<16x256xf32>
      %20 = arith.subf %19, %18 : vector<16x256xf32>
      %21 = math.exp %20 : vector<16x256xf32>
      %cst_16 = arith.constant 1.000000e+00 : f32
      %22 = vector.broadcast %cst_16 : f32 to vector<16x256xf32>
      %23 = arith.addf %22, %21 : vector<16x256xf32>
      %24 = math.log %23 : vector<16x256xf32>
      %25 = arith.addf %17, %24 : vector<16x256xf32>
      %26 = math.tanh %25 : vector<16x256xf32>
      %27 = arith.mulf %15, %26 : vector<16x256xf32>
      %c0_17 = arith.constant 0 : index
      %c0_18 = arith.constant 0 : index
      %28 = vector.load %arg6[%c0_17, %c0_18] : memref<16x256xf32, #tpu.memory_space<vmem>>, vector<16x256xf32>
      tpu.vector_store %arg6[%c0_17, %c0_18], %27 {strides = array<i32>} : memref<16x256xf32, #tpu.memory_space<vmem>>, vector<16x256xf32>,
    } else {
    }
    return
  }
  func.func @transform_0(%arg0: i32, %arg1: i32, %arg2: i32) -> (i32, i32) {
    %c0_i32 = arith.constant 0 : i32
    return %arg0, %arg2 : i32, i32
  }
  func.func @transform_1(%arg0: i32, %arg1: i32, %arg2: i32) -> (i32, i32) {
    %c0_i32 = arith.constant 0 : i32
    return %arg2, %arg1 : i32, i32
  }
  func.func @transform_2(%arg0: i32, %arg1: i32, %arg2: i32) -> (i32, i32) {
    %c0_i32 = arith.constant 0 : i32
    %c0_i32_0 = arith.constant 0 : i32
    return %c0_i32, %arg1 : i32, i32
  }
  func.func @transform_3(%arg0: i32, %arg1: i32, %arg2: i32) -> (i32, i32) {
    %c0_i32 = arith.constant 0 : i32
    return %arg0, %arg1 : i32, i32
  }
}

module attributes {stable_mosaic.version = 11 : i64} {
  func.func @kernel(%arg0: i32, %arg1: i32, %arg2: i32, %arg3: memref<16x1536xbf16, #tpu.memory_space<vmem>>, %arg4: memref<1536x256xbf16, #tpu.memory_space<vmem>>, %arg5: memref<1x256xf32, #tpu.memory_space<vmem>>, %arg6: memref<16x256xf32, #tpu.memory_space<vmem>>, %arg7: memref<16x256xf32, #tpu.memory_space<vmem>>, %arg8: memref<16x256xf32, #tpu.memory_space<vmem>>) attributes {dimension_semantics = [#tpu.dimension_semantics<parallel>, #tpu.dimension_semantics<parallel>, #tpu.dimension_semantics<arbitrary>], iteration_bounds = array<i64: 1, 2, 3>, scalar_prefetch = 0 : i64, scratch_operands = 1 : i64, tpu.core_type = #tpu.core_type<tc>, window_params = [{transform_indices = @transform_0, window_bounds = array<i64: 16, 1536>}, {transform_indices = @transform_1, window_bounds = array<i64: 1536, 256>}, {transform_indices = @transform_2, window_bounds = array<i64: 1, 256>}, {transform_indices = @transform_3, window_bounds = array<i64: 16, 256>}, {transform_indices = @transform_4, window_bounds = array<i64: 16, 256>}]} {
    %c0_i32 = arith.constant 0 : i32
    %0 = arith.cmpi eq, %arg2, %c0_i32 : i32
    %1 = arith.extui %0 : i1 to i32
    %c0_i32_0 = arith.constant 0 : i32
    %2 = arith.cmpi ne, %1, %c0_i32_0 : i32
    scf.if %2 {
      %cst_9 = arith.constant 0.000000e+00 : f32
      %12 = vector.broadcast %cst_9 : f32 to vector<16x256xf32>
      %c0_10 = arith.constant 0 : index
      %c0_11 = arith.constant 0 : index
      %13 = vector.load %arg8[%c0_10, %c0_11] : memref<16x256xf32, #tpu.memory_space<vmem>>, vector<16x256xf32>
      tpu.vector_store %arg8[%c0_10, %c0_11], %12 {strides = array<i32>} : memref<16x256xf32, #tpu.memory_space<vmem>>, vector<16x256xf32>,
    } else {
    }
    %c0 = arith.constant 0 : index
    %c0_1 = arith.constant 0 : index
    %3 = vector.load %arg8[%c0, %c0_1] : memref<16x256xf32, #tpu.memory_space<vmem>>, vector<16x256xf32>
    %c0_2 = arith.constant 0 : index
    %c0_3 = arith.constant 0 : index
    %4 = vector.load %arg3[%c0_2, %c0_3] : memref<16x1536xbf16, #tpu.memory_space<vmem>>, vector<16x1536xbf16>
    %c0_4 = arith.constant 0 : index
    %c0_5 = arith.constant 0 : index
    %5 = vector.load %arg4[%c0_4, %c0_5] : memref<1536x256xbf16, #tpu.memory_space<vmem>>, vector<1536x256xbf16>
    %cst = arith.constant dense<0.000000e+00> : vector<16x256xf32>
    %6 = tpu.matmul %4, %5, %cst {dimension_numbers = #tpu.dot_dimension_numbers<[1], [0], [0], [1], [0, 0, 1, 1], [], []>} : vector<16x1536xbf16>, vector<1536x256xbf16>, vector<16x256xf32> -> vector<16x256xf32>
    %7 = arith.addf %3, %6 : vector<16x256xf32>
    %c0_6 = arith.constant 0 : index
    %c0_7 = arith.constant 0 : index
    %8 = vector.load %arg8[%c0_6, %c0_7] : memref<16x256xf32, #tpu.memory_space<vmem>>, vector<16x256xf32>
    tpu.vector_store %arg8[%c0_6, %c0_7], %7 {strides = array<i32>} : memref<16x256xf32, #tpu.memory_space<vmem>>, vector<16x256xf32>,
    %c2_i32 = arith.constant 2 : i32
    %9 = arith.cmpi eq, %arg2, %c2_i32 : i32
    %10 = arith.extui %9 : i1 to i32
    %c0_i32_8 = arith.constant 0 : i32
    %11 = arith.cmpi ne, %10, %c0_i32_8 : i32
    scf.if %11 {
      %c0_9 = arith.constant 0 : index
      %c0_10 = arith.constant 0 : index
      %12 = vector.load %arg8[%c0_9, %c0_10] : memref<16x256xf32, #tpu.memory_space<vmem>>, vector<16x256xf32>
      %c0_11 = arith.constant 0 : index
      %c0_12 = arith.constant 0 : index
      %13 = vector.load %arg5[%c0_11, %c0_12] : memref<1x256xf32, #tpu.memory_space<vmem>>, vector<1x256xf32>
      %14 = vector.broadcast %13 : vector<1x256xf32> to vector<16x256xf32>
      %15 = arith.addf %12, %14 : vector<16x256xf32>
      %cst_13 = arith.constant 0.000000e+00 : f32
      %16 = vector.broadcast %cst_13 : f32 to vector<16x256xf32>
      %17 = arith.maximumf %15, %16 : vector<16x256xf32>
      %18 = math.absf %15 : vector<16x256xf32>
      %cst_14 = arith.constant 0.000000e+00 : f32
      %19 = vector.broadcast %cst_14 : f32 to vector<16x256xf32>
      %20 = arith.subf %19, %18 : vector<16x256xf32>
      %21 = math.exp %20 : vector<16x256xf32>
      %cst_15 = arith.constant 1.000000e+00 : f32
      %22 = vector.broadcast %cst_15 : f32 to vector<16x256xf32>
      %23 = arith.addf %22, %21 : vector<16x256xf32>
      %24 = math.log %23 : vector<16x256xf32>
      %25 = arith.addf %17, %24 : vector<16x256xf32>
      %26 = math.tanh %25 : vector<16x256xf32>
      %27 = arith.mulf %15, %26 : vector<16x256xf32>
      %c0_16 = arith.constant 0 : index
      %c0_17 = arith.constant 0 : index
      %28 = vector.load %arg6[%c0_16, %c0_17] : memref<16x256xf32, #tpu.memory_space<vmem>>, vector<16x256xf32>
      %29 = arith.addf %27, %28 : vector<16x256xf32>
      %c0_18 = arith.constant 0 : index
      %c0_19 = arith.constant 0 : index
      %30 = vector.load %arg7[%c0_18, %c0_19] : memref<16x256xf32, #tpu.memory_space<vmem>>, vector<16x256xf32>
      tpu.vector_store %arg7[%c0_18, %c0_19], %29 {strides = array<i32>} : memref<16x256xf32, #tpu.memory_space<vmem>>, vector<16x256xf32>,
    } else {
    }
    return
  }
  func.func @transform_0(%arg0: i32, %arg1: i32, %arg2: i32) -> (i32, i32) {
    %c0_i32 = arith.constant 0 : i32
    return %arg0, %arg2 : i32, i32
  }
  func.func @transform_1(%arg0: i32, %arg1: i32, %arg2: i32) -> (i32, i32) {
    %c0_i32 = arith.constant 0 : i32
    return %arg2, %arg1 : i32, i32
  }
  func.func @transform_2(%arg0: i32, %arg1: i32, %arg2: i32) -> (i32, i32) {
    %c0_i32 = arith.constant 0 : i32
    %c0_i32_0 = arith.constant 0 : i32
    return %c0_i32, %arg1 : i32, i32
  }
  func.func @transform_3(%arg0: i32, %arg1: i32, %arg2: i32) -> (i32, i32) {
    %c0_i32 = arith.constant 0 : i32
    return %arg0, %arg1 : i32, i32
  }
  func.func @transform_4(%arg0: i32, %arg1: i32, %arg2: i32) -> (i32, i32) {
    %c0_i32 = arith.constant 0 : i32
    return %arg0, %arg1 : i32, i32
  }
}

module attributes {stable_mosaic.version = 11 : i64} {
  func.func @kernel(%arg0: i32, %arg1: i32, %arg2: i32, %arg3: memref<16x512xbf16, #tpu.memory_space<vmem>>, %arg4: memref<512x512xbf16, #tpu.memory_space<vmem>>, %arg5: memref<16x512xbf16, #tpu.memory_space<vmem>>, %arg6: memref<512x512xbf16, #tpu.memory_space<vmem>>, %arg7: memref<1x512xf32, #tpu.memory_space<vmem>>, %arg8: memref<16x512xf32, #tpu.memory_space<vmem>>, %arg9: memref<16x512xf32, #tpu.memory_space<vmem>>) attributes {dimension_semantics = [#tpu.dimension_semantics<parallel>, #tpu.dimension_semantics<parallel>, #tpu.dimension_semantics<arbitrary>], iteration_bounds = array<i64: 1, 2, 1>, scalar_prefetch = 0 : i64, scratch_operands = 1 : i64, tpu.core_type = #tpu.core_type<tc>, window_params = [{transform_indices = @transform_0, window_bounds = array<i64: 16, 512>}, {transform_indices = @transform_1, window_bounds = array<i64: 512, 512>}, {transform_indices = @transform_2, window_bounds = array<i64: 16, 512>}, {transform_indices = @transform_3, window_bounds = array<i64: 512, 512>}, {transform_indices = @transform_4, window_bounds = array<i64: 1, 512>}, {transform_indices = @transform_5, window_bounds = array<i64: 16, 512>}]} {
    %c0_i32 = arith.constant 0 : i32
    %0 = arith.cmpi eq, %arg2, %c0_i32 : i32
    %1 = arith.extui %0 : i1 to i32
    %c0_i32_0 = arith.constant 0 : i32
    %2 = arith.cmpi ne, %1, %c0_i32_0 : i32
    scf.if %2 {
      %cst_19 = arith.constant 0.000000e+00 : f32
      %18 = vector.broadcast %cst_19 : f32 to vector<16x512xf32>
      %c0_20 = arith.constant 0 : index
      %c0_21 = arith.constant 0 : index
      %19 = vector.load %arg9[%c0_20, %c0_21] : memref<16x512xf32, #tpu.memory_space<vmem>>, vector<16x512xf32>
      tpu.vector_store %arg9[%c0_20, %c0_21], %18 {strides = array<i32>} : memref<16x512xf32, #tpu.memory_space<vmem>>, vector<16x512xf32>,
    } else {
    }
    %c0 = arith.constant 0 : index
    %c0_1 = arith.constant 0 : index
    %3 = vector.load %arg9[%c0, %c0_1] : memref<16x512xf32, #tpu.memory_space<vmem>>, vector<16x512xf32>
    %c0_2 = arith.constant 0 : index
    %c0_3 = arith.constant 0 : index
    %4 = vector.load %arg3[%c0_2, %c0_3] : memref<16x512xbf16, #tpu.memory_space<vmem>>, vector<16x512xbf16>
    %c0_4 = arith.constant 0 : index
    %c0_5 = arith.constant 0 : index
    %5 = vector.load %arg4[%c0_4, %c0_5] : memref<512x512xbf16, #tpu.memory_space<vmem>>, vector<512x512xbf16>
    %cst = arith.constant dense<0.000000e+00> : vector<16x512xf32>
    %6 = tpu.matmul %4, %5, %cst {dimension_numbers = #tpu.dot_dimension_numbers<[1], [0], [0], [1], [0, 0, 1, 1], [], []>} : vector<16x512xbf16>, vector<512x512xbf16>, vector<16x512xf32> -> vector<16x512xf32>
    %7 = arith.addf %3, %6 : vector<16x512xf32>
    %c0_6 = arith.constant 0 : index
    %c0_7 = arith.constant 0 : index
    %8 = vector.load %arg9[%c0_6, %c0_7] : memref<16x512xf32, #tpu.memory_space<vmem>>, vector<16x512xf32>
    tpu.vector_store %arg9[%c0_6, %c0_7], %7 {strides = array<i32>} : memref<16x512xf32, #tpu.memory_space<vmem>>, vector<16x512xf32>,
    %c0_8 = arith.constant 0 : index
    %c0_9 = arith.constant 0 : index
    %9 = vector.load %arg9[%c0_8, %c0_9] : memref<16x512xf32, #tpu.memory_space<vmem>>, vector<16x512xf32>
    %c0_10 = arith.constant 0 : index
    %c0_11 = arith.constant 0 : index
    %10 = vector.load %arg5[%c0_10, %c0_11] : memref<16x512xbf16, #tpu.memory_space<vmem>>, vector<16x512xbf16>
    %c0_12 = arith.constant 0 : index
    %c0_13 = arith.constant 0 : index
    %11 = vector.load %arg6[%c0_12, %c0_13] : memref<512x512xbf16, #tpu.memory_space<vmem>>, vector<512x512xbf16>
    %cst_14 = arith.constant dense<0.000000e+00> : vector<16x512xf32>
    %12 = tpu.matmul %10, %11, %cst_14 {dimension_numbers = #tpu.dot_dimension_numbers<[1], [0], [0], [1], [0, 0, 1, 1], [], []>} : vector<16x512xbf16>, vector<512x512xbf16>, vector<16x512xf32> -> vector<16x512xf32>
    %13 = arith.addf %9, %12 : vector<16x512xf32>
    %c0_15 = arith.constant 0 : index
    %c0_16 = arith.constant 0 : index
    %14 = vector.load %arg9[%c0_15, %c0_16] : memref<16x512xf32, #tpu.memory_space<vmem>>, vector<16x512xf32>
    tpu.vector_store %arg9[%c0_15, %c0_16], %13 {strides = array<i32>} : memref<16x512xf32, #tpu.memory_space<vmem>>, vector<16x512xf32>,
    %c0_i32_17 = arith.constant 0 : i32
    %15 = arith.cmpi eq, %arg2, %c0_i32_17 : i32
    %16 = arith.extui %15 : i1 to i32
    %c0_i32_18 = arith.constant 0 : i32
    %17 = arith.cmpi ne, %16, %c0_i32_18 : i32
    scf.if %17 {
      %c0_19 = arith.constant 0 : index
      %c0_20 = arith.constant 0 : index
      %18 = vector.load %arg9[%c0_19, %c0_20] : memref<16x512xf32, #tpu.memory_space<vmem>>, vector<16x512xf32>
      %c0_21 = arith.constant 0 : index
      %c0_22 = arith.constant 0 : index
      %19 = vector.load %arg7[%c0_21, %c0_22] : memref<1x512xf32, #tpu.memory_space<vmem>>, vector<1x512xf32>
      %20 = vector.broadcast %19 : vector<1x512xf32> to vector<16x512xf32>
      %21 = arith.addf %18, %20 : vector<16x512xf32>
      %cst_23 = arith.constant 0.000000e+00 : f32
      %22 = vector.broadcast %cst_23 : f32 to vector<16x512xf32>
      %23 = arith.maximumf %21, %22 : vector<16x512xf32>
      %24 = math.absf %21 : vector<16x512xf32>
      %cst_24 = arith.constant 0.000000e+00 : f32
      %25 = vector.broadcast %cst_24 : f32 to vector<16x512xf32>
      %26 = arith.subf %25, %24 : vector<16x512xf32>
      %27 = math.exp %26 : vector<16x512xf32>
      %cst_25 = arith.constant 1.000000e+00 : f32
      %28 = vector.broadcast %cst_25 : f32 to vector<16x512xf32>
      %29 = arith.addf %28, %27 : vector<16x512xf32>
      %30 = math.log %29 : vector<16x512xf32>
      %31 = arith.addf %23, %30 : vector<16x512xf32>
      %32 = math.tanh %31 : vector<16x512xf32>
      %33 = arith.mulf %21, %32 : vector<16x512xf32>
      %c0_26 = arith.constant 0 : index
      %c0_27 = arith.constant 0 : index
      %34 = vector.load %arg8[%c0_26, %c0_27] : memref<16x512xf32, #tpu.memory_space<vmem>>, vector<16x512xf32>
      tpu.vector_store %arg8[%c0_26, %c0_27], %33 {strides = array<i32>} : memref<16x512xf32, #tpu.memory_space<vmem>>, vector<16x512xf32>,
    } else {
    }
    return
  }
  func.func @transform_0(%arg0: i32, %arg1: i32, %arg2: i32) -> (i32, i32) {
    %c0_i32 = arith.constant 0 : i32
    return %arg0, %arg2 : i32, i32
  }
  func.func @transform_1(%arg0: i32, %arg1: i32, %arg2: i32) -> (i32, i32) {
    %c0_i32 = arith.constant 0 : i32
    return %arg2, %arg1 : i32, i32
  }
  func.func @transform_2(%arg0: i32, %arg1: i32, %arg2: i32) -> (i32, i32) {
    %c0_i32 = arith.constant 0 : i32
    return %arg0, %arg2 : i32, i32
  }
  func.func @transform_3(%arg0: i32, %arg1: i32, %arg2: i32) -> (i32, i32) {
    %c0_i32 = arith.constant 0 : i32
    return %arg2, %arg1 : i32, i32
  }
  func.func @transform_4(%arg0: i32, %arg1: i32, %arg2: i32) -> (i32, i32) {
    %c0_i32 = arith.constant 0 : i32
    %c0_i32_0 = arith.constant 0 : i32
    return %c0_i32, %arg1 : i32, i32
  }
  func.func @transform_5(%arg0: i32, %arg1: i32, %arg2: i32) -> (i32, i32) {
    %c0_i32 = arith.constant 0 : i32
    return %arg0, %arg1 : i32, i32
  }
}

</mosaic_0001>

<bundles_post_ra>
// kernel: downsample5_forward.12
= control target key start
LH: loop header
LB: loop body
LE: loop exit
PB: predicated region body
PF: predicated region fallthrough
CT: control target
= control target key end

     0   :  { %s6989_s0 = inlined_call_operand.vmem [shape: bf16[16,4608], index: 0, kind: input, shape index: {}]   ;;  %s6990_s1 = inlined_call_operand.vmem [shape: bf16[4608,1024], index: 1, kind: input, shape index: {}]   ;;  %s6991_s2 = inlined_call_operand.vmem [shape: f32[1,1024], index: 2, kind: input, shape index: {}]   ;;  %s6992_s3 = inlined_call_operand.vmem [shape: f32[16,1024], index: 3, kind: output, shape index: {}]  }
   0x1   :  { %6994 = sst [smem:[#allocation7_spill]] %s6989_s0 }
   0x2   :  { %6995 = sst [smem:[#allocation8_spill]] %s6990_s1 }
   0x3   :  { %s5587_s12 = smov 0   ;;  %s5589_s13 = smov 0  }
   0x4   :  { %s5591_s14 = smov 0   ;;  %s5593_s15 = smov 0  }
   0x5   :  { %s5595_s16 = smov 0   ;;  %s5597_s17 = smov 0  }
   0x6   :  { %s5599_s18 = smov 0   ;;  %s5601_s19 = smov 0  }
   0x7   :  { %s5603_s20 = smov 0   ;;  %s5605_s21 = smov 0  }
   0x8   :  { %s5607_s22 = smov 0  }
   0x9 LB: > { %s4286_s23 = sadd.s32 4294967295, %s5564_s22   ;;  %s25_s24 = sadd.s32 1, %s5556_s20  ;;  %s5564_s22 = sphi %s5607_s22, %s13_s22   ;;  %s5560_s21 = sphi %s5605_s21, %s7012_s21   ;;  %s5556_s20 = sphi %s5603_s20, %s7011_s20   ;;  %s5552_s19 = sphi %s5601_s19, %s7010_s19   ;;  %s5548_s18 = sphi %s5599_s18, %s7009_s18   ;;  %s5544_s17 = sphi %s5597_s17, %s7008_s17   ;;  %s5540_s16 = sphi %s5595_s16, %s7007_s16   ;;  %s5536_s15 = sphi %s5593_s15, %s7006_s15   ;;  %s5532_s14 = sphi %s5591_s14, %s7005_s14   ;;  %s5528_s13 = sphi %s5589_s13, %s7004_s13   ;;  %s5524_s12 = sphi %s5587_s12, %s7003_s12  }
   0xa   : > { %p26_p0 = scmp.ge.s32.totalorder %s25_s24, 3  ;;  %s28_s25 = sadd.s32 1, %s5560_s21 }
   0xb   : > { %s41_s26 = sadd.s32 1, %s5544_s17  ;;  %p48_p1 = scmp.ne.s32.totalorder %s5544_s17, %s5540_s16 }
   0xc   : > { %s7014_s24 = smov (%p26_p0, %s25_s24), 0  ;;  %s7016_s25 = smov (!%p26_p0, %s28_s25), %s5560_s21 }
   0xd   : > { %s37_s27 = ssub.s32 %s5556_s20, %s7014_s24  ;;  %p49_p2 = scmp.eq.s32.totalorder %s5564_s22, 0 }
   0xe   : > { %p30_p3 = scmp.ge.s32.totalorder %s7016_s25, 2  ;;  %p39_p4 = scmp.eq.s32.totalorder %s37_s27, 0 }
   0xf   : > { %p5654_p5 = por %p49_p2, %p48_p1  ;;  %s69_s29 = sadd.s32 1, %s5536_s15 }
  0x10   : > { %s7018_s25 = smov (%p30_p3, %s7016_s25), 0  ;;  %p76_p6 = scmp.ne.s32.totalorder %s5536_s15, %s5532_s14 }
  0x11   : > { %6997 = sst [smem:[#allocation6_spill]] %s7018_s25  ;;  %s65_s4 = ssub.s32 %s5560_s21, %s7018_s25 }
  0x12   : > { %s5662_s30 = scalar_select %p39_p4, %s5544_s17, %s41_s26  }
  0x13   : > { %s66_s5 = sor.u32 %s65_s4, %s37_s27  ;;  %p121_p7 = scmp.eq.s32.totalorder %s65_s4, 0 }
  0x14   : > { %p67_p8 = scmp.eq.s32.totalorder %s66_s5, 0  ;;  %p5668_p9 = por %p76_p6, %p49_p2 }
  0x15   : > { %s123_s7 = sadd.s32 1, %s5528_s13  ;;  %p133_p10 = scmp.ne.s32.totalorder %s5528_s13, %s5524_s12 }
  0x16   : > { %s5676_s8 = scalar_select %p67_p8, %s5536_s15, %s69_s29  }
  0x17   : > { %s5679_s9 = scalar_select %p121_p7, %s5528_s13, %s123_s7  }
  0x18   : > { %p134_p11 = scmp.eq.s32.totalorder %s4286_s23, 5  ;;  %p4289_p13 = scmp.ge.s32.totalorder %s5564_s22, 6 }
  0x1a   : > { %p5681_p12 = por %p134_p11, %p133_p10  ;;  %156 = sbr.rel (%p4289_p13) target bundleno = 250 (0xfa), region = 16 }
  0x21   : > { %159 = sbr.rel (!%p5654_p5) target bundleno = 48 (0x30), region = 20  ;;  %s161_s11 = sand.u32 (%p5654_p5), 1, %s5544_s17  }
  0x22   : > { %s4700_s26 = smul.u32 (%p5654_p5), 48, %s5556_s20  ;;  %s7000_s0 = sld [smem:[#allocation7_spill]] (%p5654_p5) }
  0x23   : > { %s4743_s27 = smul.u32 (%p5654_p5), 96, %s161_s11 }
  0x25   : > { %s163_s23 = scalar_lea.vmem (%p5654_p5), [#allocation3], %s4743_s27 }
  0x28   : > { %s169_s5 = scalar_lea.vmem %s7000_s0, %s4700_s26 }
  0x29   : > { %v182_v0 = vld [vmem:[%s169_s5] sm:$0xff]  ;;  %v184_v1 = vld [vmem:[%s169_s5 + $0x8] sm:$0xff]  ;;  %v186_v2 = vld [vmem:[%s169_s5 + $0x10] sm:$0xff] }
  0x2a   : > { %183 = vst [vmem:[%s163_s23] sm:$0xff] %v182_v0  ;;  %185 = vst [vmem:[%s163_s23 + $0x8] sm:$0xff] %v184_v1  ;;  %v188_v3 = vld [vmem:[%s169_s5 + $0x18] sm:$0xff]  ;;  %v190_v4 = vld [vmem:[%s169_s5 + $0x20] sm:$0xff] }
  0x2b   : > { %187 = vst [vmem:[%s163_s23 + $0x10] sm:$0xff] %v186_v2  ;;  %v192_v5 = vld [vmem:[%s169_s5 + $0x28] sm:$0xff]  ;;  %189 = vst [vmem:[%s163_s23 + $0x18] sm:$0xff] %v188_v3  ;;  %v194_v6 = vld [vmem:[%s169_s5 + $0x90] sm:$0xff] }
  0x2c   : > { %191 = vst [vmem:[%s163_s23 + $0x20] sm:$0xff] %v190_v4  ;;  %193 = vst [vmem:[%s163_s23 + $0x28] sm:$0xff] %v192_v5  ;;  %v196_v7 = vld [vmem:[%s169_s5 + $0x98] sm:$0xff]  ;;  %v198_v8 = vld [vmem:[%s169_s5 + $0xa0] sm:$0xff] }
  0x2d   : > { %195 = vst [vmem:[%s163_s23 + $0x30] sm:$0xff] %v194_v6  ;;  %197 = vst [vmem:[%s163_s23 + $0x38] sm:$0xff] %v196_v7  ;;  %v200_v9 = vld [vmem:[%s169_s5 + $0xa8] sm:$0xff]  ;;  %v202_v10 = vld [vmem:[%s169_s5 + $0xb0] sm:$0xff] }
  0x2e   : > { %199 = vst [vmem:[%s163_s23 + $0x40] sm:$0xff] %v198_v8  ;;  %v204_v11 = vld [vmem:[%s169_s5 + $0xb8] sm:$0xff]  ;;  %201 = vst [vmem:[%s163_s23 + $0x48] sm:$0xff] %v200_v9 }
  0x2f   : > { %203 = vst [vmem:[%s163_s23 + $0x50] sm:$0xff] %v202_v10  ;;  %205 = vst [vmem:[%s163_s23 + $0x58] sm:$0xff] %v204_v11 }
  0x30 PF: > { %211 = sbr.rel (!%p5668_p9) target bundleno = 250 (0xfa), region = 43  ;;  %s213_s28 = sand.u32 (%p5668_p9), 1, %s5536_s15  }
  0x31   : > { %s4744_s7 = smul.u32 (%p5668_p9), 3072, %s213_s28  ;;  %s4291_s11 = sshll.u32 (%p5668_p9), %s5560_s21, 2 }
  0x32   : > { %s4701_s26 = smul.u32 (%p5668_p9), 1536, %s5556_s20  ;;  %s7001_s1 = sld [smem:[#allocation8_spill]] (%p5668_p9) }
  0x33   : > { %s5706_s6 = scalar_lea.vmem (%p5668_p9), [#allocation4], %s4744_s7 }
  0x34   : > { %s219_s27 = sadd.s32 (%p5668_p9), %s4701_s26, %s4291_s11 }
  0x35   : > { %s4293_s29 = sshll.u32 (%p5668_p9), %s219_s27, 2 }
  0x38   : > { %s5701_s5 = scalar_lea.vmem %s7001_s1, %s4293_s29 }
  0x39   : > { %v234_v12 = vld [vmem:[%s5701_s5] sm:$0xff]  ;;  %v236_v13 = vld [vmem:[%s5701_s5 + $0x8] sm:$0xff] }
  0x3a   : > { %v238_v14 = vld [vmem:[%s5701_s5 + $0x20] sm:$0xff]  ;;  %235 = vst [vmem:[%s5706_s6] sm:$0xff] %v234_v12  ;;  %237 = vst [vmem:[%s5706_s6 + $0x8] sm:$0xff] %v236_v13  ;;  %v240_v15 = vld [vmem:[%s5701_s5 + $0x28] sm:$0xff] }
  0x3b   : > { %239 = vst [vmem:[%s5706_s6 + $0x10] sm:$0xff] %v238_v14  ;;  %v242_v16 = vld [vmem:[%s5701_s5 + $0x40] sm:$0xff]  ;;  %v244_v17 = vld [vmem:[%s5701_s5 + $0x48] sm:$0xff]  ;;  %241 = vst [vmem:[%s5706_s6 + $0x18] sm:$0xff] %v240_v15 }
  0x3c   : > { %243 = vst [vmem:[%s5706_s6 + $0x20] sm:$0xff] %v242_v16  ;;  %245 = vst [vmem:[%s5706_s6 + $0x28] sm:$0xff] %v244_v17  ;;  %v246_v18 = vld [vmem:[%s5701_s5 + $0x60] sm:$0xff]  ;;  %v248_v19 = vld [vmem:[%s5701_s5 + $0x68] sm:$0xff] }
  0x3d   : > { %v250_v20 = vld [vmem:[%s5701_s5 + $0x80] sm:$0xff]  ;;  %247 = vst [vmem:[%s5706_s6 + $0x30] sm:$0xff] %v246_v18  ;;  %249 = vst [vmem:[%s5706_s6 + $0x38] sm:$0xff] %v248_v19  ;;  %v252_v21 = vld [vmem:[%s5701_s5 + $0x88] sm:$0xff] }
  0x3e   : > { %251 = vst [vmem:[%s5706_s6 + $0x40] sm:$0xff] %v250_v20  ;;  %v254_v22 = vld [vmem:[%s5701_s5 + $0xa0] sm:$0xff]  ;;  %v256_v23 = vld [vmem:[%s5701_s5 + $0xa8] sm:$0xff]  ;;  %253 = vst [vmem:[%s5706_s6 + $0x48] sm:$0xff] %v252_v21 }
  0x3f   : > { %255 = vst [vmem:[%s5706_s6 + $0x50] sm:$0xff] %v254_v22  ;;  %257 = vst [vmem:[%s5706_s6 + $0x58] sm:$0xff] %v256_v23  ;;  %v258_v24 = vld [vmem:[%s5701_s5 + $0xc0] sm:$0xff]  ;;  %v260_v25 = vld [vmem:[%s5701_s5 + $0xc8] sm:$0xff] }
  0x40   : > { %v262_v26 = vld [vmem:[%s5701_s5 + $0xe0] sm:$0xff]  ;;  %259 = vst [vmem:[%s5706_s6 + $0x60] sm:$0xff] %v258_v24  ;;  %261 = vst [vmem:[%s5706_s6 + $0x68] sm:$0xff] %v260_v25  ;;  %v264_v27 = vld [vmem:[%s5701_s5 + $0xe8] sm:$0xff] }
  0x41   : > { %263 = vst [vmem:[%s5706_s6 + $0x70] sm:$0xff] %v262_v26  ;;  %v266_v28 = vld [vmem:[%s5701_s5 + $0x100] sm:$0xff]  ;;  %v268_v29 = vld [vmem:[%s5701_s5 + $0x108] sm:$0xff]  ;;  %265 = vst [vmem:[%s5706_s6 + $0x78] sm:$0xff] %v264_v27 }
  0x42   : > { %267 = vst [vmem:[%s5706_s6 + $0x80] sm:$0xff] %v266_v28  ;;  %269 = vst [vmem:[%s5706_s6 + $0x88] sm:$0xff] %v268_v29  ;;  %v270_v30 = vld [vmem:[%s5701_s5 + $0x120] sm:$0xff]  ;;  %v272_v31 = vld [vmem:[%s5701_s5 + $0x128] sm:$0xff] }
  0x43   : > { %v274_v32 = vld [vmem:[%s5701_s5 + $0x140] sm:$0xff]  ;;  %271 = vst [vmem:[%s5706_s6 + $0x90] sm:$0xff] %v270_v30  ;;  %273 = vst [vmem:[%s5706_s6 + $0x98] sm:$0xff] %v272_v31  ;;  %v276_v33 = vld [vmem:[%s5701_s5 + $0x148] sm:$0xff] }
  0x44   : > { %275 = vst [vmem:[%s5706_s6 + $0xa0] sm:$0xff] %v274_v32  ;;  %v278_v34 = vld [vmem:[%s5701_s5 + $0x160] sm:$0xff]  ;;  %v280_v35 = vld [vmem:[%s5701_s5 + $0x168] sm:$0xff]  ;;  %277 = vst [vmem:[%s5706_s6 + $0xa8] sm:$0xff] %v276_v33 }
  0x45   : > { %279 = vst [vmem:[%s5706_s6 + $0xb0] sm:$0xff] %v278_v34  ;;  %281 = vst [vmem:[%s5706_s6 + $0xb8] sm:$0xff] %v280_v35  ;;  %v282_v36 = vld [vmem:[%s5701_s5 + $0x180] sm:$0xff]  ;;  %v284_v37 = vld [vmem:[%s5701_s5 + $0x188] sm:$0xff] }
  0x46   : > { %v286_v38 = vld [vmem:[%s5701_s5 + $0x1a0] sm:$0xff]  ;;  %283 = vst [vmem:[%s5706_s6 + $0xc0] sm:$0xff] %v282_v36  ;;  %285 = vst [vmem:[%s5706_s6 + $0xc8] sm:$0xff] %v284_v37  ;;  %v288_v39 = vld [vmem:[%s5701_s5 + $0x1a8] sm:$0xff] }
  0x47   : > { %287 = vst [vmem:[%s5706_s6 + $0xd0] sm:$0xff] %v286_v38  ;;  %v290_v40 = vld [vmem:[%s5701_s5 + $0x1c0] sm:$0xff]  ;;  %v292_v41 = vld [vmem:[%s5701_s5 + $0x1c8] sm:$0xff]  ;;  %289 = vst [vmem:[%s5706_s6 + $0xd8] sm:$0xff] %v288_v39 }
  0x48   : > { %291 = vst [vmem:[%s5706_s6 + $0xe0] sm:$0xff] %v290_v40  ;;  %293 = vst [vmem:[%s5706_s6 + $0xe8] sm:$0xff] %v292_v41  ;;  %v294_v42 = vld [vmem:[%s5701_s5 + $0x1e0] sm:$0xff]  ;;  %v296_v43 = vld [vmem:[%s5701_s5 + $0x1e8] sm:$0xff] }
  0x49   : > { %v298_v44 = vld [vmem:[%s5701_s5 + $0x200] sm:$0xff]  ;;  %295 = vst [vmem:[%s5706_s6 + $0xf0] sm:$0xff] %v294_v42  ;;  %297 = vst [vmem:[%s5706_s6 + $0xf8] sm:$0xff] %v296_v43  ;;  %v300_v45 = vld [vmem:[%s5701_s5 + $0x208] sm:$0xff] }
  0x4a   : > { %299 = vst [vmem:[%s5706_s6 + $0x100] sm:$0xff] %v298_v44  ;;  %v302_v46 = vld [vmem:[%s5701_s5 + $0x220] sm:$0xff]  ;;  %v304_v47 = vld [vmem:[%s5701_s5 + $0x228] sm:$0xff]  ;;  %301 = vst [vmem:[%s5706_s6 + $0x108] sm:$0xff] %v300_v45 }
  0x4b   : > { %303 = vst [vmem:[%s5706_s6 + $0x110] sm:$0xff] %v302_v46  ;;  %305 = vst [vmem:[%s5706_s6 + $0x118] sm:$0xff] %v304_v47  ;;  %v306_v48 = vld [vmem:[%s5701_s5 + $0x240] sm:$0xff]  ;;  %v308_v49 = vld [vmem:[%s5701_s5 + $0x248] sm:$0xff] }
  0x4c   : > { %v310_v50 = vld [vmem:[%s5701_s5 + $0x260] sm:$0xff]  ;;  %307 = vst [vmem:[%s5706_s6 + $0x120] sm:$0xff] %v306_v48  ;;  %309 = vst [vmem:[%s5706_s6 + $0x128] sm:$0xff] %v308_v49  ;;  %v312_v51 = vld [vmem:[%s5701_s5 + $0x268] sm:$0xff] }
  0x4d   : > { %311 = vst [vmem:[%s5706_s6 + $0x130] sm:$0xff] %v310_v50  ;;  %v314_v52 = vld [vmem:[%s5701_s5 + $0x280] sm:$0xff]  ;;  %v316_v53 = vld [vmem:[%s5701_s5 + $0x288] sm:$0xff]  ;;  %313 = vst [vmem:[%s5706_s6 + $0x138] sm:$0xff] %v312_v51 }
  0x4e   : > { %315 = vst [vmem:[%s5706_s6 + $0x140] sm:$0xff] %v314_v52  ;;  %317 = vst [vmem:[%s5706_s6 + $0x148] sm:$0xff] %v316_v53  ;;  %v318_v54 = vld [vmem:[%s5701_s5 + $0x2a0] sm:$0xff]  ;;  %v320_v55 = vld [vmem:[%s5701_s5 + $0x2a8] sm:$0xff] }
  0x4f   : > { %v322_v56 = vld [vmem:[%s5701_s5 + $0x2c0] sm:$0xff]  ;;  %319 = vst [vmem:[%s5706_s6 + $0x150] sm:$0xff] %v318_v54  ;;  %321 = vst [vmem:[%s5706_s6 + $0x158] sm:$0xff] %v320_v55  ;;  %v324_v57 = vld [vmem:[%s5701_s5 + $0x2c8] sm:$0xff] }
  0x50   : > { %323 = vst [vmem:[%s5706_s6 + $0x160] sm:$0xff] %v322_v56  ;;  %v326_v58 = vld [vmem:[%s5701_s5 + $0x2e0] sm:$0xff]  ;;  %v328_v59 = vld [vmem:[%s5701_s5 + $0x2e8] sm:$0xff]  ;;  %325 = vst [vmem:[%s5706_s6 + $0x168] sm:$0xff] %v324_v57 }
  0x51   : > { %327 = vst [vmem:[%s5706_s6 + $0x170] sm:$0xff] %v326_v58  ;;  %329 = vst [vmem:[%s5706_s6 + $0x178] sm:$0xff] %v328_v59  ;;  %v330_v60 = vld [vmem:[%s5701_s5 + $0x300] sm:$0xff]  ;;  %v332_v61 = vld [vmem:[%s5701_s5 + $0x308] sm:$0xff] }
  0x52   : > { %v334_v62 = vld [vmem:[%s5701_s5 + $0x320] sm:$0xff]  ;;  %331 = vst [vmem:[%s5706_s6 + $0x180] sm:$0xff] %v330_v60  ;;  %333 = vst [vmem:[%s5706_s6 + $0x188] sm:$0xff] %v332_v61  ;;  %v336_v63 = vld [vmem:[%s5701_s5 + $0x328] sm:$0xff] }
  0x53   : > { %335 = vst [vmem:[%s5706_s6 + $0x190] sm:$0xff] %v334_v62  ;;  %v338_v0 = vld [vmem:[%s5701_s5 + $0x340] sm:$0xff]  ;;  %v340_v1 = vld [vmem:[%s5701_s5 + $0x348] sm:$0xff]  ;;  %337 = vst [vmem:[%s5706_s6 + $0x198] sm:$0xff] %v336_v63 }
  0x54   : > { %339 = vst [vmem:[%s5706_s6 + $0x1a0] sm:$0xff] %v338_v0  ;;  %341 = vst [vmem:[%s5706_s6 + $0x1a8] sm:$0xff] %v340_v1  ;;  %v342_v2 = vld [vmem:[%s5701_s5 + $0x360] sm:$0xff]  ;;  %v344_v3 = vld [vmem:[%s5701_s5 + $0x368] sm:$0xff] }
  0x55   : > { %v346_v4 = vld [vmem:[%s5701_s5 + $0x380] sm:$0xff]  ;;  %343 = vst [vmem:[%s5706_s6 + $0x1b0] sm:$0xff] %v342_v2  ;;  %345 = vst [vmem:[%s5706_s6 + $0x1b8] sm:$0xff] %v344_v3  ;;  %v348_v5 = vld [vmem:[%s5701_s5 + $0x388] sm:$0xff] }
  0x56   : > { %347 = vst [vmem:[%s5706_s6 + $0x1c0] sm:$0xff] %v346_v4  ;;  %v350_v6 = vld [vmem:[%s5701_s5 + $0x3a0] sm:$0xff]  ;;  %v352_v7 = vld [vmem:[%s5701_s5 + $0x3a8] sm:$0xff]  ;;  %349 = vst [vmem:[%s5706_s6 + $0x1c8] sm:$0xff] %v348_v5 }
  0x57   : > { %351 = vst [vmem:[%s5706_s6 + $0x1d0] sm:$0xff] %v350_v6  ;;  %353 = vst [vmem:[%s5706_s6 + $0x1d8] sm:$0xff] %v352_v7  ;;  %v354_v8 = vld [vmem:[%s5701_s5 + $0x3c0] sm:$0xff]  ;;  %v356_v9 = vld [vmem:[%s5701_s5 + $0x3c8] sm:$0xff] }
  0x58   : > { %v358_v10 = vld [vmem:[%s5701_s5 + $0x3e0] sm:$0xff]  ;;  %355 = vst [vmem:[%s5706_s6 + $0x1e0] sm:$0xff] %v354_v8  ;;  %357 = vst [vmem:[%s5706_s6 + $0x1e8] sm:$0xff] %v356_v9  ;;  %v360_v11 = vld [vmem:[%s5701_s5 + $0x3e8] sm:$0xff] }
  0x59   : > { %359 = vst [vmem:[%s5706_s6 + $0x1f0] sm:$0xff] %v358_v10  ;;  %v362_v12 = vld [vmem:[%s5701_s5 + $0x400] sm:$0xff]  ;;  %v364_v13 = vld [vmem:[%s5701_s5 + $0x408] sm:$0xff]  ;;  %361 = vst [vmem:[%s5706_s6 + $0x1f8] sm:$0xff] %v360_v11 }
  0x5a   : > { %363 = vst [vmem:[%s5706_s6 + $0x200] sm:$0xff] %v362_v12  ;;  %365 = vst [vmem:[%s5706_s6 + $0x208] sm:$0xff] %v364_v13  ;;  %v366_v14 = vld [vmem:[%s5701_s5 + $0x420] sm:$0xff]  ;;  %v368_v15 = vld [vmem:[%s5701_s5 + $0x428] sm:$0xff] }
  0x5b   : > { %v370_v16 = vld [vmem:[%s5701_s5 + $0x440] sm:$0xff]  ;;  %367 = vst [vmem:[%s5706_s6 + $0x210] sm:$0xff] %v366_v14  ;;  %369 = vst [vmem:[%s5706_s6 + $0x218] sm:$0xff] %v368_v15  ;;  %v372_v17 = vld [vmem:[%s5701_s5 + $0x448] sm:$0xff] }
  0x5c   : > { %371 = vst [vmem:[%s5706_s6 + $0x220] sm:$0xff] %v370_v16  ;;  %v374_v18 = vld [vmem:[%s5701_s5 + $0x460] sm:$0xff]  ;;  %v376_v19 = vld [vmem:[%s5701_s5 + $0x468] sm:$0xff]  ;;  %373 = vst [vmem:[%s5706_s6 + $0x228] sm:$0xff] %v372_v17 }
  0x5d   : > { %375 = vst [vmem:[%s5706_s6 + $0x230] sm:$0xff] %v374_v18  ;;  %377 = vst [vmem:[%s5706_s6 + $0x238] sm:$0xff] %v376_v19  ;;  %v378_v20 = vld [vmem:[%s5701_s5 + $0x480] sm:$0xff]  ;;  %v380_v21 = vld [vmem:[%s5701_s5 + $0x488] sm:$0xff] }
  0x5e   : > { %v382_v22 = vld [vmem:[%s5701_s5 + $0x4a0] sm:$0xff]  ;;  %379 = vst [vmem:[%s5706_s6 + $0x240] sm:$0xff] %v378_v20  ;;  %381 = vst [vmem:[%s5706_s6 + $0x248] sm:$0xff] %v380_v21  ;;  %v384_v23 = vld [vmem:[%s5701_s5 + $0x4a8] sm:$0xff] }
  0x5f   : > { %383 = vst [vmem:[%s5706_s6 + $0x250] sm:$0xff] %v382_v22  ;;  %v386_v24 = vld [vmem:[%s5701_s5 + $0x4c0] sm:$0xff]  ;;  %v388_v25 = vld [vmem:[%s5701_s5 + $0x4c8] sm:$0xff]  ;;  %385 = vst [vmem:[%s5706_s6 + $0x258] sm:$0xff] %v384_v23 }
  0x60   : > { %387 = vst [vmem:[%s5706_s6 + $0x260] sm:$0xff] %v386_v24  ;;  %389 = vst [vmem:[%s5706_s6 + $0x268] sm:$0xff] %v388_v25  ;;  %v390_v26 = vld [vmem:[%s5701_s5 + $0x4e0] sm:$0xff]  ;;  %v392_v27 = vld [vmem:[%s5701_s5 + $0x4e8] sm:$0xff] }
  0x61   : > { %v394_v28 = vld [vmem:[%s5701_s5 + $0x500] sm:$0xff]  ;;  %391 = vst [vmem:[%s5706_s6 + $0x270] sm:$0xff] %v390_v26  ;;  %393 = vst [vmem:[%s5706_s6 + $0x278] sm:$0xff] %v392_v27  ;;  %v396_v29 = vld [vmem:[%s5701_s5 + $0x508] sm:$0xff] }
  0x62   : > { %395 = vst [vmem:[%s5706_s6 + $0x280] sm:$0xff] %v394_v28  ;;  %v398_v30 = vld [vmem:[%s5701_s5 + $0x520] sm:$0xff]  ;;  %v400_v31 = vld [vmem:[%s5701_s5 + $0x528] sm:$0xff]  ;;  %397 = vst [vmem:[%s5706_s6 + $0x288] sm:$0xff] %v396_v29 }
  0x63   : > { %399 = vst [vmem:[%s5706_s6 + $0x290] sm:$0xff] %v398_v30  ;;  %401 = vst [vmem:[%s5706_s6 + $0x298] sm:$0xff] %v400_v31  ;;  %v402_v32 = vld [vmem:[%s5701_s5 + $0x540] sm:$0xff]  ;;  %v404_v33 = vld [vmem:[%s5701_s5 + $0x548] sm:$0xff] }
  0x64   : > { %v406_v34 = vld [vmem:[%s5701_s5 + $0x560] sm:$0xff]  ;;  %403 = vst [vmem:[%s5706_s6 + $0x2a0] sm:$0xff] %v402_v32  ;;  %405 = vst [vmem:[%s5706_s6 + $0x2a8] sm:$0xff] %v404_v33  ;;  %v408_v35 = vld [vmem:[%s5701_s5 + $0x568] sm:$0xff] }
  0x65   : > { %407 = vst [vmem:[%s5706_s6 + $0x2b0] sm:$0xff] %v406_v34  ;;  %v410_v36 = vld [vmem:[%s5701_s5 + $0x580] sm:$0xff]  ;;  %v412_v37 = vld [vmem:[%s5701_s5 + $0x588] sm:$0xff]  ;;  %409 = vst [vmem:[%s5706_s6 + $0x2b8] sm:$0xff] %v408_v35 }
  0x66   : > { %411 = vst [vmem:[%s5706_s6 + $0x2c0] sm:$0xff] %v410_v36  ;;  %413 = vst [vmem:[%s5706_s6 + $0x2c8] sm:$0xff] %v412_v37  ;;  %v414_v38 = vld [vmem:[%s5701_s5 + $0x5a0] sm:$0xff]  ;;  %v416_v39 = vld [vmem:[%s5701_s5 + $0x5a8] sm:$0xff] }
  0x67   : > { %v418_v40 = vld [vmem:[%s5701_s5 + $0x5c0] sm:$0xff]  ;;  %415 = vst [vmem:[%s5706_s6 + $0x2d0] sm:$0xff] %v414_v38  ;;  %417 = vst [vmem:[%s5706_s6 + $0x2d8] sm:$0xff] %v416_v39  ;;  %v420_v41 = vld [vmem:[%s5701_s5 + $0x5c8] sm:$0xff] }
  0x68   : > { %419 = vst [vmem:[%s5706_s6 + $0x2e0] sm:$0xff] %v418_v40  ;;  %v422_v42 = vld [vmem:[%s5701_s5 + $0x5e0] sm:$0xff]  ;;  %v424_v43 = vld [vmem:[%s5701_s5 + $0x5e8] sm:$0xff]  ;;  %421 = vst [vmem:[%s5706_s6 + $0x2e8] sm:$0xff] %v420_v41 }
  0x69   : > { %423 = vst [vmem:[%s5706_s6 + $0x2f0] sm:$0xff] %v422_v42  ;;  %425 = vst [vmem:[%s5706_s6 + $0x2f8] sm:$0xff] %v424_v43  ;;  %v426_v44 = vld [vmem:[%s5701_s5 + $0x600] sm:$0xff]  ;;  %v428_v45 = vld [vmem:[%s5701_s5 + $0x608] sm:$0xff] }
  0x6a   : > { %v430_v46 = vld [vmem:[%s5701_s5 + $0x620] sm:$0xff]  ;;  %427 = vst [vmem:[%s5706_s6 + $0x300] sm:$0xff] %v426_v44  ;;  %429 = vst [vmem:[%s5706_s6 + $0x308] sm:$0xff] %v428_v45  ;;  %v432_v47 = vld [vmem:[%s5701_s5 + $0x628] sm:$0xff] }
  0x6b   : > { %431 = vst [vmem:[%s5706_s6 + $0x310] sm:$0xff] %v430_v46  ;;  %v434_v48 = vld [vmem:[%s5701_s5 + $0x640] sm:$0xff]  ;;  %v436_v49 = vld [vmem:[%s5701_s5 + $0x648] sm:$0xff]  ;;  %433 = vst [vmem:[%s5706_s6 + $0x318] sm:$0xff] %v432_v47 }
  0x6c   : > { %435 = vst [vmem:[%s5706_s6 + $0x320] sm:$0xff] %v434_v48  ;;  %437 = vst [vmem:[%s5706_s6 + $0x328] sm:$0xff] %v436_v49  ;;  %v438_v50 = vld [vmem:[%s5701_s5 + $0x660] sm:$0xff]  ;;  %v440_v51 = vld [vmem:[%s5701_s5 + $0x668] sm:$0xff] }
  0x6d   : > { %v442_v52 = vld [vmem:[%s5701_s5 + $0x680] sm:$0xff]  ;;  %439 = vst [vmem:[%s5706_s6 + $0x330] sm:$0xff] %v438_v50  ;;  %441 = vst [vmem:[%s5706_s6 + $0x338] sm:$0xff] %v440_v51  ;;  %v444_v53 = vld [vmem:[%s5701_s5 + $0x688] sm:$0xff] }
  0x6e   : > { %443 = vst [vmem:[%s5706_s6 + $0x340] sm:$0xff] %v442_v52  ;;  %v446_v54 = vld [vmem:[%s5701_s5 + $0x6a0] sm:$0xff]  ;;  %v448_v55 = vld [vmem:[%s5701_s5 + $0x6a8] sm:$0xff]  ;;  %445 = vst [vmem:[%s5706_s6 + $0x348] sm:$0xff] %v444_v53 }
  0x6f   : > { %447 = vst [vmem:[%s5706_s6 + $0x350] sm:$0xff] %v446_v54  ;;  %449 = vst [vmem:[%s5706_s6 + $0x358] sm:$0xff] %v448_v55  ;;  %v450_v56 = vld [vmem:[%s5701_s5 + $0x6c0] sm:$0xff]  ;;  %v452_v57 = vld [vmem:[%s5701_s5 + $0x6c8] sm:$0xff] }
  0x70   : > { %v454_v58 = vld [vmem:[%s5701_s5 + $0x6e0] sm:$0xff]  ;;  %451 = vst [vmem:[%s5706_s6 + $0x360] sm:$0xff] %v450_v56  ;;  %453 = vst [vmem:[%s5706_s6 + $0x368] sm:$0xff] %v452_v57  ;;  %v456_v59 = vld [vmem:[%s5701_s5 + $0x6e8] sm:$0xff] }
  0x71   : > { %455 = vst [vmem:[%s5706_s6 + $0x370] sm:$0xff] %v454_v58  ;;  %v458_v60 = vld [vmem:[%s5701_s5 + $0x700] sm:$0xff]  ;;  %v460_v61 = vld [vmem:[%s5701_s5 + $0x708] sm:$0xff]  ;;  %457 = vst [vmem:[%s5706_s6 + $0x378] sm:$0xff] %v456_v59 }
  0x72   : > { %459 = vst [vmem:[%s5706_s6 + $0x380] sm:$0xff] %v458_v60  ;;  %461 = vst [vmem:[%s5706_s6 + $0x388] sm:$0xff] %v460_v61  ;;  %v462_v62 = vld [vmem:[%s5701_s5 + $0x720] sm:$0xff]  ;;  %v464_v63 = vld [vmem:[%s5701_s5 + $0x728] sm:$0xff] }
  0x73   : > { %v466_v0 = vld [vmem:[%s5701_s5 + $0x740] sm:$0xff]  ;;  %463 = vst [vmem:[%s5706_s6 + $0x390] sm:$0xff] %v462_v62  ;;  %465 = vst [vmem:[%s5706_s6 + $0x398] sm:$0xff] %v464_v63  ;;  %v468_v1 = vld [vmem:[%s5701_s5 + $0x748] sm:$0xff] }
  0x74   : > { %467 = vst [vmem:[%s5706_s6 + $0x3a0] sm:$0xff] %v466_v0  ;;  %v470_v2 = vld [vmem:[%s5701_s5 + $0x760] sm:$0xff]  ;;  %v472_v3 = vld [vmem:[%s5701_s5 + $0x768] sm:$0xff]  ;;  %469 = vst [vmem:[%s5706_s6 + $0x3a8] sm:$0xff] %v468_v1 }
  0x75   : > { %471 = vst [vmem:[%s5706_s6 + $0x3b0] sm:$0xff] %v470_v2  ;;  %473 = vst [vmem:[%s5706_s6 + $0x3b8] sm:$0xff] %v472_v3  ;;  %v474_v4 = vld [vmem:[%s5701_s5 + $0x780] sm:$0xff]  ;;  %v476_v5 = vld [vmem:[%s5701_s5 + $0x788] sm:$0xff] }
  0x76   : > { %v478_v6 = vld [vmem:[%s5701_s5 + $0x7a0] sm:$0xff]  ;;  %475 = vst [vmem:[%s5706_s6 + $0x3c0] sm:$0xff] %v474_v4  ;;  %477 = vst [vmem:[%s5706_s6 + $0x3c8] sm:$0xff] %v476_v5  ;;  %v480_v7 = vld [vmem:[%s5701_s5 + $0x7a8] sm:$0xff] }
  0x77   : > { %479 = vst [vmem:[%s5706_s6 + $0x3d0] sm:$0xff] %v478_v6  ;;  %v482_v8 = vld [vmem:[%s5701_s5 + $0x7c0] sm:$0xff]  ;;  %v484_v9 = vld [vmem:[%s5701_s5 + $0x7c8] sm:$0xff]  ;;  %481 = vst [vmem:[%s5706_s6 + $0x3d8] sm:$0xff] %v480_v7 }
  0x78   : > { %483 = vst [vmem:[%s5706_s6 + $0x3e0] sm:$0xff] %v482_v8  ;;  %485 = vst [vmem:[%s5706_s6 + $0x3e8] sm:$0xff] %v484_v9  ;;  %v486_v10 = vld [vmem:[%s5701_s5 + $0x7e0] sm:$0xff]  ;;  %v488_v11 = vld [vmem:[%s5701_s5 + $0x7e8] sm:$0xff] }
  0x79   : > { %v490_v12 = vld [vmem:[%s5701_s5 + $0x800] sm:$0xff]  ;;  %487 = vst [vmem:[%s5706_s6 + $0x3f0] sm:$0xff] %v486_v10  ;;  %489 = vst [vmem:[%s5706_s6 + $0x3f8] sm:$0xff] %v488_v11  ;;  %v492_v13 = vld [vmem:[%s5701_s5 + $0x808] sm:$0xff] }
  0x7a   : > { %491 = vst [vmem:[%s5706_s6 + $0x400] sm:$0xff] %v490_v12  ;;  %v494_v14 = vld [vmem:[%s5701_s5 + $0x820] sm:$0xff]  ;;  %v496_v15 = vld [vmem:[%s5701_s5 + $0x828] sm:$0xff]  ;;  %493 = vst [vmem:[%s5706_s6 + $0x408] sm:$0xff] %v492_v13 }
  0x7b   : > { %495 = vst [vmem:[%s5706_s6 + $0x410] sm:$0xff] %v494_v14  ;;  %497 = vst [vmem:[%s5706_s6 + $0x418] sm:$0xff] %v496_v15  ;;  %v498_v16 = vld [vmem:[%s5701_s5 + $0x840] sm:$0xff]  ;;  %v500_v17 = vld [vmem:[%s5701_s5 + $0x848] sm:$0xff] }
  0x7c   : > { %v502_v18 = vld [vmem:[%s5701_s5 + $0x860] sm:$0xff]  ;;  %499 = vst [vmem:[%s5706_s6 + $0x420] sm:$0xff] %v498_v16  ;;  %501 = vst [vmem:[%s5706_s6 + $0x428] sm:$0xff] %v500_v17  ;;  %v504_v19 = vld [vmem:[%s5701_s5 + $0x868] sm:$0xff] }
  0x7d   : > { %503 = vst [vmem:[%s5706_s6 + $0x430] sm:$0xff] %v502_v18  ;;  %v506_v20 = vld [vmem:[%s5701_s5 + $0x880] sm:$0xff]  ;;  %v508_v21 = vld [vmem:[%s5701_s5 + $0x888] sm:$0xff]  ;;  %505 = vst [vmem:[%s5706_s6 + $0x438] sm:$0xff] %v504_v19 }
  0x7e   : > { %507 = vst [vmem:[%s5706_s6 + $0x440] sm:$0xff] %v506_v20  ;;  %509 = vst [vmem:[%s5706_s6 + $0x448] sm:$0xff] %v508_v21  ;;  %v510_v22 = vld [vmem:[%s5701_s5 + $0x8a0] sm:$0xff]  ;;  %v512_v23 = vld [vmem:[%s5701_s5 + $0x8a8] sm:$0xff] }
  0x7f   : > { %v514_v24 = vld [vmem:[%s5701_s5 + $0x8c0] sm:$0xff]  ;;  %511 = vst [vmem:[%s5706_s6 + $0x450] sm:$0xff] %v510_v22  ;;  %513 = vst [vmem:[%s5706_s6 + $0x458] sm:$0xff] %v512_v23  ;;  %v516_v25 = vld [vmem:[%s5701_s5 + $0x8c8] sm:$0xff] }
  0x80   : > { %515 = vst [vmem:[%s5706_s6 + $0x460] sm:$0xff] %v514_v24  ;;  %v518_v26 = vld [vmem:[%s5701_s5 + $0x8e0] sm:$0xff]  ;;  %v520_v27 = vld [vmem:[%s5701_s5 + $0x8e8] sm:$0xff]  ;;  %517 = vst [vmem:[%s5706_s6 + $0x468] sm:$0xff] %v516_v25 }
  0x81   : > { %519 = vst [vmem:[%s5706_s6 + $0x470] sm:$0xff] %v518_v26  ;;  %521 = vst [vmem:[%s5706_s6 + $0x478] sm:$0xff] %v520_v27  ;;  %v522_v28 = vld [vmem:[%s5701_s5 + $0x900] sm:$0xff]  ;;  %v524_v29 = vld [vmem:[%s5701_s5 + $0x908] sm:$0xff] }
  0x82   : > { %v526_v30 = vld [vmem:[%s5701_s5 + $0x920] sm:$0xff]  ;;  %523 = vst [vmem:[%s5706_s6 + $0x480] sm:$0xff] %v522_v28  ;;  %525 = vst [vmem:[%s5706_s6 + $0x488] sm:$0xff] %v524_v29  ;;  %v528_v31 = vld [vmem:[%s5701_s5 + $0x928] sm:$0xff] }
  0x83   : > { %527 = vst [vmem:[%s5706_s6 + $0x490] sm:$0xff] %v526_v30  ;;  %v530_v32 = vld [vmem:[%s5701_s5 + $0x940] sm:$0xff]  ;;  %v532_v33 = vld [vmem:[%s5701_s5 + $0x948] sm:$0xff]  ;;  %529 = vst [vmem:[%s5706_s6 + $0x498] sm:$0xff] %v528_v31 }
  0x84   : > { %531 = vst [vmem:[%s5706_s6 + $0x4a0] sm:$0xff] %v530_v32  ;;  %533 = vst [vmem:[%s5706_s6 + $0x4a8] sm:$0xff] %v532_v33  ;;  %v534_v34 = vld [vmem:[%s5701_s5 + $0x960] sm:$0xff]  ;;  %v536_v35 = vld [vmem:[%s5701_s5 + $0x968] sm:$0xff] }
  0x85   : > { %v538_v36 = vld [vmem:[%s5701_s5 + $0x980] sm:$0xff]  ;;  %535 = vst [vmem:[%s5706_s6 + $0x4b0] sm:$0xff] %v534_v34  ;;  %537 = vst [vmem:[%s5706_s6 + $0x4b8] sm:$0xff] %v536_v35  ;;  %v540_v37 = vld [vmem:[%s5701_s5 + $0x988] sm:$0xff] }
  0x86   : > { %539 = vst [vmem:[%s5706_s6 + $0x4c0] sm:$0xff] %v538_v36  ;;  %v542_v38 = vld [vmem:[%s5701_s5 + $0x9a0] sm:$0xff]  ;;  %v544_v39 = vld [vmem:[%s5701_s5 + $0x9a8] sm:$0xff]  ;;  %541 = vst [vmem:[%s5706_s6 + $0x4c8] sm:$0xff] %v540_v37 }
  0x87   : > { %543 = vst [vmem:[%s5706_s6 + $0x4d0] sm:$0xff] %v542_v38  ;;  %545 = vst [vmem:[%s5706_s6 + $0x4d8] sm:$0xff] %v544_v39  ;;  %v546_v40 = vld [vmem:[%s5701_s5 + $0x9c0] sm:$0xff]  ;;  %v548_v41 = vld [vmem:[%s5701_s5 + $0x9c8] sm:$0xff] }
  0x88   : > { %v550_v42 = vld [vmem:[%s5701_s5 + $0x9e0] sm:$0xff]  ;;  %547 = vst [vmem:[%s5706_s6 + $0x4e0] sm:$0xff] %v546_v40  ;;  %549 = vst [vmem:[%s5706_s6 + $0x4e8] sm:$0xff] %v548_v41  ;;  %v552_v43 = vld [vmem:[%s5701_s5 + $0x9e8] sm:$0xff] }
  0x89   : > { %551 = vst [vmem:[%s5706_s6 + $0x4f0] sm:$0xff] %v550_v42  ;;  %v554_v44 = vld [vmem:[%s5701_s5 + $0xa00] sm:$0xff]  ;;  %v556_v45 = vld [vmem:[%s5701_s5 + $0xa08] sm:$0xff]  ;;  %553 = vst [vmem:[%s5706_s6 + $0x4f8] sm:$0xff] %v552_v43 }
  0x8a   : > { %555 = vst [vmem:[%s5706_s6 + $0x500] sm:$0xff] %v554_v44  ;;  %557 = vst [vmem:[%s5706_s6 + $0x508] sm:$0xff] %v556_v45  ;;  %v558_v46 = vld [vmem:[%s5701_s5 + $0xa20] sm:$0xff]  ;;  %v560_v47 = vld [vmem:[%s5701_s5 + $0xa28] sm:$0xff] }
  0x8b   : > { %v562_v48 = vld [vmem:[%s5701_s5 + $0xa40] sm:$0xff]  ;;  %559 = vst [vmem:[%s5706_s6 + $0x510] sm:$0xff] %v558_v46  ;;  %561 = vst [vmem:[%s5706_s6 + $0x518] sm:$0xff] %v560_v47  ;;  %v564_v49 = vld [vmem:[%s5701_s5 + $0xa48] sm:$0xff] }
  0x8c   : > { %563 = vst [vmem:[%s5706_s6 + $0x520] sm:$0xff] %v562_v48  ;;  %v566_v50 = vld [vmem:[%s5701_s5 + $0xa60] sm:$0xff]  ;;  %v568_v51 = vld [vmem:[%s5701_s5 + $0xa68] sm:$0xff]  ;;  %565 = vst [vmem:[%s5706_s6 + $0x528] sm:$0xff] %v564_v49 }
  0x8d   : > { %567 = vst [vmem:[%s5706_s6 + $0x530] sm:$0xff] %v566_v50  ;;  %569 = vst [vmem:[%s5706_s6 + $0x538] sm:$0xff] %v568_v51  ;;  %v570_v52 = vld [vmem:[%s5701_s5 + $0xa80] sm:$0xff]  ;;  %v572_v53 = vld [vmem:[%s5701_s5 + $0xa88] sm:$0xff] }
  0x8e   : > { %v574_v54 = vld [vmem:[%s5701_s5 + $0xaa0] sm:$0xff]  ;;  %571 = vst [vmem:[%s5706_s6 + $0x540] sm:$0xff] %v570_v52  ;;  %573 = vst [vmem:[%s5706_s6 + $0x548] sm:$0xff] %v572_v53  ;;  %v576_v55 = vld [vmem:[%s5701_s5 + $0xaa8] sm:$0xff] }
  0x8f   : > { %575 = vst [vmem:[%s5706_s6 + $0x550] sm:$0xff] %v574_v54  ;;  %v578_v56 = vld [vmem:[%s5701_s5 + $0xac0] sm:$0xff]  ;;  %v580_v57 = vld [vmem:[%s5701_s5 + $0xac8] sm:$0xff]  ;;  %577 = vst [vmem:[%s5706_s6 + $0x558] sm:$0xff] %v576_v55 }
  0x90   : > { %579 = vst [vmem:[%s5706_s6 + $0x560] sm:$0xff] %v578_v56  ;;  %581 = vst [vmem:[%s5706_s6 + $0x568] sm:$0xff] %v580_v57  ;;  %v582_v58 = vld [vmem:[%s5701_s5 + $0xae0] sm:$0xff]  ;;  %v584_v59 = vld [vmem:[%s5701_s5 + $0xae8] sm:$0xff] }
  0x91   : > { %v586_v60 = vld [vmem:[%s5701_s5 + $0xb00] sm:$0xff]  ;;  %583 = vst [vmem:[%s5706_s6 + $0x570] sm:$0xff] %v582_v58  ;;  %585 = vst [vmem:[%s5706_s6 + $0x578] sm:$0xff] %v584_v59  ;;  %v588_v61 = vld [vmem:[%s5701_s5 + $0xb08] sm:$0xff] }
  0x92   : > { %587 = vst [vmem:[%s5706_s6 + $0x580] sm:$0xff] %v586_v60  ;;  %v590_v62 = vld [vmem:[%s5701_s5 + $0xb20] sm:$0xff]  ;;  %v592_v63 = vld [vmem:[%s5701_s5 + $0xb28] sm:$0xff]  ;;  %589 = vst [vmem:[%s5706_s6 + $0x588] sm:$0xff] %v588_v61 }
  0x93   : > { %591 = vst [vmem:[%s5706_s6 + $0x590] sm:$0xff] %v590_v62  ;;  %593 = vst [vmem:[%s5706_s6 + $0x598] sm:$0xff] %v592_v63  ;;  %v594_v0 = vld [vmem:[%s5701_s5 + $0xb40] sm:$0xff]  ;;  %v596_v1 = vld [vmem:[%s5701_s5 + $0xb48] sm:$0xff] }
  0x94   : > { %v598_v2 = vld [vmem:[%s5701_s5 + $0xb60] sm:$0xff]  ;;  %595 = vst [vmem:[%s5706_s6 + $0x5a0] sm:$0xff] %v594_v0  ;;  %597 = vst [vmem:[%s5706_s6 + $0x5a8] sm:$0xff] %v596_v1  ;;  %v600_v3 = vld [vmem:[%s5701_s5 + $0xb68] sm:$0xff] }
  0x95   : > { %599 = vst [vmem:[%s5706_s6 + $0x5b0] sm:$0xff] %v598_v2  ;;  %v602_v4 = vld [vmem:[%s5701_s5 + $0xb80] sm:$0xff]  ;;  %v604_v5 = vld [vmem:[%s5701_s5 + $0xb88] sm:$0xff]  ;;  %601 = vst [vmem:[%s5706_s6 + $0x5b8] sm:$0xff] %v600_v3 }
  0x96   : > { %603 = vst [vmem:[%s5706_s6 + $0x5c0] sm:$0xff] %v602_v4  ;;  %605 = vst [vmem:[%s5706_s6 + $0x5c8] sm:$0xff] %v604_v5  ;;  %v606_v6 = vld [vmem:[%s5701_s5 + $0xba0] sm:$0xff]  ;;  %v608_v7 = vld [vmem:[%s5701_s5 + $0xba8] sm:$0xff] }
  0x97   : > { %v610_v8 = vld [vmem:[%s5701_s5 + $0xbc0] sm:$0xff]  ;;  %607 = vst [vmem:[%s5706_s6 + $0x5d0] sm:$0xff] %v606_v6  ;;  %609 = vst [vmem:[%s5706_s6 + $0x5d8] sm:$0xff] %v608_v7  ;;  %v612_v9 = vld [vmem:[%s5701_s5 + $0xbc8] sm:$0xff] }
  0x98   : > { %611 = vst [vmem:[%s5706_s6 + $0x5e0] sm:$0xff] %v610_v8  ;;  %v614_v10 = vld [vmem:[%s5701_s5 + $0xbe0] sm:$0xff]  ;;  %v616_v11 = vld [vmem:[%s5701_s5 + $0xbe8] sm:$0xff]  ;;  %613 = vst [vmem:[%s5706_s6 + $0x5e8] sm:$0xff] %v612_v9 }
  0x99   : > { %615 = vst [vmem:[%s5706_s6 + $0x5f0] sm:$0xff] %v614_v10  ;;  %617 = vst [vmem:[%s5706_s6 + $0x5f8] sm:$0xff] %v616_v11  ;;  %v618_v12 = vld [vmem:[%s5701_s5 + $0xc00] sm:$0xff]  ;;  %v620_v13 = vld [vmem:[%s5701_s5 + $0xc08] sm:$0xff] }
  0x9a   : > { %v622_v14 = vld [vmem:[%s5701_s5 + $0xc20] sm:$0xff]  ;;  %619 = vst [vmem:[%s5706_s6 + $0x600] sm:$0xff] %v618_v12  ;;  %621 = vst [vmem:[%s5706_s6 + $0x608] sm:$0xff] %v620_v13  ;;  %v624_v15 = vld [vmem:[%s5701_s5 + $0xc28] sm:$0xff] }
  0x9b   : > { %623 = vst [vmem:[%s5706_s6 + $0x610] sm:$0xff] %v622_v14  ;;  %v626_v16 = vld [vmem:[%s5701_s5 + $0xc40] sm:$0xff]  ;;  %v628_v17 = vld [vmem:[%s5701_s5 + $0xc48] sm:$0xff]  ;;  %625 = vst [vmem:[%s5706_s6 + $0x618] sm:$0xff] %v624_v15 }
  0x9c   : > { %627 = vst [vmem:[%s5706_s6 + $0x620] sm:$0xff] %v626_v16  ;;  %629 = vst [vmem:[%s5706_s6 + $0x628] sm:$0xff] %v628_v17  ;;  %v630_v18 = vld [vmem:[%s5701_s5 + $0xc60] sm:$0xff]  ;;  %v632_v19 = vld [vmem:[%s5701_s5 + $0xc68] sm:$0xff] }
  0x9d   : > { %v634_v20 = vld [vmem:[%s5701_s5 + $0xc80] sm:$0xff]  ;;  %631 = vst [vmem:[%s5706_s6 + $0x630] sm:$0xff] %v630_v18  ;;  %633 = vst [vmem:[%s5706_s6 + $0x638] sm:$0xff] %v632_v19  ;;  %v636_v21 = vld [vmem:[%s5701_s5 + $0xc88] sm:$0xff] }
  0x9e   : > { %635 = vst [vmem:[%s5706_s6 + $0x640] sm:$0xff] %v634_v20  ;;  %v638_v22 = vld [vmem:[%s5701_s5 + $0xca0] sm:$0xff]  ;;  %v640_v23 = vld [vmem:[%s5701_s5 + $0xca8] sm:$0xff]  ;;  %637 = vst [vmem:[%s5706_s6 + $0x648] sm:$0xff] %v636_v21 }
  0x9f   : > { %639 = vst [vmem:[%s5706_s6 + $0x650] sm:$0xff] %v638_v22  ;;  %641 = vst [vmem:[%s5706_s6 + $0x658] sm:$0xff] %v640_v23  ;;  %v642_v24 = vld [vmem:[%s5701_s5 + $0xcc0] sm:$0xff]  ;;  %v644_v25 = vld [vmem:[%s5701_s5 + $0xcc8] sm:$0xff] }
  0xa0   : > { %v646_v26 = vld [vmem:[%s5701_s5 + $0xce0] sm:$0xff]  ;;  %643 = vst [vmem:[%s5706_s6 + $0x660] sm:$0xff] %v642_v24  ;;  %645 = vst [vmem:[%s5706_s6 + $0x668] sm:$0xff] %v644_v25  ;;  %v648_v27 = vld [vmem:[%s5701_s5 + $0xce8] sm:$0xff] }
  0xa1   : > { %647 = vst [vmem:[%s5706_s6 + $0x670] sm:$0xff] %v646_v26  ;;  %v650_v28 = vld [vmem:[%s5701_s5 + $0xd00] sm:$0xff]  ;;  %v652_v29 = vld [vmem:[%s5701_s5 + $0xd08] sm:$0xff]  ;;  %649 = vst [vmem:[%s5706_s6 + $0x678] sm:$0xff] %v648_v27 }
  0xa2   : > { %651 = vst [vmem:[%s5706_s6 + $0x680] sm:$0xff] %v650_v28  ;;  %653 = vst [vmem:[%s5706_s6 + $0x688] sm:$0xff] %v652_v29  ;;  %v654_v30 = vld [vmem:[%s5701_s5 + $0xd20] sm:$0xff]  ;;  %v656_v31 = vld [vmem:[%s5701_s5 + $0xd28] sm:$0xff] }
  0xa3   : > { %v658_v32 = vld [vmem:[%s5701_s5 + $0xd40] sm:$0xff]  ;;  %655 = vst [vmem:[%s5706_s6 + $0x690] sm:$0xff] %v654_v30  ;;  %657 = vst [vmem:[%s5706_s6 + $0x698] sm:$0xff] %v656_v31  ;;  %v660_v33 = vld [vmem:[%s5701_s5 + $0xd48] sm:$0xff] }
  0xa4   : > { %659 = vst [vmem:[%s5706_s6 + $0x6a0] sm:$0xff] %v658_v32  ;;  %v662_v34 = vld [vmem:[%s5701_s5 + $0xd60] sm:$0xff]  ;;  %v664_v35 = vld [vmem:[%s5701_s5 + $0xd68] sm:$0xff]  ;;  %661 = vst [vmem:[%s5706_s6 + $0x6a8] sm:$0xff] %v660_v33 }
  0xa5   : > { %663 = vst [vmem:[%s5706_s6 + $0x6b0] sm:$0xff] %v662_v34  ;;  %665 = vst [vmem:[%s5706_s6 + $0x6b8] sm:$0xff] %v664_v35  ;;  %v666_v36 = vld [vmem:[%s5701_s5 + $0xd80] sm:$0xff]  ;;  %v668_v37 = vld [vmem:[%s5701_s5 + $0xd88] sm:$0xff] }
  0xa6   : > { %v670_v38 = vld [vmem:[%s5701_s5 + $0xda0] sm:$0xff]  ;;  %667 = vst [vmem:[%s5706_s6 + $0x6c0] sm:$0xff] %v666_v36  ;;  %669 = vst [vmem:[%s5706_s6 + $0x6c8] sm:$0xff] %v668_v37  ;;  %v672_v39 = vld [vmem:[%s5701_s5 + $0xda8] sm:$0xff] }
  0xa7   : > { %671 = vst [vmem:[%s5706_s6 + $0x6d0] sm:$0xff] %v670_v38  ;;  %v674_v40 = vld [vmem:[%s5701_s5 + $0xdc0] sm:$0xff]  ;;  %v676_v41 = vld [vmem:[%s5701_s5 + $0xdc8] sm:$0xff]  ;;  %673 = vst [vmem:[%s5706_s6 + $0x6d8] sm:$0xff] %v672_v39 }
  0xa8   : > { %675 = vst [vmem:[%s5706_s6 + $0x6e0] sm:$0xff] %v674_v40  ;;  %677 = vst [vmem:[%s5706_s6 + $0x6e8] sm:$0xff] %v676_v41  ;;  %v678_v42 = vld [vmem:[%s5701_s5 + $0xde0] sm:$0xff]  ;;  %v680_v43 = vld [vmem:[%s5701_s5 + $0xde8] sm:$0xff] }
  0xa9   : > { %v682_v44 = vld [vmem:[%s5701_s5 + $0xe00] sm:$0xff]  ;;  %679 = vst [vmem:[%s5706_s6 + $0x6f0] sm:$0xff] %v678_v42  ;;  %681 = vst [vmem:[%s5706_s6 + $0x6f8] sm:$0xff] %v680_v43  ;;  %v684_v45 = vld [vmem:[%s5701_s5 + $0xe08] sm:$0xff] }
  0xaa   : > { %683 = vst [vmem:[%s5706_s6 + $0x700] sm:$0xff] %v682_v44  ;;  %v686_v46 = vld [vmem:[%s5701_s5 + $0xe20] sm:$0xff]  ;;  %v688_v47 = vld [vmem:[%s5701_s5 + $0xe28] sm:$0xff]  ;;  %685 = vst [vmem:[%s5706_s6 + $0x708] sm:$0xff] %v684_v45 }
  0xab   : > { %687 = vst [vmem:[%s5706_s6 + $0x710] sm:$0xff] %v686_v46  ;;  %689 = vst [vmem:[%s5706_s6 + $0x718] sm:$0xff] %v688_v47  ;;  %v690_v48 = vld [vmem:[%s5701_s5 + $0xe40] sm:$0xff]  ;;  %v692_v49 = vld [vmem:[%s5701_s5 + $0xe48] sm:$0xff] }
  0xac   : > { %v694_v50 = vld [vmem:[%s5701_s5 + $0xe60] sm:$0xff]  ;;  %691 = vst [vmem:[%s5706_s6 + $0x720] sm:$0xff] %v690_v48  ;;  %693 = vst [vmem:[%s5706_s6 + $0x728] sm:$0xff] %v692_v49  ;;  %v696_v51 = vld [vmem:[%s5701_s5 + $0xe68] sm:$0xff] }
  0xad   : > { %695 = vst [vmem:[%s5706_s6 + $0x730] sm:$0xff] %v694_v50  ;;  %v698_v52 = vld [vmem:[%s5701_s5 + $0xe80] sm:$0xff]  ;;  %v700_v53 = vld [vmem:[%s5701_s5 + $0xe88] sm:$0xff]  ;;  %697 = vst [vmem:[%s5706_s6 + $0x738] sm:$0xff] %v696_v51 }
  0xae   : > { %699 = vst [vmem:[%s5706_s6 + $0x740] sm:$0xff] %v698_v52  ;;  %701 = vst [vmem:[%s5706_s6 + $0x748] sm:$0xff] %v700_v53  ;;  %v702_v54 = vld [vmem:[%s5701_s5 + $0xea0] sm:$0xff]  ;;  %v704_v55 = vld [vmem:[%s5701_s5 + $0xea8] sm:$0xff] }
  0xaf   : > { %v706_v56 = vld [vmem:[%s5701_s5 + $0xec0] sm:$0xff]  ;;  %703 = vst [vmem:[%s5706_s6 + $0x750] sm:$0xff] %v702_v54  ;;  %705 = vst [vmem:[%s5706_s6 + $0x758] sm:$0xff] %v704_v55  ;;  %v708_v57 = vld [vmem:[%s5701_s5 + $0xec8] sm:$0xff] }
  0xb0   : > { %707 = vst [vmem:[%s5706_s6 + $0x760] sm:$0xff] %v706_v56  ;;  %v710_v58 = vld [vmem:[%s5701_s5 + $0xee0] sm:$0xff]  ;;  %v712_v59 = vld [vmem:[%s5701_s5 + $0xee8] sm:$0xff]  ;;  %709 = vst [vmem:[%s5706_s6 + $0x768] sm:$0xff] %v708_v57 }
  0xb1   : > { %711 = vst [vmem:[%s5706_s6 + $0x770] sm:$0xff] %v710_v58  ;;  %713 = vst [vmem:[%s5706_s6 + $0x778] sm:$0xff] %v712_v59  ;;  %v714_v60 = vld [vmem:[%s5701_s5 + $0xf00] sm:$0xff]  ;;  %v716_v61 = vld [vmem:[%s5701_s5 + $0xf08] sm:$0xff] }
  0xb2   : > { %v718_v62 = vld [vmem:[%s5701_s5 + $0xf20] sm:$0xff]  ;;  %715 = vst [vmem:[%s5706_s6 + $0x780] sm:$0xff] %v714_v60  ;;  %717 = vst [vmem:[%s5706_s6 + $0x788] sm:$0xff] %v716_v61  ;;  %v720_v63 = vld [vmem:[%s5701_s5 + $0xf28] sm:$0xff] }
  0xb3   : > { %719 = vst [vmem:[%s5706_s6 + $0x790] sm:$0xff] %v718_v62  ;;  %v722_v0 = vld [vmem:[%s5701_s5 + $0xf40] sm:$0xff]  ;;  %v724_v1 = vld [vmem:[%s5701_s5 + $0xf48] sm:$0xff]  ;;  %721 = vst [vmem:[%s5706_s6 + $0x798] sm:$0xff] %v720_v63 }
  0xb4   : > { %723 = vst [vmem:[%s5706_s6 + $0x7a0] sm:$0xff] %v722_v0  ;;  %725 = vst [vmem:[%s5706_s6 + $0x7a8] sm:$0xff] %v724_v1  ;;  %v726_v2 = vld [vmem:[%s5701_s5 + $0xf60] sm:$0xff]  ;;  %v728_v3 = vld [vmem:[%s5701_s5 + $0xf68] sm:$0xff] }
  0xb5   : > { %v730_v4 = vld [vmem:[%s5701_s5 + $0xf80] sm:$0xff]  ;;  %727 = vst [vmem:[%s5706_s6 + $0x7b0] sm:$0xff] %v726_v2  ;;  %729 = vst [vmem:[%s5706_s6 + $0x7b8] sm:$0xff] %v728_v3  ;;  %v732_v5 = vld [vmem:[%s5701_s5 + $0xf88] sm:$0xff] }
  0xb6   : > { %731 = vst [vmem:[%s5706_s6 + $0x7c0] sm:$0xff] %v730_v4  ;;  %v734_v6 = vld [vmem:[%s5701_s5 + $0xfa0] sm:$0xff]  ;;  %v736_v7 = vld [vmem:[%s5701_s5 + $0xfa8] sm:$0xff]  ;;  %733 = vst [vmem:[%s5706_s6 + $0x7c8] sm:$0xff] %v732_v5 }
  0xb7   : > { %735 = vst [vmem:[%s5706_s6 + $0x7d0] sm:$0xff] %v734_v6  ;;  %737 = vst [vmem:[%s5706_s6 + $0x7d8] sm:$0xff] %v736_v7  ;;  %v738_v8 = vld [vmem:[%s5701_s5 + $0xfc0] sm:$0xff]  ;;  %v740_v9 = vld [vmem:[%s5701_s5 + $0xfc8] sm:$0xff] }
  0xb8   : > { %v742_v10 = vld [vmem:[%s5701_s5 + $0xfe0] sm:$0xff]  ;;  %739 = vst [vmem:[%s5706_s6 + $0x7e0] sm:$0xff] %v738_v8  ;;  %741 = vst [vmem:[%s5706_s6 + $0x7e8] sm:$0xff] %v740_v9  ;;  %v744_v11 = vld [vmem:[%s5701_s5 + $0xfe8] sm:$0xff] }
  0xb9   : > { %743 = vst [vmem:[%s5706_s6 + $0x7f0] sm:$0xff] %v742_v10  ;;  %v746_v12 = vld [vmem:[%s5701_s5 + $0x1000] sm:$0xff]  ;;  %v748_v13 = vld [vmem:[%s5701_s5 + $0x1008] sm:$0xff]  ;;  %745 = vst [vmem:[%s5706_s6 + $0x7f8] sm:$0xff] %v744_v11 }
  0xba   : > { %747 = vst [vmem:[%s5706_s6 + $0x800] sm:$0xff] %v746_v12  ;;  %749 = vst [vmem:[%s5706_s6 + $0x808] sm:$0xff] %v748_v13  ;;  %v750_v14 = vld [vmem:[%s5701_s5 + $0x1020] sm:$0xff]  ;;  %v752_v15 = vld [vmem:[%s5701_s5 + $0x1028] sm:$0xff] }
  0xbb   : > { %v754_v16 = vld [vmem:[%s5701_s5 + $0x1040] sm:$0xff]  ;;  %751 = vst [vmem:[%s5706_s6 + $0x810] sm:$0xff] %v750_v14  ;;  %753 = vst [vmem:[%s5706_s6 + $0x818] sm:$0xff] %v752_v15  ;;  %v756_v17 = vld [vmem:[%s5701_s5 + $0x1048] sm:$0xff] }
  0xbc   : > { %755 = vst [vmem:[%s5706_s6 + $0x820] sm:$0xff] %v754_v16  ;;  %v758_v18 = vld [vmem:[%s5701_s5 + $0x1060] sm:$0xff]  ;;  %v760_v19 = vld [vmem:[%s5701_s5 + $0x1068] sm:$0xff]  ;;  %757 = vst [vmem:[%s5706_s6 + $0x828] sm:$0xff] %v756_v17 }
  0xbd   : > { %759 = vst [vmem:[%s5706_s6 + $0x830] sm:$0xff] %v758_v18  ;;  %761 = vst [vmem:[%s5706_s6 + $0x838] sm:$0xff] %v760_v19  ;;  %v762_v20 = vld [vmem:[%s5701_s5 + $0x1080] sm:$0xff]  ;;  %v764_v21 = vld [vmem:[%s5701_s5 + $0x1088] sm:$0xff] }
  0xbe   : > { %v766_v22 = vld [vmem:[%s5701_s5 + $0x10a0] sm:$0xff]  ;;  %763 = vst [vmem:[%s5706_s6 + $0x840] sm:$0xff] %v762_v20  ;;  %765 = vst [vmem:[%s5706_s6 + $0x848] sm:$0xff] %v764_v21  ;;  %v768_v23 = vld [vmem:[%s5701_s5 + $0x10a8] sm:$0xff] }
  0xbf   : > { %767 = vst [vmem:[%s5706_s6 + $0x850] sm:$0xff] %v766_v22  ;;  %v770_v24 = vld [vmem:[%s5701_s5 + $0x10c0] sm:$0xff]  ;;  %v772_v25 = vld [vmem:[%s5701_s5 + $0x10c8] sm:$0xff]  ;;  %769 = vst [vmem:[%s5706_s6 + $0x858] sm:$0xff] %v768_v23 }
  0xc0   : > { %771 = vst [vmem:[%s5706_s6 + $0x860] sm:$0xff] %v770_v24  ;;  %773 = vst [vmem:[%s5706_s6 + $0x868] sm:$0xff] %v772_v25  ;;  %v774_v26 = vld [vmem:[%s5701_s5 + $0x10e0] sm:$0xff]  ;;  %v776_v27 = vld [vmem:[%s5701_s5 + $0x10e8] sm:$0xff] }
  0xc1   : > { %v778_v28 = vld [vmem:[%s5701_s5 + $0x1100] sm:$0xff]  ;;  %775 = vst [vmem:[%s5706_s6 + $0x870] sm:$0xff] %v774_v26  ;;  %777 = vst [vmem:[%s5706_s6 + $0x878] sm:$0xff] %v776_v27  ;;  %v780_v29 = vld [vmem:[%s5701_s5 + $0x1108] sm:$0xff] }
  0xc2   : > { %779 = vst [vmem:[%s5706_s6 + $0x880] sm:$0xff] %v778_v28  ;;  %v782_v30 = vld [vmem:[%s5701_s5 + $0x1120] sm:$0xff]  ;;  %v784_v31 = vld [vmem:[%s5701_s5 + $0x1128] sm:$0xff]  ;;  %781 = vst [vmem:[%s5706_s6 + $0x888] sm:$0xff] %v780_v29 }
  0xc3   : > { %783 = vst [vmem:[%s5706_s6 + $0x890] sm:$0xff] %v782_v30  ;;  %785 = vst [vmem:[%s5706_s6 + $0x898] sm:$0xff] %v784_v31  ;;  %v786_v32 = vld [vmem:[%s5701_s5 + $0x1140] sm:$0xff]  ;;  %v788_v33 = vld [vmem:[%s5701_s5 + $0x1148] sm:$0xff] }
  0xc4   : > { %v790_v34 = vld [vmem:[%s5701_s5 + $0x1160] sm:$0xff]  ;;  %787 = vst [vmem:[%s5706_s6 + $0x8a0] sm:$0xff] %v786_v32  ;;  %789 = vst [vmem:[%s5706_s6 + $0x8a8] sm:$0xff] %v788_v33  ;;  %v792_v35 = vld [vmem:[%s5701_s5 + $0x1168] sm:$0xff] }
  0xc5   : > { %791 = vst [vmem:[%s5706_s6 + $0x8b0] sm:$0xff] %v790_v34  ;;  %v794_v36 = vld [vmem:[%s5701_s5 + $0x1180] sm:$0xff]  ;;  %v796_v37 = vld [vmem:[%s5701_s5 + $0x1188] sm:$0xff]  ;;  %793 = vst [vmem:[%s5706_s6 + $0x8b8] sm:$0xff] %v792_v35 }
  0xc6   : > { %795 = vst [vmem:[%s5706_s6 + $0x8c0] sm:$0xff] %v794_v36  ;;  %797 = vst [vmem:[%s5706_s6 + $0x8c8] sm:$0xff] %v796_v37  ;;  %v798_v38 = vld [vmem:[%s5701_s5 + $0x11a0] sm:$0xff]  ;;  %v800_v39 = vld [vmem:[%s5701_s5 + $0x11a8] sm:$0xff] }
  0xc7   : > { %v802_v40 = vld [vmem:[%s5701_s5 + $0x11c0] sm:$0xff]  ;;  %799 = vst [vmem:[%s5706_s6 + $0x8d0] sm:$0xff] %v798_v38  ;;  %801 = vst [vmem:[%s5706_s6 + $0x8d8] sm:$0xff] %v800_v39  ;;  %v804_v41 = vld [vmem:[%s5701_s5 + $0x11c8] sm:$0xff] }
  0xc8   : > { %803 = vst [vmem:[%s5706_s6 + $0x8e0] sm:$0xff] %v802_v40  ;;  %v806_v42 = vld [vmem:[%s5701_s5 + $0x11e0] sm:$0xff]  ;;  %v808_v43 = vld [vmem:[%s5701_s5 + $0x11e8] sm:$0xff]  ;;  %805 = vst [vmem:[%s5706_s6 + $0x8e8] sm:$0xff] %v804_v41 }
  0xc9   : > { %807 = vst [vmem:[%s5706_s6 + $0x8f0] sm:$0xff] %v806_v42  ;;  %809 = vst [vmem:[%s5706_s6 + $0x8f8] sm:$0xff] %v808_v43  ;;  %v810_v44 = vld [vmem:[%s5701_s5 + $0x1200] sm:$0xff]  ;;  %v812_v45 = vld [vmem:[%s5701_s5 + $0x1208] sm:$0xff] }
  0xca   : > { %v814_v46 = vld [vmem:[%s5701_s5 + $0x1220] sm:$0xff]  ;;  %811 = vst [vmem:[%s5706_s6 + $0x900] sm:$0xff] %v810_v44  ;;  %813 = vst [vmem:[%s5706_s6 + $0x908] sm:$0xff] %v812_v45  ;;  %v816_v47 = vld [vmem:[%s5701_s5 + $0x1228] sm:$0xff] }
  0xcb   : > { %815 = vst [vmem:[%s5706_s6 + $0x910] sm:$0xff] %v814_v46  ;;  %v818_v48 = vld [vmem:[%s5701_s5 + $0x1240] sm:$0xff]  ;;  %v820_v49 = vld [vmem:[%s5701_s5 + $0x1248] sm:$0xff]  ;;  %817 = vst [vmem:[%s5706_s6 + $0x918] sm:$0xff] %v816_v47 }
  0xcc   : > { %819 = vst [vmem:[%s5706_s6 + $0x920] sm:$0xff] %v818_v48  ;;  %821 = vst [vmem:[%s5706_s6 + $0x928] sm:$0xff] %v820_v49  ;;  %v822_v50 = vld [vmem:[%s5701_s5 + $0x1260] sm:$0xff]  ;;  %v824_v51 = vld [vmem:[%s5701_s5 + $0x1268] sm:$0xff] }
  0xcd   : > { %v826_v52 = vld [vmem:[%s5701_s5 + $0x1280] sm:$0xff]  ;;  %823 = vst [vmem:[%s5706_s6 + $0x930] sm:$0xff] %v822_v50  ;;  %825 = vst [vmem:[%s5706_s6 + $0x938] sm:$0xff] %v824_v51  ;;  %v828_v53 = vld [vmem:[%s5701_s5 + $0x1288] sm:$0xff] }
  0xce   : > { %827 = vst [vmem:[%s5706_s6 + $0x940] sm:$0xff] %v826_v52  ;;  %v830_v54 = vld [vmem:[%s5701_s5 + $0x12a0] sm:$0xff]  ;;  %v832_v55 = vld [vmem:[%s5701_s5 + $0x12a8] sm:$0xff]  ;;  %829 = vst [vmem:[%s5706_s6 + $0x948] sm:$0xff] %v828_v53 }
  0xcf   : > { %831 = vst [vmem:[%s5706_s6 + $0x950] sm:$0xff] %v830_v54  ;;  %833 = vst [vmem:[%s5706_s6 + $0x958] sm:$0xff] %v832_v55  ;;  %v834_v56 = vld [vmem:[%s5701_s5 + $0x12c0] sm:$0xff]  ;;  %v836_v57 = vld [vmem:[%s5701_s5 + $0x12c8] sm:$0xff] }
  0xd0   : > { %v838_v58 = vld [vmem:[%s5701_s5 + $0x12e0] sm:$0xff]  ;;  %835 = vst [vmem:[%s5706_s6 + $0x960] sm:$0xff] %v834_v56  ;;  %837 = vst [vmem:[%s5706_s6 + $0x968] sm:$0xff] %v836_v57  ;;  %v840_v59 = vld [vmem:[%s5701_s5 + $0x12e8] sm:$0xff] }
  0xd1   : > { %839 = vst [vmem:[%s5706_s6 + $0x970] sm:$0xff] %v838_v58  ;;  %v842_v60 = vld [vmem:[%s5701_s5 + $0x1300] sm:$0xff]  ;;  %v844_v61 = vld [vmem:[%s5701_s5 + $0x1308] sm:$0xff]  ;;  %841 = vst [vmem:[%s5706_s6 + $0x978] sm:$0xff] %v840_v59 }
  0xd2   : > { %843 = vst [vmem:[%s5706_s6 + $0x980] sm:$0xff] %v842_v60  ;;  %845 = vst [vmem:[%s5706_s6 + $0x988] sm:$0xff] %v844_v61  ;;  %v846_v62 = vld [vmem:[%s5701_s5 + $0x1320] sm:$0xff]  ;;  %v848_v63 = vld [vmem:[%s5701_s5 + $0x1328] sm:$0xff] }
  0xd3   : > { %v850_v0 = vld [vmem:[%s5701_s5 + $0x1340] sm:$0xff]  ;;  %847 = vst [vmem:[%s5706_s6 + $0x990] sm:$0xff] %v846_v62  ;;  %849 = vst [vmem:[%s5706_s6 + $0x998] sm:$0xff] %v848_v63  ;;  %v852_v1 = vld [vmem:[%s5701_s5 + $0x1348] sm:$0xff] }
  0xd4   : > { %851 = vst [vmem:[%s5706_s6 + $0x9a0] sm:$0xff] %v850_v0  ;;  %v854_v2 = vld [vmem:[%s5701_s5 + $0x1360] sm:$0xff]  ;;  %v856_v3 = vld [vmem:[%s5701_s5 + $0x1368] sm:$0xff]  ;;  %853 = vst [vmem:[%s5706_s6 + $0x9a8] sm:$0xff] %v852_v1 }
  0xd5   : > { %855 = vst [vmem:[%s5706_s6 + $0x9b0] sm:$0xff] %v854_v2  ;;  %857 = vst [vmem:[%s5706_s6 + $0x9b8] sm:$0xff] %v856_v3  ;;  %v858_v4 = vld [vmem:[%s5701_s5 + $0x1380] sm:$0xff]  ;;  %v860_v5 = vld [vmem:[%s5701_s5 + $0x1388] sm:$0xff] }
  0xd6   : > { %v862_v6 = vld [vmem:[%s5701_s5 + $0x13a0] sm:$0xff]  ;;  %859 = vst [vmem:[%s5706_s6 + $0x9c0] sm:$0xff] %v858_v4  ;;  %861 = vst [vmem:[%s5706_s6 + $0x9c8] sm:$0xff] %v860_v5  ;;  %v864_v7 = vld [vmem:[%s5701_s5 + $0x13a8] sm:$0xff] }
  0xd7   : > { %863 = vst [vmem:[%s5706_s6 + $0x9d0] sm:$0xff] %v862_v6  ;;  %v866_v8 = vld [vmem:[%s5701_s5 + $0x13c0] sm:$0xff]  ;;  %v868_v9 = vld [vmem:[%s5701_s5 + $0x13c8] sm:$0xff]  ;;  %865 = vst [vmem:[%s5706_s6 + $0x9d8] sm:$0xff] %v864_v7 }
  0xd8   : > { %867 = vst [vmem:[%s5706_s6 + $0x9e0] sm:$0xff] %v866_v8  ;;  %869 = vst [vmem:[%s5706_s6 + $0x9e8] sm:$0xff] %v868_v9  ;;  %v870_v10 = vld [vmem:[%s5701_s5 + $0x13e0] sm:$0xff]  ;;  %v872_v11 = vld [vmem:[%s5701_s5 + $0x13e8] sm:$0xff] }
  0xd9   : > { %v874_v12 = vld [vmem:[%s5701_s5 + $0x1400] sm:$0xff]  ;;  %871 = vst [vmem:[%s5706_s6 + $0x9f0] sm:$0xff] %v870_v10  ;;  %873 = vst [vmem:[%s5706_s6 + $0x9f8] sm:$0xff] %v872_v11  ;;  %v876_v13 = vld [vmem:[%s5701_s5 + $0x1408] sm:$0xff] }
  0xda   : > { %875 = vst [vmem:[%s5706_s6 + $0xa00] sm:$0xff] %v874_v12  ;;  %v878_v14 = vld [vmem:[%s5701_s5 + $0x1420] sm:$0xff]  ;;  %v880_v15 = vld [vmem:[%s5701_s5 + $0x1428] sm:$0xff]  ;;  %877 = vst [vmem:[%s5706_s6 + $0xa08] sm:$0xff] %v876_v13 }
  0xdb   : > { %879 = vst [vmem:[%s5706_s6 + $0xa10] sm:$0xff] %v878_v14  ;;  %881 = vst [vmem:[%s5706_s6 + $0xa18] sm:$0xff] %v880_v15  ;;  %v882_v16 = vld [vmem:[%s5701_s5 + $0x1440] sm:$0xff]  ;;  %v884_v17 = vld [vmem:[%s5701_s5 + $0x1448] sm:$0xff] }
  0xdc   : > { %v886_v18 = vld [vmem:[%s5701_s5 + $0x1460] sm:$0xff]  ;;  %883 = vst [vmem:[%s5706_s6 + $0xa20] sm:$0xff] %v882_v16  ;;  %885 = vst [vmem:[%s5706_s6 + $0xa28] sm:$0xff] %v884_v17  ;;  %v888_v19 = vld [vmem:[%s5701_s5 + $0x1468] sm:$0xff] }
  0xdd   : > { %887 = vst [vmem:[%s5706_s6 + $0xa30] sm:$0xff] %v886_v18  ;;  %v890_v20 = vld [vmem:[%s5701_s5 + $0x1480] sm:$0xff]  ;;  %v892_v21 = vld [vmem:[%s5701_s5 + $0x1488] sm:$0xff]  ;;  %889 = vst [vmem:[%s5706_s6 + $0xa38] sm:$0xff] %v888_v19 }
  0xde   : > { %891 = vst [vmem:[%s5706_s6 + $0xa40] sm:$0xff] %v890_v20  ;;  %893 = vst [vmem:[%s5706_s6 + $0xa48] sm:$0xff] %v892_v21  ;;  %v894_v22 = vld [vmem:[%s5701_s5 + $0x14a0] sm:$0xff]  ;;  %v896_v23 = vld [vmem:[%s5701_s5 + $0x14a8] sm:$0xff] }
  0xdf   : > { %v898_v24 = vld [vmem:[%s5701_s5 + $0x14c0] sm:$0xff]  ;;  %895 = vst [vmem:[%s5706_s6 + $0xa50] sm:$0xff] %v894_v22  ;;  %897 = vst [vmem:[%s5706_s6 + $0xa58] sm:$0xff] %v896_v23  ;;  %v900_v25 = vld [vmem:[%s5701_s5 + $0x14c8] sm:$0xff] }
  0xe0   : > { %899 = vst [vmem:[%s5706_s6 + $0xa60] sm:$0xff] %v898_v24  ;;  %v902_v26 = vld [vmem:[%s5701_s5 + $0x14e0] sm:$0xff]  ;;  %v904_v27 = vld [vmem:[%s5701_s5 + $0x14e8] sm:$0xff]  ;;  %901 = vst [vmem:[%s5706_s6 + $0xa68] sm:$0xff] %v900_v25 }
  0xe1   : > { %903 = vst [vmem:[%s5706_s6 + $0xa70] sm:$0xff] %v902_v26  ;;  %905 = vst [vmem:[%s5706_s6 + $0xa78] sm:$0xff] %v904_v27  ;;  %v906_v28 = vld [vmem:[%s5701_s5 + $0x1500] sm:$0xff]  ;;  %v908_v29 = vld [vmem:[%s5701_s5 + $0x1508] sm:$0xff] }
  0xe2   : > { %v910_v30 = vld [vmem:[%s5701_s5 + $0x1520] sm:$0xff]  ;;  %907 = vst [vmem:[%s5706_s6 + $0xa80] sm:$0xff] %v906_v28  ;;  %909 = vst [vmem:[%s5706_s6 + $0xa88] sm:$0xff] %v908_v29  ;;  %v912_v31 = vld [vmem:[%s5701_s5 + $0x1528] sm:$0xff] }
  0xe3   : > { %911 = vst [vmem:[%s5706_s6 + $0xa90] sm:$0xff] %v910_v30  ;;  %v914_v32 = vld [vmem:[%s5701_s5 + $0x1540] sm:$0xff]  ;;  %v916_v33 = vld [vmem:[%s5701_s5 + $0x1548] sm:$0xff]  ;;  %913 = vst [vmem:[%s5706_s6 + $0xa98] sm:$0xff] %v912_v31 }
  0xe4   : > { %915 = vst [vmem:[%s5706_s6 + $0xaa0] sm:$0xff] %v914_v32  ;;  %917 = vst [vmem:[%s5706_s6 + $0xaa8] sm:$0xff] %v916_v33  ;;  %v918_v34 = vld [vmem:[%s5701_s5 + $0x1560] sm:$0xff]  ;;  %v920_v35 = vld [vmem:[%s5701_s5 + $0x1568] sm:$0xff] }
  0xe5   : > { %v922_v36 = vld [vmem:[%s5701_s5 + $0x1580] sm:$0xff]  ;;  %919 = vst [vmem:[%s5706_s6 + $0xab0] sm:$0xff] %v918_v34  ;;  %921 = vst [vmem:[%s5706_s6 + $0xab8] sm:$0xff] %v920_v35  ;;  %v924_v37 = vld [vmem:[%s5701_s5 + $0x1588] sm:$0xff] }
  0xe6   : > { %923 = vst [vmem:[%s5706_s6 + $0xac0] sm:$0xff] %v922_v36  ;;  %v926_v38 = vld [vmem:[%s5701_s5 + $0x15a0] sm:$0xff]  ;;  %v928_v39 = vld [vmem:[%s5701_s5 + $0x15a8] sm:$0xff]  ;;  %925 = vst [vmem:[%s5706_s6 + $0xac8] sm:$0xff] %v924_v37 }
  0xe7   : > { %927 = vst [vmem:[%s5706_s6 + $0xad0] sm:$0xff] %v926_v38  ;;  %929 = vst [vmem:[%s5706_s6 + $0xad8] sm:$0xff] %v928_v39  ;;  %v930_v40 = vld [vmem:[%s5701_s5 + $0x15c0] sm:$0xff]  ;;  %v932_v41 = vld [vmem:[%s5701_s5 + $0x15c8] sm:$0xff] }
  0xe8   : > { %v934_v42 = vld [vmem:[%s5701_s5 + $0x15e0] sm:$0xff]  ;;  %931 = vst [vmem:[%s5706_s6 + $0xae0] sm:$0xff] %v930_v40  ;;  %933 = vst [vmem:[%s5706_s6 + $0xae8] sm:$0xff] %v932_v41  ;;  %v936_v43 = vld [vmem:[%s5701_s5 + $0x15e8] sm:$0xff] }
  0xe9   : > { %935 = vst [vmem:[%s5706_s6 + $0xaf0] sm:$0xff] %v934_v42  ;;  %v938_v44 = vld [vmem:[%s5701_s5 + $0x1600] sm:$0xff]  ;;  %v940_v45 = vld [vmem:[%s5701_s5 + $0x1608] sm:$0xff]  ;;  %937 = vst [vmem:[%s5706_s6 + $0xaf8] sm:$0xff] %v936_v43 }
  0xea   : > { %939 = vst [vmem:[%s5706_s6 + $0xb00] sm:$0xff] %v938_v44  ;;  %941 = vst [vmem:[%s5706_s6 + $0xb08] sm:$0xff] %v940_v45  ;;  %v942_v46 = vld [vmem:[%s5701_s5 + $0x1620] sm:$0xff]  ;;  %v944_v47 = vld [vmem:[%s5701_s5 + $0x1628] sm:$0xff] }
  0xeb   : > { %v946_v48 = vld [vmem:[%s5701_s5 + $0x1640] sm:$0xff]  ;;  %943 = vst [vmem:[%s5706_s6 + $0xb10] sm:$0xff] %v942_v46  ;;  %945 = vst [vmem:[%s5706_s6 + $0xb18] sm:$0xff] %v944_v47  ;;  %v948_v49 = vld [vmem:[%s5701_s5 + $0x1648] sm:$0xff] }
  0xec   : > { %947 = vst [vmem:[%s5706_s6 + $0xb20] sm:$0xff] %v946_v48  ;;  %v950_v50 = vld [vmem:[%s5701_s5 + $0x1660] sm:$0xff]  ;;  %v952_v51 = vld [vmem:[%s5701_s5 + $0x1668] sm:$0xff]  ;;  %949 = vst [vmem:[%s5706_s6 + $0xb28] sm:$0xff] %v948_v49 }
  0xed   : > { %951 = vst [vmem:[%s5706_s6 + $0xb30] sm:$0xff] %v950_v50  ;;  %953 = vst [vmem:[%s5706_s6 + $0xb38] sm:$0xff] %v952_v51  ;;  %v954_v52 = vld [vmem:[%s5701_s5 + $0x1680] sm:$0xff]  ;;  %v956_v53 = vld [vmem:[%s5701_s5 + $0x1688] sm:$0xff] }
  0xee   : > { %v958_v54 = vld [vmem:[%s5701_s5 + $0x16a0] sm:$0xff]  ;;  %955 = vst [vmem:[%s5706_s6 + $0xb40] sm:$0xff] %v954_v52  ;;  %957 = vst [vmem:[%s5706_s6 + $0xb48] sm:$0xff] %v956_v53  ;;  %v960_v55 = vld [vmem:[%s5701_s5 + $0x16a8] sm:$0xff] }
  0xef   : > { %959 = vst [vmem:[%s5706_s6 + $0xb50] sm:$0xff] %v958_v54  ;;  %v962_v56 = vld [vmem:[%s5701_s5 + $0x16c0] sm:$0xff]  ;;  %v964_v57 = vld [vmem:[%s5701_s5 + $0x16c8] sm:$0xff]  ;;  %961 = vst [vmem:[%s5706_s6 + $0xb58] sm:$0xff] %v960_v55 }
  0xf0   : > { %963 = vst [vmem:[%s5706_s6 + $0xb60] sm:$0xff] %v962_v56  ;;  %965 = vst [vmem:[%s5706_s6 + $0xb68] sm:$0xff] %v964_v57  ;;  %v966_v58 = vld [vmem:[%s5701_s5 + $0x16e0] sm:$0xff]  ;;  %v968_v59 = vld [vmem:[%s5701_s5 + $0x16e8] sm:$0xff] }
  0xf1   : > { %v970_v60 = vld [vmem:[%s5701_s5 + $0x1700] sm:$0xff]  ;;  %967 = vst [vmem:[%s5706_s6 + $0xb70] sm:$0xff] %v966_v58  ;;  %969 = vst [vmem:[%s5706_s6 + $0xb78] sm:$0xff] %v968_v59  ;;  %v972_v61 = vld [vmem:[%s5701_s5 + $0x1708] sm:$0xff] }
  0xf2   : > { %971 = vst [vmem:[%s5706_s6 + $0xb80] sm:$0xff] %v970_v60  ;;  %v974_v62 = vld [vmem:[%s5701_s5 + $0x1720] sm:$0xff]  ;;  %v976_v63 = vld [vmem:[%s5701_s5 + $0x1728] sm:$0xff]  ;;  %973 = vst [vmem:[%s5706_s6 + $0xb88] sm:$0xff] %v972_v61 }
  0xf3   : > { %975 = vst [vmem:[%s5706_s6 + $0xb90] sm:$0xff] %v974_v62  ;;  %977 = vst [vmem:[%s5706_s6 + $0xb98] sm:$0xff] %v976_v63  ;;  %v978_v0 = vld [vmem:[%s5701_s5 + $0x1740] sm:$0xff]  ;;  %v980_v1 = vld [vmem:[%s5701_s5 + $0x1748] sm:$0xff] }
  0xf4   : > { %v982_v2 = vld [vmem:[%s5701_s5 + $0x1760] sm:$0xff]  ;;  %979 = vst [vmem:[%s5706_s6 + $0xba0] sm:$0xff] %v978_v0  ;;  %981 = vst [vmem:[%s5706_s6 + $0xba8] sm:$0xff] %v980_v1  ;;  %v984_v3 = vld [vmem:[%s5701_s5 + $0x1768] sm:$0xff] }
  0xf5   : > { %983 = vst [vmem:[%s5706_s6 + $0xbb0] sm:$0xff] %v982_v2  ;;  %v986_v4 = vld [vmem:[%s5701_s5 + $0x1780] sm:$0xff]  ;;  %v988_v5 = vld [vmem:[%s5701_s5 + $0x1788] sm:$0xff]  ;;  %985 = vst [vmem:[%s5706_s6 + $0xbb8] sm:$0xff] %v984_v3 }
  0xf6   : > { %987 = vst [vmem:[%s5706_s6 + $0xbc0] sm:$0xff] %v986_v4  ;;  %989 = vst [vmem:[%s5706_s6 + $0xbc8] sm:$0xff] %v988_v5  ;;  %v990_v6 = vld [vmem:[%s5701_s5 + $0x17a0] sm:$0xff]  ;;  %v992_v7 = vld [vmem:[%s5701_s5 + $0x17a8] sm:$0xff] }
  0xf7   : > { %v994_v8 = vld [vmem:[%s5701_s5 + $0x17c0] sm:$0xff]  ;;  %991 = vst [vmem:[%s5706_s6 + $0xbd0] sm:$0xff] %v990_v6  ;;  %993 = vst [vmem:[%s5706_s6 + $0xbd8] sm:$0xff] %v992_v7  ;;  %v996_v9 = vld [vmem:[%s5701_s5 + $0x17c8] sm:$0xff] }
  0xf8   : > { %995 = vst [vmem:[%s5706_s6 + $0xbe0] sm:$0xff] %v994_v8  ;;  %v998_v10 = vld [vmem:[%s5701_s5 + $0x17e0] sm:$0xff]  ;;  %v1000_v11 = vld [vmem:[%s5701_s5 + $0x17e8] sm:$0xff]  ;;  %997 = vst [vmem:[%s5706_s6 + $0xbe8] sm:$0xff] %v996_v9 }
  0xf9   : > { %999 = vst [vmem:[%s5706_s6 + $0xbf0] sm:$0xff] %v998_v10  ;;  %1001 = vst [vmem:[%s5706_s6 + $0xbf8] sm:$0xff] %v1000_v11 }
  0xfa PF: > { %p4294_p0 = scmp.ge.s32.totalorder %s5564_s22, 1  ;;  %p1014_p1 = scmp.lt.s32.totalorder %s5564_s22, 7 }
  0xfc   : > { %p1015_p2 = pnand %p4294_p0, %p1014_p1 }
  0xfd   : > { %s1021_s0 = sand.u32 (!%p1015_p2), 1, %s5540_s16   ;;  %s1028_s23 = sand.u32 (!%p1015_p2), 1, %s5532_s14  }
  0xfe   : > { %1018 = sbr.rel (%p1015_p2) target bundleno = 940 (0x3ac), region = 70  ;;  %s1055_s7 = sand.u32 (!%p1015_p2), 1, %s5524_s12  }
  0xff   : > { %s4745_s28 = smul.u32 (!%p1015_p2), 96, %s1021_s0  ;;  %s4295_s26 = sshll.u32 (!%p1015_p2), %s1055_s7, 6 }
 0x100   : > { %s4746_s11 = smul.u32 (!%p1015_p2), 3072, %s1028_s23  ;;  %s4296_s27 = sshll.u32 (!%p1015_p2), %s5552_s19, 2 }
 0x101   : > { %p1063_p3 = scmp.lt.s32.totalorder (!%p1015_p2), %s4296_s27, 7  ;;  %s6485_s6 = scalar_lea.vmem (!%p1015_p2), [#allocation3], %s4745_s28 }
 0x102   : > { %s6487_s1 = scalar_lea.vmem (!%p1015_p2), [#allocation4], %s4746_s11  ;;  %s6489_s25 = scalar_lea.vmem (!%p1015_p2), [#allocation5], %s4295_s26 }
 0x103   : > { %p4297_p4 = scmp.ne.s32.totalorder (!%p1015_p2), %s5548_s18, 0 }
 0x105   : > { %s7020_s27 = smov (!%p1063_p3, %s4296_s27), 7  ;;  %1072 = sbr.rel (%p4297_p4) target bundleno = 268 (0x10c), region = 82 }
 0x106   : > { %s1065_s5 = scalar_lea.vmem %s6991_s2, %s7020_s27  ;;  %v5566_v12 = vmov (!%p4297_p4), 0.0  }
 0x107   : > { %1073 = vst [vmem:[#allocation2] sm:$0xff] (!%p4297_p4), %v5566_v12  ;;  %1074 = vst [vmem:[#allocation2 + $0x8] sm:$0xff] (!%p4297_p4), %v5566_v12 }
 0x108   : > { %1075 = vst [vmem:[#allocation2 + $0x10] sm:$0xff] (!%p4297_p4), %v5566_v12  ;;  %1076 = vst [vmem:[#allocation2 + $0x18] sm:$0xff] (!%p4297_p4), %v5566_v12 }
 0x109   : > { %1077 = vst [vmem:[#allocation2 + $0x20] sm:$0xff] (!%p4297_p4), %v5566_v12  ;;  %1078 = vst [vmem:[#allocation2 + $0x28] sm:$0xff] (!%p4297_p4), %v5566_v12 }
 0x10a   : > { %1079 = vst [vmem:[#allocation2 + $0x30] sm:$0xff] (!%p4297_p4), %v5566_v12  ;;  %1080 = vst [vmem:[#allocation2 + $0x38] sm:$0xff] (!%p4297_p4), %v5566_v12 }
 0x10c PF: > { %v4836_v13 = vld [vmem:[%s6487_s1 + $0x4] ss:$16 sps:$4 sm:$0xff]   ;;  %v4838_v14 = vld [vmem:[%s6487_s1 + $0xc] ss:$16 sps:$4 sm:$0xff]   ;;  %v4840_v15 = vld [vmem:[%s6487_s1] ss:$16 sps:$4 sm:$0xff]  }
 0x10d   : > { %3465 = vmatprep.subr.bf16.mxu0 %v4836_v13  ;;  %v4841_v16 = vld [vmem:[%s6487_s1 + $0x8] ss:$16 sps:$4 sm:$0xff]   ;;  %3723 = vmatprep.subr.bf16.mxu1 %v4838_v14  ;;  %v4842_v17 = vld [vmem:[%s6487_s1 + $0x24] ss:$16 sps:$4 sm:$0xff]   ;;  %v4844_v18 = vld [vmem:[%s6487_s1 + $0x2c] ss:$16 sps:$4 sm:$0xff]  }
 0x10e   : > { %3466 = vmatpush1.bf16.msra.mxu0 %v4840_v15  ;;  %3724 = vmatpush1.bf16.msra.mxu1 %v4841_v16  ;;  %v4846_v19 = vld [vmem:[%s6487_s1 + $0x20] ss:$16 sps:$4 sm:$0xff]   ;;  %v4847_v20 = vld [vmem:[%s6487_s1 + $0x28] ss:$16 sps:$4 sm:$0xff]   ;;  %v4848_v21 = vld [vmem:[%s6487_s1 + $0x44] ss:$16 sps:$4 sm:$0xff]  }
 0x10f   : > { %3467 = vmatprep.subr.bf16.mxu0 %v4842_v17  ;;  %3725 = vmatprep.subr.bf16.mxu1 %v4844_v18  ;;  %v4850_v22 = vld [vmem:[%s6487_s1 + $0x4c] ss:$16 sps:$4 sm:$0xff]   ;;  %v4852_v23 = vld [vmem:[%s6487_s1 + $0x40] ss:$16 sps:$4 sm:$0xff]   ;;  %v4853_v24 = vld [vmem:[%s6487_s1 + $0x48] ss:$16 sps:$4 sm:$0xff]  }
 0x110   : > { %v4854_v25 = vld [vmem:[%s6487_s1 + $0x64] ss:$16 sps:$4 sm:$0xff]   ;;  %v4856_v26 = vld [vmem:[%s6487_s1 + $0x6c] ss:$16 sps:$4 sm:$0xff]   ;;  %v4858_v27 = vld [vmem:[%s6487_s1 + $0x60] ss:$16 sps:$4 sm:$0xff]  }
 0x111   : > { %v4859_v28 = vld [vmem:[%s6487_s1 + $0x68] ss:$16 sps:$4 sm:$0xff]   ;;  %v4860_v29 = vld [vmem:[%s6487_s1 + $0x84] ss:$16 sps:$4 sm:$0xff]   ;;  %v4862_v30 = vld [vmem:[%s6487_s1 + $0x8c] ss:$16 sps:$4 sm:$0xff]  }
 0x112   : > { %3468 = vmatpush1.bf16.msra.mxu0 %v4846_v19  ;;  %3726 = vmatpush1.bf16.msra.mxu1 %v4847_v20  ;;  %v4864_v31 = vld [vmem:[%s6487_s1 + $0x80] ss:$16 sps:$4 sm:$0xff]   ;;  %v4865_v32 = vld [vmem:[%s6487_s1 + $0x88] ss:$16 sps:$4 sm:$0xff]   ;;  %v4866_v33 = vld [vmem:[%s6487_s1 + $0xa4] ss:$16 sps:$4 sm:$0xff]  }
 0x113   : > { %3469 = vmatprep.subr.bf16.mxu0 %v4848_v21  ;;  %3727 = vmatprep.subr.bf16.mxu1 %v4850_v22  ;;  %v4868_v34 = vld [vmem:[%s6487_s1 + $0xac] ss:$16 sps:$4 sm:$0xff]   ;;  %v4870_v35 = vld [vmem:[%s6487_s1 + $0xa0] ss:$16 sps:$4 sm:$0xff]   ;;  %v4871_v36 = vld [vmem:[%s6487_s1 + $0xa8] ss:$16 sps:$4 sm:$0xff]  }
 0x114   : > { %v4872_v37 = vld [vmem:[%s6487_s1 + $0xc4] ss:$16 sps:$4 sm:$0xff]   ;;  %v4874_v38 = vld [vmem:[%s6487_s1 + $0xcc] ss:$16 sps:$4 sm:$0xff]   ;;  %v4876_v39 = vld [vmem:[%s6487_s1 + $0xc0] ss:$16 sps:$4 sm:$0xff]  }
 0x115   : > { %v4877_v40 = vld [vmem:[%s6487_s1 + $0xc8] ss:$16 sps:$4 sm:$0xff]   ;;  %v4878_v41 = vld [vmem:[%s6487_s1 + $0xe4] ss:$16 sps:$4 sm:$0xff]   ;;  %v4880_v42 = vld [vmem:[%s6487_s1 + $0xec] ss:$16 sps:$4 sm:$0xff]  }
 0x116   : > { %3470 = vmatpush1.bf16.msra.mxu0 %v4852_v23  ;;  %3728 = vmatpush1.bf16.msra.mxu1 %v4853_v24  ;;  %v4882_v43 = vld [vmem:[%s6487_s1 + $0xe0] ss:$16 sps:$4 sm:$0xff]   ;;  %v4883_v44 = vld [vmem:[%s6487_s1 + $0xe8] ss:$16 sps:$4 sm:$0xff]   ;;  %v4884_v45 = vld [vmem:[%s6487_s1 + $0x104] ss:$16 sps:$4 sm:$0xff]  }
 0x117   : > { %3471 = vmatprep.subr.bf16.mxu0 %v4854_v25  ;;  %3729 = vmatprep.subr.bf16.mxu1 %v4856_v26  ;;  %v4886_v46 = vld [vmem:[%s6487_s1 + $0x10c] ss:$16 sps:$4 sm:$0xff]   ;;  %v4888_v47 = vld [vmem:[%s6487_s1 + $0x100] ss:$16 sps:$4 sm:$0xff]   ;;  %v4889_v48 = vld [vmem:[%s6487_s1 + $0x108] ss:$16 sps:$4 sm:$0xff]  }
 0x118   : > { %v4890_v49 = vld [vmem:[%s6487_s1 + $0x124] ss:$16 sps:$4 sm:$0xff]   ;;  %v4892_v50 = vld [vmem:[%s6487_s1 + $0x12c] ss:$16 sps:$4 sm:$0xff]   ;;  %v4894_v51 = vld [vmem:[%s6487_s1 + $0x120] ss:$16 sps:$4 sm:$0xff]  }
 0x119   : > { %v4895_v52 = vld [vmem:[%s6487_s1 + $0x128] ss:$16 sps:$4 sm:$0xff]   ;;  %v4896_v53 = vld [vmem:[%s6487_s1 + $0x144] ss:$16 sps:$4 sm:$0xff]   ;;  %v4898_v54 = vld [vmem:[%s6487_s1 + $0x14c] ss:$16 sps:$4 sm:$0xff]  }
 0x11a   : > { %3472 = vmatpush1.bf16.msra.mxu0 %v4858_v27  ;;  %3730 = vmatpush1.bf16.msra.mxu1 %v4859_v28  ;;  %v4900_v55 = vld [vmem:[%s6487_s1 + $0x140] ss:$16 sps:$4 sm:$0xff]   ;;  %v4901_v56 = vld [vmem:[%s6487_s1 + $0x148] ss:$16 sps:$4 sm:$0xff]   ;;  %v4902_v57 = vld [vmem:[%s6487_s1 + $0x164] ss:$16 sps:$4 sm:$0xff]  }
 0x11b   : > { %3473 = vmatprep.subr.bf16.mxu0 %v4860_v29  ;;  %3731 = vmatprep.subr.bf16.mxu1 %v4862_v30  ;;  %v4904_v58 = vld [vmem:[%s6487_s1 + $0x16c] ss:$16 sps:$4 sm:$0xff]   ;;  %v4906_v59 = vld [vmem:[%s6487_s1 + $0x160] ss:$16 sps:$4 sm:$0xff]   ;;  %v4907_v60 = vld [vmem:[%s6487_s1 + $0x168] ss:$16 sps:$4 sm:$0xff]  }
 0x11c   : > { %v4934_v61 = vld [vmem:[%s6485_s6 + $0x4] ss:$48 sps:$4 sm:$0xff]   ;;  %v4910_v63 = vld [vmem:[%s6487_s1 + $0x18c] ss:$16 sps:$4 sm:$0xff]   ;;  %v4912_v0 = vld [vmem:[%s6487_s1 + $0x180] ss:$16 sps:$4 sm:$0xff]  }
 0x11d   : > { %v4908_v62 = vld [vmem:[%s6487_s1 + $0x184] ss:$16 sps:$4 sm:$0xff]   ;;  %3497 = vmatprep.mubr.bf16.mxu0 %v4934_v61  ;;  %3755 = vmatprep.mubr.bf16.mxu1 %v4934_v61  ;;  %v4913_v1 = vld [vmem:[%s6487_s1 + $0x188] ss:$16 sps:$4 sm:$0xff]   ;;  %v4916_v3 = vld [vmem:[%s6487_s1 + $0x1ac] ss:$16 sps:$4 sm:$0xff]  }
 0x11e   : > { %3474 = vmatpush1.bf16.msra.mxu0 %v4864_v31  ;;  %3732 = vmatpush1.bf16.msra.mxu1 %v4865_v32  ;;  %v4914_v2 = vld [vmem:[%s6487_s1 + $0x1a4] ss:$16 sps:$4 sm:$0xff]   ;;  %v4918_v4 = vld [vmem:[%s6487_s1 + $0x1a0] ss:$16 sps:$4 sm:$0xff]   ;;  %v4919_v5 = vld [vmem:[%s6487_s1 + $0x1a8] ss:$16 sps:$4 sm:$0xff]  }
 0x11f   : > { %3475 = vmatprep.subr.bf16.mxu0 %v4866_v33  ;;  %3733 = vmatprep.subr.bf16.mxu1 %v4868_v34  ;;  %v4920_v6 = vld [vmem:[%s6487_s1 + $0x1c4] ss:$16 sps:$4 sm:$0xff]   ;;  %v4922_v7 = vld [vmem:[%s6487_s1 + $0x1cc] ss:$16 sps:$4 sm:$0xff]   ;;  %v4924_v8 = vld [vmem:[%s6487_s1 + $0x1c0] ss:$16 sps:$4 sm:$0xff]  }
 0x120   : > { %v4925_v9 = vld [vmem:[%s6487_s1 + $0x1c8] ss:$16 sps:$4 sm:$0xff]   ;;  %v4926_v10 = vld [vmem:[%s6487_s1 + $0x1e4] ss:$16 sps:$4 sm:$0xff]   ;;  %v4928_v11 = vld [vmem:[%s6487_s1 + $0x1ec] ss:$16 sps:$4 sm:$0xff]  }
 0x121   : > { %v4930_v12 = vld [vmem:[%s6487_s1 + $0x1e0] ss:$16 sps:$4 sm:$0xff]   ;;  %v4931_v13 = vld [vmem:[%s6487_s1 + $0x1e8] ss:$16 sps:$4 sm:$0xff]   ;;  %v4937_v14 = vld [vmem:[%s6487_s1 + $0x204] ss:$16 sps:$4 sm:$0xff]  }
 0x122   : > { %3476 = vmatpush1.bf16.msra.mxu0 %v4870_v35  ;;  %3734 = vmatpush1.bf16.msra.mxu1 %v4871_v36  ;;  %v4940_v15 = vld [vmem:[%s6487_s1 + $0x20c] ss:$16 sps:$4 sm:$0xff]   ;;  %v4932_v16 = vld [vmem:[%s6485_s6] ss:$48 sps:$4 sm:$0xff]   ;;  %v4938_v18 = vld [vmem:[%s6487_s1 + $0x208] ss:$16 sps:$4 sm:$0xff]  }
 0x123   : > { %3477 = vmatprep.subr.bf16.mxu0 %v4872_v37  ;;  %3735 = vmatprep.subr.bf16.mxu1 %v4874_v38  ;;  %v4935_v17 = vld [vmem:[%s6487_s1 + $0x200] ss:$16 sps:$4 sm:$0xff]   ;;  %v4943_v19 = vld [vmem:[%s6487_s1 + $0x224] ss:$16 sps:$4 sm:$0xff]   ;;  %v4946_v20 = vld [vmem:[%s6487_s1 + $0x22c] ss:$16 sps:$4 sm:$0xff]  }
 0x124   : > { %v4941_v21 = vld [vmem:[%s6487_s1 + $0x220] ss:$16 sps:$4 sm:$0xff]   ;;  %v4944_v22 = vld [vmem:[%s6487_s1 + $0x228] ss:$16 sps:$4 sm:$0xff]   ;;  %v4949_v23 = vld [vmem:[%s6487_s1 + $0x244] ss:$16 sps:$4 sm:$0xff]  }
 0x125   : > { %v4952_v24 = vld [vmem:[%s6487_s1 + $0x24c] ss:$16 sps:$4 sm:$0xff]   ;;  %v4947_v25 = vld [vmem:[%s6487_s1 + $0x240] ss:$16 sps:$4 sm:$0xff]   ;;  %v4950_v26 = vld [vmem:[%s6487_s1 + $0x248] ss:$16 sps:$4 sm:$0xff]  }
 0x126   : > { %3478 = vmatpush1.bf16.msra.mxu0 %v4876_v39  ;;  %3736 = vmatpush1.bf16.msra.mxu1 %v4877_v40  ;;  %v4955_v27 = vld [vmem:[%s6487_s1 + $0x264] ss:$16 sps:$4 sm:$0xff]   ;;  %v4958_v28 = vld [vmem:[%s6487_s1 + $0x26c] ss:$16 sps:$4 sm:$0xff]   ;;  %v4953_v29 = vld [vmem:[%s6487_s1 + $0x260] ss:$16 sps:$4 sm:$0xff]  }
 0x127   : > { %3479 = vmatprep.subr.bf16.mxu0 %v4878_v41  ;;  %3737 = vmatprep.subr.bf16.mxu1 %v4880_v42  ;;  %v4956_v30 = vld [vmem:[%s6487_s1 + $0x268] ss:$16 sps:$4 sm:$0xff]   ;;  %v4961_v31 = vld [vmem:[%s6487_s1 + $0x284] ss:$16 sps:$4 sm:$0xff]   ;;  %v4964_v32 = vld [vmem:[%s6487_s1 + $0x28c] ss:$16 sps:$4 sm:$0xff]  }
 0x128   : > { %v4959_v33 = vld [vmem:[%s6487_s1 + $0x280] ss:$16 sps:$4 sm:$0xff]   ;;  %v4962_v34 = vld [vmem:[%s6487_s1 + $0x288] ss:$16 sps:$4 sm:$0xff]   ;;  %v4967_v35 = vld [vmem:[%s6487_s1 + $0x2a4] ss:$16 sps:$4 sm:$0xff]  }
 0x129   : > { %v4970_v36 = vld [vmem:[%s6487_s1 + $0x2ac] ss:$16 sps:$4 sm:$0xff]   ;;  %v4965_v37 = vld [vmem:[%s6487_s1 + $0x2a0] ss:$16 sps:$4 sm:$0xff]   ;;  %v4968_v38 = vld [vmem:[%s6487_s1 + $0x2a8] ss:$16 sps:$4 sm:$0xff]  }
 0x12a   : > { %3480 = vmatpush1.bf16.msra.mxu0 %v4882_v43  ;;  %3738 = vmatpush1.bf16.msra.mxu1 %v4883_v44  ;;  %v4973_v39 = vld [vmem:[%s6487_s1 + $0x2c4] ss:$16 sps:$4 sm:$0xff]   ;;  %v4976_v40 = vld [vmem:[%s6487_s1 + $0x2cc] ss:$16 sps:$4 sm:$0xff]   ;;  %v4971_v41 = vld [vmem:[%s6487_s1 + $0x2c0] ss:$16 sps:$4 sm:$0xff]  }
 0x12b   : > { %3481 = vmatprep.subr.bf16.mxu0 %v4884_v45  ;;  %3739 = vmatprep.subr.bf16.mxu1 %v4886_v46  ;;  %v4974_v42 = vld [vmem:[%s6487_s1 + $0x2c8] ss:$16 sps:$4 sm:$0xff]   ;;  %v5033_v43 = vld [vmem:[%s6485_s6 + $0xc] ss:$48 sps:$4 sm:$0xff]   ;;  %v4979_v44 = vld [vmem:[%s6487_s1 + $0x2e4] ss:$16 sps:$4 sm:$0xff]  }
 0x12c   : > { %v4982_v45 = vld [vmem:[%s6487_s1 + $0x2ec] ss:$16 sps:$4 sm:$0xff]   ;;  %v4977_v46 = vld [vmem:[%s6487_s1 + $0x2e0] ss:$16 sps:$4 sm:$0xff]   ;;  %p4694_p5 = scmp.ne.s32.totalorder %s5548_s18, 2 }
 0x12d   : > { %v5006_v61 = vld [vmem:[%s6487_s1 + $0x36c] ss:$16 sps:$4 sm:$0xff]  }
 0x12e   : > { %3482 = vmatpush1.bf16.msra.mxu0 %v4888_v47  ;;  %3740 = vmatpush1.bf16.msra.mxu1 %v4889_v48  ;;  %v4980_v47 = vld [vmem:[%s6487_s1 + $0x2e8] ss:$16 sps:$4 sm:$0xff]   ;;  %v4985_v48 = vld [vmem:[%s6487_s1 + $0x304] ss:$16 sps:$4 sm:$0xff]  }
 0x12f   : > { %3483 = vmatprep.subr.bf16.mxu0 %v4890_v49  ;;  %3741 = vmatprep.subr.bf16.mxu1 %v4892_v50  ;;  %v4988_v49 = vld [vmem:[%s6487_s1 + $0x30c] ss:$16 sps:$4 sm:$0xff]   ;;  %v4983_v50 = vld [vmem:[%s6487_s1 + $0x300] ss:$16 sps:$4 sm:$0xff]  }
 0x132   : > { %3484 = vmatpush1.bf16.msra.mxu0 %v4894_v51  ;;  %3742 = vmatpush1.bf16.msra.mxu1 %v4895_v52  ;;  %v4986_v51 = vld [vmem:[%s6487_s1 + $0x308] ss:$16 sps:$4 sm:$0xff]   ;;  %v4991_v52 = vld [vmem:[%s6487_s1 + $0x324] ss:$16 sps:$4 sm:$0xff]  }
 0x133   : > { %3485 = vmatprep.subr.bf16.mxu0 %v4896_v53  ;;  %3743 = vmatprep.subr.bf16.mxu1 %v4898_v54  ;;  %v4994_v53 = vld [vmem:[%s6487_s1 + $0x32c] ss:$16 sps:$4 sm:$0xff]   ;;  %v4989_v54 = vld [vmem:[%s6487_s1 + $0x320] ss:$16 sps:$4 sm:$0xff]  }
 0x136   : > { %3486 = vmatpush1.bf16.msra.mxu0 %v4900_v55  ;;  %3744 = vmatpush1.bf16.msra.mxu1 %v4901_v56  ;;  %v4992_v55 = vld [vmem:[%s6487_s1 + $0x328] ss:$16 sps:$4 sm:$0xff]   ;;  %v4997_v56 = vld [vmem:[%s6487_s1 + $0x344] ss:$16 sps:$4 sm:$0xff]  }
 0x137   : > { %3487 = vmatprep.subr.bf16.mxu0 %v4902_v57  ;;  %3745 = vmatprep.subr.bf16.mxu1 %v4904_v58  ;;  %v5000_v57 = vld [vmem:[%s6487_s1 + $0x34c] ss:$16 sps:$4 sm:$0xff]   ;;  %v4995_v58 = vld [vmem:[%s6487_s1 + $0x340] ss:$16 sps:$4 sm:$0xff]  }
 0x13a   : > { %3488 = vmatpush1.bf16.msra.mxu0 %v4906_v59  ;;  %3746 = vmatpush1.bf16.msra.mxu1 %v4907_v60  ;;  %v4998_v59 = vld [vmem:[%s6487_s1 + $0x348] ss:$16 sps:$4 sm:$0xff]   ;;  %v5003_v60 = vld [vmem:[%s6487_s1 + $0x364] ss:$16 sps:$4 sm:$0xff]  }
 0x13b   : > { %3489 = vmatprep.subr.bf16.mxu0 %v4908_v62  ;;  %3747 = vmatprep.subr.bf16.mxu1 %v4910_v63  ;;  %v5001_v62 = vld [vmem:[%s6487_s1 + $0x360] ss:$16 sps:$4 sm:$0xff]   ;;  %v5004_v63 = vld [vmem:[%s6487_s1 + $0x368] ss:$16 sps:$4 sm:$0xff]  }
 0x13e   : > { %3490 = vmatpush1.bf16.msra.mxu0 %v4912_v0  ;;  %3748 = vmatpush1.bf16.msra.mxu1 %v4913_v1  ;;  %v5009_v0 = vld [vmem:[%s6487_s1 + $0x384] ss:$16 sps:$4 sm:$0xff]   ;;  %v5012_v1 = vld [vmem:[%s6487_s1 + $0x38c] ss:$16 sps:$4 sm:$0xff]  }
 0x13f   : > { %3491 = vmatprep.subr.bf16.mxu0 %v4914_v2  ;;  %3749 = vmatprep.subr.bf16.mxu1 %v4916_v3  ;;  %v5007_v2 = vld [vmem:[%s6487_s1 + $0x380] ss:$16 sps:$4 sm:$0xff]   ;;  %v5010_v3 = vld [vmem:[%s6487_s1 + $0x388] ss:$16 sps:$4 sm:$0xff]  }
 0x142   : > { %3492 = vmatpush1.bf16.msra.mxu0 %v4918_v4  ;;  %3750 = vmatpush1.bf16.msra.mxu1 %v4919_v5  ;;  %v5015_v4 = vld [vmem:[%s6487_s1 + $0x3a4] ss:$16 sps:$4 sm:$0xff]   ;;  %v5018_v5 = vld [vmem:[%s6487_s1 + $0x3ac] ss:$16 sps:$4 sm:$0xff]  }
 0x143   : > { %3493 = vmatprep.subr.bf16.mxu0 %v4920_v6  ;;  %3751 = vmatprep.subr.bf16.mxu1 %v4922_v7  ;;  %v5013_v6 = vld [vmem:[%s6487_s1 + $0x3a0] ss:$16 sps:$4 sm:$0xff]   ;;  %v5016_v7 = vld [vmem:[%s6487_s1 + $0x3a8] ss:$16 sps:$4 sm:$0xff]  }
 0x146   : > { %3494 = vmatpush1.bf16.msra.mxu0 %v4924_v8  ;;  %3752 = vmatpush1.bf16.msra.mxu1 %v4925_v9  ;;  %v5021_v8 = vld [vmem:[%s6487_s1 + $0x3c4] ss:$16 sps:$4 sm:$0xff]   ;;  %v5024_v9 = vld [vmem:[%s6487_s1 + $0x3cc] ss:$16 sps:$4 sm:$0xff]  }
 0x147   : > { %3495 = vmatprep.subr.bf16.mxu0 %v4926_v10  ;;  %3753 = vmatprep.subr.bf16.mxu1 %v4928_v11  ;;  %v5019_v10 = vld [vmem:[%s6487_s1 + $0x3c0] ss:$16 sps:$4 sm:$0xff]   ;;  %v5022_v11 = vld [vmem:[%s6487_s1 + $0x3c8] ss:$16 sps:$4 sm:$0xff]  }
 0x14a   : > { %3496 = vmatpush1.bf16.msra.mxu0 %v4930_v12  ;;  %3754 = vmatpush1.bf16.msra.mxu1 %v4931_v13  ;;  %v5027_v12 = vld [vmem:[%s6487_s1 + $0x3e4] ss:$16 sps:$4 sm:$0xff]   ;;  %v5030_v13 = vld [vmem:[%s6487_s1 + $0x3ec] ss:$16 sps:$4 sm:$0xff]  }
 0x14b   : > { %3508 = vmatprep.subr.bf16.mxu0 %v4937_v14  ;;  %3766 = vmatprep.subr.bf16.mxu1 %v4940_v15  ;;  %v5025_v14 = vld [vmem:[%s6487_s1 + $0x3e0] ss:$16 sps:$4 sm:$0xff]   ;;  %v5028_v15 = vld [vmem:[%s6487_s1 + $0x3e8] ss:$16 sps:$4 sm:$0xff]  }
 0x14d   : > { %3498 = vmatmul.mubr.bf16.vlgmr.msra.gmra.mrb[0].mxu0 %v4932_v16  ;;  %3756 = vmatmul.mubr.bf16.vlgmr.msra.gmra.mrb[0].mxu1 %v4932_v16  ;;  %v5036_v16 = vld [vmem:[%s6487_s1 + $0x404] ss:$16 sps:$4 sm:$0xff]  }
 0x14e   : > { %3509 = vmatpush1.bf16.msra.mxu0 %v4935_v17  ;;  %3767 = vmatpush1.bf16.msra.mxu1 %v4938_v18  ;;  %v5039_v17 = vld [vmem:[%s6487_s1 + $0x40c] ss:$16 sps:$4 sm:$0xff]   ;;  %v5031_v18 = vld [vmem:[%s6485_s6 + $0x8] ss:$48 sps:$4 sm:$0xff]  }
 0x14f   : > { %3510 = vmatprep.subr.bf16.mxu0 %v4943_v19  ;;  %3768 = vmatprep.subr.bf16.mxu1 %v4946_v20  ;;  %v5034_v19 = vld [vmem:[%s6487_s1 + $0x400] ss:$16 sps:$4 sm:$0xff]   ;;  %v5037_v20 = vld [vmem:[%s6487_s1 + $0x408] ss:$16 sps:$4 sm:$0xff]  }
 0x150   : > { %3540 = vmatprep.mubr.bf16.mxu0 %v5033_v43  ;;  %3798 = vmatprep.mubr.bf16.mxu1 %v5033_v43  ;;  %v5075_v43 = vld [vmem:[%s6487_s1 + $0x4cc] ss:$16 sps:$4 sm:$0xff]  }
 0x152   : > { %3511 = vmatpush1.bf16.msra.mxu0 %v4941_v21  ;;  %3769 = vmatpush1.bf16.msra.mxu1 %v4944_v22  ;;  %v5042_v21 = vld [vmem:[%s6487_s1 + $0x424] ss:$16 sps:$4 sm:$0xff]   ;;  %v5045_v22 = vld [vmem:[%s6487_s1 + $0x42c] ss:$16 sps:$4 sm:$0xff]  }
 0x153   : > { %3512 = vmatprep.subr.bf16.mxu0 %v4949_v23  ;;  %3770 = vmatprep.subr.bf16.mxu1 %v4952_v24  ;;  %v5040_v23 = vld [vmem:[%s6487_s1 + $0x420] ss:$16 sps:$4 sm:$0xff]   ;;  %v5043_v24 = vld [vmem:[%s6487_s1 + $0x428] ss:$16 sps:$4 sm:$0xff]  }
 0x156   : > { %3513 = vmatpush1.bf16.msra.mxu0 %v4947_v25  ;;  %3771 = vmatpush1.bf16.msra.mxu1 %v4950_v26  ;;  %v5132_v25 = vld [vmem:[%s6485_s6 + $0x14] ss:$48 sps:$4 sm:$0xff]  }
 0x157   : > { %3514 = vmatprep.subr.bf16.mxu0 %v4955_v27  ;;  %3772 = vmatprep.subr.bf16.mxu1 %v4958_v28  ;;  %v5048_v26 = vld [vmem:[%s6487_s1 + $0x444] ss:$16 sps:$4 sm:$0xff]   ;;  %v5051_v27 = vld [vmem:[%s6487_s1 + $0x44c] ss:$16 sps:$4 sm:$0xff]   ;;  %v5046_v28 = vld [vmem:[%s6487_s1 + $0x440] ss:$16 sps:$4 sm:$0xff]  }
 0x15a   : > { %3515 = vmatpush1.bf16.msra.mxu0 %v4953_v29  ;;  %3773 = vmatpush1.bf16.msra.mxu1 %v4956_v30  ;;  %v5049_v29 = vld [vmem:[%s6487_s1 + $0x448] ss:$16 sps:$4 sm:$0xff]   ;;  %v5054_v30 = vld [vmem:[%s6487_s1 + $0x464] ss:$16 sps:$4 sm:$0xff]  }
 0x15b   : > { %3516 = vmatprep.subr.bf16.mxu0 %v4961_v31  ;;  %3774 = vmatprep.subr.bf16.mxu1 %v4964_v32  ;;  %v5057_v31 = vld [vmem:[%s6487_s1 + $0x46c] ss:$16 sps:$4 sm:$0xff]   ;;  %v5052_v32 = vld [vmem:[%s6487_s1 + $0x460] ss:$16 sps:$4 sm:$0xff]  }
 0x15e   : > { %3517 = vmatpush1.bf16.msra.mxu0 %v4959_v33  ;;  %3775 = vmatpush1.bf16.msra.mxu1 %v4962_v34  ;;  %v5055_v33 = vld [vmem:[%s6487_s1 + $0x468] ss:$16 sps:$4 sm:$0xff]   ;;  %v5060_v34 = vld [vmem:[%s6487_s1 + $0x484] ss:$16 sps:$4 sm:$0xff]  }
 0x15f   : > { %3518 = vmatprep.subr.bf16.mxu0 %v4967_v35  ;;  %3776 = vmatprep.subr.bf16.mxu1 %v4970_v36  ;;  %v5063_v35 = vld [vmem:[%s6487_s1 + $0x48c] ss:$16 sps:$4 sm:$0xff]   ;;  %v5058_v36 = vld [vmem:[%s6487_s1 + $0x480] ss:$16 sps:$4 sm:$0xff]  }
 0x162   : > { %3519 = vmatpush1.bf16.msra.mxu0 %v4965_v37  ;;  %3777 = vmatpush1.bf16.msra.mxu1 %v4968_v38  ;;  %v5061_v37 = vld [vmem:[%s6487_s1 + $0x488] ss:$16 sps:$4 sm:$0xff]   ;;  %v5066_v38 = vld [vmem:[%s6487_s1 + $0x4a4] ss:$16 sps:$4 sm:$0xff]  }
 0x163   : > { %3520 = vmatprep.subr.bf16.mxu0 %v4973_v39  ;;  %3778 = vmatprep.subr.bf16.mxu1 %v4976_v40  ;;  %v5069_v39 = vld [vmem:[%s6487_s1 + $0x4ac] ss:$16 sps:$4 sm:$0xff]   ;;  %v5064_v40 = vld [vmem:[%s6487_s1 + $0x4a0] ss:$16 sps:$4 sm:$0xff]  }
 0x166   : > { %3521 = vmatpush1.bf16.msra.mxu0 %v4971_v41  ;;  %3779 = vmatpush1.bf16.msra.mxu1 %v4974_v42  ;;  %v5067_v41 = vld [vmem:[%s6487_s1 + $0x4a8] ss:$16 sps:$4 sm:$0xff]   ;;  %v5072_v42 = vld [vmem:[%s6487_s1 + $0x4c4] ss:$16 sps:$4 sm:$0xff]  }
 0x167   : > { %3522 = vmatprep.subr.bf16.mxu0 %v4979_v44  ;;  %3780 = vmatprep.subr.bf16.mxu1 %v4982_v45  ;;  %v5070_v44 = vld [vmem:[%s6487_s1 + $0x4c0] ss:$16 sps:$4 sm:$0xff]   ;;  %v5073_v45 = vld [vmem:[%s6487_s1 + $0x4c8] ss:$16 sps:$4 sm:$0xff]  }
 0x16a   : > { %3523 = vmatpush1.bf16.msra.mxu0 %v4977_v46  ;;  %3781 = vmatpush1.bf16.msra.mxu1 %v4980_v47  ;;  %v5078_v46 = vld [vmem:[%s6487_s1 + $0x4e4] ss:$16 sps:$4 sm:$0xff]   ;;  %v5081_v47 = vld [vmem:[%s6487_s1 + $0x4ec] ss:$16 sps:$4 sm:$0xff]  }
 0x16b   : > { %3524 = vmatprep.subr.bf16.mxu0 %v4985_v48  ;;  %3782 = vmatprep.subr.bf16.mxu1 %v4988_v49  ;;  %v5076_v48 = vld [vmem:[%s6487_s1 + $0x4e0] ss:$16 sps:$4 sm:$0xff]   ;;  %v5079_v49 = vld [vmem:[%s6487_s1 + $0x4e8] ss:$16 sps:$4 sm:$0xff]  }
 0x16e   : > { %3525 = vmatpush1.bf16.msra.mxu0 %v4983_v50  ;;  %3783 = vmatpush1.bf16.msra.mxu1 %v4986_v51  ;;  %v5084_v50 = vld [vmem:[%s6487_s1 + $0x504] ss:$16 sps:$4 sm:$0xff]   ;;  %v5087_v51 = vld [vmem:[%s6487_s1 + $0x50c] ss:$16 sps:$4 sm:$0xff]  }
 0x16f   : > { %3526 = vmatprep.subr.bf16.mxu0 %v4991_v52  ;;  %3784 = vmatprep.subr.bf16.mxu1 %v4994_v53  ;;  %v5082_v52 = vld [vmem:[%s6487_s1 + $0x500] ss:$16 sps:$4 sm:$0xff]   ;;  %v5085_v53 = vld [vmem:[%s6487_s1 + $0x508] ss:$16 sps:$4 sm:$0xff]  }
 0x172   : > { %3527 = vmatpush1.bf16.msra.mxu0 %v4989_v54  ;;  %3785 = vmatpush1.bf16.msra.mxu1 %v4992_v55  ;;  %v5090_v54 = vld [vmem:[%s6487_s1 + $0x524] ss:$16 sps:$4 sm:$0xff]   ;;  %v5093_v55 = vld [vmem:[%s6487_s1 + $0x52c] ss:$16 sps:$4 sm:$0xff]  }
 0x173   : > { %3528 = vmatprep.subr.bf16.mxu0 %v4997_v56  ;;  %3786 = vmatprep.subr.bf16.mxu1 %v5000_v57  ;;  %v5088_v56 = vld [vmem:[%s6487_s1 + $0x520] ss:$16 sps:$4 sm:$0xff]   ;;  %v5091_v57 = vld [vmem:[%s6487_s1 + $0x528] ss:$16 sps:$4 sm:$0xff]  }
 0x176   : > { %3529 = vmatpush1.bf16.msra.mxu0 %v4995_v58  ;;  %3787 = vmatpush1.bf16.msra.mxu1 %v4998_v59  ;;  %v5096_v58 = vld [vmem:[%s6487_s1 + $0x544] ss:$16 sps:$4 sm:$0xff]   ;;  %v5099_v59 = vld [vmem:[%s6487_s1 + $0x54c] ss:$16 sps:$4 sm:$0xff]  }
 0x177   : > { %3530 = vmatprep.subr.bf16.mxu0 %v5003_v60  ;;  %3788 = vmatprep.subr.bf16.mxu1 %v5006_v61  ;;  %v5094_v60 = vld [vmem:[%s6487_s1 + $0x540] ss:$16 sps:$4 sm:$0xff]   ;;  %v5097_v61 = vld [vmem:[%s6487_s1 + $0x548] ss:$16 sps:$4 sm:$0xff]  }
 0x17a   : > { %3531 = vmatpush1.bf16.msra.mxu0 %v5001_v62  ;;  %3789 = vmatpush1.bf16.msra.mxu1 %v5004_v63  ;;  %v5102_v62 = vld [vmem:[%s6487_s1 + $0x564] ss:$16 sps:$4 sm:$0xff]   ;;  %v5105_v63 = vld [vmem:[%s6487_s1 + $0x56c] ss:$16 sps:$4 sm:$0xff]  }
 0x17b   : > { %3532 = vmatprep.subr.bf16.mxu0 %v5009_v0  ;;  %3790 = vmatprep.subr.bf16.mxu1 %v5012_v1  ;;  %v5100_v0 = vld [vmem:[%s6487_s1 + $0x560] ss:$16 sps:$4 sm:$0xff]   ;;  %v5103_v1 = vld [vmem:[%s6487_s1 + $0x568] ss:$16 sps:$4 sm:$0xff]  }
 0x17e   : > { %3533 = vmatpush1.bf16.msra.mxu0 %v5007_v2  ;;  %3791 = vmatpush1.bf16.msra.mxu1 %v5010_v3  ;;  %v5108_v2 = vld [vmem:[%s6487_s1 + $0x584] ss:$16 sps:$4 sm:$0xff]   ;;  %v5111_v3 = vld [vmem:[%s6487_s1 + $0x58c] ss:$16 sps:$4 sm:$0xff]  }
 0x17f   : > { %3534 = vmatprep.subr.bf16.mxu0 %v5015_v4  ;;  %3792 = vmatprep.subr.bf16.mxu1 %v5018_v5  ;;  %v5106_v4 = vld [vmem:[%s6487_s1 + $0x580] ss:$16 sps:$4 sm:$0xff]   ;;  %v5109_v5 = vld [vmem:[%s6487_s1 + $0x588] ss:$16 sps:$4 sm:$0xff]  }
 0x182   : > { %3535 = vmatpush1.bf16.msra.mxu0 %v5013_v6  ;;  %3793 = vmatpush1.bf16.msra.mxu1 %v5016_v7  ;;  %v5114_v6 = vld [vmem:[%s6487_s1 + $0x5a4] ss:$16 sps:$4 sm:$0xff]   ;;  %v5117_v7 = vld [vmem:[%s6487_s1 + $0x5ac] ss:$16 sps:$4 sm:$0xff]  }
 0x183   : > { %3536 = vmatprep.subr.bf16.mxu0 %v5021_v8  ;;  %3794 = vmatprep.subr.bf16.mxu1 %v5024_v9  ;;  %v5112_v8 = vld [vmem:[%s6487_s1 + $0x5a0] ss:$16 sps:$4 sm:$0xff]   ;;  %v5115_v9 = vld [vmem:[%s6487_s1 + $0x5a8] ss:$16 sps:$4 sm:$0xff]  }
 0x186   : > { %3537 = vmatpush1.bf16.msra.mxu0 %v5019_v10  ;;  %3795 = vmatpush1.bf16.msra.mxu1 %v5022_v11  ;;  %v5120_v10 = vld [vmem:[%s6487_s1 + $0x5c4] ss:$16 sps:$4 sm:$0xff]   ;;  %v5123_v11 = vld [vmem:[%s6487_s1 + $0x5cc] ss:$16 sps:$4 sm:$0xff]  }
 0x187   : > { %3538 = vmatprep.subr.bf16.mxu0 %v5027_v12  ;;  %3796 = vmatprep.subr.bf16.mxu1 %v5030_v13  ;;  %v5118_v12 = vld [vmem:[%s6487_s1 + $0x5c0] ss:$16 sps:$4 sm:$0xff]   ;;  %v5121_v13 = vld [vmem:[%s6487_s1 + $0x5c8] ss:$16 sps:$4 sm:$0xff]  }
 0x18a   : > { %3539 = vmatpush1.bf16.msra.mxu0 %v5025_v14  ;;  %3797 = vmatpush1.bf16.msra.mxu1 %v5028_v15  ;;  %v5126_v14 = vld [vmem:[%s6487_s1 + $0x5e4] ss:$16 sps:$4 sm:$0xff]   ;;  %v5129_v15 = vld [vmem:[%s6487_s1 + $0x5ec] ss:$16 sps:$4 sm:$0xff]  }
 0x18b   : > { %3551 = vmatprep.subr.bf16.mxu0 %v5036_v16  ;;  %3809 = vmatprep.subr.bf16.mxu1 %v5039_v17  ;;  %v5124_v16 = vld [vmem:[%s6487_s1 + $0x5e0] ss:$16 sps:$4 sm:$0xff]   ;;  %v5127_v17 = vld [vmem:[%s6487_s1 + $0x5e8] ss:$16 sps:$4 sm:$0xff]  }
 0x18d   : > { %3541 = vmatmul.mubr.bf16.vlgmr.msra.gmra.mrb[0].mxu0 %v5031_v18  ;;  %3799 = vmatmul.mubr.bf16.vlgmr.msra.gmra.mrb[0].mxu1 %v5031_v18  ;;  %v5135_v18 = vld [vmem:[%s6487_s1 + $0x604] ss:$16 sps:$4 sm:$0xff]  }
 0x18e   : > { %3552 = vmatpush1.bf16.msra.mxu0 %v5034_v19  ;;  %3810 = vmatpush1.bf16.msra.mxu1 %v5037_v20  ;;  %v5138_v19 = vld [vmem:[%s6487_s1 + $0x60c] ss:$16 sps:$4 sm:$0xff]   ;;  %v5130_v20 = vld [vmem:[%s6485_s6 + $0x10] ss:$48 sps:$4 sm:$0xff]  }
 0x18f   : > { %3553 = vmatprep.subr.bf16.mxu0 %v5042_v21  ;;  %3811 = vmatprep.subr.bf16.mxu1 %v5045_v22  ;;  %v5133_v21 = vld [vmem:[%s6487_s1 + $0x600] ss:$16 sps:$4 sm:$0xff]   ;;  %v5136_v22 = vld [vmem:[%s6487_s1 + $0x608] ss:$16 sps:$4 sm:$0xff]  }
 0x190   : > { %3583 = vmatprep.mubr.bf16.mxu0 %v5132_v25  ;;  %3841 = vmatprep.mubr.bf16.mxu1 %v5132_v25  ;;  %v5231_v25 = vld [vmem:[%s6485_s6 + $0x1c] ss:$48 sps:$4 sm:$0xff]  }
 0x192   : > { %3554 = vmatpush1.bf16.msra.mxu0 %v5040_v23  ;;  %3812 = vmatpush1.bf16.msra.mxu1 %v5043_v24  ;;  %v5141_v23 = vld [vmem:[%s6487_s1 + $0x624] ss:$16 sps:$4 sm:$0xff]   ;;  %v5144_v24 = vld [vmem:[%s6487_s1 + $0x62c] ss:$16 sps:$4 sm:$0xff]  }
 0x193   : > { %3555 = vmatprep.subr.bf16.mxu0 %v5048_v26  ;;  %3813 = vmatprep.subr.bf16.mxu1 %v5051_v27  ;;  %v5139_v26 = vld [vmem:[%s6487_s1 + $0x620] ss:$16 sps:$4 sm:$0xff]   ;;  %v5142_v27 = vld [vmem:[%s6487_s1 + $0x628] ss:$16 sps:$4 sm:$0xff]  }
 0x196   : > { %3556 = vmatpush1.bf16.msra.mxu0 %v5046_v28  ;;  %3814 = vmatpush1.bf16.msra.mxu1 %v5049_v29  ;;  %v5147_v28 = vld [vmem:[%s6487_s1 + $0x644] ss:$16 sps:$4 sm:$0xff]   ;;  %v5150_v29 = vld [vmem:[%s6487_s1 + $0x64c] ss:$16 sps:$4 sm:$0xff]  }
 0x197   : > { %3557 = vmatprep.subr.bf16.mxu0 %v5054_v30  ;;  %3815 = vmatprep.subr.bf16.mxu1 %v5057_v31  ;;  %v5145_v30 = vld [vmem:[%s6487_s1 + $0x640] ss:$16 sps:$4 sm:$0xff]   ;;  %v5148_v31 = vld [vmem:[%s6487_s1 + $0x648] ss:$16 sps:$4 sm:$0xff]  }
 0x19a   : > { %3558 = vmatpush1.bf16.msra.mxu0 %v5052_v32  ;;  %3816 = vmatpush1.bf16.msra.mxu1 %v5055_v33  ;;  %v5153_v32 = vld [vmem:[%s6487_s1 + $0x664] ss:$16 sps:$4 sm:$0xff]   ;;  %v5156_v33 = vld [vmem:[%s6487_s1 + $0x66c] ss:$16 sps:$4 sm:$0xff]  }
 0x19b   : > { %3559 = vmatprep.subr.bf16.mxu0 %v5060_v34  ;;  %3817 = vmatprep.subr.bf16.mxu1 %v5063_v35  ;;  %v5151_v34 = vld [vmem:[%s6487_s1 + $0x660] ss:$16 sps:$4 sm:$0xff]   ;;  %v5154_v35 = vld [vmem:[%s6487_s1 + $0x668] ss:$16 sps:$4 sm:$0xff]  }
 0x19e   : > { %3560 = vmatpush1.bf16.msra.mxu0 %v5058_v36  ;;  %3818 = vmatpush1.bf16.msra.mxu1 %v5061_v37  ;;  %v5159_v36 = vld [vmem:[%s6487_s1 + $0x684] ss:$16 sps:$4 sm:$0xff]   ;;  %v5162_v37 = vld [vmem:[%s6487_s1 + $0x68c] ss:$16 sps:$4 sm:$0xff]  }
 0x19f   : > { %3561 = vmatprep.subr.bf16.mxu0 %v5066_v38  ;;  %3819 = vmatprep.subr.bf16.mxu1 %v5069_v39  ;;  %v5157_v38 = vld [vmem:[%s6487_s1 + $0x680] ss:$16 sps:$4 sm:$0xff]   ;;  %v5160_v39 = vld [vmem:[%s6487_s1 + $0x688] ss:$16 sps:$4 sm:$0xff]  }
 0x1a2   : > { %3562 = vmatpush1.bf16.msra.mxu0 %v5064_v40  ;;  %3820 = vmatpush1.bf16.msra.mxu1 %v5067_v41  ;;  %v5165_v40 = vld [vmem:[%s6487_s1 + $0x6a4] ss:$16 sps:$4 sm:$0xff]   ;;  %v5168_v41 = vld [vmem:[%s6487_s1 + $0x6ac] ss:$16 sps:$4 sm:$0xff]  }
 0x1a3   : > { %3563 = vmatprep.subr.bf16.mxu0 %v5072_v42  ;;  %3821 = vmatprep.subr.bf16.mxu1 %v5075_v43  ;;  %v5163_v42 = vld [vmem:[%s6487_s1 + $0x6a0] ss:$16 sps:$4 sm:$0xff]   ;;  %v5166_v43 = vld [vmem:[%s6487_s1 + $0x6a8] ss:$16 sps:$4 sm:$0xff]  }
 0x1a6   : > { %3564 = vmatpush1.bf16.msra.mxu0 %v5070_v44  ;;  %3822 = vmatpush1.bf16.msra.mxu1 %v5073_v45  ;;  %v5171_v44 = vld [vmem:[%s6487_s1 + $0x6c4] ss:$16 sps:$4 sm:$0xff]   ;;  %v5174_v45 = vld [vmem:[%s6487_s1 + $0x6cc] ss:$16 sps:$4 sm:$0xff]  }
 0x1a7   : > { %3565 = vmatprep.subr.bf16.mxu0 %v5078_v46  ;;  %3823 = vmatprep.subr.bf16.mxu1 %v5081_v47  ;;  %v5169_v46 = vld [vmem:[%s6487_s1 + $0x6c0] ss:$16 sps:$4 sm:$0xff]   ;;  %v5172_v47 = vld [vmem:[%s6487_s1 + $0x6c8] ss:$16 sps:$4 sm:$0xff]  }
 0x1aa   : > { %3566 = vmatpush1.bf16.msra.mxu0 %v5076_v48  ;;  %3824 = vmatpush1.bf16.msra.mxu1 %v5079_v49  ;;  %v5177_v48 = vld [vmem:[%s6487_s1 + $0x6e4] ss:$16 sps:$4 sm:$0xff]   ;;  %v5180_v49 = vld [vmem:[%s6487_s1 + $0x6ec] ss:$16 sps:$4 sm:$0xff]  }
 0x1ab   : > { %3567 = vmatprep.subr.bf16.mxu0 %v5084_v50  ;;  %3825 = vmatprep.subr.bf16.mxu1 %v5087_v51  ;;  %v5175_v50 = vld [vmem:[%s6487_s1 + $0x6e0] ss:$16 sps:$4 sm:$0xff]   ;;  %v5178_v51 = vld [vmem:[%s6487_s1 + $0x6e8] ss:$16 sps:$4 sm:$0xff]  }
 0x1ae   : > { %3568 = vmatpush1.bf16.msra.mxu0 %v5082_v52  ;;  %3826 = vmatpush1.bf16.msra.mxu1 %v5085_v53  ;;  %v5183_v52 = vld [vmem:[%s6487_s1 + $0x704] ss:$16 sps:$4 sm:$0xff]   ;;  %v5186_v53 = vld [vmem:[%s6487_s1 + $0x70c] ss:$16 sps:$4 sm:$0xff]  }
 0x1af   : > { %3569 = vmatprep.subr.bf16.mxu0 %v5090_v54  ;;  %3827 = vmatprep.subr.bf16.mxu1 %v5093_v55  ;;  %v5181_v54 = vld [vmem:[%s6487_s1 + $0x700] ss:$16 sps:$4 sm:$0xff]   ;;  %v5184_v55 = vld [vmem:[%s6487_s1 + $0x708] ss:$16 sps:$4 sm:$0xff]  }
 0x1b2   : > { %3570 = vmatpush1.bf16.msra.mxu0 %v5088_v56  ;;  %3828 = vmatpush1.bf16.msra.mxu1 %v5091_v57  ;;  %v5189_v56 = vld [vmem:[%s6487_s1 + $0x724] ss:$16 sps:$4 sm:$0xff]   ;;  %v5192_v57 = vld [vmem:[%s6487_s1 + $0x72c] ss:$16 sps:$4 sm:$0xff]  }
 0x1b3   : > { %3571 = vmatprep.subr.bf16.mxu0 %v5096_v58  ;;  %3829 = vmatprep.subr.bf16.mxu1 %v5099_v59  ;;  %v5187_v58 = vld [vmem:[%s6487_s1 + $0x720] ss:$16 sps:$4 sm:$0xff]   ;;  %v5190_v59 = vld [vmem:[%s6487_s1 + $0x728] ss:$16 sps:$4 sm:$0xff]  }
 0x1b6   : > { %3572 = vmatpush1.bf16.msra.mxu0 %v5094_v60  ;;  %3830 = vmatpush1.bf16.msra.mxu1 %v5097_v61  ;;  %v5195_v60 = vld [vmem:[%s6487_s1 + $0x744] ss:$16 sps:$4 sm:$0xff]   ;;  %v5198_v61 = vld [vmem:[%s6487_s1 + $0x74c] ss:$16 sps:$4 sm:$0xff]  }
 0x1b7   : > { %3573 = vmatprep.subr.bf16.mxu0 %v5102_v62  ;;  %3831 = vmatprep.subr.bf16.mxu1 %v5105_v63  ;;  %v5193_v62 = vld [vmem:[%s6487_s1 + $0x740] ss:$16 sps:$4 sm:$0xff]   ;;  %v5196_v63 = vld [vmem:[%s6487_s1 + $0x748] ss:$16 sps:$4 sm:$0xff]  }
 0x1ba   : > { %3574 = vmatpush1.bf16.msra.mxu0 %v5100_v0  ;;  %3832 = vmatpush1.bf16.msra.mxu1 %v5103_v1  ;;  %v5201_v0 = vld [vmem:[%s6487_s1 + $0x764] ss:$16 sps:$4 sm:$0xff]   ;;  %v5204_v1 = vld [vmem:[%s6487_s1 + $0x76c] ss:$16 sps:$4 sm:$0xff]  }
 0x1bb   : > { %3575 = vmatprep.subr.bf16.mxu0 %v5108_v2  ;;  %3833 = vmatprep.subr.bf16.mxu1 %v5111_v3  ;;  %v5199_v2 = vld [vmem:[%s6487_s1 + $0x760] ss:$16 sps:$4 sm:$0xff]   ;;  %v5202_v3 = vld [vmem:[%s6487_s1 + $0x768] ss:$16 sps:$4 sm:$0xff]  }
 0x1be   : > { %3576 = vmatpush1.bf16.msra.mxu0 %v5106_v4  ;;  %3834 = vmatpush1.bf16.msra.mxu1 %v5109_v5  ;;  %v5207_v4 = vld [vmem:[%s6487_s1 + $0x784] ss:$16 sps:$4 sm:$0xff]   ;;  %v5210_v5 = vld [vmem:[%s6487_s1 + $0x78c] ss:$16 sps:$4 sm:$0xff]  }
 0x1bf   : > { %3577 = vmatprep.subr.bf16.mxu0 %v5114_v6  ;;  %3835 = vmatprep.subr.bf16.mxu1 %v5117_v7  ;;  %v5205_v6 = vld [vmem:[%s6487_s1 + $0x780] ss:$16 sps:$4 sm:$0xff]   ;;  %v5208_v7 = vld [vmem:[%s6487_s1 + $0x788] ss:$16 sps:$4 sm:$0xff]  }
 0x1c2   : > { %3578 = vmatpush1.bf16.msra.mxu0 %v5112_v8  ;;  %3836 = vmatpush1.bf16.msra.mxu1 %v5115_v9  ;;  %v5213_v8 = vld [vmem:[%s6487_s1 + $0x7a4] ss:$16 sps:$4 sm:$0xff]   ;;  %v5216_v9 = vld [vmem:[%s6487_s1 + $0x7ac] ss:$16 sps:$4 sm:$0xff]  }
 0x1c3   : > { %3579 = vmatprep.subr.bf16.mxu0 %v5120_v10  ;;  %3837 = vmatprep.subr.bf16.mxu1 %v5123_v11  ;;  %v5211_v10 = vld [vmem:[%s6487_s1 + $0x7a0] ss:$16 sps:$4 sm:$0xff]   ;;  %v5214_v11 = vld [vmem:[%s6487_s1 + $0x7a8] ss:$16 sps:$4 sm:$0xff]  }
 0x1c6   : > { %3580 = vmatpush1.bf16.msra.mxu0 %v5118_v12  ;;  %3838 = vmatpush1.bf16.msra.mxu1 %v5121_v13  ;;  %v5219_v12 = vld [vmem:[%s6487_s1 + $0x7c4] ss:$16 sps:$4 sm:$0xff]   ;;  %v5222_v13 = vld [vmem:[%s6487_s1 + $0x7cc] ss:$16 sps:$4 sm:$0xff]  }
 0x1c7   : > { %3581 = vmatprep.subr.bf16.mxu0 %v5126_v14  ;;  %3839 = vmatprep.subr.bf16.mxu1 %v5129_v15  ;;  %v5217_v14 = vld [vmem:[%s6487_s1 + $0x7c0] ss:$16 sps:$4 sm:$0xff]   ;;  %v5220_v15 = vld [vmem:[%s6487_s1 + $0x7c8] ss:$16 sps:$4 sm:$0xff]  }
 0x1ca   : > { %3582 = vmatpush1.bf16.msra.mxu0 %v5124_v16  ;;  %3840 = vmatpush1.bf16.msra.mxu1 %v5127_v17  ;;  %v5225_v16 = vld [vmem:[%s6487_s1 + $0x7e4] ss:$16 sps:$4 sm:$0xff]   ;;  %v5228_v17 = vld [vmem:[%s6487_s1 + $0x7ec] ss:$16 sps:$4 sm:$0xff]  }
 0x1cb   : > { %3594 = vmatprep.subr.bf16.mxu0 %v5135_v18  ;;  %3852 = vmatprep.subr.bf16.mxu1 %v5138_v19  ;;  %v5223_v18 = vld [vmem:[%s6487_s1 + $0x7e0] ss:$16 sps:$4 sm:$0xff]   ;;  %v5226_v19 = vld [vmem:[%s6487_s1 + $0x7e8] ss:$16 sps:$4 sm:$0xff]  }
 0x1cd   : > { %3584 = vmatmul.mubr.bf16.vlgmr.msra.gmra.mrb[0].mxu0 %v5130_v20  ;;  %3842 = vmatmul.mubr.bf16.vlgmr.msra.gmra.mrb[0].mxu1 %v5130_v20  ;;  %v5234_v20 = vld [vmem:[%s6487_s1 + $0x804] ss:$16 sps:$4 sm:$0xff]  }
 0x1ce   : > { %3595 = vmatpush1.bf16.msra.mxu0 %v5133_v21  ;;  %3853 = vmatpush1.bf16.msra.mxu1 %v5136_v22  ;;  %v5237_v21 = vld [vmem:[%s6487_s1 + $0x80c] ss:$16 sps:$4 sm:$0xff]   ;;  %v5229_v22 = vld [vmem:[%s6485_s6 + $0x18] ss:$48 sps:$4 sm:$0xff]  }
 0x1cf   : > { %3596 = vmatprep.subr.bf16.mxu0 %v5141_v23  ;;  %3854 = vmatprep.subr.bf16.mxu1 %v5144_v24  ;;  %v5232_v23 = vld [vmem:[%s6487_s1 + $0x800] ss:$16 sps:$4 sm:$0xff]   ;;  %v5235_v24 = vld [vmem:[%s6487_s1 + $0x808] ss:$16 sps:$4 sm:$0xff]  }
 0x1d0   : > { %3626 = vmatprep.mubr.bf16.mxu0 %v5231_v25  ;;  %3884 = vmatprep.mubr.bf16.mxu1 %v5231_v25  ;;  %v5240_v25 = vld [vmem:[%s6487_s1 + $0x824] ss:$16 sps:$4 sm:$0xff]  }
 0x1d2   : > { %3597 = vmatpush1.bf16.msra.mxu0 %v5139_v26  ;;  %3855 = vmatpush1.bf16.msra.mxu1 %v5142_v27  ;;  %v5243_v26 = vld [vmem:[%s6487_s1 + $0x82c] ss:$16 sps:$4 sm:$0xff]   ;;  %v5330_v27 = vld [vmem:[%s6485_s6 + $0x24] ss:$48 sps:$4 sm:$0xff]  }
 0x1d3   : > { %3598 = vmatprep.subr.bf16.mxu0 %v5147_v28  ;;  %3856 = vmatprep.subr.bf16.mxu1 %v5150_v29  ;;  %v5238_v28 = vld [vmem:[%s6487_s1 + $0x820] ss:$16 sps:$4 sm:$0xff]   ;;  %v5241_v29 = vld [vmem:[%s6487_s1 + $0x828] ss:$16 sps:$4 sm:$0xff]  }
 0x1d6   : > { %3599 = vmatpush1.bf16.msra.mxu0 %v5145_v30  ;;  %3857 = vmatpush1.bf16.msra.mxu1 %v5148_v31  ;;  %v5246_v30 = vld [vmem:[%s6487_s1 + $0x844] ss:$16 sps:$4 sm:$0xff]   ;;  %v5249_v31 = vld [vmem:[%s6487_s1 + $0x84c] ss:$16 sps:$4 sm:$0xff]  }
 0x1d7   : > { %3600 = vmatprep.subr.bf16.mxu0 %v5153_v32  ;;  %3858 = vmatprep.subr.bf16.mxu1 %v5156_v33  ;;  %v5244_v32 = vld [vmem:[%s6487_s1 + $0x840] ss:$16 sps:$4 sm:$0xff]   ;;  %v5247_v33 = vld [vmem:[%s6487_s1 + $0x848] ss:$16 sps:$4 sm:$0xff]  }
 0x1da   : > { %3601 = vmatpush1.bf16.msra.mxu0 %v5151_v34  ;;  %3859 = vmatpush1.bf16.msra.mxu1 %v5154_v35  ;;  %v5252_v34 = vld [vmem:[%s6487_s1 + $0x864] ss:$16 sps:$4 sm:$0xff]   ;;  %v5255_v35 = vld [vmem:[%s6487_s1 + $0x86c] ss:$16 sps:$4 sm:$0xff]  }
 0x1db   : > { %3602 = vmatprep.subr.bf16.mxu0 %v5159_v36  ;;  %3860 = vmatprep.subr.bf16.mxu1 %v5162_v37  ;;  %v5250_v36 = vld [vmem:[%s6487_s1 + $0x860] ss:$16 sps:$4 sm:$0xff]   ;;  %v5253_v37 = vld [vmem:[%s6487_s1 + $0x868] ss:$16 sps:$4 sm:$0xff]  }
 0x1de   : > { %3603 = vmatpush1.bf16.msra.mxu0 %v5157_v38  ;;  %3861 = vmatpush1.bf16.msra.mxu1 %v5160_v39  ;;  %v5258_v38 = vld [vmem:[%s6487_s1 + $0x884] ss:$16 sps:$4 sm:$0xff]   ;;  %v5261_v39 = vld [vmem:[%s6487_s1 + $0x88c] ss:$16 sps:$4 sm:$0xff]  }
 0x1df   : > { %3604 = vmatprep.subr.bf16.mxu0 %v5165_v40  ;;  %3862 = vmatprep.subr.bf16.mxu1 %v5168_v41  ;;  %v5256_v40 = vld [vmem:[%s6487_s1 + $0x880] ss:$16 sps:$4 sm:$0xff]   ;;  %v5259_v41 = vld [vmem:[%s6487_s1 + $0x888] ss:$16 sps:$4 sm:$0xff]  }
 0x1e2   : > { %3605 = vmatpush1.bf16.msra.mxu0 %v5163_v42  ;;  %3863 = vmatpush1.bf16.msra.mxu1 %v5166_v43  ;;  %v5264_v42 = vld [vmem:[%s6487_s1 + $0x8a4] ss:$16 sps:$4 sm:$0xff]   ;;  %v5267_v43 = vld [vmem:[%s6487_s1 + $0x8ac] ss:$16 sps:$4 sm:$0xff]  }
 0x1e3   : > { %3606 = vmatprep.subr.bf16.mxu0 %v5171_v44  ;;  %3864 = vmatprep.subr.bf16.mxu1 %v5174_v45  ;;  %v5262_v44 = vld [vmem:[%s6487_s1 + $0x8a0] ss:$16 sps:$4 sm:$0xff]   ;;  %v5265_v45 = vld [vmem:[%s6487_s1 + $0x8a8] ss:$16 sps:$4 sm:$0xff]  }
 0x1e6   : > { %3607 = vmatpush1.bf16.msra.mxu0 %v5169_v46  ;;  %3865 = vmatpush1.bf16.msra.mxu1 %v5172_v47  ;;  %v5270_v46 = vld [vmem:[%s6487_s1 + $0x8c4] ss:$16 sps:$4 sm:$0xff]   ;;  %v5273_v47 = vld [vmem:[%s6487_s1 + $0x8cc] ss:$16 sps:$4 sm:$0xff]  }
 0x1e7   : > { %3608 = vmatprep.subr.bf16.mxu0 %v5177_v48  ;;  %3866 = vmatprep.subr.bf16.mxu1 %v5180_v49  ;;  %v5268_v48 = vld [vmem:[%s6487_s1 + $0x8c0] ss:$16 sps:$4 sm:$0xff]   ;;  %v5271_v49 = vld [vmem:[%s6487_s1 + $0x8c8] ss:$16 sps:$4 sm:$0xff]  }
 0x1ea   : > { %3609 = vmatpush1.bf16.msra.mxu0 %v5175_v50  ;;  %3867 = vmatpush1.bf16.msra.mxu1 %v5178_v51  ;;  %v5276_v50 = vld [vmem:[%s6487_s1 + $0x8e4] ss:$16 sps:$4 sm:$0xff]   ;;  %v5279_v51 = vld [vmem:[%s6487_s1 + $0x8ec] ss:$16 sps:$4 sm:$0xff]  }
 0x1eb   : > { %3610 = vmatprep.subr.bf16.mxu0 %v5183_v52  ;;  %3868 = vmatprep.subr.bf16.mxu1 %v5186_v53  ;;  %v5274_v52 = vld [vmem:[%s6487_s1 + $0x8e0] ss:$16 sps:$4 sm:$0xff]   ;;  %v5277_v53 = vld [vmem:[%s6487_s1 + $0x8e8] ss:$16 sps:$4 sm:$0xff]  }
 0x1ee   : > { %3611 = vmatpush1.bf16.msra.mxu0 %v5181_v54  ;;  %3869 = vmatpush1.bf16.msra.mxu1 %v5184_v55  ;;  %v5282_v54 = vld [vmem:[%s6487_s1 + $0x904] ss:$16 sps:$4 sm:$0xff]   ;;  %v5285_v55 = vld [vmem:[%s6487_s1 + $0x90c] ss:$16 sps:$4 sm:$0xff]  }
 0x1ef   : > { %3612 = vmatprep.subr.bf16.mxu0 %v5189_v56  ;;  %3870 = vmatprep.subr.bf16.mxu1 %v5192_v57  ;;  %v5280_v56 = vld [vmem:[%s6487_s1 + $0x900] ss:$16 sps:$4 sm:$0xff]   ;;  %v5283_v57 = vld [vmem:[%s6487_s1 + $0x908] ss:$16 sps:$4 sm:$0xff]  }
 0x1f2   : > { %3613 = vmatpush1.bf16.msra.mxu0 %v5187_v58  ;;  %3871 = vmatpush1.bf16.msra.mxu1 %v5190_v59  ;;  %v5288_v58 = vld [vmem:[%s6487_s1 + $0x924] ss:$16 sps:$4 sm:$0xff]   ;;  %v5291_v59 = vld [vmem:[%s6487_s1 + $0x92c] ss:$16 sps:$4 sm:$0xff]  }
 0x1f3   : > { %3614 = vmatprep.subr.bf16.mxu0 %v5195_v60  ;;  %3872 = vmatprep.subr.bf16.mxu1 %v5198_v61  ;;  %v5286_v60 = vld [vmem:[%s6487_s1 + $0x920] ss:$16 sps:$4 sm:$0xff]   ;;  %v5289_v61 = vld [vmem:[%s6487_s1 + $0x928] ss:$16 sps:$4 sm:$0xff]  }
 0x1f6   : > { %3615 = vmatpush1.bf16.msra.mxu0 %v5193_v62  ;;  %3873 = vmatpush1.bf16.msra.mxu1 %v5196_v63  ;;  %v5294_v62 = vld [vmem:[%s6487_s1 + $0x944] ss:$16 sps:$4 sm:$0xff]   ;;  %v5297_v63 = vld [vmem:[%s6487_s1 + $0x94c] ss:$16 sps:$4 sm:$0xff]  }
 0x1f7   : > { %3616 = vmatprep.subr.bf16.mxu0 %v5201_v0  ;;  %3874 = vmatprep.subr.bf16.mxu1 %v5204_v1  ;;  %v5292_v0 = vld [vmem:[%s6487_s1 + $0x940] ss:$16 sps:$4 sm:$0xff]   ;;  %v5295_v1 = vld [vmem:[%s6487_s1 + $0x948] ss:$16 sps:$4 sm:$0xff]  }
 0x1fa   : > { %3617 = vmatpush1.bf16.msra.mxu0 %v5199_v2  ;;  %3875 = vmatpush1.bf16.msra.mxu1 %v5202_v3  ;;  %v5300_v2 = vld [vmem:[%s6487_s1 + $0x964] ss:$16 sps:$4 sm:$0xff]   ;;  %v5303_v3 = vld [vmem:[%s6487_s1 + $0x96c] ss:$16 sps:$4 sm:$0xff]  }
 0x1fb   : > { %3618 = vmatprep.subr.bf16.mxu0 %v5207_v4  ;;  %3876 = vmatprep.subr.bf16.mxu1 %v5210_v5  ;;  %v5298_v4 = vld [vmem:[%s6487_s1 + $0x960] ss:$16 sps:$4 sm:$0xff]   ;;  %v5301_v5 = vld [vmem:[%s6487_s1 + $0x968] ss:$16 sps:$4 sm:$0xff]  }
 0x1fe   : > { %3619 = vmatpush1.bf16.msra.mxu0 %v5205_v6  ;;  %3877 = vmatpush1.bf16.msra.mxu1 %v5208_v7  ;;  %v5306_v6 = vld [vmem:[%s6487_s1 + $0x984] ss:$16 sps:$4 sm:$0xff]   ;;  %v5309_v7 = vld [vmem:[%s6487_s1 + $0x98c] ss:$16 sps:$4 sm:$0xff]  }
 0x1ff   : > { %3620 = vmatprep.subr.bf16.mxu0 %v5213_v8  ;;  %3878 = vmatprep.subr.bf16.mxu1 %v5216_v9  ;;  %v5304_v8 = vld [vmem:[%s6487_s1 + $0x980] ss:$16 sps:$4 sm:$0xff]   ;;  %v5307_v9 = vld [vmem:[%s6487_s1 + $0x988] ss:$16 sps:$4 sm:$0xff]  }
 0x202   : > { %3621 = vmatpush1.bf16.msra.mxu0 %v5211_v10  ;;  %3879 = vmatpush1.bf16.msra.mxu1 %v5214_v11  ;;  %v5312_v10 = vld [vmem:[%s6487_s1 + $0x9a4] ss:$16 sps:$4 sm:$0xff]   ;;  %v5315_v11 = vld [vmem:[%s6487_s1 + $0x9ac] ss:$16 sps:$4 sm:$0xff]  }
 0x203   : > { %3622 = vmatprep.subr.bf16.mxu0 %v5219_v12  ;;  %3880 = vmatprep.subr.bf16.mxu1 %v5222_v13  ;;  %v5310_v12 = vld [vmem:[%s6487_s1 + $0x9a0] ss:$16 sps:$4 sm:$0xff]   ;;  %v5313_v13 = vld [vmem:[%s6487_s1 + $0x9a8] ss:$16 sps:$4 sm:$0xff]  }
 0x206   : > { %3623 = vmatpush1.bf16.msra.mxu0 %v5217_v14  ;;  %3881 = vmatpush1.bf16.msra.mxu1 %v5220_v15  ;;  %v5318_v14 = vld [vmem:[%s6487_s1 + $0x9c4] ss:$16 sps:$4 sm:$0xff]   ;;  %v5321_v15 = vld [vmem:[%s6487_s1 + $0x9cc] ss:$16 sps:$4 sm:$0xff]  }
 0x207   : > { %3624 = vmatprep.subr.bf16.mxu0 %v5225_v16  ;;  %3882 = vmatprep.subr.bf16.mxu1 %v5228_v17  ;;  %v5316_v16 = vld [vmem:[%s6487_s1 + $0x9c0] ss:$16 sps:$4 sm:$0xff]   ;;  %v5319_v17 = vld [vmem:[%s6487_s1 + $0x9c8] ss:$16 sps:$4 sm:$0xff]  }
 0x20a   : > { %3625 = vmatpush1.bf16.msra.mxu0 %v5223_v18  ;;  %3883 = vmatpush1.bf16.msra.mxu1 %v5226_v19  ;;  %v5324_v18 = vld [vmem:[%s6487_s1 + $0x9e4] ss:$16 sps:$4 sm:$0xff]   ;;  %v5327_v19 = vld [vmem:[%s6487_s1 + $0x9ec] ss:$16 sps:$4 sm:$0xff]  }
 0x20b   : > { %3637 = vmatprep.subr.bf16.mxu0 %v5234_v20  ;;  %3895 = vmatprep.subr.bf16.mxu1 %v5237_v21  ;;  %v5322_v20 = vld [vmem:[%s6487_s1 + $0x9e0] ss:$16 sps:$4 sm:$0xff]   ;;  %v5325_v21 = vld [vmem:[%s6487_s1 + $0x9e8] ss:$16 sps:$4 sm:$0xff]  }
 0x20d   : > { %3627 = vmatmul.mubr.bf16.vlgmr.msra.gmra.mrb[0].mxu0 %v5229_v22  ;;  %3885 = vmatmul.mubr.bf16.vlgmr.msra.gmra.mrb[0].mxu1 %v5229_v22  ;;  %v5333_v22 = vld [vmem:[%s6487_s1 + $0xa04] ss:$16 sps:$4 sm:$0xff]  }
 0x20e   : > { %3638 = vmatpush1.bf16.msra.mxu0 %v5232_v23  ;;  %3896 = vmatpush1.bf16.msra.mxu1 %v5235_v24  ;;  %v5336_v23 = vld [vmem:[%s6487_s1 + $0xa0c] ss:$16 sps:$4 sm:$0xff]   ;;  %v5328_v24 = vld [vmem:[%s6485_s6 + $0x20] ss:$48 sps:$4 sm:$0xff]  }
 0x20f   : > { %3639 = vmatprep.subr.bf16.mxu0 %v5240_v25  ;;  %3897 = vmatprep.subr.bf16.mxu1 %v5243_v26  ;;  %v5331_v25 = vld [vmem:[%s6487_s1 + $0xa00] ss:$16 sps:$4 sm:$0xff]   ;;  %v5334_v26 = vld [vmem:[%s6487_s1 + $0xa08] ss:$16 sps:$4 sm:$0xff]  }
 0x210   : > { %3669 = vmatprep.mubr.bf16.mxu0 %v5330_v27  ;;  %3927 = vmatprep.mubr.bf16.mxu1 %v5330_v27  ;;  %v5339_v27 = vld [vmem:[%s6487_s1 + $0xa24] ss:$16 sps:$4 sm:$0xff]  }
 0x212   : > { %3640 = vmatpush1.bf16.msra.mxu0 %v5238_v28  ;;  %3898 = vmatpush1.bf16.msra.mxu1 %v5241_v29  ;;  %v5342_v28 = vld [vmem:[%s6487_s1 + $0xa2c] ss:$16 sps:$4 sm:$0xff]  }
 0x213   : > { %3641 = vmatprep.subr.bf16.mxu0 %v5246_v30  ;;  %3899 = vmatprep.subr.bf16.mxu1 %v5249_v31  ;;  %v5429_v29 = vld [vmem:[%s6485_s6 + $0x2c] ss:$48 sps:$4 sm:$0xff]   ;;  %v5337_v30 = vld [vmem:[%s6487_s1 + $0xa20] ss:$16 sps:$4 sm:$0xff]   ;;  %v5340_v31 = vld [vmem:[%s6487_s1 + $0xa28] ss:$16 sps:$4 sm:$0xff]  }
 0x216   : > { %3642 = vmatpush1.bf16.msra.mxu0 %v5244_v32  ;;  %3900 = vmatpush1.bf16.msra.mxu1 %v5247_v33  ;;  %v5345_v32 = vld [vmem:[%s6487_s1 + $0xa44] ss:$16 sps:$4 sm:$0xff]   ;;  %v5348_v33 = vld [vmem:[%s6487_s1 + $0xa4c] ss:$16 sps:$4 sm:$0xff]  }
 0x217   : > { %3643 = vmatprep.subr.bf16.mxu0 %v5252_v34  ;;  %3901 = vmatprep.subr.bf16.mxu1 %v5255_v35  ;;  %v5343_v34 = vld [vmem:[%s6487_s1 + $0xa40] ss:$16 sps:$4 sm:$0xff]   ;;  %v5346_v35 = vld [vmem:[%s6487_s1 + $0xa48] ss:$16 sps:$4 sm:$0xff]  }
 0x21a   : > { %3644 = vmatpush1.bf16.msra.mxu0 %v5250_v36  ;;  %3902 = vmatpush1.bf16.msra.mxu1 %v5253_v37  ;;  %v5351_v36 = vld [vmem:[%s6487_s1 + $0xa64] ss:$16 sps:$4 sm:$0xff]   ;;  %v5354_v37 = vld [vmem:[%s6487_s1 + $0xa6c] ss:$16 sps:$4 sm:$0xff]  }
 0x21b   : > { %3645 = vmatprep.subr.bf16.mxu0 %v5258_v38  ;;  %3903 = vmatprep.subr.bf16.mxu1 %v5261_v39  ;;  %v5349_v38 = vld [vmem:[%s6487_s1 + $0xa60] ss:$16 sps:$4 sm:$0xff]   ;;  %v5352_v39 = vld [vmem:[%s6487_s1 + $0xa68] ss:$16 sps:$4 sm:$0xff]  }
 0x21e   : > { %3646 = vmatpush1.bf16.msra.mxu0 %v5256_v40  ;;  %3904 = vmatpush1.bf16.msra.mxu1 %v5259_v41  ;;  %v5357_v40 = vld [vmem:[%s6487_s1 + $0xa84] ss:$16 sps:$4 sm:$0xff]   ;;  %v5360_v41 = vld [vmem:[%s6487_s1 + $0xa8c] ss:$16 sps:$4 sm:$0xff]  }
 0x21f   : > { %3647 = vmatprep.subr.bf16.mxu0 %v5264_v42  ;;  %3905 = vmatprep.subr.bf16.mxu1 %v5267_v43  ;;  %v5355_v42 = vld [vmem:[%s6487_s1 + $0xa80] ss:$16 sps:$4 sm:$0xff]   ;;  %v5358_v43 = vld [vmem:[%s6487_s1 + $0xa88] ss:$16 sps:$4 sm:$0xff]  }
 0x222   : > { %3648 = vmatpush1.bf16.msra.mxu0 %v5262_v44  ;;  %3906 = vmatpush1.bf16.msra.mxu1 %v5265_v45  ;;  %v5363_v44 = vld [vmem:[%s6487_s1 + $0xaa4] ss:$16 sps:$4 sm:$0xff]   ;;  %v5366_v45 = vld [vmem:[%s6487_s1 + $0xaac] ss:$16 sps:$4 sm:$0xff]  }
 0x223   : > { %3649 = vmatprep.subr.bf16.mxu0 %v5270_v46  ;;  %3907 = vmatprep.subr.bf16.mxu1 %v5273_v47  ;;  %v5361_v46 = vld [vmem:[%s6487_s1 + $0xaa0] ss:$16 sps:$4 sm:$0xff]   ;;  %v5364_v47 = vld [vmem:[%s6487_s1 + $0xaa8] ss:$16 sps:$4 sm:$0xff]  }
 0x226   : > { %3650 = vmatpush1.bf16.msra.mxu0 %v5268_v48  ;;  %3908 = vmatpush1.bf16.msra.mxu1 %v5271_v49  ;;  %v5369_v48 = vld [vmem:[%s6487_s1 + $0xac4] ss:$16 sps:$4 sm:$0xff]   ;;  %v5372_v49 = vld [vmem:[%s6487_s1 + $0xacc] ss:$16 sps:$4 sm:$0xff]  }
 0x227   : > { %3651 = vmatprep.subr.bf16.mxu0 %v5276_v50  ;;  %3909 = vmatprep.subr.bf16.mxu1 %v5279_v51  ;;  %v5367_v50 = vld [vmem:[%s6487_s1 + $0xac0] ss:$16 sps:$4 sm:$0xff]   ;;  %v5370_v51 = vld [vmem:[%s6487_s1 + $0xac8] ss:$16 sps:$4 sm:$0xff]  }
 0x22a   : > { %3652 = vmatpush1.bf16.msra.mxu0 %v5274_v52  ;;  %3910 = vmatpush1.bf16.msra.mxu1 %v5277_v53  ;;  %v5375_v52 = vld [vmem:[%s6487_s1 + $0xae4] ss:$16 sps:$4 sm:$0xff]   ;;  %v5378_v53 = vld [vmem:[%s6487_s1 + $0xaec] ss:$16 sps:$4 sm:$0xff]  }
 0x22b   : > { %3653 = vmatprep.subr.bf16.mxu0 %v5282_v54  ;;  %3911 = vmatprep.subr.bf16.mxu1 %v5285_v55  ;;  %v5373_v54 = vld [vmem:[%s6487_s1 + $0xae0] ss:$16 sps:$4 sm:$0xff]   ;;  %v5376_v55 = vld [vmem:[%s6487_s1 + $0xae8] ss:$16 sps:$4 sm:$0xff]  }
 0x22e   : > { %3654 = vmatpush1.bf16.msra.mxu0 %v5280_v56  ;;  %3912 = vmatpush1.bf16.msra.mxu1 %v5283_v57  ;;  %v5381_v56 = vld [vmem:[%s6487_s1 + $0xb04] ss:$16 sps:$4 sm:$0xff]   ;;  %v5384_v57 = vld [vmem:[%s6487_s1 + $0xb0c] ss:$16 sps:$4 sm:$0xff]  }
 0x22f   : > { %3655 = vmatprep.subr.bf16.mxu0 %v5288_v58  ;;  %3913 = vmatprep.subr.bf16.mxu1 %v5291_v59  ;;  %v5379_v58 = vld [vmem:[%s6487_s1 + $0xb00] ss:$16 sps:$4 sm:$0xff]   ;;  %v5382_v59 = vld [vmem:[%s6487_s1 + $0xb08] ss:$16 sps:$4 sm:$0xff]  }
 0x232   : > { %3656 = vmatpush1.bf16.msra.mxu0 %v5286_v60  ;;  %3914 = vmatpush1.bf16.msra.mxu1 %v5289_v61  ;;  %v5387_v60 = vld [vmem:[%s6487_s1 + $0xb24] ss:$16 sps:$4 sm:$0xff]   ;;  %v5390_v61 = vld [vmem:[%s6487_s1 + $0xb2c] ss:$16 sps:$4 sm:$0xff]  }
 0x233   : > { %3657 = vmatprep.subr.bf16.mxu0 %v5294_v62  ;;  %3915 = vmatprep.subr.bf16.mxu1 %v5297_v63  ;;  %v5385_v62 = vld [vmem:[%s6487_s1 + $0xb20] ss:$16 sps:$4 sm:$0xff]   ;;  %v5388_v63 = vld [vmem:[%s6487_s1 + $0xb28] ss:$16 sps:$4 sm:$0xff]  }
 0x236   : > { %3658 = vmatpush1.bf16.msra.mxu0 %v5292_v0  ;;  %3916 = vmatpush1.bf16.msra.mxu1 %v5295_v1  ;;  %v5393_v0 = vld [vmem:[%s6487_s1 + $0xb44] ss:$16 sps:$4 sm:$0xff]   ;;  %v5396_v1 = vld [vmem:[%s6487_s1 + $0xb4c] ss:$16 sps:$4 sm:$0xff]  }
 0x237   : > { %3659 = vmatprep.subr.bf16.mxu0 %v5300_v2  ;;  %3917 = vmatprep.subr.bf16.mxu1 %v5303_v3  ;;  %v5391_v2 = vld [vmem:[%s6487_s1 + $0xb40] ss:$16 sps:$4 sm:$0xff]   ;;  %v5394_v3 = vld [vmem:[%s6487_s1 + $0xb48] ss:$16 sps:$4 sm:$0xff]  }
 0x23a   : > { %3660 = vmatpush1.bf16.msra.mxu0 %v5298_v4  ;;  %3918 = vmatpush1.bf16.msra.mxu1 %v5301_v5  ;;  %v5399_v4 = vld [vmem:[%s6487_s1 + $0xb64] ss:$16 sps:$4 sm:$0xff]   ;;  %v5402_v5 = vld [vmem:[%s6487_s1 + $0xb6c] ss:$16 sps:$4 sm:$0xff]  }
 0x23b   : > { %3661 = vmatprep.subr.bf16.mxu0 %v5306_v6  ;;  %3919 = vmatprep.subr.bf16.mxu1 %v5309_v7  ;;  %v5397_v6 = vld [vmem:[%s6487_s1 + $0xb60] ss:$16 sps:$4 sm:$0xff]   ;;  %v5400_v7 = vld [vmem:[%s6487_s1 + $0xb68] ss:$16 sps:$4 sm:$0xff]  }
 0x23e   : > { %3662 = vmatpush1.bf16.msra.mxu0 %v5304_v8  ;;  %3920 = vmatpush1.bf16.msra.mxu1 %v5307_v9  ;;  %v5405_v8 = vld [vmem:[%s6487_s1 + $0xb84] ss:$16 sps:$4 sm:$0xff]   ;;  %v5408_v9 = vld [vmem:[%s6487_s1 + $0xb8c] ss:$16 sps:$4 sm:$0xff]  }
 0x23f   : > { %3663 = vmatprep.subr.bf16.mxu0 %v5312_v10  ;;  %3921 = vmatprep.subr.bf16.mxu1 %v5315_v11  ;;  %v5403_v10 = vld [vmem:[%s6487_s1 + $0xb80] ss:$16 sps:$4 sm:$0xff]   ;;  %v5406_v11 = vld [vmem:[%s6487_s1 + $0xb88] ss:$16 sps:$4 sm:$0xff]  }
 0x242   : > { %3664 = vmatpush1.bf16.msra.mxu0 %v5310_v12  ;;  %3922 = vmatpush1.bf16.msra.mxu1 %v5313_v13  ;;  %v5411_v12 = vld [vmem:[%s6487_s1 + $0xba4] ss:$16 sps:$4 sm:$0xff]   ;;  %v5414_v13 = vld [vmem:[%s6487_s1 + $0xbac] ss:$16 sps:$4 sm:$0xff]  }
 0x243   : > { %3665 = vmatprep.subr.bf16.mxu0 %v5318_v14  ;;  %3923 = vmatprep.subr.bf16.mxu1 %v5321_v15  ;;  %v5409_v14 = vld [vmem:[%s6487_s1 + $0xba0] ss:$16 sps:$4 sm:$0xff]   ;;  %v5412_v15 = vld [vmem:[%s6487_s1 + $0xba8] ss:$16 sps:$4 sm:$0xff]  }
 0x246   : > { %3666 = vmatpush1.bf16.msra.mxu0 %v5316_v16  ;;  %3924 = vmatpush1.bf16.msra.mxu1 %v5319_v17  ;;  %v5417_v16 = vld [vmem:[%s6487_s1 + $0xbc4] ss:$16 sps:$4 sm:$0xff]   ;;  %v5420_v17 = vld [vmem:[%s6487_s1 + $0xbcc] ss:$16 sps:$4 sm:$0xff]  }
 0x247   : > { %3667 = vmatprep.subr.bf16.mxu0 %v5324_v18  ;;  %3925 = vmatprep.subr.bf16.mxu1 %v5327_v19  ;;  %v5415_v18 = vld [vmem:[%s6487_s1 + $0xbc0] ss:$16 sps:$4 sm:$0xff]   ;;  %v5418_v19 = vld [vmem:[%s6487_s1 + $0xbc8] ss:$16 sps:$4 sm:$0xff]  }
 0x24a   : > { %3668 = vmatpush1.bf16.msra.mxu0 %v5322_v20  ;;  %3926 = vmatpush1.bf16.msra.mxu1 %v5325_v21  ;;  %v5423_v20 = vld [vmem:[%s6487_s1 + $0xbe4] ss:$16 sps:$4 sm:$0xff]   ;;  %v5426_v21 = vld [vmem:[%s6487_s1 + $0xbec] ss:$16 sps:$4 sm:$0xff]  }
 0x24b   : > { %3680 = vmatprep.subr.bf16.mxu0 %v5333_v22  ;;  %3938 = vmatprep.subr.bf16.mxu1 %v5336_v23  ;;  %v5421_v22 = vld [vmem:[%s6487_s1 + $0xbe0] ss:$16 sps:$4 sm:$0xff]   ;;  %v5424_v23 = vld [vmem:[%s6487_s1 + $0xbe8] ss:$16 sps:$4 sm:$0xff]  }
 0x24d   : > { %3670 = vmatmul.mubr.bf16.vlgmr.msra.gmra.mrb[0].mxu0 %v5328_v24  ;;  %3928 = vmatmul.mubr.bf16.vlgmr.msra.gmra.mrb[0].mxu1 %v5328_v24  ;;  %v5427_v24 = vld [vmem:[%s6485_s6 + $0x28] ss:$48 sps:$4 sm:$0xff]  }
 0x24e   : > { %3681 = vmatpush1.bf16.msra.mxu0 %v5331_v25  ;;  %3939 = vmatpush1.bf16.msra.mxu1 %v5334_v26  ;;  %v1081_v25 = vld [vmem:[#allocation2] sm:$0xff]  ;;  %v1083_v26 = vld [vmem:[#allocation2 + $0x10] sm:$0xff] }
 0x24f   : > { %3682 = vmatprep.subr.bf16.mxu0 %v5339_v27  ;;  %3940 = vmatprep.subr.bf16.mxu1 %v5342_v28  ;;  %v1082_v27 = vld [vmem:[#allocation2 + $0x8] sm:$0xff]  ;;  %v1084_v28 = vld [vmem:[#allocation2 + $0x18] sm:$0xff] }
 0x250   : > { %3712 = vmatprep.mubr.bf16.mxu0 %v5429_v29  ;;  %3970 = vmatprep.mubr.bf16.mxu1 %v5429_v29 }
 0x252   : > { %3683 = vmatpush1.bf16.msra.mxu0 %v5337_v30  ;;  %3941 = vmatpush1.bf16.msra.mxu1 %v5340_v31  ;;  %v1085_v31 = vld [vmem:[#allocation2 + $0x20] sm:$0xff] }
 0x253   : > { %3684 = vmatprep.subr.bf16.mxu0 %v5345_v32  ;;  %3942 = vmatprep.subr.bf16.mxu1 %v5348_v33  ;;  %v1087_v32 = vld [vmem:[#allocation2 + $0x30] sm:$0xff] }
 0x256   : > { %3685 = vmatpush1.bf16.msra.mxu0 %v5343_v34  ;;  %3943 = vmatpush1.bf16.msra.mxu1 %v5346_v35 }
 0x257   : > { %3686 = vmatprep.subr.bf16.mxu0 %v5351_v36  ;;  %3944 = vmatprep.subr.bf16.mxu1 %v5354_v37  ;;  %v1086_v37 = vld [vmem:[#allocation2 + $0x28] sm:$0xff] }
 0x25a   : > { %3687 = vmatpush1.bf16.msra.mxu0 %v5349_v38  ;;  %3945 = vmatpush1.bf16.msra.mxu1 %v5352_v39  ;;  %v1088_v38 = vld [vmem:[#allocation2 + $0x38] sm:$0xff] }
 0x25b   : > { %3688 = vmatprep.subr.bf16.mxu0 %v5357_v40  ;;  %3946 = vmatprep.subr.bf16.mxu1 %v5360_v41 }
 0x25e   : > { %3689 = vmatpush1.bf16.msra.mxu0 %v5355_v42  ;;  %3947 = vmatpush1.bf16.msra.mxu1 %v5358_v43 }
 0x25f   : > { %3690 = vmatprep.subr.bf16.mxu0 %v5363_v44  ;;  %3948 = vmatprep.subr.bf16.mxu1 %v5366_v45 }
 0x262   : > { %3691 = vmatpush1.bf16.msra.mxu0 %v5361_v46  ;;  %3949 = vmatpush1.bf16.msra.mxu1 %v5364_v47 }
 0x263   : > { %3692 = vmatprep.subr.bf16.mxu0 %v5369_v48  ;;  %3950 = vmatprep.subr.bf16.mxu1 %v5372_v49  ;;  %v4011_v49 = vlaneseq (!%p4694_p5) }
 0x266   : > { %3693 = vmatpush1.bf16.msra.mxu0 %v5367_v50  ;;  %3951 = vmatpush1.bf16.msra.mxu1 %v5370_v51  ;;  %v4012_v50 = vshrl.u32 (!%p4694_p5), %v4011_v49, 7  ;;  %v4009_v51 = vld [vmem:[%s1065_s5] sm:$0xf] (!%p4694_p5) }
 0x267   : > { %3694 = vmatprep.subr.bf16.mxu0 %v5375_v52  ;;  %3952 = vmatprep.subr.bf16.mxu1 %v5378_v53 }
 0x268   : > { %v4013_v53 = vsub.s32 (!%p4694_p5), 0, %v4012_v50 }
 0x26a   : > { %3695 = vmatpush1.bf16.msra.mxu0 %v5373_v54  ;;  %3953 = vmatpush1.bf16.msra.mxu1 %v5376_v55  ;;  %v4017_v54 = vsub.s32 (!%p4694_p5), 1, %v4012_v50  ;;  %v4021_v55 = vsub.s32 (!%p4694_p5), 2, %v4012_v50 }
 0x26b   : > { %3696 = vmatprep.subr.bf16.mxu0 %v5381_v56  ;;  %3954 = vmatprep.subr.bf16.mxu1 %v5384_v57  ;;  %v4025_v56 = vsub.s32 (!%p4694_p5), 3, %v4012_v50 }
 0x26e   : > { %3697 = vmatpush1.bf16.msra.mxu0 %v5379_v58  ;;  %3955 = vmatpush1.bf16.msra.mxu1 %v5382_v59 }
 0x26f   : > { %3698 = vmatprep.subr.bf16.mxu0 %v5387_v60  ;;  %3956 = vmatprep.subr.bf16.mxu1 %v5390_v61  ;;  %v4014_v60 = vrot.slane (!%p4694_p5), %v4009_v51, %v4013_v53  ;;  %v4018_v61 = vrot.slane (!%p4694_p5), %v4009_v51, %v4017_v54 }
 0x272   : > { %3699 = vmatpush1.bf16.msra.mxu0 %v5385_v62  ;;  %3957 = vmatpush1.bf16.msra.mxu1 %v5388_v63  ;;  %v4022_v62 = vrot.slane (!%p4694_p5), %v4009_v51, %v4021_v55  ;;  %v4026_v63 = vrot.slane (!%p4694_p5), %v4009_v51, %v4025_v56 }
 0x273   : > { %3700 = vmatprep.subr.bf16.mxu0 %v5393_v0  ;;  %3958 = vmatprep.subr.bf16.mxu1 %v5396_v1 }
 0x276   : > { %3701 = vmatpush1.bf16.msra.mxu0 %v5391_v2  ;;  %3959 = vmatpush1.bf16.msra.mxu1 %v5394_v3 }
 0x277   : > { %3702 = vmatprep.subr.bf16.mxu0 %v5399_v4  ;;  %3960 = vmatprep.subr.bf16.mxu1 %v5402_v5 }
 0x27a   : > { %3703 = vmatpush1.bf16.msra.mxu0 %v5397_v6  ;;  %3961 = vmatpush1.bf16.msra.mxu1 %v5400_v7 }
 0x27b   : > { %3704 = vmatprep.subr.bf16.mxu0 %v5405_v8  ;;  %3962 = vmatprep.subr.bf16.mxu1 %v5408_v9 }
 0x27e   : > { %3705 = vmatpush1.bf16.msra.mxu0 %v5403_v10  ;;  %3963 = vmatpush1.bf16.msra.mxu1 %v5406_v11 }
 0x27f   : > { %3706 = vmatprep.subr.bf16.mxu0 %v5411_v12  ;;  %3964 = vmatprep.subr.bf16.mxu1 %v5414_v13 }
 0x282   : > { %3707 = vmatpush1.bf16.msra.mxu0 %v5409_v14  ;;  %3965 = vmatpush1.bf16.msra.mxu1 %v5412_v15 }
 0x283   : > { %3708 = vmatprep.subr.bf16.mxu0 %v5417_v16  ;;  %3966 = vmatprep.subr.bf16.mxu1 %v5420_v17 }
 0x286   : > { %3709 = vmatpush1.bf16.msra.mxu0 %v5415_v18  ;;  %3967 = vmatpush1.bf16.msra.mxu1 %v5418_v19 }
 0x287   : > { %3710 = vmatprep.subr.bf16.mxu0 %v5423_v20  ;;  %3968 = vmatprep.subr.bf16.mxu1 %v5426_v21 }
 0x28a   : > { %3711 = vmatpush1.bf16.msra.mxu0 %v5421_v22  ;;  %3969 = vmatpush1.bf16.msra.mxu1 %v5424_v23 }
 0x28d   : > { %3713 = vmatmul.mubr.bf16.vlgmr.msra.gmra.mrb[0].mxu0 %v5427_v24  ;;  %3971 = vmatmul.mubr.bf16.vlgmr.msra.gmra.mrb[0].mxu1 %v5427_v24 }
 0x360   : > { %v3714_v29 = vpop.f32.mrb[0].mxu0  ;;  %v3972_v30 = vpop.f32.mrb[0].mxu1  ;;  %4000 = sbr.rel (%p4694_p5) target bundleno = 932 (0x3a4), region = 86 }
 0x361   : > { %v3981_v33 = vadd.f32 %v3714_v29, %v1081_v25  ;;  %v3983_v34 = vadd.f32 %v3972_v30, %v1083_v26  ;;  %v3716_v35 = vpop.f32.mrb[1].mxu0  ;;  %v3974_v36 = vpop.f32.mrb[1].mxu1 }
 0x362   : > { %v3982_v39 = vadd.f32 %v3716_v35, %v1082_v27  ;;  %v3984_v40 = vadd.f32 %v3974_v36, %v1084_v28  ;;  %v3718_v41 = vpop.f32.mrb[2].mxu0  ;;  %v3976_v42 = vpop.f32.mrb[2].mxu1 }
 0x363   : > { %3989 = vst [vmem:[#allocation2] sm:$0xff] %v3981_v33  ;;  %3991 = vst [vmem:[#allocation2 + $0x10] sm:$0xff] %v3983_v34  ;;  %v3985_v43 = vadd.f32 %v3718_v41, %v1085_v31  ;;  %v3987_v44 = vadd.f32 %v3976_v42, %v1087_v32  ;;  %v3720_v45 = vpop.f32.mrb[3].mxu0  ;;  %v3978_v46 = vpop.f32.mrb[3].mxu1 }
 0x364   : > { %3990 = vst [vmem:[#allocation2 + $0x8] sm:$0xff] %v3982_v39  ;;  %3992 = vst [vmem:[#allocation2 + $0x18] sm:$0xff] %v3984_v40  ;;  %v3986_v47 = vadd.f32 %v3720_v45, %v1086_v37  ;;  %v3988_v48 = vadd.f32 %v3978_v46, %v1088_v38 }
 0x365   : > { %3993 = vst [vmem:[#allocation2 + $0x20] sm:$0xff] %v3985_v43  ;;  %3995 = vst [vmem:[#allocation2 + $0x30] sm:$0xff] %v3987_v44 }
 0x366   : > { %3994 = vst [vmem:[#allocation2 + $0x28] sm:$0xff] %v3986_v47  ;;  %3996 = vst [vmem:[#allocation2 + $0x38] sm:$0xff] %v3988_v48 }
 0x36a   : > { %v4001_v52 = vld [vmem:[#allocation2] sm:$0xff]  ;;  %v4003_v58 = vld [vmem:[#allocation2 + $0x10] sm:$0xff] }
 0x36b   : > { %v4002_v57 = vld [vmem:[#allocation2 + $0x8] sm:$0xff]  ;;  %v4004_v59 = vld [vmem:[#allocation2 + $0x18] sm:$0xff]  ;;  %v6894_v2 = vadd.f32 %v4014_v60, %v4001_v52  ;;  %v6898_v4 = vadd.f32 %v4022_v62, %v4003_v58 }
 0x36c   : > { %v4005_v0 = vld [vmem:[#allocation2 + $0x20] sm:$0xff]  ;;  %v6896_v3 = vadd.f32 %v4018_v61, %v4002_v57  ;;  %v6900_v5 = vadd.f32 %v4026_v63, %v4004_v59  ;;  %v4007_v6 = vld [vmem:[#allocation2 + $0x30] sm:$0xff] }
 0x36d   : > { %v4006_v1 = vld [vmem:[#allocation2 + $0x28] sm:$0xff]  ;;  %v6902_v7 = vadd.f32 %v4014_v60, %v4005_v0  ;;  %v4008_v9 = vld [vmem:[#allocation2 + $0x38] sm:$0xff]  ;;  %v4047_v10 = vand.u32 2147483647, %v6894_v2  ;;  %v4049_v12 = vand.u32 2147483647, %v6898_v4  ;;  %v6910_v14 = vadd.f32 %v4022_v62, %v4007_v6 }
 0x36e   : > { %v6904_v8 = vadd.f32 %v4018_v61, %v4006_v1  ;;  %v4048_v11 = vand.u32 2147483647, %v6896_v3  ;;  %v4050_v13 = vand.u32 2147483647, %v6900_v5  ;;  %v6913_v18 = vadd.f32 %v4026_v63, %v4008_v9 }
 0x36f   : > { %v4055_v15 = vsub.f32 0.0, %v4047_v10  ;;  %v4051_v17 = vand.u32 2147483647, %v6902_v7  ;;  %v4057_v19 = vsub.f32 0.0, %v4049_v12  ;;  %v4053_v29 = vand.u32 2147483647, %v6910_v14 }
 0x370   : > { %v4056_v16 = vsub.f32 0.0, %v4048_v11  ;;  %v4058_v20 = vsub.f32 0.0, %v4050_v13  ;;  %v4052_v21 = vand.u32 2147483647, %v6904_v8  ;;  %v4054_v30 = vand.u32 2147483647, %v6913_v18 }
 0x371   : > { %v4063_v22 = vmul.f32 1.442695, %v4055_v15  ;;  %v4059_v24 = vsub.f32 0.0, %v4051_v17  ;;  %v4067_v25 = vmul.f32 1.442695, %v4057_v19  ;;  %v4061_v32 = vsub.f32 0.0, %v4053_v29 }
 0x372   : > { %v4065_v23 = vmul.f32 1.442695, %v4056_v16  ;;  %v4069_v26 = vmul.f32 1.442695, %v4058_v20  ;;  %v4060_v27 = vsub.f32 0.0, %v4052_v21  ;;  %v4062_v33 = vsub.f32 0.0, %v4054_v30 }
 0x373   : > { %5430 = vpow2.f32 %v4063_v22  ;;  %v4071_v28 = vmul.f32 1.442695, %v4059_v24  ;;  %v4075_v34 = vmul.f32 1.442695, %v4061_v32  ;;  %v4039_v52 = vmax.f32 %v6894_v2, 0.0 }
 0x374   : > { %5432 = vpow2.f32 %v4065_v23  ;;  %v4073_v31 = vmul.f32 1.442695, %v4060_v27  ;;  %v4077_v35 = vmul.f32 1.442695, %v4062_v33  ;;  %v4040_v54 = vmax.f32 %v6896_v3, 0.0 }
 0x375   : > { %5434 = vpow2.f32 %v4067_v25  ;;  %v4041_v57 = vmax.f32 %v6898_v4, 0.0  ;;  %v4042_v60 = vmax.f32 %v6900_v5, 0.0  ;;  %v4043_v0 = vmax.f32 %v6902_v7, 0.0 }
 0x376   : > { %5436 = vpow2.f32 %v4069_v26  ;;  %v4044_v10 = vmax.f32 %v6904_v8, 0.0  ;;  %v4045_v15 = vmax.f32 %v6910_v14, 0.0  ;;  %v4046_v20 = vmax.f32 %v6913_v18, 0.0 }
 0x377   : > { %5438 = vpow2.f32 %v4071_v28 }
 0x378   : > { %5440 = vpow2.f32 %v4073_v31 }
 0x379   : > { %5442 = vpow2.f32 %v4075_v34 }
 0x37a   : > { %5444 = vpow2.f32 %v4077_v35 }
 0x37d   : > { %v5431_v36 = vpop.eup %5430 }
 0x37e   : > { %v5433_v37 = vpop.eup %5432  ;;  %v4079_v38 = vadd.f32 1.0, %v5431_v36 }
 0x37f   : > { %v5435_v39 = vpop.eup %5434  ;;  %v4080_v40 = vadd.f32 1.0, %v5433_v37 }
 0x380   : > { %v5437_v41 = vpop.eup %5436  ;;  %5446 = vlog2.f32 %v4079_v38  ;;  %v4081_v42 = vadd.f32 1.0, %v5435_v39 }
 0x381   : > { %v5439_v43 = vpop.eup %5438  ;;  %5448 = vlog2.f32 %v4080_v40  ;;  %v4082_v44 = vadd.f32 1.0, %v5437_v41 }
 0x382   : > { %v5441_v45 = vpop.eup %5440  ;;  %5450 = vlog2.f32 %v4081_v42  ;;  %v4083_v46 = vadd.f32 1.0, %v5439_v43 }
 0x383   : > { %v5443_v47 = vpop.eup %5442  ;;  %5452 = vlog2.f32 %v4082_v44  ;;  %v4084_v48 = vadd.f32 1.0, %v5441_v45 }
 0x384   : > { %v5445_v49 = vpop.eup %5444  ;;  %5454 = vlog2.f32 %v4083_v46  ;;  %v4085_v50 = vadd.f32 1.0, %v5443_v47 }
 0x385   : > { %5456 = vlog2.f32 %v4084_v48  ;;  %v4086_v51 = vadd.f32 1.0, %v5445_v49 }
 0x386   : > { %5458 = vlog2.f32 %v4085_v50 }
 0x387   : > { %5460 = vlog2.f32 %v4086_v51 }
 0x38a   : > { %v5447_v53 = vpop.eup %5446 }
 0x38b   : > { %v5449_v55 = vpop.eup %5448  ;;  %v4088_v56 = vmul.f32 0.6931472, %v5447_v53 }
 0x38c   : > { %v5451_v58 = vpop.eup %5450  ;;  %v4090_v59 = vmul.f32 0.6931472, %v5449_v55 }
 0x38d   : > { %v5453_v61 = vpop.eup %5452  ;;  %v4103_v62 = vadd.f32 %v4088_v56, %v4039_v52  ;;  %v4092_v63 = vmul.f32 0.6931472, %v5451_v58 }
 0x38e   : > { %v5455_v1 = vpop.eup %5454  ;;  %v4104_v6 = vadd.f32 %v4090_v59, %v4040_v54  ;;  %v4094_v9 = vmul.f32 0.6931472, %v5453_v61 }
 0x38f   : > { %v5457_v11 = vpop.eup %5456  ;;  %5462 = vtanh.f32 %v4103_v62  ;;  %v4105_v12 = vadd.f32 %v4092_v63, %v4041_v57  ;;  %v4096_v13 = vmul.f32 0.6931472, %v5455_v1 }
 0x390   : > { %v5459_v16 = vpop.eup %5458  ;;  %5464 = vtanh.f32 %v4104_v6  ;;  %v4106_v17 = vadd.f32 %v4094_v9, %v4042_v60  ;;  %v4098_v19 = vmul.f32 0.6931472, %v5457_v11 }
 0x391   : > { %v5461_v21 = vpop.eup %5460  ;;  %5466 = vtanh.f32 %v4105_v12  ;;  %v4107_v22 = vadd.f32 %v4096_v13, %v4043_v0  ;;  %v4100_v23 = vmul.f32 0.6931472, %v5459_v16 }
 0x392   : > { %5468 = vtanh.f32 %v4106_v17  ;;  %v4108_v24 = vadd.f32 %v4098_v19, %v4044_v10  ;;  %v4102_v25 = vmul.f32 0.6931472, %v5461_v21 }
 0x393   : > { %5470 = vtanh.f32 %v4107_v22  ;;  %v4109_v26 = vadd.f32 %v4100_v23, %v4045_v15 }
 0x394   : > { %5472 = vtanh.f32 %v4108_v24  ;;  %v4110_v27 = vadd.f32 %v4102_v25, %v4046_v20 }
 0x395   : > { %5474 = vtanh.f32 %v4109_v26 }
 0x396   : > { %5476 = vtanh.f32 %v4110_v27 }
 0x399   : > { %v5463_v28 = vpop.eup %5462 }
 0x39a   : > { %v5465_v29 = vpop.eup %5464  ;;  %v4119_v30 = vmul.f32 %v5463_v28, %v6894_v2 }
 0x39b   : > { %v5467_v31 = vpop.eup %5466  ;;  %v4120_v32 = vmul.f32 %v5465_v29, %v6896_v3 }
 0x39c   : > { %v5469_v33 = vpop.eup %5468  ;;  %4127 = vst [vmem:[%s6489_s25] sm:$0xff] %v4119_v30  ;;  %v4121_v34 = vmul.f32 %v5467_v31, %v6898_v4 }
 0x39d   : > { %v5471_v35 = vpop.eup %5470  ;;  %4128 = vst [vmem:[%s6489_s25 + $0x8] sm:$0xff] %v4120_v32  ;;  %v4122_v36 = vmul.f32 %v5469_v33, %v6900_v5 }
 0x39e   : > { %v5473_v37 = vpop.eup %5472  ;;  %4129 = vst [vmem:[%s6489_s25 + $0x10] sm:$0xff] %v4121_v34  ;;  %v4123_v38 = vmul.f32 %v5471_v35, %v6902_v7 }
 0x39f   : > { %v5475_v2 = vpop.eup %5474  ;;  %4130 = vst [vmem:[%s6489_s25 + $0x18] sm:$0xff] %v4122_v36  ;;  %v4124_v39 = vmul.f32 %v5473_v37, %v6904_v8 }
 0x3a0   : > { %v5477_v3 = vpop.eup %5476  ;;  %4131 = vst [vmem:[%s6489_s25 + $0x20] sm:$0xff] %v4123_v38  ;;  %v4125_v40 = vmul.f32 %v5475_v2, %v6910_v14 }
 0x3a1   : > { %4132 = vst [vmem:[%s6489_s25 + $0x28] sm:$0xff] %v4124_v39  ;;  %v4126_v4 = vmul.f32 %v5477_v3, %v6913_v18 }
 0x3a2   : > { %4133 = vst [vmem:[%s6489_s25 + $0x30] sm:$0xff] %v4125_v40 }
 0x3a3   : > { %4134 = vst [vmem:[%s6489_s25 + $0x38] sm:$0xff] %v4126_v4 }
 0x3a4 PF: > { %4141 = sbr.rel (!%p5681_p12) target bundleno = 940 (0x3ac), region = 90  ;;  %s4702_s14 = sshll.u32 (%p5681_p12), %s5552_s19, 5  ;;  %v4160_v5 = vld [vmem:[%s6489_s25] sm:$0xff] (%p5681_p12)  ;;  %v4162_v7 = vld [vmem:[%s6489_s25 + $0x8] sm:$0xff] (%p5681_p12) }
 0x3a5   : > { %v4164_v8 = vld [vmem:[%s6489_s25 + $0x10] sm:$0xff] (%p5681_p12)  ;;  %s4147_s0 = scalar_lea.vmem (%p5681_p12), %s6992_s3, %s4702_s14 }
 0x3a6   : > { %v4166_v14 = vld [vmem:[%s6489_s25 + $0x18] sm:$0xff] (%p5681_p12)  ;;  %4161 = vst [vmem:[%s4147_s0] sm:$0xff] (%p5681_p12), %v4160_v5  ;;  %4163 = vst [vmem:[%s4147_s0 + $0x8] sm:$0xff] (%p5681_p12), %v4162_v7 }
 0x3a7   : > { %v4168_v18 = vld [vmem:[%s6489_s25 + $0x20] sm:$0xff] (%p5681_p12)  ;;  %4165 = vst [vmem:[%s4147_s0 + $0x10] sm:$0xff] (%p5681_p12), %v4164_v8  ;;  %4167 = vst [vmem:[%s4147_s0 + $0x18] sm:$0xff] (%p5681_p12), %v4166_v14 }
 0x3a8   : > { %v4170_v41 = vld [vmem:[%s6489_s25 + $0x28] sm:$0xff] (%p5681_p12)  ;;  %4169 = vst [vmem:[%s4147_s0 + $0x40] sm:$0xff] (%p5681_p12), %v4168_v18 }
 0x3a9   : > { %4171 = vst [vmem:[%s4147_s0 + $0x48] sm:$0xff] (%p5681_p12), %v4170_v41  ;;  %v4172_v42 = vld [vmem:[%s6489_s25 + $0x30] sm:$0xff] (%p5681_p12) }
 0x3aa   : > { %v4174_v43 = vld [vmem:[%s6489_s25 + $0x38] sm:$0xff] (%p5681_p12)  ;;  %4173 = vst [vmem:[%s4147_s0 + $0x50] sm:$0xff] (%p5681_p12), %v4172_v42 }
 0x3ab   : > { %4175 = vst [vmem:[%s4147_s0 + $0x58] sm:$0xff] %v4174_v43 }
 0x3ac PF: > { %s13_s22 = sadd.s32 1, %s5564_s22   ;;  %s7002_s10 = sld [smem:[#allocation6_spill]] }
 0x3ad   : > { %p10_p6 = scmp.ge.s32.totalorder %s13_s22, 8   ;;  %s7003_s12 = smov %s5528_s13 }
 0x3ae   : > { %s7004_s13 = smov %s5679_s9  ;;  %s7005_s14 = smov %s5536_s15 }
 0x3af   : > { %s7006_s15 = smov %s5676_s8  ;;  %s7007_s16 = smov %s5544_s17 }
 0x3b0   : > { %s7008_s17 = smov %s5662_s30  ;;  %s7009_s18 = smov %s5556_s20 }
 0x3b1   : > { %s7010_s19 = smov %s5560_s21  ;;  %s7011_s20 = smov %s7014_s24 }
 0x3b2   : > { %s7012_s21 = smov %s7002_s10  ;;  %12 = sbr.rel (!%p10_p6) target bundleno = 9 (0x9), region = 155 }

// kernel: downsample5_forward.13
= control target key start
LH: loop header
LB: loop body
LE: loop exit
PB: predicated region body
PF: predicated region fallthrough
CT: control target
= control target key end

     0   :  { %s3873_s12 = smov 0   ;;  %s3875_s13 = smov 0   ;;  %s4837_s0 = inlined_call_operand.vmem [shape: bf16[16,1024], index: 0, kind: input, shape index: {}]   ;;  %s4838_s1 = inlined_call_operand.vmem [shape: bf16[1024,1024], index: 1, kind: input, shape index: {}]   ;;  %s4839_s2 = inlined_call_operand.vmem [shape: f32[1,1024], index: 2, kind: input, shape index: {}]   ;;  %s4840_s3 = inlined_call_operand.vmem [shape: f32[16,1024], index: 3, kind: output, shape index: {}]  }
   0x1   :  { %s3877_s14 = smov 0   ;;  %s3879_s15 = smov 0  }
   0x2   :  { %s3881_s16 = smov 0  }
   0x3 LB: > { %s28_s17 = sadd.s32 1, %s3847_s15  ;;  %s3034_s18 = sadd.s32 4294967295, %s3851_s16   ;;  %s3851_s16 = sphi %s3881_s16, %s13_s16   ;;  %s3847_s15 = sphi %s3879_s15, %s4845_s15   ;;  %s3843_s14 = sphi %s3877_s14, %s4844_s14   ;;  %s3839_s13 = sphi %s3875_s13, %s4843_s13   ;;  %s3835_s12 = sphi %s3873_s12, %s4842_s12  }
   0x4   : > { %p30_p0 = scmp.ge.s32.totalorder %s28_s17, 2  ;;  %p76_p1 = scmp.ne.s32.totalorder %s3839_s13, %s3835_s12 }
   0x5   : > { %p77_p2 = scmp.eq.s32.totalorder %s3851_s16, 0  ;;  %p134_p4 = scmp.eq.s32.totalorder %s3034_s18, 1 }
   0x6   : > { %s4847_s17 = smov (%p30_p0, %s28_s17), 0  ;;  %s69_s20 = sadd.s32 1, %s3839_s13 }
   0x7   : > { %p78_p3 = por %p77_p2, %p76_p1  ;;  %s65_s19 = ssub.s32 %s3847_s15, %s4847_s17 }
   0x8   : > { %p67_p5 = scmp.eq.s32.totalorder %s65_s19, 0  ;;  %p3908_p6 = por %p134_p4, %p76_p1 }
   0x9   : > { %p3038_p7 = scmp.ge.s32.totalorder %s3851_s16, 2 }
   0xa   : > { %s3913_s22 = scalar_select %p67_p5, %s3839_s13, %s69_s20  }
   0xb   : > { %171 = sbr.rel (%p3038_p7) target bundleno = 150 (0x96), region = 20 }
  0x12   : > { %174 = sbr.rel (!%p78_p3) target bundleno = 150 (0x96), region = 24  ;;  %s176_s23 = sand.u32 (%p78_p3), 1, %s3839_s13  }
  0x13   : > { %s3315_s24 = sshll.u32 (%p78_p3), %s3847_s15, 4  ;;  %s3039_s25 = sshll.u32 (%p78_p3), %s176_s23, 11 }
  0x14   : > { %s3921_s28 = scalar_lea.vmem (%p78_p3), %s4838_s1, %s3315_s24  ;;  %s3926_s29 = scalar_lea.vmem (%p78_p3), [#allocation3], %s3039_s25 }
  0x15   : > { %v197_v0 = vld [vmem:[%s3921_s28] sm:$0xff] (%p78_p3)  ;;  %v199_v1 = vld [vmem:[%s3921_s28 + $0x8] sm:$0xff] (%p78_p3) }
  0x16   : > { %v201_v2 = vld [vmem:[%s3921_s28 + $0x20] sm:$0xff] (%p78_p3)  ;;  %198 = vst [vmem:[%s3926_s29] sm:$0xff] (%p78_p3), %v197_v0  ;;  %200 = vst [vmem:[%s3926_s29 + $0x8] sm:$0xff] (%p78_p3), %v199_v1  ;;  %v203_v3 = vld [vmem:[%s3921_s28 + $0x28] sm:$0xff] (%p78_p3) }
  0x17   : > { %202 = vst [vmem:[%s3926_s29 + $0x10] sm:$0xff] (%p78_p3), %v201_v2  ;;  %v205_v4 = vld [vmem:[%s3921_s28 + $0x40] sm:$0xff] (%p78_p3)  ;;  %v207_v5 = vld [vmem:[%s3921_s28 + $0x48] sm:$0xff] (%p78_p3)  ;;  %204 = vst [vmem:[%s3926_s29 + $0x18] sm:$0xff] (%p78_p3), %v203_v3 }
  0x18   : > { %206 = vst [vmem:[%s3926_s29 + $0x20] sm:$0xff] (%p78_p3), %v205_v4  ;;  %208 = vst [vmem:[%s3926_s29 + $0x28] sm:$0xff] (%p78_p3), %v207_v5  ;;  %v209_v6 = vld [vmem:[%s3921_s28 + $0x60] sm:$0xff] (%p78_p3)  ;;  %v211_v7 = vld [vmem:[%s3921_s28 + $0x68] sm:$0xff] (%p78_p3) }
  0x19   : > { %v213_v8 = vld [vmem:[%s3921_s28 + $0x80] sm:$0xff]  ;;  %210 = vst [vmem:[%s3926_s29 + $0x30] sm:$0xff] %v209_v6  ;;  %212 = vst [vmem:[%s3926_s29 + $0x38] sm:$0xff] %v211_v7  ;;  %v215_v9 = vld [vmem:[%s3921_s28 + $0x88] sm:$0xff] }
  0x1a   : > { %214 = vst [vmem:[%s3926_s29 + $0x40] sm:$0xff] %v213_v8  ;;  %v217_v10 = vld [vmem:[%s3921_s28 + $0xa0] sm:$0xff]  ;;  %v219_v11 = vld [vmem:[%s3921_s28 + $0xa8] sm:$0xff]  ;;  %216 = vst [vmem:[%s3926_s29 + $0x48] sm:$0xff] %v215_v9 }
  0x1b   : > { %218 = vst [vmem:[%s3926_s29 + $0x50] sm:$0xff] %v217_v10  ;;  %220 = vst [vmem:[%s3926_s29 + $0x58] sm:$0xff] %v219_v11  ;;  %v221_v12 = vld [vmem:[%s3921_s28 + $0xc0] sm:$0xff]  ;;  %v223_v13 = vld [vmem:[%s3921_s28 + $0xc8] sm:$0xff] }
  0x1c   : > { %v225_v14 = vld [vmem:[%s3921_s28 + $0xe0] sm:$0xff]  ;;  %222 = vst [vmem:[%s3926_s29 + $0x60] sm:$0xff] %v221_v12  ;;  %224 = vst [vmem:[%s3926_s29 + $0x68] sm:$0xff] %v223_v13  ;;  %v227_v15 = vld [vmem:[%s3921_s28 + $0xe8] sm:$0xff] }
  0x1d   : > { %226 = vst [vmem:[%s3926_s29 + $0x70] sm:$0xff] %v225_v14  ;;  %v229_v16 = vld [vmem:[%s3921_s28 + $0x100] sm:$0xff]  ;;  %v231_v17 = vld [vmem:[%s3921_s28 + $0x108] sm:$0xff]  ;;  %228 = vst [vmem:[%s3926_s29 + $0x78] sm:$0xff] %v227_v15 }
  0x1e   : > { %230 = vst [vmem:[%s3926_s29 + $0x80] sm:$0xff] %v229_v16  ;;  %232 = vst [vmem:[%s3926_s29 + $0x88] sm:$0xff] %v231_v17  ;;  %v233_v18 = vld [vmem:[%s3921_s28 + $0x120] sm:$0xff]  ;;  %v235_v19 = vld [vmem:[%s3921_s28 + $0x128] sm:$0xff] }
  0x1f   : > { %v237_v20 = vld [vmem:[%s3921_s28 + $0x140] sm:$0xff]  ;;  %234 = vst [vmem:[%s3926_s29 + $0x90] sm:$0xff] %v233_v18  ;;  %236 = vst [vmem:[%s3926_s29 + $0x98] sm:$0xff] %v235_v19  ;;  %v239_v21 = vld [vmem:[%s3921_s28 + $0x148] sm:$0xff] }
  0x20   : > { %238 = vst [vmem:[%s3926_s29 + $0xa0] sm:$0xff] %v237_v20  ;;  %v241_v22 = vld [vmem:[%s3921_s28 + $0x160] sm:$0xff]  ;;  %v243_v23 = vld [vmem:[%s3921_s28 + $0x168] sm:$0xff]  ;;  %240 = vst [vmem:[%s3926_s29 + $0xa8] sm:$0xff] %v239_v21 }
  0x21   : > { %242 = vst [vmem:[%s3926_s29 + $0xb0] sm:$0xff] %v241_v22  ;;  %244 = vst [vmem:[%s3926_s29 + $0xb8] sm:$0xff] %v243_v23  ;;  %v245_v24 = vld [vmem:[%s3921_s28 + $0x180] sm:$0xff]  ;;  %v247_v25 = vld [vmem:[%s3921_s28 + $0x188] sm:$0xff] }
  0x22   : > { %v249_v26 = vld [vmem:[%s3921_s28 + $0x1a0] sm:$0xff]  ;;  %246 = vst [vmem:[%s3926_s29 + $0xc0] sm:$0xff] %v245_v24  ;;  %248 = vst [vmem:[%s3926_s29 + $0xc8] sm:$0xff] %v247_v25  ;;  %v251_v27 = vld [vmem:[%s3921_s28 + $0x1a8] sm:$0xff] }
  0x23   : > { %250 = vst [vmem:[%s3926_s29 + $0xd0] sm:$0xff] %v249_v26  ;;  %v253_v28 = vld [vmem:[%s3921_s28 + $0x1c0] sm:$0xff]  ;;  %v255_v29 = vld [vmem:[%s3921_s28 + $0x1c8] sm:$0xff]  ;;  %252 = vst [vmem:[%s3926_s29 + $0xd8] sm:$0xff] %v251_v27 }
  0x24   : > { %254 = vst [vmem:[%s3926_s29 + $0xe0] sm:$0xff] %v253_v28  ;;  %256 = vst [vmem:[%s3926_s29 + $0xe8] sm:$0xff] %v255_v29  ;;  %v257_v30 = vld [vmem:[%s3921_s28 + $0x1e0] sm:$0xff]  ;;  %v259_v31 = vld [vmem:[%s3921_s28 + $0x1e8] sm:$0xff] }
  0x25   : > { %v261_v32 = vld [vmem:[%s3921_s28 + $0x200] sm:$0xff]  ;;  %258 = vst [vmem:[%s3926_s29 + $0xf0] sm:$0xff] %v257_v30  ;;  %260 = vst [vmem:[%s3926_s29 + $0xf8] sm:$0xff] %v259_v31  ;;  %v263_v33 = vld [vmem:[%s3921_s28 + $0x208] sm:$0xff] }
  0x26   : > { %262 = vst [vmem:[%s3926_s29 + $0x100] sm:$0xff] %v261_v32  ;;  %v265_v34 = vld [vmem:[%s3921_s28 + $0x220] sm:$0xff]  ;;  %v267_v35 = vld [vmem:[%s3921_s28 + $0x228] sm:$0xff]  ;;  %264 = vst [vmem:[%s3926_s29 + $0x108] sm:$0xff] %v263_v33 }
  0x27   : > { %266 = vst [vmem:[%s3926_s29 + $0x110] sm:$0xff] %v265_v34  ;;  %268 = vst [vmem:[%s3926_s29 + $0x118] sm:$0xff] %v267_v35  ;;  %v269_v36 = vld [vmem:[%s3921_s28 + $0x240] sm:$0xff]  ;;  %v271_v37 = vld [vmem:[%s3921_s28 + $0x248] sm:$0xff] }
  0x28   : > { %v273_v38 = vld [vmem:[%s3921_s28 + $0x260] sm:$0xff]  ;;  %270 = vst [vmem:[%s3926_s29 + $0x120] sm:$0xff] %v269_v36  ;;  %272 = vst [vmem:[%s3926_s29 + $0x128] sm:$0xff] %v271_v37  ;;  %v275_v39 = vld [vmem:[%s3921_s28 + $0x268] sm:$0xff] }
  0x29   : > { %274 = vst [vmem:[%s3926_s29 + $0x130] sm:$0xff] %v273_v38  ;;  %v277_v40 = vld [vmem:[%s3921_s28 + $0x280] sm:$0xff]  ;;  %v279_v41 = vld [vmem:[%s3921_s28 + $0x288] sm:$0xff]  ;;  %276 = vst [vmem:[%s3926_s29 + $0x138] sm:$0xff] %v275_v39 }
  0x2a   : > { %278 = vst [vmem:[%s3926_s29 + $0x140] sm:$0xff] %v277_v40  ;;  %280 = vst [vmem:[%s3926_s29 + $0x148] sm:$0xff] %v279_v41  ;;  %v281_v42 = vld [vmem:[%s3921_s28 + $0x2a0] sm:$0xff]  ;;  %v283_v43 = vld [vmem:[%s3921_s28 + $0x2a8] sm:$0xff] }
  0x2b   : > { %v285_v44 = vld [vmem:[%s3921_s28 + $0x2c0] sm:$0xff]  ;;  %282 = vst [vmem:[%s3926_s29 + $0x150] sm:$0xff] %v281_v42  ;;  %284 = vst [vmem:[%s3926_s29 + $0x158] sm:$0xff] %v283_v43  ;;  %v287_v45 = vld [vmem:[%s3921_s28 + $0x2c8] sm:$0xff] }
  0x2c   : > { %286 = vst [vmem:[%s3926_s29 + $0x160] sm:$0xff] %v285_v44  ;;  %v289_v46 = vld [vmem:[%s3921_s28 + $0x2e0] sm:$0xff]  ;;  %v291_v47 = vld [vmem:[%s3921_s28 + $0x2e8] sm:$0xff]  ;;  %288 = vst [vmem:[%s3926_s29 + $0x168] sm:$0xff] %v287_v45 }
  0x2d   : > { %290 = vst [vmem:[%s3926_s29 + $0x170] sm:$0xff] %v289_v46  ;;  %292 = vst [vmem:[%s3926_s29 + $0x178] sm:$0xff] %v291_v47  ;;  %v293_v48 = vld [vmem:[%s3921_s28 + $0x300] sm:$0xff]  ;;  %v295_v49 = vld [vmem:[%s3921_s28 + $0x308] sm:$0xff] }
  0x2e   : > { %v297_v50 = vld [vmem:[%s3921_s28 + $0x320] sm:$0xff]  ;;  %294 = vst [vmem:[%s3926_s29 + $0x180] sm:$0xff] %v293_v48  ;;  %296 = vst [vmem:[%s3926_s29 + $0x188] sm:$0xff] %v295_v49  ;;  %v299_v51 = vld [vmem:[%s3921_s28 + $0x328] sm:$0xff] }
  0x2f   : > { %298 = vst [vmem:[%s3926_s29 + $0x190] sm:$0xff] %v297_v50  ;;  %v301_v52 = vld [vmem:[%s3921_s28 + $0x340] sm:$0xff]  ;;  %v303_v53 = vld [vmem:[%s3921_s28 + $0x348] sm:$0xff]  ;;  %300 = vst [vmem:[%s3926_s29 + $0x198] sm:$0xff] %v299_v51 }
  0x30   : > { %302 = vst [vmem:[%s3926_s29 + $0x1a0] sm:$0xff] %v301_v52  ;;  %304 = vst [vmem:[%s3926_s29 + $0x1a8] sm:$0xff] %v303_v53  ;;  %v305_v54 = vld [vmem:[%s3921_s28 + $0x360] sm:$0xff]  ;;  %v307_v55 = vld [vmem:[%s3921_s28 + $0x368] sm:$0xff] }
  0x31   : > { %v309_v56 = vld [vmem:[%s3921_s28 + $0x380] sm:$0xff]  ;;  %306 = vst [vmem:[%s3926_s29 + $0x1b0] sm:$0xff] %v305_v54  ;;  %308 = vst [vmem:[%s3926_s29 + $0x1b8] sm:$0xff] %v307_v55  ;;  %v311_v57 = vld [vmem:[%s3921_s28 + $0x388] sm:$0xff] }
  0x32   : > { %310 = vst [vmem:[%s3926_s29 + $0x1c0] sm:$0xff] %v309_v56  ;;  %v313_v58 = vld [vmem:[%s3921_s28 + $0x3a0] sm:$0xff]  ;;  %v315_v59 = vld [vmem:[%s3921_s28 + $0x3a8] sm:$0xff]  ;;  %312 = vst [vmem:[%s3926_s29 + $0x1c8] sm:$0xff] %v311_v57 }
  0x33   : > { %314 = vst [vmem:[%s3926_s29 + $0x1d0] sm:$0xff] %v313_v58  ;;  %316 = vst [vmem:[%s3926_s29 + $0x1d8] sm:$0xff] %v315_v59  ;;  %v317_v60 = vld [vmem:[%s3921_s28 + $0x3c0] sm:$0xff]  ;;  %v319_v61 = vld [vmem:[%s3921_s28 + $0x3c8] sm:$0xff] }
  0x34   : > { %v321_v62 = vld [vmem:[%s3921_s28 + $0x3e0] sm:$0xff]  ;;  %318 = vst [vmem:[%s3926_s29 + $0x1e0] sm:$0xff] %v317_v60  ;;  %320 = vst [vmem:[%s3926_s29 + $0x1e8] sm:$0xff] %v319_v61  ;;  %v323_v63 = vld [vmem:[%s3921_s28 + $0x3e8] sm:$0xff] }
  0x35   : > { %322 = vst [vmem:[%s3926_s29 + $0x1f0] sm:$0xff] %v321_v62  ;;  %v325_v0 = vld [vmem:[%s3921_s28 + $0x400] sm:$0xff]  ;;  %v327_v1 = vld [vmem:[%s3921_s28 + $0x408] sm:$0xff]  ;;  %324 = vst [vmem:[%s3926_s29 + $0x1f8] sm:$0xff] %v323_v63 }
  0x36   : > { %326 = vst [vmem:[%s3926_s29 + $0x200] sm:$0xff] %v325_v0  ;;  %328 = vst [vmem:[%s3926_s29 + $0x208] sm:$0xff] %v327_v1  ;;  %v329_v2 = vld [vmem:[%s3921_s28 + $0x420] sm:$0xff]  ;;  %v331_v3 = vld [vmem:[%s3921_s28 + $0x428] sm:$0xff] }
  0x37   : > { %v333_v4 = vld [vmem:[%s3921_s28 + $0x440] sm:$0xff]  ;;  %330 = vst [vmem:[%s3926_s29 + $0x210] sm:$0xff] %v329_v2  ;;  %332 = vst [vmem:[%s3926_s29 + $0x218] sm:$0xff] %v331_v3  ;;  %v335_v5 = vld [vmem:[%s3921_s28 + $0x448] sm:$0xff] }
  0x38   : > { %334 = vst [vmem:[%s3926_s29 + $0x220] sm:$0xff] %v333_v4  ;;  %v337_v6 = vld [vmem:[%s3921_s28 + $0x460] sm:$0xff]  ;;  %v339_v7 = vld [vmem:[%s3921_s28 + $0x468] sm:$0xff]  ;;  %336 = vst [vmem:[%s3926_s29 + $0x228] sm:$0xff] %v335_v5 }
  0x39   : > { %338 = vst [vmem:[%s3926_s29 + $0x230] sm:$0xff] %v337_v6  ;;  %340 = vst [vmem:[%s3926_s29 + $0x238] sm:$0xff] %v339_v7  ;;  %v341_v8 = vld [vmem:[%s3921_s28 + $0x480] sm:$0xff]  ;;  %v343_v9 = vld [vmem:[%s3921_s28 + $0x488] sm:$0xff] }
  0x3a   : > { %v345_v10 = vld [vmem:[%s3921_s28 + $0x4a0] sm:$0xff]  ;;  %342 = vst [vmem:[%s3926_s29 + $0x240] sm:$0xff] %v341_v8  ;;  %344 = vst [vmem:[%s3926_s29 + $0x248] sm:$0xff] %v343_v9  ;;  %v347_v11 = vld [vmem:[%s3921_s28 + $0x4a8] sm:$0xff] }
  0x3b   : > { %346 = vst [vmem:[%s3926_s29 + $0x250] sm:$0xff] %v345_v10  ;;  %v349_v12 = vld [vmem:[%s3921_s28 + $0x4c0] sm:$0xff]  ;;  %v351_v13 = vld [vmem:[%s3921_s28 + $0x4c8] sm:$0xff]  ;;  %348 = vst [vmem:[%s3926_s29 + $0x258] sm:$0xff] %v347_v11 }
  0x3c   : > { %350 = vst [vmem:[%s3926_s29 + $0x260] sm:$0xff] %v349_v12  ;;  %352 = vst [vmem:[%s3926_s29 + $0x268] sm:$0xff] %v351_v13  ;;  %v353_v14 = vld [vmem:[%s3921_s28 + $0x4e0] sm:$0xff]  ;;  %v355_v15 = vld [vmem:[%s3921_s28 + $0x4e8] sm:$0xff] }
  0x3d   : > { %v357_v16 = vld [vmem:[%s3921_s28 + $0x500] sm:$0xff]  ;;  %354 = vst [vmem:[%s3926_s29 + $0x270] sm:$0xff] %v353_v14  ;;  %356 = vst [vmem:[%s3926_s29 + $0x278] sm:$0xff] %v355_v15  ;;  %v359_v17 = vld [vmem:[%s3921_s28 + $0x508] sm:$0xff] }
  0x3e   : > { %358 = vst [vmem:[%s3926_s29 + $0x280] sm:$0xff] %v357_v16  ;;  %v361_v18 = vld [vmem:[%s3921_s28 + $0x520] sm:$0xff]  ;;  %v363_v19 = vld [vmem:[%s3921_s28 + $0x528] sm:$0xff]  ;;  %360 = vst [vmem:[%s3926_s29 + $0x288] sm:$0xff] %v359_v17 }
  0x3f   : > { %362 = vst [vmem:[%s3926_s29 + $0x290] sm:$0xff] %v361_v18  ;;  %364 = vst [vmem:[%s3926_s29 + $0x298] sm:$0xff] %v363_v19  ;;  %v365_v20 = vld [vmem:[%s3921_s28 + $0x540] sm:$0xff]  ;;  %v367_v21 = vld [vmem:[%s3921_s28 + $0x548] sm:$0xff] }
  0x40   : > { %v369_v22 = vld [vmem:[%s3921_s28 + $0x560] sm:$0xff]  ;;  %366 = vst [vmem:[%s3926_s29 + $0x2a0] sm:$0xff] %v365_v20  ;;  %368 = vst [vmem:[%s3926_s29 + $0x2a8] sm:$0xff] %v367_v21  ;;  %v371_v23 = vld [vmem:[%s3921_s28 + $0x568] sm:$0xff] }
  0x41   : > { %370 = vst [vmem:[%s3926_s29 + $0x2b0] sm:$0xff] %v369_v22  ;;  %v373_v24 = vld [vmem:[%s3921_s28 + $0x580] sm:$0xff]  ;;  %v375_v25 = vld [vmem:[%s3921_s28 + $0x588] sm:$0xff]  ;;  %372 = vst [vmem:[%s3926_s29 + $0x2b8] sm:$0xff] %v371_v23 }
  0x42   : > { %374 = vst [vmem:[%s3926_s29 + $0x2c0] sm:$0xff] %v373_v24  ;;  %376 = vst [vmem:[%s3926_s29 + $0x2c8] sm:$0xff] %v375_v25  ;;  %v377_v26 = vld [vmem:[%s3921_s28 + $0x5a0] sm:$0xff]  ;;  %v379_v27 = vld [vmem:[%s3921_s28 + $0x5a8] sm:$0xff] }
  0x43   : > { %v381_v28 = vld [vmem:[%s3921_s28 + $0x5c0] sm:$0xff]  ;;  %378 = vst [vmem:[%s3926_s29 + $0x2d0] sm:$0xff] %v377_v26  ;;  %380 = vst [vmem:[%s3926_s29 + $0x2d8] sm:$0xff] %v379_v27  ;;  %v383_v29 = vld [vmem:[%s3921_s28 + $0x5c8] sm:$0xff] }
  0x44   : > { %382 = vst [vmem:[%s3926_s29 + $0x2e0] sm:$0xff] %v381_v28  ;;  %v385_v30 = vld [vmem:[%s3921_s28 + $0x5e0] sm:$0xff]  ;;  %v387_v31 = vld [vmem:[%s3921_s28 + $0x5e8] sm:$0xff]  ;;  %384 = vst [vmem:[%s3926_s29 + $0x2e8] sm:$0xff] %v383_v29 }
  0x45   : > { %386 = vst [vmem:[%s3926_s29 + $0x2f0] sm:$0xff] %v385_v30  ;;  %388 = vst [vmem:[%s3926_s29 + $0x2f8] sm:$0xff] %v387_v31  ;;  %v389_v32 = vld [vmem:[%s3921_s28 + $0x600] sm:$0xff]  ;;  %v391_v33 = vld [vmem:[%s3921_s28 + $0x608] sm:$0xff] }
  0x46   : > { %v393_v34 = vld [vmem:[%s3921_s28 + $0x620] sm:$0xff]  ;;  %390 = vst [vmem:[%s3926_s29 + $0x300] sm:$0xff] %v389_v32  ;;  %392 = vst [vmem:[%s3926_s29 + $0x308] sm:$0xff] %v391_v33  ;;  %v395_v35 = vld [vmem:[%s3921_s28 + $0x628] sm:$0xff] }
  0x47   : > { %394 = vst [vmem:[%s3926_s29 + $0x310] sm:$0xff] %v393_v34  ;;  %v397_v36 = vld [vmem:[%s3921_s28 + $0x640] sm:$0xff]  ;;  %v399_v37 = vld [vmem:[%s3921_s28 + $0x648] sm:$0xff]  ;;  %396 = vst [vmem:[%s3926_s29 + $0x318] sm:$0xff] %v395_v35 }
  0x48   : > { %398 = vst [vmem:[%s3926_s29 + $0x320] sm:$0xff] %v397_v36  ;;  %400 = vst [vmem:[%s3926_s29 + $0x328] sm:$0xff] %v399_v37  ;;  %v401_v38 = vld [vmem:[%s3921_s28 + $0x660] sm:$0xff]  ;;  %v403_v39 = vld [vmem:[%s3921_s28 + $0x668] sm:$0xff] }
  0x49   : > { %v405_v40 = vld [vmem:[%s3921_s28 + $0x680] sm:$0xff]  ;;  %402 = vst [vmem:[%s3926_s29 + $0x330] sm:$0xff] %v401_v38  ;;  %404 = vst [vmem:[%s3926_s29 + $0x338] sm:$0xff] %v403_v39  ;;  %v407_v41 = vld [vmem:[%s3921_s28 + $0x688] sm:$0xff] }
  0x4a   : > { %406 = vst [vmem:[%s3926_s29 + $0x340] sm:$0xff] %v405_v40  ;;  %v409_v42 = vld [vmem:[%s3921_s28 + $0x6a0] sm:$0xff]  ;;  %v411_v43 = vld [vmem:[%s3921_s28 + $0x6a8] sm:$0xff]  ;;  %408 = vst [vmem:[%s3926_s29 + $0x348] sm:$0xff] %v407_v41 }
  0x4b   : > { %410 = vst [vmem:[%s3926_s29 + $0x350] sm:$0xff] %v409_v42  ;;  %412 = vst [vmem:[%s3926_s29 + $0x358] sm:$0xff] %v411_v43  ;;  %v413_v44 = vld [vmem:[%s3921_s28 + $0x6c0] sm:$0xff]  ;;  %v415_v45 = vld [vmem:[%s3921_s28 + $0x6c8] sm:$0xff] }
  0x4c   : > { %v417_v46 = vld [vmem:[%s3921_s28 + $0x6e0] sm:$0xff]  ;;  %414 = vst [vmem:[%s3926_s29 + $0x360] sm:$0xff] %v413_v44  ;;  %416 = vst [vmem:[%s3926_s29 + $0x368] sm:$0xff] %v415_v45  ;;  %v419_v47 = vld [vmem:[%s3921_s28 + $0x6e8] sm:$0xff] }
  0x4d   : > { %418 = vst [vmem:[%s3926_s29 + $0x370] sm:$0xff] %v417_v46  ;;  %v421_v48 = vld [vmem:[%s3921_s28 + $0x700] sm:$0xff]  ;;  %v423_v49 = vld [vmem:[%s3921_s28 + $0x708] sm:$0xff]  ;;  %420 = vst [vmem:[%s3926_s29 + $0x378] sm:$0xff] %v419_v47 }
  0x4e   : > { %422 = vst [vmem:[%s3926_s29 + $0x380] sm:$0xff] %v421_v48  ;;  %424 = vst [vmem:[%s3926_s29 + $0x388] sm:$0xff] %v423_v49  ;;  %v425_v50 = vld [vmem:[%s3921_s28 + $0x720] sm:$0xff]  ;;  %v427_v51 = vld [vmem:[%s3921_s28 + $0x728] sm:$0xff] }
  0x4f   : > { %v429_v52 = vld [vmem:[%s3921_s28 + $0x740] sm:$0xff]  ;;  %426 = vst [vmem:[%s3926_s29 + $0x390] sm:$0xff] %v425_v50  ;;  %428 = vst [vmem:[%s3926_s29 + $0x398] sm:$0xff] %v427_v51  ;;  %v431_v53 = vld [vmem:[%s3921_s28 + $0x748] sm:$0xff] }
  0x50   : > { %430 = vst [vmem:[%s3926_s29 + $0x3a0] sm:$0xff] %v429_v52  ;;  %v433_v54 = vld [vmem:[%s3921_s28 + $0x760] sm:$0xff]  ;;  %v435_v55 = vld [vmem:[%s3921_s28 + $0x768] sm:$0xff]  ;;  %432 = vst [vmem:[%s3926_s29 + $0x3a8] sm:$0xff] %v431_v53 }
  0x51   : > { %434 = vst [vmem:[%s3926_s29 + $0x3b0] sm:$0xff] %v433_v54  ;;  %436 = vst [vmem:[%s3926_s29 + $0x3b8] sm:$0xff] %v435_v55  ;;  %v437_v56 = vld [vmem:[%s3921_s28 + $0x780] sm:$0xff]  ;;  %v439_v57 = vld [vmem:[%s3921_s28 + $0x788] sm:$0xff] }
  0x52   : > { %v441_v58 = vld [vmem:[%s3921_s28 + $0x7a0] sm:$0xff]  ;;  %438 = vst [vmem:[%s3926_s29 + $0x3c0] sm:$0xff] %v437_v56  ;;  %440 = vst [vmem:[%s3926_s29 + $0x3c8] sm:$0xff] %v439_v57  ;;  %v443_v59 = vld [vmem:[%s3921_s28 + $0x7a8] sm:$0xff] }
  0x53   : > { %442 = vst [vmem:[%s3926_s29 + $0x3d0] sm:$0xff] %v441_v58  ;;  %v445_v60 = vld [vmem:[%s3921_s28 + $0x7c0] sm:$0xff]  ;;  %v447_v61 = vld [vmem:[%s3921_s28 + $0x7c8] sm:$0xff]  ;;  %444 = vst [vmem:[%s3926_s29 + $0x3d8] sm:$0xff] %v443_v59 }
  0x54   : > { %446 = vst [vmem:[%s3926_s29 + $0x3e0] sm:$0xff] %v445_v60  ;;  %448 = vst [vmem:[%s3926_s29 + $0x3e8] sm:$0xff] %v447_v61  ;;  %v449_v62 = vld [vmem:[%s3921_s28 + $0x7e0] sm:$0xff]  ;;  %v451_v63 = vld [vmem:[%s3921_s28 + $0x7e8] sm:$0xff] }
  0x55   : > { %v453_v0 = vld [vmem:[%s3921_s28 + $0x800] sm:$0xff]  ;;  %450 = vst [vmem:[%s3926_s29 + $0x3f0] sm:$0xff] %v449_v62  ;;  %452 = vst [vmem:[%s3926_s29 + $0x3f8] sm:$0xff] %v451_v63  ;;  %v455_v1 = vld [vmem:[%s3921_s28 + $0x808] sm:$0xff] }
  0x56   : > { %454 = vst [vmem:[%s3926_s29 + $0x400] sm:$0xff] %v453_v0  ;;  %v457_v2 = vld [vmem:[%s3921_s28 + $0x820] sm:$0xff]  ;;  %v459_v3 = vld [vmem:[%s3921_s28 + $0x828] sm:$0xff]  ;;  %456 = vst [vmem:[%s3926_s29 + $0x408] sm:$0xff] %v455_v1 }
  0x57   : > { %458 = vst [vmem:[%s3926_s29 + $0x410] sm:$0xff] %v457_v2  ;;  %460 = vst [vmem:[%s3926_s29 + $0x418] sm:$0xff] %v459_v3  ;;  %v461_v4 = vld [vmem:[%s3921_s28 + $0x840] sm:$0xff]  ;;  %v463_v5 = vld [vmem:[%s3921_s28 + $0x848] sm:$0xff] }
  0x58   : > { %v465_v6 = vld [vmem:[%s3921_s28 + $0x860] sm:$0xff]  ;;  %462 = vst [vmem:[%s3926_s29 + $0x420] sm:$0xff] %v461_v4  ;;  %464 = vst [vmem:[%s3926_s29 + $0x428] sm:$0xff] %v463_v5  ;;  %v467_v7 = vld [vmem:[%s3921_s28 + $0x868] sm:$0xff] }
  0x59   : > { %466 = vst [vmem:[%s3926_s29 + $0x430] sm:$0xff] %v465_v6  ;;  %v469_v8 = vld [vmem:[%s3921_s28 + $0x880] sm:$0xff]  ;;  %v471_v9 = vld [vmem:[%s3921_s28 + $0x888] sm:$0xff]  ;;  %468 = vst [vmem:[%s3926_s29 + $0x438] sm:$0xff] %v467_v7 }
  0x5a   : > { %470 = vst [vmem:[%s3926_s29 + $0x440] sm:$0xff] %v469_v8  ;;  %472 = vst [vmem:[%s3926_s29 + $0x448] sm:$0xff] %v471_v9  ;;  %v473_v10 = vld [vmem:[%s3921_s28 + $0x8a0] sm:$0xff]  ;;  %v475_v11 = vld [vmem:[%s3921_s28 + $0x8a8] sm:$0xff] }
  0x5b   : > { %v477_v12 = vld [vmem:[%s3921_s28 + $0x8c0] sm:$0xff]  ;;  %474 = vst [vmem:[%s3926_s29 + $0x450] sm:$0xff] %v473_v10  ;;  %476 = vst [vmem:[%s3926_s29 + $0x458] sm:$0xff] %v475_v11  ;;  %v479_v13 = vld [vmem:[%s3921_s28 + $0x8c8] sm:$0xff] }
  0x5c   : > { %478 = vst [vmem:[%s3926_s29 + $0x460] sm:$0xff] %v477_v12  ;;  %v481_v14 = vld [vmem:[%s3921_s28 + $0x8e0] sm:$0xff]  ;;  %v483_v15 = vld [vmem:[%s3921_s28 + $0x8e8] sm:$0xff]  ;;  %480 = vst [vmem:[%s3926_s29 + $0x468] sm:$0xff] %v479_v13 }
  0x5d   : > { %482 = vst [vmem:[%s3926_s29 + $0x470] sm:$0xff] %v481_v14  ;;  %484 = vst [vmem:[%s3926_s29 + $0x478] sm:$0xff] %v483_v15  ;;  %v485_v16 = vld [vmem:[%s3921_s28 + $0x900] sm:$0xff]  ;;  %v487_v17 = vld [vmem:[%s3921_s28 + $0x908] sm:$0xff] }
  0x5e   : > { %v489_v18 = vld [vmem:[%s3921_s28 + $0x920] sm:$0xff]  ;;  %486 = vst [vmem:[%s3926_s29 + $0x480] sm:$0xff] %v485_v16  ;;  %488 = vst [vmem:[%s3926_s29 + $0x488] sm:$0xff] %v487_v17  ;;  %v491_v19 = vld [vmem:[%s3921_s28 + $0x928] sm:$0xff] }
  0x5f   : > { %490 = vst [vmem:[%s3926_s29 + $0x490] sm:$0xff] %v489_v18  ;;  %v493_v20 = vld [vmem:[%s3921_s28 + $0x940] sm:$0xff]  ;;  %v495_v21 = vld [vmem:[%s3921_s28 + $0x948] sm:$0xff]  ;;  %492 = vst [vmem:[%s3926_s29 + $0x498] sm:$0xff] %v491_v19 }
  0x60   : > { %494 = vst [vmem:[%s3926_s29 + $0x4a0] sm:$0xff] %v493_v20  ;;  %496 = vst [vmem:[%s3926_s29 + $0x4a8] sm:$0xff] %v495_v21  ;;  %v497_v22 = vld [vmem:[%s3921_s28 + $0x960] sm:$0xff]  ;;  %v499_v23 = vld [vmem:[%s3921_s28 + $0x968] sm:$0xff] }
  0x61   : > { %v501_v24 = vld [vmem:[%s3921_s28 + $0x980] sm:$0xff]  ;;  %498 = vst [vmem:[%s3926_s29 + $0x4b0] sm:$0xff] %v497_v22  ;;  %500 = vst [vmem:[%s3926_s29 + $0x4b8] sm:$0xff] %v499_v23  ;;  %v503_v25 = vld [vmem:[%s3921_s28 + $0x988] sm:$0xff] }
  0x62   : > { %502 = vst [vmem:[%s3926_s29 + $0x4c0] sm:$0xff] %v501_v24  ;;  %v505_v26 = vld [vmem:[%s3921_s28 + $0x9a0] sm:$0xff]  ;;  %v507_v27 = vld [vmem:[%s3921_s28 + $0x9a8] sm:$0xff]  ;;  %504 = vst [vmem:[%s3926_s29 + $0x4c8] sm:$0xff] %v503_v25 }
  0x63   : > { %506 = vst [vmem:[%s3926_s29 + $0x4d0] sm:$0xff] %v505_v26  ;;  %508 = vst [vmem:[%s3926_s29 + $0x4d8] sm:$0xff] %v507_v27  ;;  %v509_v28 = vld [vmem:[%s3921_s28 + $0x9c0] sm:$0xff]  ;;  %v511_v29 = vld [vmem:[%s3921_s28 + $0x9c8] sm:$0xff] }
  0x64   : > { %v513_v30 = vld [vmem:[%s3921_s28 + $0x9e0] sm:$0xff]  ;;  %510 = vst [vmem:[%s3926_s29 + $0x4e0] sm:$0xff] %v509_v28  ;;  %512 = vst [vmem:[%s3926_s29 + $0x4e8] sm:$0xff] %v511_v29  ;;  %v515_v31 = vld [vmem:[%s3921_s28 + $0x9e8] sm:$0xff] }
  0x65   : > { %514 = vst [vmem:[%s3926_s29 + $0x4f0] sm:$0xff] %v513_v30  ;;  %v517_v32 = vld [vmem:[%s3921_s28 + $0xa00] sm:$0xff]  ;;  %v519_v33 = vld [vmem:[%s3921_s28 + $0xa08] sm:$0xff]  ;;  %516 = vst [vmem:[%s3926_s29 + $0x4f8] sm:$0xff] %v515_v31 }
  0x66   : > { %518 = vst [vmem:[%s3926_s29 + $0x500] sm:$0xff] %v517_v32  ;;  %520 = vst [vmem:[%s3926_s29 + $0x508] sm:$0xff] %v519_v33  ;;  %v521_v34 = vld [vmem:[%s3921_s28 + $0xa20] sm:$0xff]  ;;  %v523_v35 = vld [vmem:[%s3921_s28 + $0xa28] sm:$0xff] }
  0x67   : > { %v525_v36 = vld [vmem:[%s3921_s28 + $0xa40] sm:$0xff]  ;;  %522 = vst [vmem:[%s3926_s29 + $0x510] sm:$0xff] %v521_v34  ;;  %524 = vst [vmem:[%s3926_s29 + $0x518] sm:$0xff] %v523_v35  ;;  %v527_v37 = vld [vmem:[%s3921_s28 + $0xa48] sm:$0xff] }
  0x68   : > { %526 = vst [vmem:[%s3926_s29 + $0x520] sm:$0xff] %v525_v36  ;;  %v529_v38 = vld [vmem:[%s3921_s28 + $0xa60] sm:$0xff]  ;;  %v531_v39 = vld [vmem:[%s3921_s28 + $0xa68] sm:$0xff]  ;;  %528 = vst [vmem:[%s3926_s29 + $0x528] sm:$0xff] %v527_v37 }
  0x69   : > { %530 = vst [vmem:[%s3926_s29 + $0x530] sm:$0xff] %v529_v38  ;;  %532 = vst [vmem:[%s3926_s29 + $0x538] sm:$0xff] %v531_v39  ;;  %v533_v40 = vld [vmem:[%s3921_s28 + $0xa80] sm:$0xff]  ;;  %v535_v41 = vld [vmem:[%s3921_s28 + $0xa88] sm:$0xff] }
  0x6a   : > { %v537_v42 = vld [vmem:[%s3921_s28 + $0xaa0] sm:$0xff]  ;;  %534 = vst [vmem:[%s3926_s29 + $0x540] sm:$0xff] %v533_v40  ;;  %536 = vst [vmem:[%s3926_s29 + $0x548] sm:$0xff] %v535_v41  ;;  %v539_v43 = vld [vmem:[%s3921_s28 + $0xaa8] sm:$0xff] }
  0x6b   : > { %538 = vst [vmem:[%s3926_s29 + $0x550] sm:$0xff] %v537_v42  ;;  %v541_v44 = vld [vmem:[%s3921_s28 + $0xac0] sm:$0xff]  ;;  %v543_v45 = vld [vmem:[%s3921_s28 + $0xac8] sm:$0xff]  ;;  %540 = vst [vmem:[%s3926_s29 + $0x558] sm:$0xff] %v539_v43 }
  0x6c   : > { %542 = vst [vmem:[%s3926_s29 + $0x560] sm:$0xff] %v541_v44  ;;  %544 = vst [vmem:[%s3926_s29 + $0x568] sm:$0xff] %v543_v45  ;;  %v545_v46 = vld [vmem:[%s3921_s28 + $0xae0] sm:$0xff]  ;;  %v547_v47 = vld [vmem:[%s3921_s28 + $0xae8] sm:$0xff] }
  0x6d   : > { %v549_v48 = vld [vmem:[%s3921_s28 + $0xb00] sm:$0xff]  ;;  %546 = vst [vmem:[%s3926_s29 + $0x570] sm:$0xff] %v545_v46  ;;  %548 = vst [vmem:[%s3926_s29 + $0x578] sm:$0xff] %v547_v47  ;;  %v551_v49 = vld [vmem:[%s3921_s28 + $0xb08] sm:$0xff] }
  0x6e   : > { %550 = vst [vmem:[%s3926_s29 + $0x580] sm:$0xff] %v549_v48  ;;  %v553_v50 = vld [vmem:[%s3921_s28 + $0xb20] sm:$0xff]  ;;  %v555_v51 = vld [vmem:[%s3921_s28 + $0xb28] sm:$0xff]  ;;  %552 = vst [vmem:[%s3926_s29 + $0x588] sm:$0xff] %v551_v49 }
  0x6f   : > { %554 = vst [vmem:[%s3926_s29 + $0x590] sm:$0xff] %v553_v50  ;;  %556 = vst [vmem:[%s3926_s29 + $0x598] sm:$0xff] %v555_v51  ;;  %v557_v52 = vld [vmem:[%s3921_s28 + $0xb40] sm:$0xff]  ;;  %v559_v53 = vld [vmem:[%s3921_s28 + $0xb48] sm:$0xff] }
  0x70   : > { %v561_v54 = vld [vmem:[%s3921_s28 + $0xb60] sm:$0xff]  ;;  %558 = vst [vmem:[%s3926_s29 + $0x5a0] sm:$0xff] %v557_v52  ;;  %560 = vst [vmem:[%s3926_s29 + $0x5a8] sm:$0xff] %v559_v53  ;;  %v563_v55 = vld [vmem:[%s3921_s28 + $0xb68] sm:$0xff] }
  0x71   : > { %562 = vst [vmem:[%s3926_s29 + $0x5b0] sm:$0xff] %v561_v54  ;;  %v565_v56 = vld [vmem:[%s3921_s28 + $0xb80] sm:$0xff]  ;;  %v567_v57 = vld [vmem:[%s3921_s28 + $0xb88] sm:$0xff]  ;;  %564 = vst [vmem:[%s3926_s29 + $0x5b8] sm:$0xff] %v563_v55 }
  0x72   : > { %566 = vst [vmem:[%s3926_s29 + $0x5c0] sm:$0xff] %v565_v56  ;;  %568 = vst [vmem:[%s3926_s29 + $0x5c8] sm:$0xff] %v567_v57  ;;  %v569_v58 = vld [vmem:[%s3921_s28 + $0xba0] sm:$0xff]  ;;  %v571_v59 = vld [vmem:[%s3921_s28 + $0xba8] sm:$0xff] }
  0x73   : > { %v573_v60 = vld [vmem:[%s3921_s28 + $0xbc0] sm:$0xff]  ;;  %570 = vst [vmem:[%s3926_s29 + $0x5d0] sm:$0xff] %v569_v58  ;;  %572 = vst [vmem:[%s3926_s29 + $0x5d8] sm:$0xff] %v571_v59  ;;  %v575_v61 = vld [vmem:[%s3921_s28 + $0xbc8] sm:$0xff] }
  0x74   : > { %574 = vst [vmem:[%s3926_s29 + $0x5e0] sm:$0xff] %v573_v60  ;;  %v577_v62 = vld [vmem:[%s3921_s28 + $0xbe0] sm:$0xff]  ;;  %v579_v63 = vld [vmem:[%s3921_s28 + $0xbe8] sm:$0xff]  ;;  %576 = vst [vmem:[%s3926_s29 + $0x5e8] sm:$0xff] %v575_v61 }
  0x75   : > { %578 = vst [vmem:[%s3926_s29 + $0x5f0] sm:$0xff] %v577_v62  ;;  %580 = vst [vmem:[%s3926_s29 + $0x5f8] sm:$0xff] %v579_v63  ;;  %v581_v0 = vld [vmem:[%s3921_s28 + $0xc00] sm:$0xff]  ;;  %v583_v1 = vld [vmem:[%s3921_s28 + $0xc08] sm:$0xff] }
  0x76   : > { %v585_v2 = vld [vmem:[%s3921_s28 + $0xc20] sm:$0xff]  ;;  %582 = vst [vmem:[%s3926_s29 + $0x600] sm:$0xff] %v581_v0  ;;  %584 = vst [vmem:[%s3926_s29 + $0x608] sm:$0xff] %v583_v1  ;;  %v587_v3 = vld [vmem:[%s3921_s28 + $0xc28] sm:$0xff] }
  0x77   : > { %586 = vst [vmem:[%s3926_s29 + $0x610] sm:$0xff] %v585_v2  ;;  %v589_v4 = vld [vmem:[%s3921_s28 + $0xc40] sm:$0xff]  ;;  %v591_v5 = vld [vmem:[%s3921_s28 + $0xc48] sm:$0xff]  ;;  %588 = vst [vmem:[%s3926_s29 + $0x618] sm:$0xff] %v587_v3 }
  0x78   : > { %590 = vst [vmem:[%s3926_s29 + $0x620] sm:$0xff] %v589_v4  ;;  %592 = vst [vmem:[%s3926_s29 + $0x628] sm:$0xff] %v591_v5  ;;  %v593_v6 = vld [vmem:[%s3921_s28 + $0xc60] sm:$0xff]  ;;  %v595_v7 = vld [vmem:[%s3921_s28 + $0xc68] sm:$0xff] }
  0x79   : > { %v597_v8 = vld [vmem:[%s3921_s28 + $0xc80] sm:$0xff]  ;;  %594 = vst [vmem:[%s3926_s29 + $0x630] sm:$0xff] %v593_v6  ;;  %596 = vst [vmem:[%s3926_s29 + $0x638] sm:$0xff] %v595_v7  ;;  %v599_v9 = vld [vmem:[%s3921_s28 + $0xc88] sm:$0xff] }
  0x7a   : > { %598 = vst [vmem:[%s3926_s29 + $0x640] sm:$0xff] %v597_v8  ;;  %v601_v10 = vld [vmem:[%s3921_s28 + $0xca0] sm:$0xff]  ;;  %v603_v11 = vld [vmem:[%s3921_s28 + $0xca8] sm:$0xff]  ;;  %600 = vst [vmem:[%s3926_s29 + $0x648] sm:$0xff] %v599_v9 }
  0x7b   : > { %602 = vst [vmem:[%s3926_s29 + $0x650] sm:$0xff] %v601_v10  ;;  %604 = vst [vmem:[%s3926_s29 + $0x658] sm:$0xff] %v603_v11  ;;  %v605_v12 = vld [vmem:[%s3921_s28 + $0xcc0] sm:$0xff]  ;;  %v607_v13 = vld [vmem:[%s3921_s28 + $0xcc8] sm:$0xff] }
  0x7c   : > { %v609_v14 = vld [vmem:[%s3921_s28 + $0xce0] sm:$0xff]  ;;  %606 = vst [vmem:[%s3926_s29 + $0x660] sm:$0xff] %v605_v12  ;;  %608 = vst [vmem:[%s3926_s29 + $0x668] sm:$0xff] %v607_v13  ;;  %v611_v15 = vld [vmem:[%s3921_s28 + $0xce8] sm:$0xff] }
  0x7d   : > { %610 = vst [vmem:[%s3926_s29 + $0x670] sm:$0xff] %v609_v14  ;;  %v613_v16 = vld [vmem:[%s3921_s28 + $0xd00] sm:$0xff]  ;;  %v615_v17 = vld [vmem:[%s3921_s28 + $0xd08] sm:$0xff]  ;;  %612 = vst [vmem:[%s3926_s29 + $0x678] sm:$0xff] %v611_v15 }
  0x7e   : > { %614 = vst [vmem:[%s3926_s29 + $0x680] sm:$0xff] %v613_v16  ;;  %616 = vst [vmem:[%s3926_s29 + $0x688] sm:$0xff] %v615_v17  ;;  %v617_v18 = vld [vmem:[%s3921_s28 + $0xd20] sm:$0xff]  ;;  %v619_v19 = vld [vmem:[%s3921_s28 + $0xd28] sm:$0xff] }
  0x7f   : > { %v621_v20 = vld [vmem:[%s3921_s28 + $0xd40] sm:$0xff]  ;;  %618 = vst [vmem:[%s3926_s29 + $0x690] sm:$0xff] %v617_v18  ;;  %620 = vst [vmem:[%s3926_s29 + $0x698] sm:$0xff] %v619_v19  ;;  %v623_v21 = vld [vmem:[%s3921_s28 + $0xd48] sm:$0xff] }
  0x80   : > { %622 = vst [vmem:[%s3926_s29 + $0x6a0] sm:$0xff] %v621_v20  ;;  %v625_v22 = vld [vmem:[%s3921_s28 + $0xd60] sm:$0xff]  ;;  %v627_v23 = vld [vmem:[%s3921_s28 + $0xd68] sm:$0xff]  ;;  %624 = vst [vmem:[%s3926_s29 + $0x6a8] sm:$0xff] %v623_v21 }
  0x81   : > { %626 = vst [vmem:[%s3926_s29 + $0x6b0] sm:$0xff] %v625_v22  ;;  %628 = vst [vmem:[%s3926_s29 + $0x6b8] sm:$0xff] %v627_v23  ;;  %v629_v24 = vld [vmem:[%s3921_s28 + $0xd80] sm:$0xff]  ;;  %v631_v25 = vld [vmem:[%s3921_s28 + $0xd88] sm:$0xff] }
  0x82   : > { %v633_v26 = vld [vmem:[%s3921_s28 + $0xda0] sm:$0xff]  ;;  %630 = vst [vmem:[%s3926_s29 + $0x6c0] sm:$0xff] %v629_v24  ;;  %632 = vst [vmem:[%s3926_s29 + $0x6c8] sm:$0xff] %v631_v25  ;;  %v635_v27 = vld [vmem:[%s3921_s28 + $0xda8] sm:$0xff] }
  0x83   : > { %634 = vst [vmem:[%s3926_s29 + $0x6d0] sm:$0xff] %v633_v26  ;;  %v637_v28 = vld [vmem:[%s3921_s28 + $0xdc0] sm:$0xff]  ;;  %v639_v29 = vld [vmem:[%s3921_s28 + $0xdc8] sm:$0xff]  ;;  %636 = vst [vmem:[%s3926_s29 + $0x6d8] sm:$0xff] %v635_v27 }
  0x84   : > { %638 = vst [vmem:[%s3926_s29 + $0x6e0] sm:$0xff] %v637_v28  ;;  %640 = vst [vmem:[%s3926_s29 + $0x6e8] sm:$0xff] %v639_v29  ;;  %v641_v30 = vld [vmem:[%s3921_s28 + $0xde0] sm:$0xff]  ;;  %v643_v31 = vld [vmem:[%s3921_s28 + $0xde8] sm:$0xff] }
  0x85   : > { %v645_v32 = vld [vmem:[%s3921_s28 + $0xe00] sm:$0xff]  ;;  %642 = vst [vmem:[%s3926_s29 + $0x6f0] sm:$0xff] %v641_v30  ;;  %644 = vst [vmem:[%s3926_s29 + $0x6f8] sm:$0xff] %v643_v31  ;;  %v647_v33 = vld [vmem:[%s3921_s28 + $0xe08] sm:$0xff] }
  0x86   : > { %646 = vst [vmem:[%s3926_s29 + $0x700] sm:$0xff] %v645_v32  ;;  %v649_v34 = vld [vmem:[%s3921_s28 + $0xe20] sm:$0xff]  ;;  %v651_v35 = vld [vmem:[%s3921_s28 + $0xe28] sm:$0xff]  ;;  %648 = vst [vmem:[%s3926_s29 + $0x708] sm:$0xff] %v647_v33 }
  0x87   : > { %650 = vst [vmem:[%s3926_s29 + $0x710] sm:$0xff] %v649_v34  ;;  %652 = vst [vmem:[%s3926_s29 + $0x718] sm:$0xff] %v651_v35  ;;  %v653_v36 = vld [vmem:[%s3921_s28 + $0xe40] sm:$0xff]  ;;  %v655_v37 = vld [vmem:[%s3921_s28 + $0xe48] sm:$0xff] }
  0x88   : > { %v657_v38 = vld [vmem:[%s3921_s28 + $0xe60] sm:$0xff]  ;;  %654 = vst [vmem:[%s3926_s29 + $0x720] sm:$0xff] %v653_v36  ;;  %656 = vst [vmem:[%s3926_s29 + $0x728] sm:$0xff] %v655_v37  ;;  %v659_v39 = vld [vmem:[%s3921_s28 + $0xe68] sm:$0xff] }
  0x89   : > { %658 = vst [vmem:[%s3926_s29 + $0x730] sm:$0xff] %v657_v38  ;;  %v661_v40 = vld [vmem:[%s3921_s28 + $0xe80] sm:$0xff]  ;;  %v663_v41 = vld [vmem:[%s3921_s28 + $0xe88] sm:$0xff]  ;;  %660 = vst [vmem:[%s3926_s29 + $0x738] sm:$0xff] %v659_v39 }
  0x8a   : > { %662 = vst [vmem:[%s3926_s29 + $0x740] sm:$0xff] %v661_v40  ;;  %664 = vst [vmem:[%s3926_s29 + $0x748] sm:$0xff] %v663_v41  ;;  %v665_v42 = vld [vmem:[%s3921_s28 + $0xea0] sm:$0xff]  ;;  %v667_v43 = vld [vmem:[%s3921_s28 + $0xea8] sm:$0xff] }
  0x8b   : > { %v669_v44 = vld [vmem:[%s3921_s28 + $0xec0] sm:$0xff]  ;;  %666 = vst [vmem:[%s3926_s29 + $0x750] sm:$0xff] %v665_v42  ;;  %668 = vst [vmem:[%s3926_s29 + $0x758] sm:$0xff] %v667_v43  ;;  %v671_v45 = vld [vmem:[%s3921_s28 + $0xec8] sm:$0xff] }
  0x8c   : > { %670 = vst [vmem:[%s3926_s29 + $0x760] sm:$0xff] %v669_v44  ;;  %v673_v46 = vld [vmem:[%s3921_s28 + $0xee0] sm:$0xff]  ;;  %v675_v47 = vld [vmem:[%s3921_s28 + $0xee8] sm:$0xff]  ;;  %672 = vst [vmem:[%s3926_s29 + $0x768] sm:$0xff] %v671_v45 }
  0x8d   : > { %674 = vst [vmem:[%s3926_s29 + $0x770] sm:$0xff] %v673_v46  ;;  %676 = vst [vmem:[%s3926_s29 + $0x778] sm:$0xff] %v675_v47  ;;  %v677_v48 = vld [vmem:[%s3921_s28 + $0xf00] sm:$0xff]  ;;  %v679_v49 = vld [vmem:[%s3921_s28 + $0xf08] sm:$0xff] }
  0x8e   : > { %v681_v50 = vld [vmem:[%s3921_s28 + $0xf20] sm:$0xff]  ;;  %678 = vst [vmem:[%s3926_s29 + $0x780] sm:$0xff] %v677_v48  ;;  %680 = vst [vmem:[%s3926_s29 + $0x788] sm:$0xff] %v679_v49  ;;  %v683_v51 = vld [vmem:[%s3921_s28 + $0xf28] sm:$0xff] }
  0x8f   : > { %682 = vst [vmem:[%s3926_s29 + $0x790] sm:$0xff] %v681_v50  ;;  %v685_v52 = vld [vmem:[%s3921_s28 + $0xf40] sm:$0xff]  ;;  %v687_v53 = vld [vmem:[%s3921_s28 + $0xf48] sm:$0xff]  ;;  %684 = vst [vmem:[%s3926_s29 + $0x798] sm:$0xff] %v683_v51 }
  0x90   : > { %686 = vst [vmem:[%s3926_s29 + $0x7a0] sm:$0xff] %v685_v52  ;;  %688 = vst [vmem:[%s3926_s29 + $0x7a8] sm:$0xff] %v687_v53  ;;  %v689_v54 = vld [vmem:[%s3921_s28 + $0xf60] sm:$0xff]  ;;  %v691_v55 = vld [vmem:[%s3921_s28 + $0xf68] sm:$0xff] }
  0x91   : > { %v693_v56 = vld [vmem:[%s3921_s28 + $0xf80] sm:$0xff]  ;;  %690 = vst [vmem:[%s3926_s29 + $0x7b0] sm:$0xff] %v689_v54  ;;  %692 = vst [vmem:[%s3926_s29 + $0x7b8] sm:$0xff] %v691_v55  ;;  %v695_v57 = vld [vmem:[%s3921_s28 + $0xf88] sm:$0xff] }
  0x92   : > { %694 = vst [vmem:[%s3926_s29 + $0x7c0] sm:$0xff] %v693_v56  ;;  %v697_v58 = vld [vmem:[%s3921_s28 + $0xfa0] sm:$0xff]  ;;  %v699_v59 = vld [vmem:[%s3921_s28 + $0xfa8] sm:$0xff]  ;;  %696 = vst [vmem:[%s3926_s29 + $0x7c8] sm:$0xff] %v695_v57 }
  0x93   : > { %698 = vst [vmem:[%s3926_s29 + $0x7d0] sm:$0xff] %v697_v58  ;;  %700 = vst [vmem:[%s3926_s29 + $0x7d8] sm:$0xff] %v699_v59  ;;  %v701_v60 = vld [vmem:[%s3921_s28 + $0xfc0] sm:$0xff]  ;;  %v703_v61 = vld [vmem:[%s3921_s28 + $0xfc8] sm:$0xff] }
  0x94   : > { %v705_v62 = vld [vmem:[%s3921_s28 + $0xfe0] sm:$0xff]  ;;  %702 = vst [vmem:[%s3926_s29 + $0x7e0] sm:$0xff] %v701_v60  ;;  %704 = vst [vmem:[%s3926_s29 + $0x7e8] sm:$0xff] %v703_v61  ;;  %v707_v63 = vld [vmem:[%s3921_s28 + $0xfe8] sm:$0xff] }
  0x95   : > { %706 = vst [vmem:[%s3926_s29 + $0x7f0] sm:$0xff] %v705_v62  ;;  %708 = vst [vmem:[%s3926_s29 + $0x7f8] sm:$0xff] %v707_v63 }
  0x96 PF: > { %p3042_p8 = scmp.ge.s32.totalorder %s3851_s16, 1  ;;  %p721_p9 = scmp.lt.s32.totalorder %s3851_s16, 3 }
  0x98   : > { %p722_p10 = pnand %p3042_p8, %p721_p9 }
  0x99   : > { %s728_s30 = sand.u32 (!%p722_p10), 1, %s3835_s12   ;;  %v805_v0 = vld [vmem:[%s4837_s0] sm:$0xff] (!%p722_p10)  ;;  %s3045_s4 = sshll.u32 (!%p722_p10), %s3843_s14, 2 }
  0x9a   : > { %725 = sbr.rel (%p722_p10) target bundleno = 691 (0x2b3), region = 51  ;;  %v809_v1 = vld [vmem:[%s4837_s0 + $0x20] sm:$0xff] (!%p722_p10)  ;;  %s3043_s8 = sshll.u32 (!%p722_p10), %s728_s30, 11 }
  0x9b   : > { %v4448_v2 = vcombine.low (!%p722_p10), %v805_v0, %v809_v1  ;;  %v3047_v3 = vcombine.high (!%p722_p10), %v805_v0, %v809_v1  ;;  %s4450_s9 = scalar_lea.vmem (!%p722_p10), [#allocation3], %s3043_s8  ;;  %p779_p11 = scmp.lt.s32.totalorder (!%p722_p10), %s3045_s4, 7 }
  0x9c   : > { %v3381_v4 = vld [vmem:[%s4450_s9 + $0x4] ss:$16 sps:$4 sm:$0xff] (!%p722_p10)   ;;  %v3383_v5 = vld [vmem:[%s4450_s9 + $0xc] ss:$16 sps:$4 sm:$0xff] (!%p722_p10)   ;;  %v3385_v6 = vld [vmem:[%s4450_s9] ss:$16 sps:$4 sm:$0xff] (!%p722_p10)  }
  0x9d   : > { %2421 = vmatprep.mubr.bf16.mxu0 (!%p722_p10), %v3047_v3  ;;  %2593 = vmatprep.mubr.bf16.mxu1 (!%p722_p10), %v3047_v3  ;;  %v3386_v7 = vld [vmem:[%s4450_s9 + $0x8] ss:$16 sps:$4 sm:$0xff] (!%p722_p10)   ;;  %v3387_v8 = vld [vmem:[%s4450_s9 + $0x24] ss:$16 sps:$4 sm:$0xff] (!%p722_p10)   ;;  %v3389_v9 = vld [vmem:[%s4450_s9 + $0x2c] ss:$16 sps:$4 sm:$0xff] (!%p722_p10)  }
  0x9e   : > { %2389 = vmatprep.subr.bf16.mxu0 (!%p722_p10), %v3381_v4  ;;  %2561 = vmatprep.subr.bf16.mxu1 (!%p722_p10), %v3383_v5  ;;  %v3391_v10 = vld [vmem:[%s4450_s9 + $0x20] ss:$16 sps:$4 sm:$0xff] (!%p722_p10)   ;;  %v3392_v11 = vld [vmem:[%s4450_s9 + $0x28] ss:$16 sps:$4 sm:$0xff] (!%p722_p10)   ;;  %v3393_v12 = vld [vmem:[%s4450_s9 + $0x44] ss:$16 sps:$4 sm:$0xff] (!%p722_p10)  }
  0x9f   : > { %2390 = vmatpush1.bf16.msra.mxu0 (!%p722_p10), %v3385_v6  ;;  %2562 = vmatpush1.bf16.msra.mxu1 (!%p722_p10), %v3386_v7  ;;  %v3395_v13 = vld [vmem:[%s4450_s9 + $0x4c] ss:$16 sps:$4 sm:$0xff] (!%p722_p10)   ;;  %v3397_v14 = vld [vmem:[%s4450_s9 + $0x40] ss:$16 sps:$4 sm:$0xff] (!%p722_p10)   ;;  %v3398_v15 = vld [vmem:[%s4450_s9 + $0x48] ss:$16 sps:$4 sm:$0xff] (!%p722_p10)  }
  0xa0   : > { %2391 = vmatprep.subr.bf16.mxu0 (!%p722_p10), %v3387_v8  ;;  %2563 = vmatprep.subr.bf16.mxu1 (!%p722_p10), %v3389_v9  ;;  %v3399_v16 = vld [vmem:[%s4450_s9 + $0x64] ss:$16 sps:$4 sm:$0xff] (!%p722_p10)   ;;  %v3401_v17 = vld [vmem:[%s4450_s9 + $0x6c] ss:$16 sps:$4 sm:$0xff] (!%p722_p10)   ;;  %v3403_v18 = vld [vmem:[%s4450_s9 + $0x60] ss:$16 sps:$4 sm:$0xff] (!%p722_p10)  }
  0xa1   : > { %v3404_v19 = vld [vmem:[%s4450_s9 + $0x68] ss:$16 sps:$4 sm:$0xff]   ;;  %v3405_v20 = vld [vmem:[%s4450_s9 + $0x84] ss:$16 sps:$4 sm:$0xff]   ;;  %v3407_v21 = vld [vmem:[%s4450_s9 + $0x8c] ss:$16 sps:$4 sm:$0xff]  }
  0xa2   : > { %v3409_v22 = vld [vmem:[%s4450_s9 + $0x80] ss:$16 sps:$4 sm:$0xff]   ;;  %v3410_v23 = vld [vmem:[%s4450_s9 + $0x88] ss:$16 sps:$4 sm:$0xff]   ;;  %v3411_v24 = vld [vmem:[%s4450_s9 + $0xa4] ss:$16 sps:$4 sm:$0xff]  }
  0xa3   : > { %2392 = vmatpush1.bf16.msra.mxu0 %v3391_v10  ;;  %2564 = vmatpush1.bf16.msra.mxu1 %v3392_v11  ;;  %v3413_v25 = vld [vmem:[%s4450_s9 + $0xac] ss:$16 sps:$4 sm:$0xff]   ;;  %v3415_v26 = vld [vmem:[%s4450_s9 + $0xa0] ss:$16 sps:$4 sm:$0xff]   ;;  %v3416_v27 = vld [vmem:[%s4450_s9 + $0xa8] ss:$16 sps:$4 sm:$0xff]  }
  0xa4   : > { %2393 = vmatprep.subr.bf16.mxu0 %v3393_v12  ;;  %2565 = vmatprep.subr.bf16.mxu1 %v3395_v13  ;;  %v3417_v28 = vld [vmem:[%s4450_s9 + $0xc4] ss:$16 sps:$4 sm:$0xff]   ;;  %v3419_v29 = vld [vmem:[%s4450_s9 + $0xcc] ss:$16 sps:$4 sm:$0xff]   ;;  %v3421_v30 = vld [vmem:[%s4450_s9 + $0xc0] ss:$16 sps:$4 sm:$0xff]  }
  0xa5   : > { %v3422_v31 = vld [vmem:[%s4450_s9 + $0xc8] ss:$16 sps:$4 sm:$0xff]   ;;  %v3423_v32 = vld [vmem:[%s4450_s9 + $0xe4] ss:$16 sps:$4 sm:$0xff]   ;;  %v3425_v33 = vld [vmem:[%s4450_s9 + $0xec] ss:$16 sps:$4 sm:$0xff]  }
  0xa6   : > { %v3427_v34 = vld [vmem:[%s4450_s9 + $0xe0] ss:$16 sps:$4 sm:$0xff]   ;;  %v3428_v35 = vld [vmem:[%s4450_s9 + $0xe8] ss:$16 sps:$4 sm:$0xff]   ;;  %v3429_v36 = vld [vmem:[%s4450_s9 + $0x104] ss:$16 sps:$4 sm:$0xff]  }
  0xa7   : > { %2394 = vmatpush1.bf16.msra.mxu0 %v3397_v14  ;;  %2566 = vmatpush1.bf16.msra.mxu1 %v3398_v15  ;;  %v3431_v37 = vld [vmem:[%s4450_s9 + $0x10c] ss:$16 sps:$4 sm:$0xff]   ;;  %v3433_v38 = vld [vmem:[%s4450_s9 + $0x100] ss:$16 sps:$4 sm:$0xff]   ;;  %v3434_v39 = vld [vmem:[%s4450_s9 + $0x108] ss:$16 sps:$4 sm:$0xff]  }
  0xa8   : > { %2395 = vmatprep.subr.bf16.mxu0 %v3399_v16  ;;  %2567 = vmatprep.subr.bf16.mxu1 %v3401_v17  ;;  %v3435_v40 = vld [vmem:[%s4450_s9 + $0x124] ss:$16 sps:$4 sm:$0xff]   ;;  %v3437_v41 = vld [vmem:[%s4450_s9 + $0x12c] ss:$16 sps:$4 sm:$0xff]   ;;  %v3439_v42 = vld [vmem:[%s4450_s9 + $0x120] ss:$16 sps:$4 sm:$0xff]  }
  0xa9   : > { %v3440_v43 = vld [vmem:[%s4450_s9 + $0x128] ss:$16 sps:$4 sm:$0xff]   ;;  %v3441_v44 = vld [vmem:[%s4450_s9 + $0x144] ss:$16 sps:$4 sm:$0xff]   ;;  %v3443_v45 = vld [vmem:[%s4450_s9 + $0x14c] ss:$16 sps:$4 sm:$0xff]  }
  0xaa   : > { %v3445_v46 = vld [vmem:[%s4450_s9 + $0x140] ss:$16 sps:$4 sm:$0xff]   ;;  %v3446_v47 = vld [vmem:[%s4450_s9 + $0x148] ss:$16 sps:$4 sm:$0xff]   ;;  %v3447_v48 = vld [vmem:[%s4450_s9 + $0x164] ss:$16 sps:$4 sm:$0xff]  }
  0xab   : > { %2396 = vmatpush1.bf16.msra.mxu0 %v3403_v18  ;;  %2568 = vmatpush1.bf16.msra.mxu1 %v3404_v19  ;;  %v3449_v49 = vld [vmem:[%s4450_s9 + $0x16c] ss:$16 sps:$4 sm:$0xff]   ;;  %v3451_v50 = vld [vmem:[%s4450_s9 + $0x160] ss:$16 sps:$4 sm:$0xff]   ;;  %v3452_v51 = vld [vmem:[%s4450_s9 + $0x168] ss:$16 sps:$4 sm:$0xff]  }
  0xac   : > { %2397 = vmatprep.subr.bf16.mxu0 %v3405_v20  ;;  %2569 = vmatprep.subr.bf16.mxu1 %v3407_v21  ;;  %v3453_v52 = vld [vmem:[%s4450_s9 + $0x184] ss:$16 sps:$4 sm:$0xff]   ;;  %v3455_v53 = vld [vmem:[%s4450_s9 + $0x18c] ss:$16 sps:$4 sm:$0xff]   ;;  %v3457_v54 = vld [vmem:[%s4450_s9 + $0x180] ss:$16 sps:$4 sm:$0xff]  }
  0xad   : > { %v3458_v55 = vld [vmem:[%s4450_s9 + $0x188] ss:$16 sps:$4 sm:$0xff]   ;;  %v3459_v56 = vld [vmem:[%s4450_s9 + $0x1a4] ss:$16 sps:$4 sm:$0xff]   ;;  %v3461_v57 = vld [vmem:[%s4450_s9 + $0x1ac] ss:$16 sps:$4 sm:$0xff]  }
  0xae   : > { %v3463_v58 = vld [vmem:[%s4450_s9 + $0x1a0] ss:$16 sps:$4 sm:$0xff]   ;;  %v3464_v59 = vld [vmem:[%s4450_s9 + $0x1a8] ss:$16 sps:$4 sm:$0xff]   ;;  %v3465_v60 = vld [vmem:[%s4450_s9 + $0x1c4] ss:$16 sps:$4 sm:$0xff]  }
  0xaf   : > { %2398 = vmatpush1.bf16.msra.mxu0 %v3409_v22  ;;  %2570 = vmatpush1.bf16.msra.mxu1 %v3410_v23  ;;  %v3467_v61 = vld [vmem:[%s4450_s9 + $0x1cc] ss:$16 sps:$4 sm:$0xff]   ;;  %v3469_v62 = vld [vmem:[%s4450_s9 + $0x1c0] ss:$16 sps:$4 sm:$0xff]   ;;  %v3470_v63 = vld [vmem:[%s4450_s9 + $0x1c8] ss:$16 sps:$4 sm:$0xff]  }
  0xb0   : > { %2399 = vmatprep.subr.bf16.mxu0 %v3411_v24  ;;  %2571 = vmatprep.subr.bf16.mxu1 %v3413_v25  ;;  %v3471_v0 = vld [vmem:[%s4450_s9 + $0x1e4] ss:$16 sps:$4 sm:$0xff]   ;;  %v3473_v1 = vld [vmem:[%s4450_s9 + $0x1ec] ss:$16 sps:$4 sm:$0xff]   ;;  %v3475_v3 = vld [vmem:[%s4450_s9 + $0x1e0] ss:$16 sps:$4 sm:$0xff]  }
  0xb1   : > { %v3476_v4 = vld [vmem:[%s4450_s9 + $0x1e8] ss:$16 sps:$4 sm:$0xff]   ;;  %v3479_v5 = vld [vmem:[%s4450_s9 + $0x204] ss:$16 sps:$4 sm:$0xff]   ;;  %v3482_v6 = vld [vmem:[%s4450_s9 + $0x20c] ss:$16 sps:$4 sm:$0xff]  }
  0xb2   : > { %v3477_v7 = vld [vmem:[%s4450_s9 + $0x200] ss:$16 sps:$4 sm:$0xff]   ;;  %v3480_v8 = vld [vmem:[%s4450_s9 + $0x208] ss:$16 sps:$4 sm:$0xff]   ;;  %v3485_v9 = vld [vmem:[%s4450_s9 + $0x224] ss:$16 sps:$4 sm:$0xff]  }
  0xb3   : > { %2400 = vmatpush1.bf16.msra.mxu0 %v3415_v26  ;;  %2572 = vmatpush1.bf16.msra.mxu1 %v3416_v27  ;;  %v3488_v10 = vld [vmem:[%s4450_s9 + $0x22c] ss:$16 sps:$4 sm:$0xff]   ;;  %v3483_v11 = vld [vmem:[%s4450_s9 + $0x220] ss:$16 sps:$4 sm:$0xff]   ;;  %v3486_v12 = vld [vmem:[%s4450_s9 + $0x228] ss:$16 sps:$4 sm:$0xff]  }
  0xb4   : > { %2401 = vmatprep.subr.bf16.mxu0 %v3417_v28  ;;  %2573 = vmatprep.subr.bf16.mxu1 %v3419_v29  ;;  %v3491_v13 = vld [vmem:[%s4450_s9 + $0x244] ss:$16 sps:$4 sm:$0xff]   ;;  %v3494_v14 = vld [vmem:[%s4450_s9 + $0x24c] ss:$16 sps:$4 sm:$0xff]   ;;  %v3489_v15 = vld [vmem:[%s4450_s9 + $0x240] ss:$16 sps:$4 sm:$0xff]  }
  0xb5   : > { %v3492_v16 = vld [vmem:[%s4450_s9 + $0x248] ss:$16 sps:$4 sm:$0xff]   ;;  %v3500_v17 = vld [vmem:[%s4450_s9 + $0x26c] ss:$16 sps:$4 sm:$0xff]   ;;  %v3495_v18 = vld [vmem:[%s4450_s9 + $0x260] ss:$16 sps:$4 sm:$0xff]  }
  0xb6   : > { %v3498_v19 = vld [vmem:[%s4450_s9 + $0x268] ss:$16 sps:$4 sm:$0xff]   ;;  %v3503_v20 = vld [vmem:[%s4450_s9 + $0x284] ss:$16 sps:$4 sm:$0xff]   ;;  %v3506_v21 = vld [vmem:[%s4450_s9 + $0x28c] ss:$16 sps:$4 sm:$0xff]  }
  0xb7   : > { %2402 = vmatpush1.bf16.msra.mxu0 %v3421_v30  ;;  %2574 = vmatpush1.bf16.msra.mxu1 %v3422_v31  ;;  %v3501_v22 = vld [vmem:[%s4450_s9 + $0x280] ss:$16 sps:$4 sm:$0xff]   ;;  %v3504_v23 = vld [vmem:[%s4450_s9 + $0x288] ss:$16 sps:$4 sm:$0xff]   ;;  %v3509_v24 = vld [vmem:[%s4450_s9 + $0x2a4] ss:$16 sps:$4 sm:$0xff]  }
  0xb8   : > { %2403 = vmatprep.subr.bf16.mxu0 %v3423_v32  ;;  %2575 = vmatprep.subr.bf16.mxu1 %v3425_v33  ;;  %v3512_v25 = vld [vmem:[%s4450_s9 + $0x2ac] ss:$16 sps:$4 sm:$0xff]   ;;  %v3507_v26 = vld [vmem:[%s4450_s9 + $0x2a0] ss:$16 sps:$4 sm:$0xff]   ;;  %v3510_v27 = vld [vmem:[%s4450_s9 + $0x2a8] ss:$16 sps:$4 sm:$0xff]  }
  0xb9   : > { %v3515_v28 = vld [vmem:[%s4450_s9 + $0x2c4] ss:$16 sps:$4 sm:$0xff]   ;;  %v3518_v29 = vld [vmem:[%s4450_s9 + $0x2cc] ss:$16 sps:$4 sm:$0xff]   ;;  %v3513_v33 = vld [vmem:[%s4450_s9 + $0x2c0] ss:$16 sps:$4 sm:$0xff]  }
  0xba   : > { %v4547_v30 = vld [vmem:[%s4837_s0 + $0x8] sm:$0xff]  ;;  %s4849_s4 = smov (!%p779_p11, %s3045_s4), 7  ;;  %s3044_s8 = sshll.u32 %s728_s30, 6 }
  0xbb   : > { %2404 = vmatpush1.bf16.msra.mxu0 %v3427_v34  ;;  %2576 = vmatpush1.bf16.msra.mxu1 %v3428_v35  ;;  %v4552_v31 = vld [vmem:[%s4837_s0 + $0x28] sm:$0xff]  ;;  %v3521_v35 = vld [vmem:[%s4450_s9 + $0x2e4] ss:$16 sps:$4 sm:$0xff]   ;;  %s781_s7 = scalar_lea.vmem %s4839_s2, %s4849_s4  ;;  %s3316_s12 = sshll.u32 (%p3908_p6), %s3843_s14, 5 }
  0xbc   : > { %2405 = vmatprep.subr.bf16.mxu0 %v3429_v36  ;;  %2577 = vmatprep.subr.bf16.mxu1 %v3431_v37  ;;  %v3049_v32 = vcombine.high %v4547_v30, %v4552_v31  ;;  %v3516_v34 = vld [vmem:[%s4450_s9 + $0x2c8] ss:$16 sps:$4 sm:$0xff]   ;;  %v3524_v36 = vld [vmem:[%s4450_s9 + $0x2ec] ss:$16 sps:$4 sm:$0xff]   ;;  %v3519_v37 = vld [vmem:[%s4450_s9 + $0x2e0] ss:$16 sps:$4 sm:$0xff]   ;;  %s2898_s11 = scalar_lea.vmem (%p3908_p6), %s4840_s3, %s3316_s12 }
  0xbf   : > { %2406 = vmatpush1.bf16.msra.mxu0 %v3433_v38  ;;  %2578 = vmatpush1.bf16.msra.mxu1 %v3434_v39  ;;  %v3522_v38 = vld [vmem:[%s4450_s9 + $0x2e8] ss:$16 sps:$4 sm:$0xff]   ;;  %v3527_v39 = vld [vmem:[%s4450_s9 + $0x304] ss:$16 sps:$4 sm:$0xff]  }
  0xc0   : > { %2407 = vmatprep.subr.bf16.mxu0 %v3435_v40  ;;  %2579 = vmatprep.subr.bf16.mxu1 %v3437_v41  ;;  %v3530_v40 = vld [vmem:[%s4450_s9 + $0x30c] ss:$16 sps:$4 sm:$0xff]   ;;  %v3525_v41 = vld [vmem:[%s4450_s9 + $0x300] ss:$16 sps:$4 sm:$0xff]  }
  0xc3   : > { %2408 = vmatpush1.bf16.msra.mxu0 %v3439_v42  ;;  %2580 = vmatpush1.bf16.msra.mxu1 %v3440_v43  ;;  %v3528_v42 = vld [vmem:[%s4450_s9 + $0x308] ss:$16 sps:$4 sm:$0xff]   ;;  %v3533_v43 = vld [vmem:[%s4450_s9 + $0x324] ss:$16 sps:$4 sm:$0xff]  }
  0xc4   : > { %2409 = vmatprep.subr.bf16.mxu0 %v3441_v44  ;;  %2581 = vmatprep.subr.bf16.mxu1 %v3443_v45  ;;  %v3536_v44 = vld [vmem:[%s4450_s9 + $0x32c] ss:$16 sps:$4 sm:$0xff]   ;;  %v3531_v45 = vld [vmem:[%s4450_s9 + $0x320] ss:$16 sps:$4 sm:$0xff]  }
  0xc7   : > { %2410 = vmatpush1.bf16.msra.mxu0 %v3445_v46  ;;  %2582 = vmatpush1.bf16.msra.mxu1 %v3446_v47  ;;  %v3534_v46 = vld [vmem:[%s4450_s9 + $0x328] ss:$16 sps:$4 sm:$0xff]   ;;  %v3539_v47 = vld [vmem:[%s4450_s9 + $0x344] ss:$16 sps:$4 sm:$0xff]  }
  0xc8   : > { %2411 = vmatprep.subr.bf16.mxu0 %v3447_v48  ;;  %2583 = vmatprep.subr.bf16.mxu1 %v3449_v49  ;;  %v3542_v48 = vld [vmem:[%s4450_s9 + $0x34c] ss:$16 sps:$4 sm:$0xff]   ;;  %v3537_v49 = vld [vmem:[%s4450_s9 + $0x340] ss:$16 sps:$4 sm:$0xff]  }
  0xcb   : > { %2412 = vmatpush1.bf16.msra.mxu0 %v3451_v50  ;;  %2584 = vmatpush1.bf16.msra.mxu1 %v3452_v51  ;;  %v3540_v50 = vld [vmem:[%s4450_s9 + $0x348] ss:$16 sps:$4 sm:$0xff]   ;;  %v3545_v51 = vld [vmem:[%s4450_s9 + $0x364] ss:$16 sps:$4 sm:$0xff]  }
  0xcc   : > { %2413 = vmatprep.subr.bf16.mxu0 %v3453_v52  ;;  %2585 = vmatprep.subr.bf16.mxu1 %v3455_v53  ;;  %v3548_v52 = vld [vmem:[%s4450_s9 + $0x36c] ss:$16 sps:$4 sm:$0xff]   ;;  %v3543_v53 = vld [vmem:[%s4450_s9 + $0x360] ss:$16 sps:$4 sm:$0xff]  }
  0xcf   : > { %2414 = vmatpush1.bf16.msra.mxu0 %v3457_v54  ;;  %2586 = vmatpush1.bf16.msra.mxu1 %v3458_v55  ;;  %v3546_v54 = vld [vmem:[%s4450_s9 + $0x368] ss:$16 sps:$4 sm:$0xff]   ;;  %v3551_v55 = vld [vmem:[%s4450_s9 + $0x384] ss:$16 sps:$4 sm:$0xff]  }
  0xd0   : > { %2415 = vmatprep.subr.bf16.mxu0 %v3459_v56  ;;  %2587 = vmatprep.subr.bf16.mxu1 %v3461_v57  ;;  %v3554_v56 = vld [vmem:[%s4450_s9 + $0x38c] ss:$16 sps:$4 sm:$0xff]   ;;  %v3549_v57 = vld [vmem:[%s4450_s9 + $0x380] ss:$16 sps:$4 sm:$0xff]  }
  0xd3   : > { %2416 = vmatpush1.bf16.msra.mxu0 %v3463_v58  ;;  %2588 = vmatpush1.bf16.msra.mxu1 %v3464_v59  ;;  %v3552_v58 = vld [vmem:[%s4450_s9 + $0x388] ss:$16 sps:$4 sm:$0xff]   ;;  %v3557_v59 = vld [vmem:[%s4450_s9 + $0x3a4] ss:$16 sps:$4 sm:$0xff]  }
  0xd4   : > { %2417 = vmatprep.subr.bf16.mxu0 %v3465_v60  ;;  %2589 = vmatprep.subr.bf16.mxu1 %v3467_v61  ;;  %v3560_v60 = vld [vmem:[%s4450_s9 + $0x3ac] ss:$16 sps:$4 sm:$0xff]   ;;  %v3555_v61 = vld [vmem:[%s4450_s9 + $0x3a0] ss:$16 sps:$4 sm:$0xff]  }
  0xd7   : > { %2418 = vmatpush1.bf16.msra.mxu0 %v3469_v62  ;;  %2590 = vmatpush1.bf16.msra.mxu1 %v3470_v63  ;;  %v3558_v62 = vld [vmem:[%s4450_s9 + $0x3a8] ss:$16 sps:$4 sm:$0xff]   ;;  %v3563_v63 = vld [vmem:[%s4450_s9 + $0x3c4] ss:$16 sps:$4 sm:$0xff]  }
  0xd8   : > { %2419 = vmatprep.subr.bf16.mxu0 %v3471_v0  ;;  %2591 = vmatprep.subr.bf16.mxu1 %v3473_v1  ;;  %v3566_v0 = vld [vmem:[%s4450_s9 + $0x3cc] ss:$16 sps:$4 sm:$0xff]   ;;  %v3561_v1 = vld [vmem:[%s4450_s9 + $0x3c0] ss:$16 sps:$4 sm:$0xff]  }
  0xdb   : > { %2420 = vmatpush1.bf16.msra.mxu0 %v3475_v3  ;;  %2592 = vmatpush1.bf16.msra.mxu1 %v3476_v4  ;;  %v3564_v3 = vld [vmem:[%s4450_s9 + $0x3c8] ss:$16 sps:$4 sm:$0xff]   ;;  %v3569_v4 = vld [vmem:[%s4450_s9 + $0x3e4] ss:$16 sps:$4 sm:$0xff]  }
  0xdc   : > { %2432 = vmatprep.subr.bf16.mxu0 %v3479_v5  ;;  %2604 = vmatprep.subr.bf16.mxu1 %v3482_v6  ;;  %v3572_v5 = vld [vmem:[%s4450_s9 + $0x3ec] ss:$16 sps:$4 sm:$0xff]   ;;  %v3567_v6 = vld [vmem:[%s4450_s9 + $0x3e0] ss:$16 sps:$4 sm:$0xff]  }
  0xde   : > { %2422 = vmatmul.mubr.bf16.vlgmr.msra.gmra.mrb[0].mxu0 %v4448_v2  ;;  %2594 = vmatmul.mubr.bf16.vlgmr.msra.gmra.mrb[0].mxu1 %v4448_v2  ;;  %v3497_v2 = vld [vmem:[%s4450_s9 + $0x264] ss:$16 sps:$4 sm:$0xff]  }
  0xdf   : > { %2433 = vmatpush1.bf16.msra.mxu0 %v3477_v7  ;;  %2605 = vmatpush1.bf16.msra.mxu1 %v3480_v8  ;;  %v3570_v7 = vld [vmem:[%s4450_s9 + $0x3e8] ss:$16 sps:$4 sm:$0xff]   ;;  %v3575_v8 = vld [vmem:[%s4450_s9 + $0x404] ss:$16 sps:$4 sm:$0xff]  }
  0xe0   : > { %2434 = vmatprep.subr.bf16.mxu0 %v3485_v9  ;;  %2606 = vmatprep.subr.bf16.mxu1 %v3488_v10  ;;  %v3578_v9 = vld [vmem:[%s4450_s9 + $0x40c] ss:$16 sps:$4 sm:$0xff]   ;;  %v3573_v10 = vld [vmem:[%s4450_s9 + $0x400] ss:$16 sps:$4 sm:$0xff]  }
  0xe1   : > { %2464 = vmatprep.mubr.bf16.mxu0 %v3049_v32  ;;  %2636 = vmatprep.mubr.bf16.mxu1 %v3049_v32  ;;  %v3608_v32 = vld [vmem:[%s4450_s9 + $0x4ac] ss:$16 sps:$4 sm:$0xff]  }
  0xe3   : > { %2435 = vmatpush1.bf16.msra.mxu0 %v3483_v11  ;;  %2607 = vmatpush1.bf16.msra.mxu1 %v3486_v12  ;;  %v3048_v11 = vcombine.low %v4547_v30, %v4552_v31  ;;  %v3576_v12 = vld [vmem:[%s4450_s9 + $0x408] ss:$16 sps:$4 sm:$0xff]   ;;  %v3605_v31 = vld [vmem:[%s4450_s9 + $0x4a4] ss:$16 sps:$4 sm:$0xff]  }
  0xe4   : > { %2436 = vmatprep.subr.bf16.mxu0 %v3491_v13  ;;  %2608 = vmatprep.subr.bf16.mxu1 %v3494_v14  ;;  %v3581_v13 = vld [vmem:[%s4450_s9 + $0x424] ss:$16 sps:$4 sm:$0xff]   ;;  %v3584_v14 = vld [vmem:[%s4450_s9 + $0x42c] ss:$16 sps:$4 sm:$0xff]   ;;  %v3600_v30 = vld [vmem:[%s4450_s9 + $0x488] ss:$16 sps:$4 sm:$0xff]  }
  0xe7   : > { %2437 = vmatpush1.bf16.msra.mxu0 %v3489_v15  ;;  %2609 = vmatpush1.bf16.msra.mxu1 %v3492_v16  ;;  %v4605_v15 = vld [vmem:[%s4837_s0 + $0x10] sm:$0xff] }
  0xe8   : > { %2438 = vmatprep.subr.bf16.mxu0 %v3497_v2  ;;  %2610 = vmatprep.subr.bf16.mxu1 %v3500_v17  ;;  %v4610_v16 = vld [vmem:[%s4837_s0 + $0x30] sm:$0xff] }
  0xe9   : > { %v3051_v2 = vcombine.high %v4605_v15, %v4610_v16  ;;  %v3579_v17 = vld [vmem:[%s4450_s9 + $0x420] ss:$16 sps:$4 sm:$0xff]  }
  0xeb   : > { %2439 = vmatpush1.bf16.msra.mxu0 %v3495_v18  ;;  %2611 = vmatpush1.bf16.msra.mxu1 %v3498_v19  ;;  %v3582_v18 = vld [vmem:[%s4450_s9 + $0x428] ss:$16 sps:$4 sm:$0xff]   ;;  %v3587_v19 = vld [vmem:[%s4450_s9 + $0x444] ss:$16 sps:$4 sm:$0xff]  }
  0xec   : > { %2440 = vmatprep.subr.bf16.mxu0 %v3503_v20  ;;  %2612 = vmatprep.subr.bf16.mxu1 %v3506_v21  ;;  %v3590_v20 = vld [vmem:[%s4450_s9 + $0x44c] ss:$16 sps:$4 sm:$0xff]   ;;  %v3585_v21 = vld [vmem:[%s4450_s9 + $0x440] ss:$16 sps:$4 sm:$0xff]  }
  0xef   : > { %2441 = vmatpush1.bf16.msra.mxu0 %v3501_v22  ;;  %2613 = vmatpush1.bf16.msra.mxu1 %v3504_v23  ;;  %v3588_v22 = vld [vmem:[%s4450_s9 + $0x448] ss:$16 sps:$4 sm:$0xff]   ;;  %v3593_v23 = vld [vmem:[%s4450_s9 + $0x464] ss:$16 sps:$4 sm:$0xff]  }
  0xf0   : > { %2442 = vmatprep.subr.bf16.mxu0 %v3509_v24  ;;  %2614 = vmatprep.subr.bf16.mxu1 %v3512_v25  ;;  %v3596_v24 = vld [vmem:[%s4450_s9 + $0x46c] ss:$16 sps:$4 sm:$0xff]   ;;  %v3591_v25 = vld [vmem:[%s4450_s9 + $0x460] ss:$16 sps:$4 sm:$0xff]  }
  0xf3   : > { %2443 = vmatpush1.bf16.msra.mxu0 %v3507_v26  ;;  %2615 = vmatpush1.bf16.msra.mxu1 %v3510_v27  ;;  %v3594_v26 = vld [vmem:[%s4450_s9 + $0x468] ss:$16 sps:$4 sm:$0xff]   ;;  %v3599_v27 = vld [vmem:[%s4450_s9 + $0x484] ss:$16 sps:$4 sm:$0xff]  }
  0xf4   : > { %2444 = vmatprep.subr.bf16.mxu0 %v3515_v28  ;;  %2616 = vmatprep.subr.bf16.mxu1 %v3518_v29  ;;  %v3602_v28 = vld [vmem:[%s4450_s9 + $0x48c] ss:$16 sps:$4 sm:$0xff]   ;;  %v3597_v29 = vld [vmem:[%s4450_s9 + $0x480] ss:$16 sps:$4 sm:$0xff]  }
  0xf7   : > { %2445 = vmatpush1.bf16.msra.mxu0 %v3513_v33  ;;  %2617 = vmatpush1.bf16.msra.mxu1 %v3516_v34  ;;  %v3603_v33 = vld [vmem:[%s4450_s9 + $0x4a0] ss:$16 sps:$4 sm:$0xff]   ;;  %v3606_v34 = vld [vmem:[%s4450_s9 + $0x4a8] ss:$16 sps:$4 sm:$0xff]  }
  0xf8   : > { %2446 = vmatprep.subr.bf16.mxu0 %v3521_v35  ;;  %2618 = vmatprep.subr.bf16.mxu1 %v3524_v36  ;;  %v3611_v35 = vld [vmem:[%s4450_s9 + $0x4c4] ss:$16 sps:$4 sm:$0xff]   ;;  %v3614_v36 = vld [vmem:[%s4450_s9 + $0x4cc] ss:$16 sps:$4 sm:$0xff]  }
  0xfb   : > { %2447 = vmatpush1.bf16.msra.mxu0 %v3519_v37  ;;  %2619 = vmatpush1.bf16.msra.mxu1 %v3522_v38  ;;  %v3609_v37 = vld [vmem:[%s4450_s9 + $0x4c0] ss:$16 sps:$4 sm:$0xff]   ;;  %v3612_v38 = vld [vmem:[%s4450_s9 + $0x4c8] ss:$16 sps:$4 sm:$0xff]  }
  0xfc   : > { %2448 = vmatprep.subr.bf16.mxu0 %v3527_v39  ;;  %2620 = vmatprep.subr.bf16.mxu1 %v3530_v40  ;;  %v3617_v39 = vld [vmem:[%s4450_s9 + $0x4e4] ss:$16 sps:$4 sm:$0xff]   ;;  %v3620_v40 = vld [vmem:[%s4450_s9 + $0x4ec] ss:$16 sps:$4 sm:$0xff]  }
  0xff   : > { %2449 = vmatpush1.bf16.msra.mxu0 %v3525_v41  ;;  %2621 = vmatpush1.bf16.msra.mxu1 %v3528_v42  ;;  %v3615_v41 = vld [vmem:[%s4450_s9 + $0x4e0] ss:$16 sps:$4 sm:$0xff]   ;;  %v3618_v42 = vld [vmem:[%s4450_s9 + $0x4e8] ss:$16 sps:$4 sm:$0xff]  }
 0x100   : > { %2450 = vmatprep.subr.bf16.mxu0 %v3533_v43  ;;  %2622 = vmatprep.subr.bf16.mxu1 %v3536_v44  ;;  %v3623_v43 = vld [vmem:[%s4450_s9 + $0x504] ss:$16 sps:$4 sm:$0xff]   ;;  %v3626_v44 = vld [vmem:[%s4450_s9 + $0x50c] ss:$16 sps:$4 sm:$0xff]  }
 0x103   : > { %2451 = vmatpush1.bf16.msra.mxu0 %v3531_v45  ;;  %2623 = vmatpush1.bf16.msra.mxu1 %v3534_v46  ;;  %v3621_v45 = vld [vmem:[%s4450_s9 + $0x500] ss:$16 sps:$4 sm:$0xff]   ;;  %v3624_v46 = vld [vmem:[%s4450_s9 + $0x508] ss:$16 sps:$4 sm:$0xff]  }
 0x104   : > { %2452 = vmatprep.subr.bf16.mxu0 %v3539_v47  ;;  %2624 = vmatprep.subr.bf16.mxu1 %v3542_v48  ;;  %v3629_v47 = vld [vmem:[%s4450_s9 + $0x524] ss:$16 sps:$4 sm:$0xff]   ;;  %v3632_v48 = vld [vmem:[%s4450_s9 + $0x52c] ss:$16 sps:$4 sm:$0xff]  }
 0x107   : > { %2453 = vmatpush1.bf16.msra.mxu0 %v3537_v49  ;;  %2625 = vmatpush1.bf16.msra.mxu1 %v3540_v50  ;;  %v3627_v49 = vld [vmem:[%s4450_s9 + $0x520] ss:$16 sps:$4 sm:$0xff]   ;;  %v3630_v50 = vld [vmem:[%s4450_s9 + $0x528] ss:$16 sps:$4 sm:$0xff]  }
 0x108   : > { %2454 = vmatprep.subr.bf16.mxu0 %v3545_v51  ;;  %2626 = vmatprep.subr.bf16.mxu1 %v3548_v52  ;;  %v3635_v51 = vld [vmem:[%s4450_s9 + $0x544] ss:$16 sps:$4 sm:$0xff]   ;;  %v3638_v52 = vld [vmem:[%s4450_s9 + $0x54c] ss:$16 sps:$4 sm:$0xff]  }
 0x10b   : > { %2455 = vmatpush1.bf16.msra.mxu0 %v3543_v53  ;;  %2627 = vmatpush1.bf16.msra.mxu1 %v3546_v54  ;;  %v3633_v53 = vld [vmem:[%s4450_s9 + $0x540] ss:$16 sps:$4 sm:$0xff]   ;;  %v3636_v54 = vld [vmem:[%s4450_s9 + $0x548] ss:$16 sps:$4 sm:$0xff]  }
 0x10c   : > { %2456 = vmatprep.subr.bf16.mxu0 %v3551_v55  ;;  %2628 = vmatprep.subr.bf16.mxu1 %v3554_v56  ;;  %v3641_v55 = vld [vmem:[%s4450_s9 + $0x564] ss:$16 sps:$4 sm:$0xff]   ;;  %v3644_v56 = vld [vmem:[%s4450_s9 + $0x56c] ss:$16 sps:$4 sm:$0xff]  }
 0x10f   : > { %2457 = vmatpush1.bf16.msra.mxu0 %v3549_v57  ;;  %2629 = vmatpush1.bf16.msra.mxu1 %v3552_v58  ;;  %v3639_v57 = vld [vmem:[%s4450_s9 + $0x560] ss:$16 sps:$4 sm:$0xff]   ;;  %v3642_v58 = vld [vmem:[%s4450_s9 + $0x568] ss:$16 sps:$4 sm:$0xff]  }
 0x110   : > { %2458 = vmatprep.subr.bf16.mxu0 %v3557_v59  ;;  %2630 = vmatprep.subr.bf16.mxu1 %v3560_v60  ;;  %v3647_v59 = vld [vmem:[%s4450_s9 + $0x584] ss:$16 sps:$4 sm:$0xff]   ;;  %v3650_v60 = vld [vmem:[%s4450_s9 + $0x58c] ss:$16 sps:$4 sm:$0xff]  }
 0x113   : > { %2459 = vmatpush1.bf16.msra.mxu0 %v3555_v61  ;;  %2631 = vmatpush1.bf16.msra.mxu1 %v3558_v62  ;;  %v3645_v61 = vld [vmem:[%s4450_s9 + $0x580] ss:$16 sps:$4 sm:$0xff]   ;;  %v3648_v62 = vld [vmem:[%s4450_s9 + $0x588] ss:$16 sps:$4 sm:$0xff]  }
 0x114   : > { %2460 = vmatprep.subr.bf16.mxu0 %v3563_v63  ;;  %2632 = vmatprep.subr.bf16.mxu1 %v3566_v0  ;;  %v3653_v63 = vld [vmem:[%s4450_s9 + $0x5a4] ss:$16 sps:$4 sm:$0xff]   ;;  %v3656_v0 = vld [vmem:[%s4450_s9 + $0x5ac] ss:$16 sps:$4 sm:$0xff]  }
 0x117   : > { %2461 = vmatpush1.bf16.msra.mxu0 %v3561_v1  ;;  %2633 = vmatpush1.bf16.msra.mxu1 %v3564_v3  ;;  %v3651_v1 = vld [vmem:[%s4450_s9 + $0x5a0] ss:$16 sps:$4 sm:$0xff]   ;;  %v3654_v3 = vld [vmem:[%s4450_s9 + $0x5a8] ss:$16 sps:$4 sm:$0xff]  }
 0x118   : > { %2462 = vmatprep.subr.bf16.mxu0 %v3569_v4  ;;  %2634 = vmatprep.subr.bf16.mxu1 %v3572_v5  ;;  %v3659_v4 = vld [vmem:[%s4450_s9 + $0x5c4] ss:$16 sps:$4 sm:$0xff]   ;;  %v3662_v5 = vld [vmem:[%s4450_s9 + $0x5cc] ss:$16 sps:$4 sm:$0xff]  }
 0x11b   : > { %2463 = vmatpush1.bf16.msra.mxu0 %v3567_v6  ;;  %2635 = vmatpush1.bf16.msra.mxu1 %v3570_v7  ;;  %v3657_v6 = vld [vmem:[%s4450_s9 + $0x5c0] ss:$16 sps:$4 sm:$0xff]   ;;  %v3660_v7 = vld [vmem:[%s4450_s9 + $0x5c8] ss:$16 sps:$4 sm:$0xff]  }
 0x11c   : > { %2475 = vmatprep.subr.bf16.mxu0 %v3575_v8  ;;  %2647 = vmatprep.subr.bf16.mxu1 %v3578_v9  ;;  %v3665_v8 = vld [vmem:[%s4450_s9 + $0x5e4] ss:$16 sps:$4 sm:$0xff]   ;;  %v3668_v9 = vld [vmem:[%s4450_s9 + $0x5ec] ss:$16 sps:$4 sm:$0xff]  }
 0x11e   : > { %2465 = vmatmul.mubr.bf16.vlgmr.msra.gmra.mrb[0].mxu0 %v3048_v11  ;;  %2637 = vmatmul.mubr.bf16.vlgmr.msra.gmra.mrb[0].mxu1 %v3048_v11  ;;  %v3666_v11 = vld [vmem:[%s4450_s9 + $0x5e8] ss:$16 sps:$4 sm:$0xff]  }
 0x11f   : > { %2476 = vmatpush1.bf16.msra.mxu0 %v3573_v10  ;;  %2648 = vmatpush1.bf16.msra.mxu1 %v3576_v12  ;;  %v3663_v10 = vld [vmem:[%s4450_s9 + $0x5e0] ss:$16 sps:$4 sm:$0xff]   ;;  %v3671_v12 = vld [vmem:[%s4450_s9 + $0x604] ss:$16 sps:$4 sm:$0xff]  }
 0x120   : > { %2477 = vmatprep.subr.bf16.mxu0 %v3581_v13  ;;  %2649 = vmatprep.subr.bf16.mxu1 %v3584_v14  ;;  %v3674_v13 = vld [vmem:[%s4450_s9 + $0x60c] ss:$16 sps:$4 sm:$0xff]   ;;  %v3050_v14 = vcombine.low %v4605_v15, %v4610_v16  ;;  %v3677_v15 = vld [vmem:[%s4450_s9 + $0x624] ss:$16 sps:$4 sm:$0xff]  }
 0x121   : > { %2507 = vmatprep.mubr.bf16.mxu0 %v3051_v2  ;;  %2679 = vmatprep.mubr.bf16.mxu1 %v3051_v2  ;;  %v4679_v2 = vld [vmem:[%s4837_s0 + $0x18] sm:$0xff] }
 0x122   : > { %v3680_v16 = vld [vmem:[%s4450_s9 + $0x62c] ss:$16 sps:$4 sm:$0xff]  }
 0x123   : > { %2478 = vmatpush1.bf16.msra.mxu0 %v3579_v17  ;;  %2650 = vmatpush1.bf16.msra.mxu1 %v3582_v18  ;;  %v4684_v17 = vld [vmem:[%s4837_s0 + $0x38] sm:$0xff]  ;;  %v3669_v18 = vld [vmem:[%s4450_s9 + $0x600] ss:$16 sps:$4 sm:$0xff]  }
 0x124   : > { %2479 = vmatprep.subr.bf16.mxu0 %v3587_v19  ;;  %2651 = vmatprep.subr.bf16.mxu1 %v3590_v20  ;;  %v3672_v19 = vld [vmem:[%s4450_s9 + $0x608] ss:$16 sps:$4 sm:$0xff]   ;;  %v3053_v20 = vcombine.high %v4679_v2, %v4684_v17 }
 0x127   : > { %2480 = vmatpush1.bf16.msra.mxu0 %v3585_v21  ;;  %2652 = vmatpush1.bf16.msra.mxu1 %v3588_v22  ;;  %v3675_v21 = vld [vmem:[%s4450_s9 + $0x620] ss:$16 sps:$4 sm:$0xff]   ;;  %v3678_v22 = vld [vmem:[%s4450_s9 + $0x628] ss:$16 sps:$4 sm:$0xff]  }
 0x128   : > { %2481 = vmatprep.subr.bf16.mxu0 %v3593_v23  ;;  %2653 = vmatprep.subr.bf16.mxu1 %v3596_v24  ;;  %v3683_v23 = vld [vmem:[%s4450_s9 + $0x644] ss:$16 sps:$4 sm:$0xff]   ;;  %v3686_v24 = vld [vmem:[%s4450_s9 + $0x64c] ss:$16 sps:$4 sm:$0xff]  }
 0x12b   : > { %2482 = vmatpush1.bf16.msra.mxu0 %v3591_v25  ;;  %2654 = vmatpush1.bf16.msra.mxu1 %v3594_v26  ;;  %v3681_v25 = vld [vmem:[%s4450_s9 + $0x640] ss:$16 sps:$4 sm:$0xff]   ;;  %v3684_v26 = vld [vmem:[%s4450_s9 + $0x648] ss:$16 sps:$4 sm:$0xff]  }
 0x12c   : > { %2483 = vmatprep.subr.bf16.mxu0 %v3599_v27  ;;  %2655 = vmatprep.subr.bf16.mxu1 %v3602_v28  ;;  %v3689_v27 = vld [vmem:[%s4450_s9 + $0x664] ss:$16 sps:$4 sm:$0xff]   ;;  %v3692_v28 = vld [vmem:[%s4450_s9 + $0x66c] ss:$16 sps:$4 sm:$0xff]  }
 0x12f   : > { %2484 = vmatpush1.bf16.msra.mxu0 %v3597_v29  ;;  %2656 = vmatpush1.bf16.msra.mxu1 %v3600_v30  ;;  %v3687_v29 = vld [vmem:[%s4450_s9 + $0x660] ss:$16 sps:$4 sm:$0xff]   ;;  %v3690_v30 = vld [vmem:[%s4450_s9 + $0x668] ss:$16 sps:$4 sm:$0xff]  }
 0x130   : > { %2485 = vmatprep.subr.bf16.mxu0 %v3605_v31  ;;  %2657 = vmatprep.subr.bf16.mxu1 %v3608_v32  ;;  %v3695_v31 = vld [vmem:[%s4450_s9 + $0x684] ss:$16 sps:$4 sm:$0xff]   ;;  %v3698_v32 = vld [vmem:[%s4450_s9 + $0x68c] ss:$16 sps:$4 sm:$0xff]  }
 0x133   : > { %2486 = vmatpush1.bf16.msra.mxu0 %v3603_v33  ;;  %2658 = vmatpush1.bf16.msra.mxu1 %v3606_v34  ;;  %v3693_v33 = vld [vmem:[%s4450_s9 + $0x680] ss:$16 sps:$4 sm:$0xff]   ;;  %v3696_v34 = vld [vmem:[%s4450_s9 + $0x688] ss:$16 sps:$4 sm:$0xff]  }
 0x134   : > { %2487 = vmatprep.subr.bf16.mxu0 %v3611_v35  ;;  %2659 = vmatprep.subr.bf16.mxu1 %v3614_v36  ;;  %v3701_v35 = vld [vmem:[%s4450_s9 + $0x6a4] ss:$16 sps:$4 sm:$0xff]   ;;  %v3704_v36 = vld [vmem:[%s4450_s9 + $0x6ac] ss:$16 sps:$4 sm:$0xff]  }
 0x137   : > { %2488 = vmatpush1.bf16.msra.mxu0 %v3609_v37  ;;  %2660 = vmatpush1.bf16.msra.mxu1 %v3612_v38  ;;  %v3699_v37 = vld [vmem:[%s4450_s9 + $0x6a0] ss:$16 sps:$4 sm:$0xff]   ;;  %v3702_v38 = vld [vmem:[%s4450_s9 + $0x6a8] ss:$16 sps:$4 sm:$0xff]  }
 0x138   : > { %2489 = vmatprep.subr.bf16.mxu0 %v3617_v39  ;;  %2661 = vmatprep.subr.bf16.mxu1 %v3620_v40  ;;  %v3707_v39 = vld [vmem:[%s4450_s9 + $0x6c4] ss:$16 sps:$4 sm:$0xff]   ;;  %v3710_v40 = vld [vmem:[%s4450_s9 + $0x6cc] ss:$16 sps:$4 sm:$0xff]  }
 0x13b   : > { %2490 = vmatpush1.bf16.msra.mxu0 %v3615_v41  ;;  %2662 = vmatpush1.bf16.msra.mxu1 %v3618_v42  ;;  %v3705_v41 = vld [vmem:[%s4450_s9 + $0x6c0] ss:$16 sps:$4 sm:$0xff]   ;;  %v3708_v42 = vld [vmem:[%s4450_s9 + $0x6c8] ss:$16 sps:$4 sm:$0xff]  }
 0x13c   : > { %2491 = vmatprep.subr.bf16.mxu0 %v3623_v43  ;;  %2663 = vmatprep.subr.bf16.mxu1 %v3626_v44  ;;  %v3713_v43 = vld [vmem:[%s4450_s9 + $0x6e4] ss:$16 sps:$4 sm:$0xff]   ;;  %v3716_v44 = vld [vmem:[%s4450_s9 + $0x6ec] ss:$16 sps:$4 sm:$0xff]  }
 0x13f   : > { %2492 = vmatpush1.bf16.msra.mxu0 %v3621_v45  ;;  %2664 = vmatpush1.bf16.msra.mxu1 %v3624_v46  ;;  %v3711_v45 = vld [vmem:[%s4450_s9 + $0x6e0] ss:$16 sps:$4 sm:$0xff]   ;;  %v3714_v46 = vld [vmem:[%s4450_s9 + $0x6e8] ss:$16 sps:$4 sm:$0xff]  }
 0x140   : > { %2493 = vmatprep.subr.bf16.mxu0 %v3629_v47  ;;  %2665 = vmatprep.subr.bf16.mxu1 %v3632_v48  ;;  %v3719_v47 = vld [vmem:[%s4450_s9 + $0x704] ss:$16 sps:$4 sm:$0xff]   ;;  %v3722_v48 = vld [vmem:[%s4450_s9 + $0x70c] ss:$16 sps:$4 sm:$0xff]  }
 0x143   : > { %2494 = vmatpush1.bf16.msra.mxu0 %v3627_v49  ;;  %2666 = vmatpush1.bf16.msra.mxu1 %v3630_v50  ;;  %v3717_v49 = vld [vmem:[%s4450_s9 + $0x700] ss:$16 sps:$4 sm:$0xff]   ;;  %v3720_v50 = vld [vmem:[%s4450_s9 + $0x708] ss:$16 sps:$4 sm:$0xff]  }
 0x144   : > { %2495 = vmatprep.subr.bf16.mxu0 %v3635_v51  ;;  %2667 = vmatprep.subr.bf16.mxu1 %v3638_v52  ;;  %v3725_v51 = vld [vmem:[%s4450_s9 + $0x724] ss:$16 sps:$4 sm:$0xff]   ;;  %v3728_v52 = vld [vmem:[%s4450_s9 + $0x72c] ss:$16 sps:$4 sm:$0xff]  }
 0x147   : > { %2496 = vmatpush1.bf16.msra.mxu0 %v3633_v53  ;;  %2668 = vmatpush1.bf16.msra.mxu1 %v3636_v54  ;;  %v3723_v53 = vld [vmem:[%s4450_s9 + $0x720] ss:$16 sps:$4 sm:$0xff]   ;;  %v3726_v54 = vld [vmem:[%s4450_s9 + $0x728] ss:$16 sps:$4 sm:$0xff]  }
 0x148   : > { %2497 = vmatprep.subr.bf16.mxu0 %v3641_v55  ;;  %2669 = vmatprep.subr.bf16.mxu1 %v3644_v56  ;;  %v3731_v55 = vld [vmem:[%s4450_s9 + $0x744] ss:$16 sps:$4 sm:$0xff]   ;;  %v3734_v56 = vld [vmem:[%s4450_s9 + $0x74c] ss:$16 sps:$4 sm:$0xff]  }
 0x14b   : > { %2498 = vmatpush1.bf16.msra.mxu0 %v3639_v57  ;;  %2670 = vmatpush1.bf16.msra.mxu1 %v3642_v58  ;;  %v3729_v57 = vld [vmem:[%s4450_s9 + $0x740] ss:$16 sps:$4 sm:$0xff]   ;;  %v3732_v58 = vld [vmem:[%s4450_s9 + $0x748] ss:$16 sps:$4 sm:$0xff]  }
 0x14c   : > { %2499 = vmatprep.subr.bf16.mxu0 %v3647_v59  ;;  %2671 = vmatprep.subr.bf16.mxu1 %v3650_v60  ;;  %v3737_v59 = vld [vmem:[%s4450_s9 + $0x764] ss:$16 sps:$4 sm:$0xff]   ;;  %v3740_v60 = vld [vmem:[%s4450_s9 + $0x76c] ss:$16 sps:$4 sm:$0xff]  }
 0x14f   : > { %2500 = vmatpush1.bf16.msra.mxu0 %v3645_v61  ;;  %2672 = vmatpush1.bf16.msra.mxu1 %v3648_v62  ;;  %v3735_v61 = vld [vmem:[%s4450_s9 + $0x760] ss:$16 sps:$4 sm:$0xff]   ;;  %v3738_v62 = vld [vmem:[%s4450_s9 + $0x768] ss:$16 sps:$4 sm:$0xff]  }
 0x150   : > { %2501 = vmatprep.subr.bf16.mxu0 %v3653_v63  ;;  %2673 = vmatprep.subr.bf16.mxu1 %v3656_v0  ;;  %v3743_v63 = vld [vmem:[%s4450_s9 + $0x784] ss:$16 sps:$4 sm:$0xff]   ;;  %v3746_v0 = vld [vmem:[%s4450_s9 + $0x78c] ss:$16 sps:$4 sm:$0xff]  }
 0x153   : > { %2502 = vmatpush1.bf16.msra.mxu0 %v3651_v1  ;;  %2674 = vmatpush1.bf16.msra.mxu1 %v3654_v3  ;;  %v3741_v1 = vld [vmem:[%s4450_s9 + $0x780] ss:$16 sps:$4 sm:$0xff]   ;;  %v3744_v3 = vld [vmem:[%s4450_s9 + $0x788] ss:$16 sps:$4 sm:$0xff]  }
 0x154   : > { %2503 = vmatprep.subr.bf16.mxu0 %v3659_v4  ;;  %2675 = vmatprep.subr.bf16.mxu1 %v3662_v5  ;;  %v3749_v4 = vld [vmem:[%s4450_s9 + $0x7a4] ss:$16 sps:$4 sm:$0xff]   ;;  %v3752_v5 = vld [vmem:[%s4450_s9 + $0x7ac] ss:$16 sps:$4 sm:$0xff]  }
 0x157   : > { %2504 = vmatpush1.bf16.msra.mxu0 %v3657_v6  ;;  %2676 = vmatpush1.bf16.msra.mxu1 %v3660_v7  ;;  %v3747_v6 = vld [vmem:[%s4450_s9 + $0x7a0] ss:$16 sps:$4 sm:$0xff]   ;;  %v3750_v7 = vld [vmem:[%s4450_s9 + $0x7a8] ss:$16 sps:$4 sm:$0xff]  }
 0x158   : > { %2505 = vmatprep.subr.bf16.mxu0 %v3665_v8  ;;  %2677 = vmatprep.subr.bf16.mxu1 %v3668_v9  ;;  %v3755_v8 = vld [vmem:[%s4450_s9 + $0x7c4] ss:$16 sps:$4 sm:$0xff]   ;;  %v3758_v9 = vld [vmem:[%s4450_s9 + $0x7cc] ss:$16 sps:$4 sm:$0xff]  }
 0x15b   : > { %2506 = vmatpush1.bf16.msra.mxu0 %v3663_v10  ;;  %2678 = vmatpush1.bf16.msra.mxu1 %v3666_v11  ;;  %v3753_v10 = vld [vmem:[%s4450_s9 + $0x7c0] ss:$16 sps:$4 sm:$0xff]   ;;  %v3756_v11 = vld [vmem:[%s4450_s9 + $0x7c8] ss:$16 sps:$4 sm:$0xff]  }
 0x15c   : > { %2518 = vmatprep.subr.bf16.mxu0 %v3671_v12  ;;  %2690 = vmatprep.subr.bf16.mxu1 %v3674_v13  ;;  %v3761_v12 = vld [vmem:[%s4450_s9 + $0x7e4] ss:$16 sps:$4 sm:$0xff]   ;;  %v3764_v13 = vld [vmem:[%s4450_s9 + $0x7ec] ss:$16 sps:$4 sm:$0xff]  }
 0x15e   : > { %2508 = vmatmul.mubr.bf16.vlgmr.msra.gmra.mrb[0].mxu0 %v3050_v14  ;;  %2680 = vmatmul.mubr.bf16.vlgmr.msra.gmra.mrb[0].mxu1 %v3050_v14  ;;  %v3759_v14 = vld [vmem:[%s4450_s9 + $0x7e0] ss:$16 sps:$4 sm:$0xff]  }
 0x15f   : > { %2519 = vmatpush1.bf16.msra.mxu0 %v3669_v18  ;;  %2691 = vmatpush1.bf16.msra.mxu1 %v3672_v19  ;;  %v3762_v18 = vld [vmem:[%s4450_s9 + $0x7e8] ss:$16 sps:$4 sm:$0xff]   ;;  %v3052_v19 = vcombine.low %v4679_v2, %v4684_v17  ;;  %s4792_s9 = scalar_lea.vmem [#allocation4], %s3044_s8 }
 0x160   : > { %2520 = vmatprep.subr.bf16.mxu0 %v3677_v15  ;;  %2692 = vmatprep.subr.bf16.mxu1 %v3680_v16  ;;  %v2762_v15 = vlaneseq }
 0x161   : > { %2550 = vmatprep.mubr.bf16.mxu0 %v3053_v20  ;;  %2722 = vmatprep.mubr.bf16.mxu1 %v3053_v20 }
 0x162   : > { %v2763_v16 = vshrl.u32 %v2762_v15, 7 }
 0x163   : > { %2521 = vmatpush1.bf16.msra.mxu0 %v3675_v21  ;;  %2693 = vmatpush1.bf16.msra.mxu1 %v3678_v22  ;;  %v2760_v22 = vld [vmem:[%s781_s7] sm:$0xf] }
 0x164   : > { %2522 = vmatprep.subr.bf16.mxu0 %v3683_v23  ;;  %2694 = vmatprep.subr.bf16.mxu1 %v3686_v24  ;;  %v2764_v20 = vsub.s32 0, %v2763_v16  ;;  %v2772_v21 = vsub.s32 2, %v2763_v16  ;;  %v2768_v23 = vsub.s32 1, %v2763_v16  ;;  %v2776_v24 = vsub.s32 3, %v2763_v16 }
 0x166   : > { %v2773_v2 = vrot.slane %v2760_v22, %v2772_v21  ;;  %v2769_v17 = vrot.slane %v2760_v22, %v2768_v23 }
 0x167   : > { %2523 = vmatpush1.bf16.msra.mxu0 %v3681_v25  ;;  %2695 = vmatpush1.bf16.msra.mxu1 %v3684_v26  ;;  %v2765_v25 = vrot.slane %v2760_v22, %v2764_v20  ;;  %v2777_v26 = vrot.slane %v2760_v22, %v2776_v24 }
 0x168   : > { %2524 = vmatprep.subr.bf16.mxu0 %v3689_v27  ;;  %2696 = vmatprep.subr.bf16.mxu1 %v3692_v28 }
 0x16b   : > { %2525 = vmatpush1.bf16.msra.mxu0 %v3687_v29  ;;  %2697 = vmatpush1.bf16.msra.mxu1 %v3690_v30 }
 0x16c   : > { %2526 = vmatprep.subr.bf16.mxu0 %v3695_v31  ;;  %2698 = vmatprep.subr.bf16.mxu1 %v3698_v32 }
 0x16f   : > { %2527 = vmatpush1.bf16.msra.mxu0 %v3693_v33  ;;  %2699 = vmatpush1.bf16.msra.mxu1 %v3696_v34 }
 0x170   : > { %2528 = vmatprep.subr.bf16.mxu0 %v3701_v35  ;;  %2700 = vmatprep.subr.bf16.mxu1 %v3704_v36 }
 0x173   : > { %2529 = vmatpush1.bf16.msra.mxu0 %v3699_v37  ;;  %2701 = vmatpush1.bf16.msra.mxu1 %v3702_v38 }
 0x174   : > { %2530 = vmatprep.subr.bf16.mxu0 %v3707_v39  ;;  %2702 = vmatprep.subr.bf16.mxu1 %v3710_v40 }
 0x177   : > { %2531 = vmatpush1.bf16.msra.mxu0 %v3705_v41  ;;  %2703 = vmatpush1.bf16.msra.mxu1 %v3708_v42 }
 0x178   : > { %2532 = vmatprep.subr.bf16.mxu0 %v3713_v43  ;;  %2704 = vmatprep.subr.bf16.mxu1 %v3716_v44 }
 0x17b   : > { %2533 = vmatpush1.bf16.msra.mxu0 %v3711_v45  ;;  %2705 = vmatpush1.bf16.msra.mxu1 %v3714_v46 }
 0x17c   : > { %2534 = vmatprep.subr.bf16.mxu0 %v3719_v47  ;;  %2706 = vmatprep.subr.bf16.mxu1 %v3722_v48 }
 0x17f   : > { %2535 = vmatpush1.bf16.msra.mxu0 %v3717_v49  ;;  %2707 = vmatpush1.bf16.msra.mxu1 %v3720_v50 }
 0x180   : > { %2536 = vmatprep.subr.bf16.mxu0 %v3725_v51  ;;  %2708 = vmatprep.subr.bf16.mxu1 %v3728_v52 }
 0x183   : > { %2537 = vmatpush1.bf16.msra.mxu0 %v3723_v53  ;;  %2709 = vmatpush1.bf16.msra.mxu1 %v3726_v54 }
 0x184   : > { %2538 = vmatprep.subr.bf16.mxu0 %v3731_v55  ;;  %2710 = vmatprep.subr.bf16.mxu1 %v3734_v56 }
 0x187   : > { %2539 = vmatpush1.bf16.msra.mxu0 %v3729_v57  ;;  %2711 = vmatpush1.bf16.msra.mxu1 %v3732_v58 }
 0x188   : > { %2540 = vmatprep.subr.bf16.mxu0 %v3737_v59  ;;  %2712 = vmatprep.subr.bf16.mxu1 %v3740_v60 }
 0x18b   : > { %2541 = vmatpush1.bf16.msra.mxu0 %v3735_v61  ;;  %2713 = vmatpush1.bf16.msra.mxu1 %v3738_v62 }
 0x18c   : > { %2542 = vmatprep.subr.bf16.mxu0 %v3743_v63  ;;  %2714 = vmatprep.subr.bf16.mxu1 %v3746_v0 }
 0x18f   : > { %2543 = vmatpush1.bf16.msra.mxu0 %v3741_v1  ;;  %2715 = vmatpush1.bf16.msra.mxu1 %v3744_v3 }
 0x190   : > { %2544 = vmatprep.subr.bf16.mxu0 %v3749_v4  ;;  %2716 = vmatprep.subr.bf16.mxu1 %v3752_v5 }
 0x193   : > { %2545 = vmatpush1.bf16.msra.mxu0 %v3747_v6  ;;  %2717 = vmatpush1.bf16.msra.mxu1 %v3750_v7 }
 0x194   : > { %2546 = vmatprep.subr.bf16.mxu0 %v3755_v8  ;;  %2718 = vmatprep.subr.bf16.mxu1 %v3758_v9 }
 0x197   : > { %2547 = vmatpush1.bf16.msra.mxu0 %v3753_v10  ;;  %2719 = vmatpush1.bf16.msra.mxu1 %v3756_v11 }
 0x198   : > { %2548 = vmatprep.subr.bf16.mxu0 %v3761_v12  ;;  %2720 = vmatprep.subr.bf16.mxu1 %v3764_v13 }
 0x19b   : > { %2549 = vmatpush1.bf16.msra.mxu0 %v3759_v14  ;;  %2721 = vmatpush1.bf16.msra.mxu1 %v3762_v18 }
 0x19e   : > { %2551 = vmatmul.mubr.bf16.vlgmr.msra.gmra.mrb[0].mxu0 %v3052_v19  ;;  %2723 = vmatmul.mubr.bf16.vlgmr.msra.gmra.mrb[0].mxu1 %v3052_v19 }
 0x271   : > { %v2552_v27 = vpop.f32.mrb[0].mxu0  ;;  %v2724_v28 = vpop.f32.mrb[0].mxu1 }
 0x272   : > { %v4756_v29 = vadd.f32 %v2765_v25, %v2552_v27  ;;  %v4758_v30 = vadd.f32 %v2773_v2, %v2724_v28  ;;  %v2554_v31 = vpop.f32.mrb[1].mxu0  ;;  %v2726_v32 = vpop.f32.mrb[1].mxu1 }
 0x273   : > { %v4760_v33 = vadd.f32 %v2769_v17, %v2554_v31  ;;  %v4762_v34 = vadd.f32 %v2777_v26, %v2726_v32  ;;  %v2556_v35 = vpop.f32.mrb[2].mxu0  ;;  %v2728_v36 = vpop.f32.mrb[2].mxu1 }
 0x274   : > { %v2798_v37 = vand.u32 2147483647, %v4756_v29  ;;  %v2800_v38 = vand.u32 2147483647, %v4758_v30  ;;  %v4768_v43 = vadd.f32 %v2765_v25, %v2556_v35  ;;  %v4770_v44 = vadd.f32 %v2773_v2, %v2728_v36  ;;  %v2558_v45 = vpop.f32.mrb[3].mxu0  ;;  %v2730_v46 = vpop.f32.mrb[3].mxu1 }
 0x275   : > { %v2799_v39 = vand.u32 2147483647, %v4760_v33  ;;  %v2801_v40 = vand.u32 2147483647, %v4762_v34  ;;  %v4772_v49 = vadd.f32 %v2769_v17, %v2558_v45  ;;  %v4774_v50 = vadd.f32 %v2777_v26, %v2730_v46 }
 0x276   : > { %v2806_v41 = vsub.f32 0.0, %v2798_v37  ;;  %v2808_v42 = vsub.f32 0.0, %v2800_v38  ;;  %v2802_v55 = vand.u32 2147483647, %v4768_v43  ;;  %v2804_v56 = vand.u32 2147483647, %v4770_v44 }
 0x277   : > { %v2807_v47 = vsub.f32 0.0, %v2799_v39  ;;  %v2809_v48 = vsub.f32 0.0, %v2801_v40  ;;  %v2803_v57 = vand.u32 2147483647, %v4772_v49  ;;  %v2805_v59 = vand.u32 2147483647, %v4774_v50 }
 0x278   : > { %v2814_v51 = vmul.f32 1.442695, %v2806_v41  ;;  %v2818_v52 = vmul.f32 1.442695, %v2808_v42  ;;  %v2810_v58 = vsub.f32 0.0, %v2802_v55  ;;  %v2812_v60 = vsub.f32 0.0, %v2804_v56 }
 0x279   : > { %v2816_v53 = vmul.f32 1.442695, %v2807_v47  ;;  %v2820_v54 = vmul.f32 1.442695, %v2809_v48  ;;  %v2811_v61 = vsub.f32 0.0, %v2803_v57  ;;  %v2813_v63 = vsub.f32 0.0, %v2805_v59 }
 0x27a   : > { %3765 = vpow2.f32 %v2814_v51  ;;  %v2822_v62 = vmul.f32 1.442695, %v2810_v58  ;;  %v2826_v0 = vmul.f32 1.442695, %v2812_v60  ;;  %v2790_v23 = vmax.f32 %v4756_v29, 0.0 }
 0x27b   : > { %3767 = vpow2.f32 %v2818_v52  ;;  %v2824_v1 = vmul.f32 1.442695, %v2811_v61  ;;  %v2828_v3 = vmul.f32 1.442695, %v2813_v63  ;;  %v2792_v2 = vmax.f32 %v4758_v30, 0.0 }
 0x27c   : > { %3769 = vpow2.f32 %v2816_v53  ;;  %v2791_v28 = vmax.f32 %v4760_v33, 0.0  ;;  %v2793_v35 = vmax.f32 %v4762_v34, 0.0  ;;  %v2794_v41 = vmax.f32 %v4768_v43, 0.0 }
 0x27d   : > { %3771 = vpow2.f32 %v2820_v54  ;;  %v2796_v46 = vmax.f32 %v4770_v44, 0.0  ;;  %v2795_v52 = vmax.f32 %v4772_v49, 0.0  ;;  %v2797_v55 = vmax.f32 %v4774_v50, 0.0 }
 0x27e   : > { %3773 = vpow2.f32 %v2822_v62 }
 0x27f   : > { %3775 = vpow2.f32 %v2826_v0 }
 0x280   : > { %3777 = vpow2.f32 %v2824_v1 }
 0x281   : > { %3779 = vpow2.f32 %v2828_v3 }
 0x284   : > { %v3766_v4 = vpop.eup %3765 }
 0x285   : > { %v3768_v5 = vpop.eup %3767  ;;  %v2830_v6 = vadd.f32 1.0, %v3766_v4 }
 0x286   : > { %v3770_v7 = vpop.eup %3769  ;;  %v2832_v8 = vadd.f32 1.0, %v3768_v5 }
 0x287   : > { %v3772_v9 = vpop.eup %3771  ;;  %3781 = vlog2.f32 %v2830_v6  ;;  %v2831_v10 = vadd.f32 1.0, %v3770_v7 }
 0x288   : > { %3783 = vlog2.f32 %v2832_v8  ;;  %v2833_v11 = vadd.f32 1.0, %v3772_v9  ;;  %v3774_v12 = vpop.eup %3773 }
 0x289   : > { %3785 = vlog2.f32 %v2831_v10  ;;  %v3776_v13 = vpop.eup %3775  ;;  %v2834_v14 = vadd.f32 1.0, %v3774_v12 }
 0x28a   : > { %3787 = vlog2.f32 %v2833_v11  ;;  %v3778_v18 = vpop.eup %3777  ;;  %v2836_v19 = vadd.f32 1.0, %v3776_v13 }
 0x28b   : > { %v3780_v15 = vpop.eup %3779  ;;  %3789 = vlog2.f32 %v2834_v14  ;;  %v2835_v16 = vadd.f32 1.0, %v3778_v18 }
 0x28c   : > { %3791 = vlog2.f32 %v2836_v19  ;;  %v2837_v20 = vadd.f32 1.0, %v3780_v15 }
 0x28d   : > { %3793 = vlog2.f32 %v2835_v16 }
 0x28e   : > { %3795 = vlog2.f32 %v2837_v20 }
 0x291   : > { %v3782_v21 = vpop.eup %3781 }
 0x292   : > { %v3784_v22 = vpop.eup %3783  ;;  %v2839_v24 = vmul.f32 0.6931472, %v3782_v21 }
 0x293   : > { %v3786_v25 = vpop.eup %3785  ;;  %v2843_v17 = vmul.f32 0.6931472, %v3784_v22 }
 0x294   : > { %v3788_v26 = vpop.eup %3787  ;;  %v2854_v27 = vadd.f32 %v2839_v24, %v2790_v23  ;;  %v2841_v31 = vmul.f32 0.6931472, %v3786_v25 }
 0x295   : > { %v2856_v32 = vadd.f32 %v2843_v17, %v2792_v2  ;;  %v2845_v36 = vmul.f32 0.6931472, %v3788_v26  ;;  %v3790_v37 = vpop.eup %3789 }
 0x296   : > { %3797 = vtanh.f32 %v2854_v27  ;;  %v2855_v38 = vadd.f32 %v2841_v31, %v2791_v28  ;;  %v3792_v39 = vpop.eup %3791  ;;  %v2847_v42 = vmul.f32 0.6931472, %v3790_v37 }
 0x297   : > { %3799 = vtanh.f32 %v2856_v32  ;;  %v2857_v40 = vadd.f32 %v2845_v36, %v2793_v35  ;;  %v3794_v45 = vpop.eup %3793  ;;  %v2851_v47 = vmul.f32 0.6931472, %v3792_v39 }
 0x298   : > { %3801 = vtanh.f32 %v2855_v38  ;;  %v3796_v48 = vpop.eup %3795  ;;  %v2858_v51 = vadd.f32 %v2847_v42, %v2794_v41  ;;  %v2849_v53 = vmul.f32 0.6931472, %v3794_v45 }
 0x299   : > { %3803 = vtanh.f32 %v2857_v40  ;;  %v2860_v54 = vadd.f32 %v2851_v47, %v2796_v46  ;;  %v2853_v56 = vmul.f32 0.6931472, %v3796_v48 }
 0x29a   : > { %3805 = vtanh.f32 %v2858_v51  ;;  %v2859_v57 = vadd.f32 %v2849_v53, %v2795_v52 }
 0x29b   : > { %3807 = vtanh.f32 %v2860_v54  ;;  %v2861_v58 = vadd.f32 %v2853_v56, %v2797_v55 }
 0x29c   : > { %3809 = vtanh.f32 %v2859_v57 }
 0x29d   : > { %3811 = vtanh.f32 %v2861_v58 }
 0x2a0   : > { %v3798_v59 = vpop.eup %3797 }
 0x2a1   : > { %v3800_v60 = vpop.eup %3799  ;;  %v2870_v61 = vmul.f32 %v3798_v59, %v4756_v29 }
 0x2a2   : > { %v3802_v62 = vpop.eup %3801  ;;  %v2872_v63 = vmul.f32 %v3800_v60, %v4758_v30 }
 0x2a3   : > { %v3804_v0 = vpop.eup %3803  ;;  %2878 = vst [vmem:[%s4792_s9] sm:$0xff] %v2870_v61  ;;  %v2871_v1 = vmul.f32 %v3802_v62, %v4760_v33 }
 0x2a4   : > { %2880 = vst [vmem:[%s4792_s9 + $0x10] sm:$0xff] %v2872_v63  ;;  %v2873_v29 = vmul.f32 %v3804_v0, %v4762_v34  ;;  %v3806_v3 = vpop.eup %3805  ;;  %2892 = sbr.rel (!%p3908_p6) target bundleno = 691 (0x2b3), region = 67 }
 0x2a5   : > { %2879 = vst [vmem:[%s4792_s9 + $0x8] sm:$0xff] %v2871_v1  ;;  %v3808_v30 = vpop.eup %3807  ;;  %v2874_v4 = vmul.f32 %v3806_v3, %v4768_v43 }
 0x2a6   : > { %2881 = vst [vmem:[%s4792_s9 + $0x18] sm:$0xff] %v2873_v29  ;;  %v3810_v5 = vpop.eup %3809  ;;  %v2876_v6 = vmul.f32 %v3808_v30, %v4770_v44 }
 0x2a7   : > { %v3812_v7 = vpop.eup %3811  ;;  %2882 = vst [vmem:[%s4792_s9 + $0x20] sm:$0xff] %v2874_v4  ;;  %v2875_v8 = vmul.f32 %v3810_v5, %v4772_v49 }
 0x2a8   : > { %2884 = vst [vmem:[%s4792_s9 + $0x30] sm:$0xff] %v2876_v6  ;;  %v2877_v33 = vmul.f32 %v3812_v7, %v4774_v50 }
 0x2a9   : > { %2883 = vst [vmem:[%s4792_s9 + $0x28] sm:$0xff] %v2875_v8 }
 0x2aa   : > { %2885 = vst [vmem:[%s4792_s9 + $0x38] sm:$0xff] %v2877_v33  ;;  %v2911_v34 = vld [vmem:[%s4792_s9] sm:$0xff] (%p3908_p6) }
 0x2ab   : > { %v2915_v44 = vld [vmem:[%s4792_s9 + $0x10] sm:$0xff]  ;;  %2912 = vst [vmem:[%s2898_s11] sm:$0xff] %v2911_v34 }
 0x2ac   : > { %v2913_v43 = vld [vmem:[%s4792_s9 + $0x8] sm:$0xff]  ;;  %2916 = vst [vmem:[%s2898_s11 + $0x10] sm:$0xff] %v2915_v44 }
 0x2ad   : > { %v2917_v49 = vld [vmem:[%s4792_s9 + $0x18] sm:$0xff]  ;;  %2914 = vst [vmem:[%s2898_s11 + $0x8] sm:$0xff] %v2913_v43 }
 0x2ae   : > { %v2919_v50 = vld [vmem:[%s4792_s9 + $0x20] sm:$0xff]  ;;  %2918 = vst [vmem:[%s2898_s11 + $0x18] sm:$0xff] %v2917_v49 }
 0x2af   : > { %2920 = vst [vmem:[%s2898_s11 + $0x40] sm:$0xff] %v2919_v50  ;;  %v2923_v10 = vld [vmem:[%s4792_s9 + $0x30] sm:$0xff] }
 0x2b0   : > { %v2921_v9 = vld [vmem:[%s4792_s9 + $0x28] sm:$0xff]  ;;  %2924 = vst [vmem:[%s2898_s11 + $0x50] sm:$0xff] %v2923_v10 }
 0x2b1   : > { %2922 = vst [vmem:[%s2898_s11 + $0x48] sm:$0xff] %v2921_v9  ;;  %v2925_v11 = vld [vmem:[%s4792_s9 + $0x38] sm:$0xff] }
 0x2b2   : > { %2926 = vst [vmem:[%s2898_s11 + $0x58] sm:$0xff] %v2925_v11 }
 0x2b3 PF: > { %s13_s16 = sadd.s32 1, %s3851_s16   ;;  %s4842_s12 = smov %s3839_s13 }
 0x2b4   : > { %p10_p12 = scmp.ge.s32.totalorder %s13_s16, 4   ;;  %s4843_s13 = smov %s3913_s22 }
 0x2b5   : > { %s4844_s14 = smov %s3847_s15  ;;  %s4845_s15 = smov %s4847_s17 }
 0x2b6   :  { %12 = sbr.rel (!%p10_p12) target bundleno = 3 (0x3), region = 127 }

// kernel: downsample5_forward.14
= control target key start
LH: loop header
LB: loop body
LE: loop exit
PB: predicated region body
PF: predicated region fallthrough
CT: control target
= control target key end

     0   :  { %s1584_s12 = smov 0   ;;  %s1586_s13 = smov 0   ;;  %s1874_s0 = inlined_call_operand.vmem [shape: bf16[16,512], index: 0, kind: input, shape index: {}]   ;;  %s1875_s1 = inlined_call_operand.vmem [shape: bf16[512,512], index: 1, kind: input, shape index: {}]   ;;  %s1876_s2 = inlined_call_operand.vmem [shape: f32[1,512], index: 2, kind: input, shape index: {}]   ;;  %s1877_s3 = inlined_call_operand.vmem [shape: f32[16,512], index: 3, kind: output, shape index: {}]  }
   0x1   :  { %s1588_s14 = smov 0   ;;  %s1590_s15 = smov 0  }
   0x2   :  { %s1592_s16 = smov 0  }
   0x3 LB: > { %s28_s17 = sadd.s32 1, %s1558_s15  ;;  %s1267_s18 = sadd.s32 4294967295, %s1562_s16   ;;  %s1562_s16 = sphi %s1592_s16, %s13_s16   ;;  %s1558_s15 = sphi %s1590_s15, %s1882_s15   ;;  %s1554_s14 = sphi %s1588_s14, %s1881_s14   ;;  %s1550_s13 = sphi %s1586_s13, %s1880_s13   ;;  %s1546_s12 = sphi %s1584_s12, %s1879_s12  }
   0x4   : > { %p30_p0 = scmp.ge.s32.totalorder %s28_s17, 2  ;;  %p76_p1 = scmp.ne.s32.totalorder %s1550_s13, %s1546_s12 }
   0x5   : > { %p77_p2 = scmp.eq.s32.totalorder %s1562_s16, 0  ;;  %p134_p4 = scmp.eq.s32.totalorder %s1267_s18, 1 }
   0x6   : > { %s1884_s17 = smov (%p30_p0, %s28_s17), 0  ;;  %s69_s20 = sadd.s32 1, %s1550_s13 }
   0x7   : > { %p78_p3 = por %p77_p2, %p76_p1  ;;  %s65_s19 = ssub.s32 %s1558_s15, %s1884_s17 }
   0x8   : > { %p67_p5 = scmp.eq.s32.totalorder %s65_s19, 0  ;;  %p1619_p6 = por %p134_p4, %p76_p1 }
   0x9   : > { %p1271_p7 = scmp.ge.s32.totalorder %s1562_s16, 2 }
   0xa   : > { %s1624_s22 = scalar_select %p67_p5, %s1550_s13, %s69_s20  }
   0xb   : > { %171 = sbr.rel (%p1271_p7) target bundleno = 54 (0x36), region = 20 }
  0x12   : > { %174 = sbr.rel (!%p78_p3) target bundleno = 54 (0x36), region = 24  ;;  %s176_s23 = sand.u32 (%p78_p3), 1, %s1550_s13  }
  0x13   : > { %s1352_s24 = sshll.u32 (%p78_p3), %s1558_s15, 3  ;;  %s1272_s25 = sshll.u32 (%p78_p3), %s176_s23, 9 }
  0x14   : > { %s1632_s28 = scalar_lea.vmem (%p78_p3), %s1875_s1, %s1352_s24  ;;  %s1637_s29 = scalar_lea.vmem (%p78_p3), [#allocation3], %s1272_s25 }
  0x15   : > { %v338_v0 = vld [vmem:[%s1632_s28] sm:$0xff] (%p78_p3)  ;;  %v340_v1 = vld [vmem:[%s1632_s28 + $0x10] sm:$0xff] (%p78_p3) }
  0x16   : > { %v342_v2 = vld [vmem:[%s1632_s28 + $0x20] sm:$0xff] (%p78_p3)  ;;  %339 = vst [vmem:[%s1637_s29] sm:$0xff] (%p78_p3), %v338_v0  ;;  %341 = vst [vmem:[%s1637_s29 + $0x8] sm:$0xff] (%p78_p3), %v340_v1  ;;  %v344_v3 = vld [vmem:[%s1632_s28 + $0x30] sm:$0xff] (%p78_p3) }
  0x17   : > { %343 = vst [vmem:[%s1637_s29 + $0x10] sm:$0xff] (%p78_p3), %v342_v2  ;;  %v346_v4 = vld [vmem:[%s1632_s28 + $0x40] sm:$0xff] (%p78_p3)  ;;  %v348_v5 = vld [vmem:[%s1632_s28 + $0x50] sm:$0xff] (%p78_p3)  ;;  %345 = vst [vmem:[%s1637_s29 + $0x18] sm:$0xff] (%p78_p3), %v344_v3 }
  0x18   : > { %347 = vst [vmem:[%s1637_s29 + $0x20] sm:$0xff] (%p78_p3), %v346_v4  ;;  %349 = vst [vmem:[%s1637_s29 + $0x28] sm:$0xff] (%p78_p3), %v348_v5  ;;  %v350_v6 = vld [vmem:[%s1632_s28 + $0x60] sm:$0xff] (%p78_p3)  ;;  %v352_v7 = vld [vmem:[%s1632_s28 + $0x70] sm:$0xff] (%p78_p3) }
  0x19   : > { %v354_v8 = vld [vmem:[%s1632_s28 + $0x80] sm:$0xff]  ;;  %351 = vst [vmem:[%s1637_s29 + $0x30] sm:$0xff] %v350_v6  ;;  %353 = vst [vmem:[%s1637_s29 + $0x38] sm:$0xff] %v352_v7  ;;  %v356_v9 = vld [vmem:[%s1632_s28 + $0x90] sm:$0xff] }
  0x1a   : > { %355 = vst [vmem:[%s1637_s29 + $0x40] sm:$0xff] %v354_v8  ;;  %v358_v10 = vld [vmem:[%s1632_s28 + $0xa0] sm:$0xff]  ;;  %v360_v11 = vld [vmem:[%s1632_s28 + $0xb0] sm:$0xff]  ;;  %357 = vst [vmem:[%s1637_s29 + $0x48] sm:$0xff] %v356_v9 }
  0x1b   : > { %359 = vst [vmem:[%s1637_s29 + $0x50] sm:$0xff] %v358_v10  ;;  %361 = vst [vmem:[%s1637_s29 + $0x58] sm:$0xff] %v360_v11  ;;  %v362_v12 = vld [vmem:[%s1632_s28 + $0xc0] sm:$0xff]  ;;  %v364_v13 = vld [vmem:[%s1632_s28 + $0xd0] sm:$0xff] }
  0x1c   : > { %v366_v14 = vld [vmem:[%s1632_s28 + $0xe0] sm:$0xff]  ;;  %363 = vst [vmem:[%s1637_s29 + $0x60] sm:$0xff] %v362_v12  ;;  %365 = vst [vmem:[%s1637_s29 + $0x68] sm:$0xff] %v364_v13  ;;  %v368_v15 = vld [vmem:[%s1632_s28 + $0xf0] sm:$0xff] }
  0x1d   : > { %367 = vst [vmem:[%s1637_s29 + $0x70] sm:$0xff] %v366_v14  ;;  %v370_v16 = vld [vmem:[%s1632_s28 + $0x100] sm:$0xff]  ;;  %v372_v17 = vld [vmem:[%s1632_s28 + $0x110] sm:$0xff]  ;;  %369 = vst [vmem:[%s1637_s29 + $0x78] sm:$0xff] %v368_v15 }
  0x1e   : > { %371 = vst [vmem:[%s1637_s29 + $0x80] sm:$0xff] %v370_v16  ;;  %373 = vst [vmem:[%s1637_s29 + $0x88] sm:$0xff] %v372_v17  ;;  %v374_v18 = vld [vmem:[%s1632_s28 + $0x120] sm:$0xff]  ;;  %v376_v19 = vld [vmem:[%s1632_s28 + $0x130] sm:$0xff] }
  0x1f   : > { %v378_v20 = vld [vmem:[%s1632_s28 + $0x140] sm:$0xff]  ;;  %375 = vst [vmem:[%s1637_s29 + $0x90] sm:$0xff] %v374_v18  ;;  %377 = vst [vmem:[%s1637_s29 + $0x98] sm:$0xff] %v376_v19  ;;  %v380_v21 = vld [vmem:[%s1632_s28 + $0x150] sm:$0xff] }
  0x20   : > { %379 = vst [vmem:[%s1637_s29 + $0xa0] sm:$0xff] %v378_v20  ;;  %v382_v22 = vld [vmem:[%s1632_s28 + $0x160] sm:$0xff]  ;;  %v384_v23 = vld [vmem:[%s1632_s28 + $0x170] sm:$0xff]  ;;  %381 = vst [vmem:[%s1637_s29 + $0xa8] sm:$0xff] %v380_v21 }
  0x21   : > { %383 = vst [vmem:[%s1637_s29 + $0xb0] sm:$0xff] %v382_v22  ;;  %385 = vst [vmem:[%s1637_s29 + $0xb8] sm:$0xff] %v384_v23  ;;  %v386_v24 = vld [vmem:[%s1632_s28 + $0x180] sm:$0xff]  ;;  %v388_v25 = vld [vmem:[%s1632_s28 + $0x190] sm:$0xff] }
  0x22   : > { %v390_v26 = vld [vmem:[%s1632_s28 + $0x1a0] sm:$0xff]  ;;  %387 = vst [vmem:[%s1637_s29 + $0xc0] sm:$0xff] %v386_v24  ;;  %389 = vst [vmem:[%s1637_s29 + $0xc8] sm:$0xff] %v388_v25  ;;  %v392_v27 = vld [vmem:[%s1632_s28 + $0x1b0] sm:$0xff] }
  0x23   : > { %391 = vst [vmem:[%s1637_s29 + $0xd0] sm:$0xff] %v390_v26  ;;  %v394_v28 = vld [vmem:[%s1632_s28 + $0x1c0] sm:$0xff]  ;;  %v396_v29 = vld [vmem:[%s1632_s28 + $0x1d0] sm:$0xff]  ;;  %393 = vst [vmem:[%s1637_s29 + $0xd8] sm:$0xff] %v392_v27 }
  0x24   : > { %395 = vst [vmem:[%s1637_s29 + $0xe0] sm:$0xff] %v394_v28  ;;  %397 = vst [vmem:[%s1637_s29 + $0xe8] sm:$0xff] %v396_v29  ;;  %v398_v30 = vld [vmem:[%s1632_s28 + $0x1e0] sm:$0xff]  ;;  %v400_v31 = vld [vmem:[%s1632_s28 + $0x1f0] sm:$0xff] }
  0x25   : > { %v402_v32 = vld [vmem:[%s1632_s28 + $0x200] sm:$0xff]  ;;  %399 = vst [vmem:[%s1637_s29 + $0xf0] sm:$0xff] %v398_v30  ;;  %401 = vst [vmem:[%s1637_s29 + $0xf8] sm:$0xff] %v400_v31  ;;  %v404_v33 = vld [vmem:[%s1632_s28 + $0x210] sm:$0xff] }
  0x26   : > { %403 = vst [vmem:[%s1637_s29 + $0x100] sm:$0xff] %v402_v32  ;;  %v406_v34 = vld [vmem:[%s1632_s28 + $0x220] sm:$0xff]  ;;  %v408_v35 = vld [vmem:[%s1632_s28 + $0x230] sm:$0xff]  ;;  %405 = vst [vmem:[%s1637_s29 + $0x108] sm:$0xff] %v404_v33 }
  0x27   : > { %407 = vst [vmem:[%s1637_s29 + $0x110] sm:$0xff] %v406_v34  ;;  %409 = vst [vmem:[%s1637_s29 + $0x118] sm:$0xff] %v408_v35  ;;  %v410_v36 = vld [vmem:[%s1632_s28 + $0x240] sm:$0xff]  ;;  %v412_v37 = vld [vmem:[%s1632_s28 + $0x250] sm:$0xff] }
  0x28   : > { %v414_v38 = vld [vmem:[%s1632_s28 + $0x260] sm:$0xff]  ;;  %411 = vst [vmem:[%s1637_s29 + $0x120] sm:$0xff] %v410_v36  ;;  %413 = vst [vmem:[%s1637_s29 + $0x128] sm:$0xff] %v412_v37  ;;  %v416_v39 = vld [vmem:[%s1632_s28 + $0x270] sm:$0xff] }
  0x29   : > { %415 = vst [vmem:[%s1637_s29 + $0x130] sm:$0xff] %v414_v38  ;;  %v418_v40 = vld [vmem:[%s1632_s28 + $0x280] sm:$0xff]  ;;  %v420_v41 = vld [vmem:[%s1632_s28 + $0x290] sm:$0xff]  ;;  %417 = vst [vmem:[%s1637_s29 + $0x138] sm:$0xff] %v416_v39 }
  0x2a   : > { %419 = vst [vmem:[%s1637_s29 + $0x140] sm:$0xff] %v418_v40  ;;  %421 = vst [vmem:[%s1637_s29 + $0x148] sm:$0xff] %v420_v41  ;;  %v422_v42 = vld [vmem:[%s1632_s28 + $0x2a0] sm:$0xff]  ;;  %v424_v43 = vld [vmem:[%s1632_s28 + $0x2b0] sm:$0xff] }
  0x2b   : > { %v426_v44 = vld [vmem:[%s1632_s28 + $0x2c0] sm:$0xff]  ;;  %423 = vst [vmem:[%s1637_s29 + $0x150] sm:$0xff] %v422_v42  ;;  %425 = vst [vmem:[%s1637_s29 + $0x158] sm:$0xff] %v424_v43  ;;  %v428_v45 = vld [vmem:[%s1632_s28 + $0x2d0] sm:$0xff] }
  0x2c   : > { %427 = vst [vmem:[%s1637_s29 + $0x160] sm:$0xff] %v426_v44  ;;  %v430_v46 = vld [vmem:[%s1632_s28 + $0x2e0] sm:$0xff]  ;;  %v432_v47 = vld [vmem:[%s1632_s28 + $0x2f0] sm:$0xff]  ;;  %429 = vst [vmem:[%s1637_s29 + $0x168] sm:$0xff] %v428_v45 }
  0x2d   : > { %431 = vst [vmem:[%s1637_s29 + $0x170] sm:$0xff] %v430_v46  ;;  %433 = vst [vmem:[%s1637_s29 + $0x178] sm:$0xff] %v432_v47  ;;  %v434_v48 = vld [vmem:[%s1632_s28 + $0x300] sm:$0xff]  ;;  %v436_v49 = vld [vmem:[%s1632_s28 + $0x310] sm:$0xff] }
  0x2e   : > { %v438_v50 = vld [vmem:[%s1632_s28 + $0x320] sm:$0xff]  ;;  %435 = vst [vmem:[%s1637_s29 + $0x180] sm:$0xff] %v434_v48  ;;  %437 = vst [vmem:[%s1637_s29 + $0x188] sm:$0xff] %v436_v49  ;;  %v440_v51 = vld [vmem:[%s1632_s28 + $0x330] sm:$0xff] }
  0x2f   : > { %439 = vst [vmem:[%s1637_s29 + $0x190] sm:$0xff] %v438_v50  ;;  %v442_v52 = vld [vmem:[%s1632_s28 + $0x340] sm:$0xff]  ;;  %v444_v53 = vld [vmem:[%s1632_s28 + $0x350] sm:$0xff]  ;;  %441 = vst [vmem:[%s1637_s29 + $0x198] sm:$0xff] %v440_v51 }
  0x30   : > { %443 = vst [vmem:[%s1637_s29 + $0x1a0] sm:$0xff] %v442_v52  ;;  %445 = vst [vmem:[%s1637_s29 + $0x1a8] sm:$0xff] %v444_v53  ;;  %v446_v54 = vld [vmem:[%s1632_s28 + $0x360] sm:$0xff]  ;;  %v448_v55 = vld [vmem:[%s1632_s28 + $0x370] sm:$0xff] }
  0x31   : > { %v450_v56 = vld [vmem:[%s1632_s28 + $0x380] sm:$0xff]  ;;  %447 = vst [vmem:[%s1637_s29 + $0x1b0] sm:$0xff] %v446_v54  ;;  %449 = vst [vmem:[%s1637_s29 + $0x1b8] sm:$0xff] %v448_v55  ;;  %v452_v57 = vld [vmem:[%s1632_s28 + $0x390] sm:$0xff] }
  0x32   : > { %451 = vst [vmem:[%s1637_s29 + $0x1c0] sm:$0xff] %v450_v56  ;;  %v454_v58 = vld [vmem:[%s1632_s28 + $0x3a0] sm:$0xff]  ;;  %v456_v59 = vld [vmem:[%s1632_s28 + $0x3b0] sm:$0xff]  ;;  %453 = vst [vmem:[%s1637_s29 + $0x1c8] sm:$0xff] %v452_v57 }
  0x33   : > { %455 = vst [vmem:[%s1637_s29 + $0x1d0] sm:$0xff] %v454_v58  ;;  %457 = vst [vmem:[%s1637_s29 + $0x1d8] sm:$0xff] %v456_v59  ;;  %v458_v60 = vld [vmem:[%s1632_s28 + $0x3c0] sm:$0xff]  ;;  %v460_v61 = vld [vmem:[%s1632_s28 + $0x3d0] sm:$0xff] }
  0x34   : > { %v462_v62 = vld [vmem:[%s1632_s28 + $0x3e0] sm:$0xff]  ;;  %459 = vst [vmem:[%s1637_s29 + $0x1e0] sm:$0xff] %v458_v60  ;;  %461 = vst [vmem:[%s1637_s29 + $0x1e8] sm:$0xff] %v460_v61  ;;  %v464_v63 = vld [vmem:[%s1632_s28 + $0x3f0] sm:$0xff] }
  0x35   : > { %463 = vst [vmem:[%s1637_s29 + $0x1f0] sm:$0xff] %v462_v62  ;;  %465 = vst [vmem:[%s1637_s29 + $0x1f8] sm:$0xff] %v464_v63 }
  0x36 PF: > { %p1275_p8 = scmp.ge.s32.totalorder %s1562_s16, 1  ;;  %p478_p9 = scmp.lt.s32.totalorder %s1562_s16, 3 }
  0x38   : > { %p479_p10 = pnand %p1275_p8, %p478_p9 }
  0x39   : > { %s485_s30 = sand.u32 (!%p479_p10), 1, %s1546_s12   ;;  %v1496_v0 = vld [vmem:[%s1874_s0 + $0x4] ss:$16 sps:$4 sm:$0xff] (!%p479_p10)   ;;  %v1499_v1 = vld [vmem:[%s1874_s0 + $0xc] ss:$16 sps:$4 sm:$0xff] (!%p479_p10)   ;;  %s1278_s20 = sshll.u32 (!%p479_p10), %s1554_s14, 1 }
  0x3a   : > { %482 = sbr.rel (%p479_p10) target bundleno = 401 (0x191), region = 66  ;;  %s1276_s4 = sshll.u32 (!%p479_p10), %s485_s30, 9  ;;  %994 = vmatprep.mubr.bf16.mxu1 (!%p479_p10), %v1496_v0  ;;  %1037 = vmatprep.mubr.bf16.mxu0 (!%p479_p10), %v1499_v1 }
  0x3b   : > { %s1775_s9 = scalar_lea.vmem (!%p479_p10), [#allocation3], %s1276_s4  ;;  %p536_p11 = scmp.lt.s32.totalorder (!%p479_p10), %s1278_s20, 3 }
  0x3c   : > { %v1398_v2 = vld [vmem:[%s1775_s9 + $0x4] ss:$8 sps:$4 sm:$0xff] (!%p479_p10)   ;;  %v1402_v4 = vld [vmem:[%s1775_s9] ss:$8 sps:$4 sm:$0xff] (!%p479_p10)   ;;  %v1404_v6 = vld [vmem:[%s1775_s9 + $0x14] ss:$8 sps:$4 sm:$0xff] (!%p479_p10)  }
  0x3d   : > { %v1400_v3 = vld [vmem:[%s1775_s9 + $0x104] ss:$8 sps:$4 sm:$0xff] (!%p479_p10)   ;;  %962 = vmatprep.subr.bf16.mxu1 (!%p479_p10), %v1398_v2  ;;  %v1403_v5 = vld [vmem:[%s1775_s9 + $0x100] ss:$8 sps:$4 sm:$0xff] (!%p479_p10)   ;;  %v1406_v7 = vld [vmem:[%s1775_s9 + $0x114] ss:$8 sps:$4 sm:$0xff] (!%p479_p10)  }
  0x3e   : > { %1005 = vmatprep.subr.bf16.mxu0 (!%p479_p10), %v1400_v3  ;;  %963 = vmatpush1.bf16.msra.mxu1 (!%p479_p10), %v1402_v4  ;;  %v1408_v8 = vld [vmem:[%s1775_s9 + $0x10] ss:$8 sps:$4 sm:$0xff] (!%p479_p10)   ;;  %v1410_v10 = vld [vmem:[%s1775_s9 + $0x24] ss:$8 sps:$4 sm:$0xff] (!%p479_p10)   ;;  %v1414_v12 = vld [vmem:[%s1775_s9 + $0x20] ss:$8 sps:$4 sm:$0xff] (!%p479_p10)   ;;  %v1065_v4 = vlaneseq (!%p479_p10) }
  0x3f   : > { %1006 = vmatpush1.bf16.msra.mxu0 (!%p479_p10), %v1403_v5  ;;  %964 = vmatprep.subr.bf16.mxu1 (!%p479_p10), %v1404_v6  ;;  %v1409_v9 = vld [vmem:[%s1775_s9 + $0x110] ss:$8 sps:$4 sm:$0xff] (!%p479_p10)   ;;  %v1412_v11 = vld [vmem:[%s1775_s9 + $0x124] ss:$8 sps:$4 sm:$0xff] (!%p479_p10)   ;;  %v1415_v13 = vld [vmem:[%s1775_s9 + $0x120] ss:$8 sps:$4 sm:$0xff] (!%p479_p10)  }
  0x40   : > { %1007 = vmatprep.subr.bf16.mxu0 (!%p479_p10), %v1406_v7  ;;  %v1416_v14 = vld [vmem:[%s1775_s9 + $0x34] ss:$8 sps:$4 sm:$0xff] (!%p479_p10)   ;;  %v1420_v16 = vld [vmem:[%s1775_s9 + $0x30] ss:$8 sps:$4 sm:$0xff] (!%p479_p10)   ;;  %v1422_v18 = vld [vmem:[%s1775_s9 + $0x44] ss:$8 sps:$4 sm:$0xff] (!%p479_p10)  }
  0x41   : > { %v1418_v15 = vld [vmem:[%s1775_s9 + $0x134] ss:$8 sps:$4 sm:$0xff]   ;;  %v1421_v17 = vld [vmem:[%s1775_s9 + $0x130] ss:$8 sps:$4 sm:$0xff]   ;;  %v1424_v19 = vld [vmem:[%s1775_s9 + $0x144] ss:$8 sps:$4 sm:$0xff]  }
  0x42   : > { %965 = vmatpush1.bf16.msra.mxu1 %v1408_v8  ;;  %v1426_v20 = vld [vmem:[%s1775_s9 + $0x40] ss:$8 sps:$4 sm:$0xff]   ;;  %v1428_v22 = vld [vmem:[%s1775_s9 + $0x54] ss:$8 sps:$4 sm:$0xff]   ;;  %v1432_v24 = vld [vmem:[%s1775_s9 + $0x50] ss:$8 sps:$4 sm:$0xff]  }
  0x43   : > { %1008 = vmatpush1.bf16.msra.mxu0 %v1409_v9  ;;  %966 = vmatprep.subr.bf16.mxu1 %v1410_v10  ;;  %v1427_v21 = vld [vmem:[%s1775_s9 + $0x140] ss:$8 sps:$4 sm:$0xff]   ;;  %v1430_v23 = vld [vmem:[%s1775_s9 + $0x154] ss:$8 sps:$4 sm:$0xff]   ;;  %v1433_v25 = vld [vmem:[%s1775_s9 + $0x150] ss:$8 sps:$4 sm:$0xff]  }
  0x44   : > { %1009 = vmatprep.subr.bf16.mxu0 %v1412_v11  ;;  %v1434_v26 = vld [vmem:[%s1775_s9 + $0x64] ss:$8 sps:$4 sm:$0xff]   ;;  %v1438_v28 = vld [vmem:[%s1775_s9 + $0x60] ss:$8 sps:$4 sm:$0xff]   ;;  %v1440_v30 = vld [vmem:[%s1775_s9 + $0x74] ss:$8 sps:$4 sm:$0xff]  }
  0x45   : > { %v1436_v27 = vld [vmem:[%s1775_s9 + $0x164] ss:$8 sps:$4 sm:$0xff]   ;;  %v1439_v29 = vld [vmem:[%s1775_s9 + $0x160] ss:$8 sps:$4 sm:$0xff]   ;;  %v1442_v31 = vld [vmem:[%s1775_s9 + $0x174] ss:$8 sps:$4 sm:$0xff]  }
  0x46   : > { %967 = vmatpush1.bf16.msra.mxu1 %v1414_v12  ;;  %v1444_v32 = vld [vmem:[%s1775_s9 + $0x70] ss:$8 sps:$4 sm:$0xff]   ;;  %v1446_v34 = vld [vmem:[%s1775_s9 + $0x84] ss:$8 sps:$4 sm:$0xff]   ;;  %v1450_v36 = vld [vmem:[%s1775_s9 + $0x80] ss:$8 sps:$4 sm:$0xff]  }
  0x47   : > { %1010 = vmatpush1.bf16.msra.mxu0 %v1415_v13  ;;  %968 = vmatprep.subr.bf16.mxu1 %v1416_v14  ;;  %v1445_v33 = vld [vmem:[%s1775_s9 + $0x170] ss:$8 sps:$4 sm:$0xff]   ;;  %v1448_v35 = vld [vmem:[%s1775_s9 + $0x184] ss:$8 sps:$4 sm:$0xff]   ;;  %v1451_v37 = vld [vmem:[%s1775_s9 + $0x180] ss:$8 sps:$4 sm:$0xff]  }
  0x48   : > { %1011 = vmatprep.subr.bf16.mxu0 %v1418_v15  ;;  %v1452_v38 = vld [vmem:[%s1775_s9 + $0x94] ss:$8 sps:$4 sm:$0xff]   ;;  %v1456_v40 = vld [vmem:[%s1775_s9 + $0x90] ss:$8 sps:$4 sm:$0xff]   ;;  %v1458_v42 = vld [vmem:[%s1775_s9 + $0xa4] ss:$8 sps:$4 sm:$0xff]  }
  0x49   : > { %v1454_v39 = vld [vmem:[%s1775_s9 + $0x194] ss:$8 sps:$4 sm:$0xff]   ;;  %v1457_v41 = vld [vmem:[%s1775_s9 + $0x190] ss:$8 sps:$4 sm:$0xff]   ;;  %v1460_v43 = vld [vmem:[%s1775_s9 + $0x1a4] ss:$8 sps:$4 sm:$0xff]  }
  0x4a   : > { %969 = vmatpush1.bf16.msra.mxu1 %v1420_v16  ;;  %v1462_v44 = vld [vmem:[%s1775_s9 + $0xa0] ss:$8 sps:$4 sm:$0xff]   ;;  %v1464_v46 = vld [vmem:[%s1775_s9 + $0xb4] ss:$8 sps:$4 sm:$0xff]   ;;  %v1468_v48 = vld [vmem:[%s1775_s9 + $0xb0] ss:$8 sps:$4 sm:$0xff]  }
  0x4b   : > { %1012 = vmatpush1.bf16.msra.mxu0 %v1421_v17  ;;  %970 = vmatprep.subr.bf16.mxu1 %v1422_v18  ;;  %v1463_v45 = vld [vmem:[%s1775_s9 + $0x1a0] ss:$8 sps:$4 sm:$0xff]   ;;  %v1466_v47 = vld [vmem:[%s1775_s9 + $0x1b4] ss:$8 sps:$4 sm:$0xff]   ;;  %v1469_v49 = vld [vmem:[%s1775_s9 + $0x1b0] ss:$8 sps:$4 sm:$0xff]  }
  0x4c   : > { %1013 = vmatprep.subr.bf16.mxu0 %v1424_v19  ;;  %v1470_v50 = vld [vmem:[%s1775_s9 + $0xc4] ss:$8 sps:$4 sm:$0xff]   ;;  %v1474_v52 = vld [vmem:[%s1775_s9 + $0xc0] ss:$8 sps:$4 sm:$0xff]   ;;  %v1476_v54 = vld [vmem:[%s1775_s9 + $0xd4] ss:$8 sps:$4 sm:$0xff]  }
  0x4d   : > { %v1472_v51 = vld [vmem:[%s1775_s9 + $0x1c4] ss:$8 sps:$4 sm:$0xff]   ;;  %v1475_v53 = vld [vmem:[%s1775_s9 + $0x1c0] ss:$8 sps:$4 sm:$0xff]   ;;  %v1478_v55 = vld [vmem:[%s1775_s9 + $0x1d4] ss:$8 sps:$4 sm:$0xff]  }
  0x4e   : > { %971 = vmatpush1.bf16.msra.mxu1 %v1426_v20  ;;  %v1480_v56 = vld [vmem:[%s1775_s9 + $0xd0] ss:$8 sps:$4 sm:$0xff]   ;;  %v1482_v58 = vld [vmem:[%s1775_s9 + $0xe4] ss:$8 sps:$4 sm:$0xff]   ;;  %v1486_v60 = vld [vmem:[%s1775_s9 + $0xe0] ss:$8 sps:$4 sm:$0xff]  }
  0x4f   : > { %1014 = vmatpush1.bf16.msra.mxu0 %v1427_v21  ;;  %972 = vmatprep.subr.bf16.mxu1 %v1428_v22  ;;  %v1481_v57 = vld [vmem:[%s1775_s9 + $0x1d0] ss:$8 sps:$4 sm:$0xff]   ;;  %v1484_v59 = vld [vmem:[%s1775_s9 + $0x1e4] ss:$8 sps:$4 sm:$0xff]   ;;  %v1487_v61 = vld [vmem:[%s1775_s9 + $0x1e0] ss:$8 sps:$4 sm:$0xff]  }
  0x50   : > { %1015 = vmatprep.subr.bf16.mxu0 %v1430_v23  ;;  %v1488_v62 = vld [vmem:[%s1775_s9 + $0xf4] ss:$8 sps:$4 sm:$0xff]   ;;  %v1492_v0 = vld [vmem:[%s1775_s9 + $0xf0] ss:$8 sps:$4 sm:$0xff]   ;;  %s1886_s20 = smov (!%p536_p11, %s1278_s20), 3  ;;  %v1066_v5 = vshrl.u32 %v1065_v4, 7 }
  0x51   : > { %v1490_v63 = vld [vmem:[%s1775_s9 + $0x1f4] ss:$8 sps:$4 sm:$0xff]   ;;  %v1493_v1 = vld [vmem:[%s1775_s9 + $0x1f0] ss:$8 sps:$4 sm:$0xff]   ;;  %s538_s25 = scalar_lea.vmem %s1876_s2, %s1886_s20  ;;  %s1277_s26 = sshll.u32 %s485_s30, 5 }
  0x52   : > { %973 = vmatpush1.bf16.msra.mxu1 %v1432_v24  ;;  %v1494_v2 = vld [vmem:[%s1874_s0] ss:$16 sps:$4 sm:$0xff]   ;;  %v1497_v3 = vld [vmem:[%s1874_s0 + $0x8] ss:$16 sps:$4 sm:$0xff]   ;;  %v1067_v6 = vsub.s32 0, %v1066_v5  ;;  %v1071_v8 = vsub.s32 1, %v1066_v5 }
  0x53   : > { %1016 = vmatpush1.bf16.msra.mxu0 %v1433_v25  ;;  %974 = vmatprep.subr.bf16.mxu1 %v1434_v26  ;;  %v1063_v7 = vld [vmem:[%s538_s25] sm:$0x3]  ;;  %s520_s27 = scalar_lea.vmem [#allocation4], %s1277_s26  ;;  %s1353_s28 = sshll.u32 (%p1619_p6), %s1554_s14, 4 }
  0x54   : > { %1017 = vmatprep.subr.bf16.mxu0 %v1436_v27  ;;  %v1068_v9 = vrot.slane %v1063_v7, %v1067_v6  ;;  %v1072_v12 = vrot.slane %v1063_v7, %v1071_v8  ;;  %s1139_s30 = scalar_lea.vmem (%p1619_p6), %s1877_s3, %s1353_s28 }
  0x56   : > { %975 = vmatpush1.bf16.msra.mxu1 %v1438_v28 }
  0x57   : > { %1018 = vmatpush1.bf16.msra.mxu0 %v1439_v29  ;;  %976 = vmatprep.subr.bf16.mxu1 %v1440_v30 }
  0x58   : > { %1019 = vmatprep.subr.bf16.mxu0 %v1442_v31 }
  0x5a   : > { %977 = vmatpush1.bf16.msra.mxu1 %v1444_v32 }
  0x5b   : > { %1020 = vmatpush1.bf16.msra.mxu0 %v1445_v33  ;;  %978 = vmatprep.subr.bf16.mxu1 %v1446_v34 }
  0x5c   : > { %1021 = vmatprep.subr.bf16.mxu0 %v1448_v35 }
  0x5e   : > { %979 = vmatpush1.bf16.msra.mxu1 %v1450_v36 }
  0x5f   : > { %1022 = vmatpush1.bf16.msra.mxu0 %v1451_v37  ;;  %980 = vmatprep.subr.bf16.mxu1 %v1452_v38 }
  0x60   : > { %1023 = vmatprep.subr.bf16.mxu0 %v1454_v39 }
  0x62   : > { %981 = vmatpush1.bf16.msra.mxu1 %v1456_v40 }
  0x63   : > { %1024 = vmatpush1.bf16.msra.mxu0 %v1457_v41  ;;  %982 = vmatprep.subr.bf16.mxu1 %v1458_v42 }
  0x64   : > { %1025 = vmatprep.subr.bf16.mxu0 %v1460_v43 }
  0x66   : > { %983 = vmatpush1.bf16.msra.mxu1 %v1462_v44 }
  0x67   : > { %1026 = vmatpush1.bf16.msra.mxu0 %v1463_v45  ;;  %984 = vmatprep.subr.bf16.mxu1 %v1464_v46 }
  0x68   : > { %1027 = vmatprep.subr.bf16.mxu0 %v1466_v47 }
  0x6a   : > { %985 = vmatpush1.bf16.msra.mxu1 %v1468_v48 }
  0x6b   : > { %1028 = vmatpush1.bf16.msra.mxu0 %v1469_v49  ;;  %986 = vmatprep.subr.bf16.mxu1 %v1470_v50 }
  0x6c   : > { %1029 = vmatprep.subr.bf16.mxu0 %v1472_v51 }
  0x6e   : > { %987 = vmatpush1.bf16.msra.mxu1 %v1474_v52 }
  0x6f   : > { %1030 = vmatpush1.bf16.msra.mxu0 %v1475_v53  ;;  %988 = vmatprep.subr.bf16.mxu1 %v1476_v54 }
  0x70   : > { %1031 = vmatprep.subr.bf16.mxu0 %v1478_v55 }
  0x72   : > { %989 = vmatpush1.bf16.msra.mxu1 %v1480_v56 }
  0x73   : > { %1032 = vmatpush1.bf16.msra.mxu0 %v1481_v57  ;;  %990 = vmatprep.subr.bf16.mxu1 %v1482_v58 }
  0x74   : > { %1033 = vmatprep.subr.bf16.mxu0 %v1484_v59 }
  0x76   : > { %991 = vmatpush1.bf16.msra.mxu1 %v1486_v60 }
  0x77   : > { %1034 = vmatpush1.bf16.msra.mxu0 %v1487_v61  ;;  %992 = vmatprep.subr.bf16.mxu1 %v1488_v62 }
  0x78   : > { %1035 = vmatprep.subr.bf16.mxu0 %v1490_v63 }
  0x7a   : > { %993 = vmatpush1.bf16.msra.mxu1 %v1492_v0 }
  0x7b   : > { %1036 = vmatpush1.bf16.msra.mxu0 %v1493_v1 }
  0x7d   : > { %995 = vmatmul.mubr.bf16.vlgmr.msra.gmra.mrb[0].mxu1 %v1494_v2 }
  0x7e   : > { %1038 = vmatmul.mubr.bf16.vlgmr.msra.gmra.mrb[0].mxu0 %v1497_v3 }
 0x150   : > { %v996_v10 = vpop.f32.mrb[0].mxu1 }
 0x151   : > { %v1039_v11 = vpop.f32.mrb[0].mxu0  ;;  %v998_v14 = vpop.f32.mrb[1].mxu1 }
 0x152   : > { %v1040_v13 = vadd.f32 %v1039_v11, %v996_v10  ;;  %v1041_v15 = vpop.f32.mrb[1].mxu0  ;;  %v1000_v17 = vpop.f32.mrb[2].mxu1 }
 0x153   : > { %v1042_v16 = vadd.f32 %v1041_v15, %v998_v14  ;;  %v1043_v18 = vpop.f32.mrb[2].mxu0  ;;  %v1002_v21 = vpop.f32.mrb[3].mxu1 }
 0x154   : > { %v1075_v19 = vadd.f32 %v1068_v9, %v1040_v13  ;;  %v1044_v20 = vadd.f32 %v1043_v18, %v1000_v17  ;;  %v1045_v22 = vpop.f32.mrb[3].mxu0 }
 0x155   : > { %v1076_v23 = vadd.f32 %v1072_v12, %v1042_v16  ;;  %v1046_v24 = vadd.f32 %v1045_v22, %v1002_v21 }
 0x156   : > { %v1083_v25 = vand.u32 2147483647, %v1075_v19  ;;  %v1077_v26 = vadd.f32 %v1068_v9, %v1044_v20  ;;  %v1079_v49 = vmax.f32 %v1075_v19, 0.0 }
 0x157   : > { %v1084_v27 = vand.u32 2147483647, %v1076_v23  ;;  %v1078_v28 = vadd.f32 %v1072_v12, %v1046_v24  ;;  %v1080_v52 = vmax.f32 %v1076_v23, 0.0 }
 0x158   : > { %v1087_v29 = vsub.f32 0.0, %v1083_v25  ;;  %v1085_v30 = vand.u32 2147483647, %v1077_v26  ;;  %v1081_v56 = vmax.f32 %v1077_v26, 0.0 }
 0x159   : > { %v1088_v31 = vsub.f32 0.0, %v1084_v27  ;;  %v1086_v32 = vand.u32 2147483647, %v1078_v28  ;;  %v1082_v59 = vmax.f32 %v1078_v28, 0.0 }
 0x15a   : > { %v1091_v33 = vmul.f32 1.442695, %v1087_v29  ;;  %v1089_v34 = vsub.f32 0.0, %v1085_v30 }
 0x15b   : > { %v1093_v35 = vmul.f32 1.442695, %v1088_v31  ;;  %v1090_v36 = vsub.f32 0.0, %v1086_v32 }
 0x15c   : > { %1500 = vpow2.f32 %v1091_v33  ;;  %v1095_v37 = vmul.f32 1.442695, %v1089_v34 }
 0x15d   : > { %1502 = vpow2.f32 %v1093_v35  ;;  %v1097_v38 = vmul.f32 1.442695, %v1090_v36 }
 0x15e   : > { %1504 = vpow2.f32 %v1095_v37 }
 0x15f   : > { %1506 = vpow2.f32 %v1097_v38 }
 0x166   : > { %v1501_v39 = vpop.eup %1500 }
 0x167   : > { %v1503_v40 = vpop.eup %1502  ;;  %v1099_v41 = vadd.f32 1.0, %v1501_v39 }
 0x168   : > { %v1505_v42 = vpop.eup %1504  ;;  %v1100_v43 = vadd.f32 1.0, %v1503_v40 }
 0x169   : > { %v1507_v44 = vpop.eup %1506  ;;  %1508 = vlog2.f32 %v1099_v41  ;;  %v1101_v45 = vadd.f32 1.0, %v1505_v42 }
 0x16a   : > { %1510 = vlog2.f32 %v1100_v43  ;;  %v1102_v46 = vadd.f32 1.0, %v1507_v44 }
 0x16b   : > { %1512 = vlog2.f32 %v1101_v45 }
 0x16c   : > { %1514 = vlog2.f32 %v1102_v46 }
 0x173   : > { %v1509_v47 = vpop.eup %1508 }
 0x174   : > { %v1511_v48 = vpop.eup %1510  ;;  %v1104_v50 = vmul.f32 0.6931472, %v1509_v47 }
 0x175   : > { %v1513_v51 = vpop.eup %1512  ;;  %v1106_v53 = vmul.f32 0.6931472, %v1511_v48 }
 0x176   : > { %v1515_v54 = vpop.eup %1514  ;;  %v1111_v55 = vadd.f32 %v1104_v50, %v1079_v49  ;;  %v1108_v57 = vmul.f32 0.6931472, %v1513_v51 }
 0x177   : > { %v1112_v58 = vadd.f32 %v1106_v53, %v1080_v52  ;;  %v1110_v60 = vmul.f32 0.6931472, %v1515_v54 }
 0x178   : > { %1516 = vtanh.f32 %v1111_v55  ;;  %v1113_v61 = vadd.f32 %v1108_v57, %v1081_v56 }
 0x179   : > { %1518 = vtanh.f32 %v1112_v58  ;;  %v1114_v62 = vadd.f32 %v1110_v60, %v1082_v59 }
 0x17a   : > { %1520 = vtanh.f32 %v1113_v61 }
 0x17b   : > { %1522 = vtanh.f32 %v1114_v62 }
 0x182   : > { %v1517_v63 = vpop.eup %1516  ;;  %1133 = sbr.rel (!%p1619_p6) target bundleno = 401 (0x191), region = 82 }
 0x183   : > { %v1519_v0 = vpop.eup %1518  ;;  %v1119_v1 = vmul.f32 %v1517_v63, %v1075_v19 }
 0x184   : > { %v1521_v2 = vpop.eup %1520  ;;  %v1120_v3 = vmul.f32 %v1519_v0, %v1076_v23 }
 0x185   : > { %v1523_v4 = vpop.eup %1522  ;;  %1123 = vst [vmem:[%s520_s27] sm:$0xff] %v1119_v1  ;;  %v1121_v5 = vmul.f32 %v1521_v2, %v1077_v26 }
 0x186   : > { %1124 = vst [vmem:[%s520_s27 + $0x8] sm:$0xff] %v1120_v3  ;;  %v1122_v6 = vmul.f32 %v1523_v4, %v1078_v28 }
 0x187   : > { %1125 = vst [vmem:[%s520_s27 + $0x10] sm:$0xff] %v1121_v5 }
 0x188   : > { %1126 = vst [vmem:[%s520_s27 + $0x18] sm:$0xff] %v1122_v6 }
 0x18c   : > { %v1152_v7 = vld [vmem:[%s520_s27] sm:$0xff] }
 0x18d   : > { %v1154_v8 = vld [vmem:[%s520_s27 + $0x8] sm:$0xff]  ;;  %1153 = vst [vmem:[%s1139_s30] sm:$0xff] %v1152_v7 }
 0x18e   : > { %v1156_v9 = vld [vmem:[%s520_s27 + $0x10] sm:$0xff]  ;;  %1155 = vst [vmem:[%s1139_s30 + $0x8] sm:$0xff] %v1154_v8 }
 0x18f   : > { %v1158_v10 = vld [vmem:[%s520_s27 + $0x18] sm:$0xff]  ;;  %1157 = vst [vmem:[%s1139_s30 + $0x20] sm:$0xff] %v1156_v9 }
 0x190   : > { %1159 = vst [vmem:[%s1139_s30 + $0x28] sm:$0xff] %v1158_v10 }
 0x191 PF: > { %s13_s16 = sadd.s32 1, %s1562_s16   ;;  %s1879_s12 = smov %s1550_s13 }
 0x192   : > { %p10_p12 = scmp.ge.s32.totalorder %s13_s16, 4   ;;  %s1880_s13 = smov %s1624_s22 }
 0x193   : > { %s1881_s14 = smov %s1558_s15  ;;  %s1882_s15 = smov %s1884_s17 }
 0x194   :  { %12 = sbr.rel (!%p10_p12) target bundleno = 3 (0x3), region = 142 }

// kernel: downsample5_forward.15
= control target key start
LH: loop header
LB: loop body
LE: loop exit
PB: predicated region body
PF: predicated region fallthrough
CT: control target
= control target key end

     0   :  { %s4496_s0 = inlined_call_operand.vmem [shape: bf16[16,4608], index: 0, kind: input, shape index: {}]   ;;  %s4497_s1 = inlined_call_operand.vmem [shape: bf16[4608,512], index: 1, kind: input, shape index: {}]   ;;  %s4498_s2 = inlined_call_operand.vmem [shape: f32[1,512], index: 2, kind: input, shape index: {}]   ;;  %s4499_s3 = inlined_call_operand.vmem [shape: f32[16,512], index: 3, kind: input, shape index: {}]   ;;  %s4500_s4 = inlined_call_operand.vmem [shape: f32[16,512], index: 4, kind: output, shape index: {}]  }
   0x1   :  { %4503 = sst [smem:[#allocation9_spill]] %s4496_s0 }
   0x2   :  { %4504 = sst [smem:[#allocation10_spill]] %s4497_s1 }
   0x3   :  { %s3695_s15 = smov 0   ;;  %s3697_s16 = smov 0  }
   0x4   :  { %s3699_s17 = smov 0   ;;  %s3701_s18 = smov 0  }
   0x5   :  { %s3703_s19 = smov 0   ;;  %s3705_s20 = smov 0  }
   0x6   :  { %s3707_s21 = smov 0   ;;  %s3709_s22 = smov 0  }
   0x7   :  { %s3711_s23 = smov 0   ;;  %s3713_s24 = smov 0  }
   0x8   :  { %s3715_s25 = smov 0  }
   0x9 LB: > { %s2908_s26 = sadd.s32 4294967295, %s3667_s25   ;;  %s26_s27 = sadd.s32 1, %s3659_s23  ;;  %s3667_s25 = sphi %s3715_s25, %s14_s25   ;;  %s3663_s24 = sphi %s3713_s24, %s4524_s24   ;;  %s3659_s23 = sphi %s3711_s23, %s4523_s23   ;;  %s3655_s22 = sphi %s3709_s22, %s4522_s22   ;;  %s3651_s21 = sphi %s3707_s21, %s4521_s21   ;;  %s3647_s20 = sphi %s3705_s20, %s4520_s20   ;;  %s3643_s19 = sphi %s3703_s19, %s4519_s19   ;;  %s3639_s18 = sphi %s3701_s18, %s4518_s18   ;;  %s3635_s17 = sphi %s3699_s17, %s4517_s17   ;;  %s3631_s16 = sphi %s3697_s16, %s4516_s16   ;;  %s3627_s15 = sphi %s3695_s15, %s4515_s15  }
   0xa   : > { %p27_p0 = scmp.ge.s32.totalorder %s26_s27, 3  ;;  %s29_s28 = sadd.s32 1, %s3663_s24 }
   0xb   : > { %s42_s29 = sadd.s32 1, %s3647_s20  ;;  %p49_p1 = scmp.ne.s32.totalorder %s3647_s20, %s3643_s19 }
   0xc   : > { %s4526_s27 = smov (%p27_p0, %s26_s27), 0  ;;  %s4528_s28 = smov (!%p27_p0, %s29_s28), %s3663_s24 }
   0xd   : > { %4505 = sst [smem:[#allocation7_spill]] %s4526_s27  ;;  %s38_s30 = ssub.s32 %s3659_s23, %s4526_s27 }
   0xe   : > { %p50_p2 = scmp.eq.s32.totalorder %s3667_s25, 0  ;;  %p31_p3 = scmp.ge.s32.totalorder %s4528_s28, 2 }
   0xf   : > { %p40_p4 = scmp.eq.s32.totalorder %s38_s30, 0  ;;  %s70_s6 = sadd.s32 1, %s3639_s18 }
  0x10   : > { %p3764_p5 = por %p50_p2, %p49_p1  ;;  %s4530_s28 = smov (%p31_p3, %s4528_s28), 0 }
  0x11   : > { %4507 = sst [smem:[#allocation8_spill]] %s4530_s28  ;;  %s66_s8 = ssub.s32 %s3663_s24, %s4530_s28 }
  0x12   : > { %s3772_s7 = scalar_select %p40_p4, %s3647_s20, %s42_s29  }
  0x13   : > { %p77_p6 = scmp.ne.s32.totalorder %s3639_s18, %s3635_s17  ;;  %s67_s9 = sor.u32 %s66_s8, %s38_s30 }
  0x14   : > { %p122_p7 = scmp.eq.s32.totalorder %s66_s8, 0  ;;  %p68_p8 = scmp.eq.s32.totalorder %s67_s9, 0 }
  0x15   : > { %p3780_p9 = por %p77_p6, %p50_p2  ;;  %s124_s11 = sadd.s32 1, %s3631_s16 }
  0x16   : > { %p131_p10 = scmp.ne.s32.totalorder %s3631_s16, %s3627_s15  ;;  %p163_p12 = scmp.eq.s32.totalorder %s2908_s26, 5 }
  0x17   : > { %s3788_s12 = scalar_select %p68_p8, %s3639_s18, %s70_s6  }
  0x18   : > { %s3791_s13 = scalar_select %p122_p7, %s3631_s16, %s124_s11  }
  0x19   : > { %p3795_p11 = por %p131_p10, %p50_p2  ;;  %p3799_p13 = por %p163_p12, %p131_p10 }
  0x1a   : > { %p2911_p0 = scmp.ge.s32.totalorder %s3667_s25, 6 }
  0x1c   : > { %185 = sbr.rel (%p2911_p0) target bundleno = 163 (0xa3), region = 16 }
  0x23   : > { %188 = sbr.rel (!%p3764_p5) target bundleno = 50 (0x32), region = 20  ;;  %s190_s30 = sand.u32 (%p3764_p5), 1, %s3647_s20  }
  0x24   : > { %s3134_s6 = smul.u32 (%p3764_p5), 48, %s3659_s23  ;;  %s4511_s0 = sld [smem:[#allocation9_spill]] (%p3764_p5) }
  0x25   : > { %s3158_s8 = smul.u32 (%p3764_p5), 96, %s190_s30 }
  0x27   : > { %s192_s26 = scalar_lea.vmem (%p3764_p5), [#allocation3], %s3158_s8 }
  0x2a   : > { %s198_s28 = scalar_lea.vmem %s4511_s0, %s3134_s6 }
  0x2b   : > { %v211_v0 = vld [vmem:[%s198_s28] sm:$0xff]  ;;  %v213_v1 = vld [vmem:[%s198_s28 + $0x8] sm:$0xff]  ;;  %v215_v2 = vld [vmem:[%s198_s28 + $0x10] sm:$0xff] }
  0x2c   : > { %212 = vst [vmem:[%s192_s26] sm:$0xff] %v211_v0  ;;  %214 = vst [vmem:[%s192_s26 + $0x8] sm:$0xff] %v213_v1  ;;  %v217_v3 = vld [vmem:[%s198_s28 + $0x18] sm:$0xff]  ;;  %v219_v4 = vld [vmem:[%s198_s28 + $0x20] sm:$0xff] }
  0x2d   : > { %216 = vst [vmem:[%s192_s26 + $0x10] sm:$0xff] %v215_v2  ;;  %v221_v5 = vld [vmem:[%s198_s28 + $0x28] sm:$0xff]  ;;  %218 = vst [vmem:[%s192_s26 + $0x18] sm:$0xff] %v217_v3  ;;  %v223_v6 = vld [vmem:[%s198_s28 + $0x90] sm:$0xff] }
  0x2e   : > { %220 = vst [vmem:[%s192_s26 + $0x20] sm:$0xff] %v219_v4  ;;  %222 = vst [vmem:[%s192_s26 + $0x28] sm:$0xff] %v221_v5  ;;  %v225_v7 = vld [vmem:[%s198_s28 + $0x98] sm:$0xff]  ;;  %v227_v8 = vld [vmem:[%s198_s28 + $0xa0] sm:$0xff] }
  0x2f   : > { %224 = vst [vmem:[%s192_s26 + $0x30] sm:$0xff] %v223_v6  ;;  %226 = vst [vmem:[%s192_s26 + $0x38] sm:$0xff] %v225_v7  ;;  %v229_v9 = vld [vmem:[%s198_s28 + $0xa8] sm:$0xff]  ;;  %v231_v10 = vld [vmem:[%s198_s28 + $0xb0] sm:$0xff] }
  0x30   : > { %228 = vst [vmem:[%s192_s26 + $0x40] sm:$0xff] %v227_v8  ;;  %v233_v11 = vld [vmem:[%s198_s28 + $0xb8] sm:$0xff]  ;;  %230 = vst [vmem:[%s192_s26 + $0x48] sm:$0xff] %v229_v9 }
  0x31   : > { %232 = vst [vmem:[%s192_s26 + $0x50] sm:$0xff] %v231_v10  ;;  %234 = vst [vmem:[%s192_s26 + $0x58] sm:$0xff] %v233_v11 }
  0x32 PF: > { %240 = sbr.rel (!%p3780_p9) target bundleno = 156 (0x9c), region = 43  ;;  %s242_s5 = sand.u32 (%p3780_p9), 1, %s3639_s18  }
  0x33   : > { %s3159_s30 = smul.u32 (%p3780_p9), 1536, %s242_s5  ;;  %s2913_s6 = sshll.u32 (%p3780_p9), %s3663_s24, 1 }
  0x34   : > { %s3135_s8 = smul.u32 (%p3780_p9), 768, %s3659_s23  ;;  %s4512_s1 = sld [smem:[#allocation10_spill]] (%p3780_p9) }
  0x35   : > { %s3824_s10 = scalar_lea.vmem (%p3780_p9), [#allocation4], %s3159_s30 }
  0x36   : > { %s248_s9 = sadd.s32 (%p3780_p9), %s3135_s8, %s2913_s6 }
  0x37   : > { %s2915_s11 = sshll.u32 (%p3780_p9), %s248_s9, 2 }
  0x3a   : > { %s3819_s28 = scalar_lea.vmem %s4512_s1, %s2915_s11 }
  0x3b   : > { %v660_v12 = vld [vmem:[%s3819_s28] sm:$0xff]  ;;  %v662_v13 = vld [vmem:[%s3819_s28 + $0x10] sm:$0xff] }
  0x3c   : > { %v664_v14 = vld [vmem:[%s3819_s28 + $0x20] sm:$0xff]  ;;  %661 = vst [vmem:[%s3824_s10] sm:$0xff] %v660_v12  ;;  %663 = vst [vmem:[%s3824_s10 + $0x8] sm:$0xff] %v662_v13  ;;  %v666_v15 = vld [vmem:[%s3819_s28 + $0x30] sm:$0xff] }
  0x3d   : > { %665 = vst [vmem:[%s3824_s10 + $0x10] sm:$0xff] %v664_v14  ;;  %v668_v16 = vld [vmem:[%s3819_s28 + $0x40] sm:$0xff]  ;;  %v670_v17 = vld [vmem:[%s3819_s28 + $0x50] sm:$0xff]  ;;  %667 = vst [vmem:[%s3824_s10 + $0x18] sm:$0xff] %v666_v15 }
  0x3e   : > { %669 = vst [vmem:[%s3824_s10 + $0x20] sm:$0xff] %v668_v16  ;;  %671 = vst [vmem:[%s3824_s10 + $0x28] sm:$0xff] %v670_v17  ;;  %v672_v18 = vld [vmem:[%s3819_s28 + $0x60] sm:$0xff]  ;;  %v674_v19 = vld [vmem:[%s3819_s28 + $0x70] sm:$0xff] }
  0x3f   : > { %v676_v20 = vld [vmem:[%s3819_s28 + $0x80] sm:$0xff]  ;;  %673 = vst [vmem:[%s3824_s10 + $0x30] sm:$0xff] %v672_v18  ;;  %675 = vst [vmem:[%s3824_s10 + $0x38] sm:$0xff] %v674_v19  ;;  %v678_v21 = vld [vmem:[%s3819_s28 + $0x90] sm:$0xff] }
  0x40   : > { %677 = vst [vmem:[%s3824_s10 + $0x40] sm:$0xff] %v676_v20  ;;  %v680_v22 = vld [vmem:[%s3819_s28 + $0xa0] sm:$0xff]  ;;  %v682_v23 = vld [vmem:[%s3819_s28 + $0xb0] sm:$0xff]  ;;  %679 = vst [vmem:[%s3824_s10 + $0x48] sm:$0xff] %v678_v21 }
  0x41   : > { %681 = vst [vmem:[%s3824_s10 + $0x50] sm:$0xff] %v680_v22  ;;  %683 = vst [vmem:[%s3824_s10 + $0x58] sm:$0xff] %v682_v23  ;;  %v684_v24 = vld [vmem:[%s3819_s28 + $0xc0] sm:$0xff]  ;;  %v686_v25 = vld [vmem:[%s3819_s28 + $0xd0] sm:$0xff] }
  0x42   : > { %v688_v26 = vld [vmem:[%s3819_s28 + $0xe0] sm:$0xff]  ;;  %685 = vst [vmem:[%s3824_s10 + $0x60] sm:$0xff] %v684_v24  ;;  %687 = vst [vmem:[%s3824_s10 + $0x68] sm:$0xff] %v686_v25  ;;  %v690_v27 = vld [vmem:[%s3819_s28 + $0xf0] sm:$0xff] }
  0x43   : > { %689 = vst [vmem:[%s3824_s10 + $0x70] sm:$0xff] %v688_v26  ;;  %v692_v28 = vld [vmem:[%s3819_s28 + $0x100] sm:$0xff]  ;;  %v694_v29 = vld [vmem:[%s3819_s28 + $0x110] sm:$0xff]  ;;  %691 = vst [vmem:[%s3824_s10 + $0x78] sm:$0xff] %v690_v27 }
  0x44   : > { %693 = vst [vmem:[%s3824_s10 + $0x80] sm:$0xff] %v692_v28  ;;  %695 = vst [vmem:[%s3824_s10 + $0x88] sm:$0xff] %v694_v29  ;;  %v696_v30 = vld [vmem:[%s3819_s28 + $0x120] sm:$0xff]  ;;  %v698_v31 = vld [vmem:[%s3819_s28 + $0x130] sm:$0xff] }
  0x45   : > { %v700_v32 = vld [vmem:[%s3819_s28 + $0x140] sm:$0xff]  ;;  %697 = vst [vmem:[%s3824_s10 + $0x90] sm:$0xff] %v696_v30  ;;  %699 = vst [vmem:[%s3824_s10 + $0x98] sm:$0xff] %v698_v31  ;;  %v702_v33 = vld [vmem:[%s3819_s28 + $0x150] sm:$0xff] }
  0x46   : > { %701 = vst [vmem:[%s3824_s10 + $0xa0] sm:$0xff] %v700_v32  ;;  %v704_v34 = vld [vmem:[%s3819_s28 + $0x160] sm:$0xff]  ;;  %v706_v35 = vld [vmem:[%s3819_s28 + $0x170] sm:$0xff]  ;;  %703 = vst [vmem:[%s3824_s10 + $0xa8] sm:$0xff] %v702_v33 }
  0x47   : > { %705 = vst [vmem:[%s3824_s10 + $0xb0] sm:$0xff] %v704_v34  ;;  %707 = vst [vmem:[%s3824_s10 + $0xb8] sm:$0xff] %v706_v35  ;;  %v708_v36 = vld [vmem:[%s3819_s28 + $0x180] sm:$0xff]  ;;  %v710_v37 = vld [vmem:[%s3819_s28 + $0x190] sm:$0xff] }
  0x48   : > { %v712_v38 = vld [vmem:[%s3819_s28 + $0x1a0] sm:$0xff]  ;;  %709 = vst [vmem:[%s3824_s10 + $0xc0] sm:$0xff] %v708_v36  ;;  %711 = vst [vmem:[%s3824_s10 + $0xc8] sm:$0xff] %v710_v37  ;;  %v714_v39 = vld [vmem:[%s3819_s28 + $0x1b0] sm:$0xff] }
  0x49   : > { %713 = vst [vmem:[%s3824_s10 + $0xd0] sm:$0xff] %v712_v38  ;;  %v716_v40 = vld [vmem:[%s3819_s28 + $0x1c0] sm:$0xff]  ;;  %v718_v41 = vld [vmem:[%s3819_s28 + $0x1d0] sm:$0xff]  ;;  %715 = vst [vmem:[%s3824_s10 + $0xd8] sm:$0xff] %v714_v39 }
  0x4a   : > { %717 = vst [vmem:[%s3824_s10 + $0xe0] sm:$0xff] %v716_v40  ;;  %719 = vst [vmem:[%s3824_s10 + $0xe8] sm:$0xff] %v718_v41  ;;  %v720_v42 = vld [vmem:[%s3819_s28 + $0x1e0] sm:$0xff]  ;;  %v722_v43 = vld [vmem:[%s3819_s28 + $0x1f0] sm:$0xff] }
  0x4b   : > { %v724_v44 = vld [vmem:[%s3819_s28 + $0x200] sm:$0xff]  ;;  %721 = vst [vmem:[%s3824_s10 + $0xf0] sm:$0xff] %v720_v42  ;;  %723 = vst [vmem:[%s3824_s10 + $0xf8] sm:$0xff] %v722_v43  ;;  %v726_v45 = vld [vmem:[%s3819_s28 + $0x210] sm:$0xff] }
  0x4c   : > { %725 = vst [vmem:[%s3824_s10 + $0x100] sm:$0xff] %v724_v44  ;;  %v728_v46 = vld [vmem:[%s3819_s28 + $0x220] sm:$0xff]  ;;  %v730_v47 = vld [vmem:[%s3819_s28 + $0x230] sm:$0xff]  ;;  %727 = vst [vmem:[%s3824_s10 + $0x108] sm:$0xff] %v726_v45 }
  0x4d   : > { %729 = vst [vmem:[%s3824_s10 + $0x110] sm:$0xff] %v728_v46  ;;  %731 = vst [vmem:[%s3824_s10 + $0x118] sm:$0xff] %v730_v47  ;;  %v732_v48 = vld [vmem:[%s3819_s28 + $0x240] sm:$0xff]  ;;  %v734_v49 = vld [vmem:[%s3819_s28 + $0x250] sm:$0xff] }
  0x4e   : > { %v736_v50 = vld [vmem:[%s3819_s28 + $0x260] sm:$0xff]  ;;  %733 = vst [vmem:[%s3824_s10 + $0x120] sm:$0xff] %v732_v48  ;;  %735 = vst [vmem:[%s3824_s10 + $0x128] sm:$0xff] %v734_v49  ;;  %v738_v51 = vld [vmem:[%s3819_s28 + $0x270] sm:$0xff] }
  0x4f   : > { %737 = vst [vmem:[%s3824_s10 + $0x130] sm:$0xff] %v736_v50  ;;  %v740_v52 = vld [vmem:[%s3819_s28 + $0x280] sm:$0xff]  ;;  %v742_v53 = vld [vmem:[%s3819_s28 + $0x290] sm:$0xff]  ;;  %739 = vst [vmem:[%s3824_s10 + $0x138] sm:$0xff] %v738_v51 }
  0x50   : > { %741 = vst [vmem:[%s3824_s10 + $0x140] sm:$0xff] %v740_v52  ;;  %743 = vst [vmem:[%s3824_s10 + $0x148] sm:$0xff] %v742_v53  ;;  %v744_v54 = vld [vmem:[%s3819_s28 + $0x2a0] sm:$0xff]  ;;  %v746_v55 = vld [vmem:[%s3819_s28 + $0x2b0] sm:$0xff] }
  0x51   : > { %v748_v56 = vld [vmem:[%s3819_s28 + $0x2c0] sm:$0xff]  ;;  %745 = vst [vmem:[%s3824_s10 + $0x150] sm:$0xff] %v744_v54  ;;  %747 = vst [vmem:[%s3824_s10 + $0x158] sm:$0xff] %v746_v55  ;;  %v750_v57 = vld [vmem:[%s3819_s28 + $0x2d0] sm:$0xff] }
  0x52   : > { %749 = vst [vmem:[%s3824_s10 + $0x160] sm:$0xff] %v748_v56  ;;  %v752_v58 = vld [vmem:[%s3819_s28 + $0x2e0] sm:$0xff]  ;;  %v754_v59 = vld [vmem:[%s3819_s28 + $0x2f0] sm:$0xff]  ;;  %751 = vst [vmem:[%s3824_s10 + $0x168] sm:$0xff] %v750_v57 }
  0x53   : > { %753 = vst [vmem:[%s3824_s10 + $0x170] sm:$0xff] %v752_v58  ;;  %755 = vst [vmem:[%s3824_s10 + $0x178] sm:$0xff] %v754_v59  ;;  %v756_v60 = vld [vmem:[%s3819_s28 + $0x300] sm:$0xff]  ;;  %v758_v61 = vld [vmem:[%s3819_s28 + $0x310] sm:$0xff] }
  0x54   : > { %v760_v62 = vld [vmem:[%s3819_s28 + $0x320] sm:$0xff]  ;;  %757 = vst [vmem:[%s3824_s10 + $0x180] sm:$0xff] %v756_v60  ;;  %759 = vst [vmem:[%s3824_s10 + $0x188] sm:$0xff] %v758_v61  ;;  %v762_v63 = vld [vmem:[%s3819_s28 + $0x330] sm:$0xff] }
  0x55   : > { %761 = vst [vmem:[%s3824_s10 + $0x190] sm:$0xff] %v760_v62  ;;  %v764_v0 = vld [vmem:[%s3819_s28 + $0x340] sm:$0xff]  ;;  %v766_v1 = vld [vmem:[%s3819_s28 + $0x350] sm:$0xff]  ;;  %763 = vst [vmem:[%s3824_s10 + $0x198] sm:$0xff] %v762_v63 }
  0x56   : > { %765 = vst [vmem:[%s3824_s10 + $0x1a0] sm:$0xff] %v764_v0  ;;  %767 = vst [vmem:[%s3824_s10 + $0x1a8] sm:$0xff] %v766_v1  ;;  %v768_v2 = vld [vmem:[%s3819_s28 + $0x360] sm:$0xff]  ;;  %v770_v3 = vld [vmem:[%s3819_s28 + $0x370] sm:$0xff] }
  0x57   : > { %v772_v4 = vld [vmem:[%s3819_s28 + $0x380] sm:$0xff]  ;;  %769 = vst [vmem:[%s3824_s10 + $0x1b0] sm:$0xff] %v768_v2  ;;  %771 = vst [vmem:[%s3824_s10 + $0x1b8] sm:$0xff] %v770_v3  ;;  %v774_v5 = vld [vmem:[%s3819_s28 + $0x390] sm:$0xff] }
  0x58   : > { %773 = vst [vmem:[%s3824_s10 + $0x1c0] sm:$0xff] %v772_v4  ;;  %v776_v6 = vld [vmem:[%s3819_s28 + $0x3a0] sm:$0xff]  ;;  %v778_v7 = vld [vmem:[%s3819_s28 + $0x3b0] sm:$0xff]  ;;  %775 = vst [vmem:[%s3824_s10 + $0x1c8] sm:$0xff] %v774_v5 }
  0x59   : > { %777 = vst [vmem:[%s3824_s10 + $0x1d0] sm:$0xff] %v776_v6  ;;  %779 = vst [vmem:[%s3824_s10 + $0x1d8] sm:$0xff] %v778_v7  ;;  %v780_v8 = vld [vmem:[%s3819_s28 + $0x3c0] sm:$0xff]  ;;  %v782_v9 = vld [vmem:[%s3819_s28 + $0x3d0] sm:$0xff] }
  0x5a   : > { %v784_v10 = vld [vmem:[%s3819_s28 + $0x3e0] sm:$0xff]  ;;  %781 = vst [vmem:[%s3824_s10 + $0x1e0] sm:$0xff] %v780_v8  ;;  %783 = vst [vmem:[%s3824_s10 + $0x1e8] sm:$0xff] %v782_v9  ;;  %v786_v11 = vld [vmem:[%s3819_s28 + $0x3f0] sm:$0xff] }
  0x5b   : > { %785 = vst [vmem:[%s3824_s10 + $0x1f0] sm:$0xff] %v784_v10  ;;  %v788_v12 = vld [vmem:[%s3819_s28 + $0x400] sm:$0xff]  ;;  %v790_v13 = vld [vmem:[%s3819_s28 + $0x410] sm:$0xff]  ;;  %787 = vst [vmem:[%s3824_s10 + $0x1f8] sm:$0xff] %v786_v11 }
  0x5c   : > { %789 = vst [vmem:[%s3824_s10 + $0x200] sm:$0xff] %v788_v12  ;;  %791 = vst [vmem:[%s3824_s10 + $0x208] sm:$0xff] %v790_v13  ;;  %v792_v14 = vld [vmem:[%s3819_s28 + $0x420] sm:$0xff]  ;;  %v794_v15 = vld [vmem:[%s3819_s28 + $0x430] sm:$0xff] }
  0x5d   : > { %v796_v16 = vld [vmem:[%s3819_s28 + $0x440] sm:$0xff]  ;;  %793 = vst [vmem:[%s3824_s10 + $0x210] sm:$0xff] %v792_v14  ;;  %795 = vst [vmem:[%s3824_s10 + $0x218] sm:$0xff] %v794_v15  ;;  %v798_v17 = vld [vmem:[%s3819_s28 + $0x450] sm:$0xff] }
  0x5e   : > { %797 = vst [vmem:[%s3824_s10 + $0x220] sm:$0xff] %v796_v16  ;;  %v800_v18 = vld [vmem:[%s3819_s28 + $0x460] sm:$0xff]  ;;  %v802_v19 = vld [vmem:[%s3819_s28 + $0x470] sm:$0xff]  ;;  %799 = vst [vmem:[%s3824_s10 + $0x228] sm:$0xff] %v798_v17 }
  0x5f   : > { %801 = vst [vmem:[%s3824_s10 + $0x230] sm:$0xff] %v800_v18  ;;  %803 = vst [vmem:[%s3824_s10 + $0x238] sm:$0xff] %v802_v19  ;;  %v804_v20 = vld [vmem:[%s3819_s28 + $0x480] sm:$0xff]  ;;  %v806_v21 = vld [vmem:[%s3819_s28 + $0x490] sm:$0xff] }
  0x60   : > { %v808_v22 = vld [vmem:[%s3819_s28 + $0x4a0] sm:$0xff]  ;;  %805 = vst [vmem:[%s3824_s10 + $0x240] sm:$0xff] %v804_v20  ;;  %807 = vst [vmem:[%s3824_s10 + $0x248] sm:$0xff] %v806_v21  ;;  %v810_v23 = vld [vmem:[%s3819_s28 + $0x4b0] sm:$0xff] }
  0x61   : > { %809 = vst [vmem:[%s3824_s10 + $0x250] sm:$0xff] %v808_v22  ;;  %v812_v24 = vld [vmem:[%s3819_s28 + $0x4c0] sm:$0xff]  ;;  %v814_v25 = vld [vmem:[%s3819_s28 + $0x4d0] sm:$0xff]  ;;  %811 = vst [vmem:[%s3824_s10 + $0x258] sm:$0xff] %v810_v23 }
  0x62   : > { %813 = vst [vmem:[%s3824_s10 + $0x260] sm:$0xff] %v812_v24  ;;  %815 = vst [vmem:[%s3824_s10 + $0x268] sm:$0xff] %v814_v25  ;;  %v816_v26 = vld [vmem:[%s3819_s28 + $0x4e0] sm:$0xff]  ;;  %v818_v27 = vld [vmem:[%s3819_s28 + $0x4f0] sm:$0xff] }
  0x63   : > { %v820_v28 = vld [vmem:[%s3819_s28 + $0x500] sm:$0xff]  ;;  %817 = vst [vmem:[%s3824_s10 + $0x270] sm:$0xff] %v816_v26  ;;  %819 = vst [vmem:[%s3824_s10 + $0x278] sm:$0xff] %v818_v27  ;;  %v822_v29 = vld [vmem:[%s3819_s28 + $0x510] sm:$0xff] }
  0x64   : > { %821 = vst [vmem:[%s3824_s10 + $0x280] sm:$0xff] %v820_v28  ;;  %v824_v30 = vld [vmem:[%s3819_s28 + $0x520] sm:$0xff]  ;;  %v826_v31 = vld [vmem:[%s3819_s28 + $0x530] sm:$0xff]  ;;  %823 = vst [vmem:[%s3824_s10 + $0x288] sm:$0xff] %v822_v29 }
  0x65   : > { %825 = vst [vmem:[%s3824_s10 + $0x290] sm:$0xff] %v824_v30  ;;  %827 = vst [vmem:[%s3824_s10 + $0x298] sm:$0xff] %v826_v31  ;;  %v828_v32 = vld [vmem:[%s3819_s28 + $0x540] sm:$0xff]  ;;  %v830_v33 = vld [vmem:[%s3819_s28 + $0x550] sm:$0xff] }
  0x66   : > { %v832_v34 = vld [vmem:[%s3819_s28 + $0x560] sm:$0xff]  ;;  %829 = vst [vmem:[%s3824_s10 + $0x2a0] sm:$0xff] %v828_v32  ;;  %831 = vst [vmem:[%s3824_s10 + $0x2a8] sm:$0xff] %v830_v33  ;;  %v834_v35 = vld [vmem:[%s3819_s28 + $0x570] sm:$0xff] }
  0x67   : > { %833 = vst [vmem:[%s3824_s10 + $0x2b0] sm:$0xff] %v832_v34  ;;  %v836_v36 = vld [vmem:[%s3819_s28 + $0x580] sm:$0xff]  ;;  %v838_v37 = vld [vmem:[%s3819_s28 + $0x590] sm:$0xff]  ;;  %835 = vst [vmem:[%s3824_s10 + $0x2b8] sm:$0xff] %v834_v35 }
  0x68   : > { %837 = vst [vmem:[%s3824_s10 + $0x2c0] sm:$0xff] %v836_v36  ;;  %839 = vst [vmem:[%s3824_s10 + $0x2c8] sm:$0xff] %v838_v37  ;;  %v840_v38 = vld [vmem:[%s3819_s28 + $0x5a0] sm:$0xff]  ;;  %v842_v39 = vld [vmem:[%s3819_s28 + $0x5b0] sm:$0xff] }
  0x69   : > { %v844_v40 = vld [vmem:[%s3819_s28 + $0x5c0] sm:$0xff]  ;;  %841 = vst [vmem:[%s3824_s10 + $0x2d0] sm:$0xff] %v840_v38  ;;  %843 = vst [vmem:[%s3824_s10 + $0x2d8] sm:$0xff] %v842_v39  ;;  %v846_v41 = vld [vmem:[%s3819_s28 + $0x5d0] sm:$0xff] }
  0x6a   : > { %845 = vst [vmem:[%s3824_s10 + $0x2e0] sm:$0xff] %v844_v40  ;;  %v848_v42 = vld [vmem:[%s3819_s28 + $0x5e0] sm:$0xff]  ;;  %v850_v43 = vld [vmem:[%s3819_s28 + $0x5f0] sm:$0xff]  ;;  %847 = vst [vmem:[%s3824_s10 + $0x2e8] sm:$0xff] %v846_v41 }
  0x6b   : > { %849 = vst [vmem:[%s3824_s10 + $0x2f0] sm:$0xff] %v848_v42  ;;  %851 = vst [vmem:[%s3824_s10 + $0x2f8] sm:$0xff] %v850_v43  ;;  %v852_v44 = vld [vmem:[%s3819_s28 + $0x600] sm:$0xff]  ;;  %v854_v45 = vld [vmem:[%s3819_s28 + $0x610] sm:$0xff] }
  0x6c   : > { %v856_v46 = vld [vmem:[%s3819_s28 + $0x620] sm:$0xff]  ;;  %853 = vst [vmem:[%s3824_s10 + $0x300] sm:$0xff] %v852_v44  ;;  %855 = vst [vmem:[%s3824_s10 + $0x308] sm:$0xff] %v854_v45  ;;  %v858_v47 = vld [vmem:[%s3819_s28 + $0x630] sm:$0xff] }
  0x6d   : > { %857 = vst [vmem:[%s3824_s10 + $0x310] sm:$0xff] %v856_v46  ;;  %v860_v48 = vld [vmem:[%s3819_s28 + $0x640] sm:$0xff]  ;;  %v862_v49 = vld [vmem:[%s3819_s28 + $0x650] sm:$0xff]  ;;  %859 = vst [vmem:[%s3824_s10 + $0x318] sm:$0xff] %v858_v47 }
  0x6e   : > { %861 = vst [vmem:[%s3824_s10 + $0x320] sm:$0xff] %v860_v48  ;;  %863 = vst [vmem:[%s3824_s10 + $0x328] sm:$0xff] %v862_v49  ;;  %v864_v50 = vld [vmem:[%s3819_s28 + $0x660] sm:$0xff]  ;;  %v866_v51 = vld [vmem:[%s3819_s28 + $0x670] sm:$0xff] }
  0x6f   : > { %v868_v52 = vld [vmem:[%s3819_s28 + $0x680] sm:$0xff]  ;;  %865 = vst [vmem:[%s3824_s10 + $0x330] sm:$0xff] %v864_v50  ;;  %867 = vst [vmem:[%s3824_s10 + $0x338] sm:$0xff] %v866_v51  ;;  %v870_v53 = vld [vmem:[%s3819_s28 + $0x690] sm:$0xff] }
  0x70   : > { %869 = vst [vmem:[%s3824_s10 + $0x340] sm:$0xff] %v868_v52  ;;  %v872_v54 = vld [vmem:[%s3819_s28 + $0x6a0] sm:$0xff]  ;;  %v874_v55 = vld [vmem:[%s3819_s28 + $0x6b0] sm:$0xff]  ;;  %871 = vst [vmem:[%s3824_s10 + $0x348] sm:$0xff] %v870_v53 }
  0x71   : > { %873 = vst [vmem:[%s3824_s10 + $0x350] sm:$0xff] %v872_v54  ;;  %875 = vst [vmem:[%s3824_s10 + $0x358] sm:$0xff] %v874_v55  ;;  %v876_v56 = vld [vmem:[%s3819_s28 + $0x6c0] sm:$0xff]  ;;  %v878_v57 = vld [vmem:[%s3819_s28 + $0x6d0] sm:$0xff] }
  0x72   : > { %v880_v58 = vld [vmem:[%s3819_s28 + $0x6e0] sm:$0xff]  ;;  %877 = vst [vmem:[%s3824_s10 + $0x360] sm:$0xff] %v876_v56  ;;  %879 = vst [vmem:[%s3824_s10 + $0x368] sm:$0xff] %v878_v57  ;;  %v882_v59 = vld [vmem:[%s3819_s28 + $0x6f0] sm:$0xff] }
  0x73   : > { %881 = vst [vmem:[%s3824_s10 + $0x370] sm:$0xff] %v880_v58  ;;  %v884_v60 = vld [vmem:[%s3819_s28 + $0x700] sm:$0xff]  ;;  %v886_v61 = vld [vmem:[%s3819_s28 + $0x710] sm:$0xff]  ;;  %883 = vst [vmem:[%s3824_s10 + $0x378] sm:$0xff] %v882_v59 }
  0x74   : > { %885 = vst [vmem:[%s3824_s10 + $0x380] sm:$0xff] %v884_v60  ;;  %887 = vst [vmem:[%s3824_s10 + $0x388] sm:$0xff] %v886_v61  ;;  %v888_v62 = vld [vmem:[%s3819_s28 + $0x720] sm:$0xff]  ;;  %v890_v63 = vld [vmem:[%s3819_s28 + $0x730] sm:$0xff] }
  0x75   : > { %v892_v0 = vld [vmem:[%s3819_s28 + $0x740] sm:$0xff]  ;;  %889 = vst [vmem:[%s3824_s10 + $0x390] sm:$0xff] %v888_v62  ;;  %891 = vst [vmem:[%s3824_s10 + $0x398] sm:$0xff] %v890_v63  ;;  %v894_v1 = vld [vmem:[%s3819_s28 + $0x750] sm:$0xff] }
  0x76   : > { %893 = vst [vmem:[%s3824_s10 + $0x3a0] sm:$0xff] %v892_v0  ;;  %v896_v2 = vld [vmem:[%s3819_s28 + $0x760] sm:$0xff]  ;;  %v898_v3 = vld [vmem:[%s3819_s28 + $0x770] sm:$0xff]  ;;  %895 = vst [vmem:[%s3824_s10 + $0x3a8] sm:$0xff] %v894_v1 }
  0x77   : > { %897 = vst [vmem:[%s3824_s10 + $0x3b0] sm:$0xff] %v896_v2  ;;  %899 = vst [vmem:[%s3824_s10 + $0x3b8] sm:$0xff] %v898_v3  ;;  %v900_v4 = vld [vmem:[%s3819_s28 + $0x780] sm:$0xff]  ;;  %v902_v5 = vld [vmem:[%s3819_s28 + $0x790] sm:$0xff] }
  0x78   : > { %v904_v6 = vld [vmem:[%s3819_s28 + $0x7a0] sm:$0xff]  ;;  %901 = vst [vmem:[%s3824_s10 + $0x3c0] sm:$0xff] %v900_v4  ;;  %903 = vst [vmem:[%s3824_s10 + $0x3c8] sm:$0xff] %v902_v5  ;;  %v906_v7 = vld [vmem:[%s3819_s28 + $0x7b0] sm:$0xff] }
  0x79   : > { %905 = vst [vmem:[%s3824_s10 + $0x3d0] sm:$0xff] %v904_v6  ;;  %v908_v8 = vld [vmem:[%s3819_s28 + $0x7c0] sm:$0xff]  ;;  %v910_v9 = vld [vmem:[%s3819_s28 + $0x7d0] sm:$0xff]  ;;  %907 = vst [vmem:[%s3824_s10 + $0x3d8] sm:$0xff] %v906_v7 }
  0x7a   : > { %909 = vst [vmem:[%s3824_s10 + $0x3e0] sm:$0xff] %v908_v8  ;;  %911 = vst [vmem:[%s3824_s10 + $0x3e8] sm:$0xff] %v910_v9  ;;  %v912_v10 = vld [vmem:[%s3819_s28 + $0x7e0] sm:$0xff]  ;;  %v914_v11 = vld [vmem:[%s3819_s28 + $0x7f0] sm:$0xff] }
  0x7b   : > { %v916_v12 = vld [vmem:[%s3819_s28 + $0x800] sm:$0xff]  ;;  %913 = vst [vmem:[%s3824_s10 + $0x3f0] sm:$0xff] %v912_v10  ;;  %915 = vst [vmem:[%s3824_s10 + $0x3f8] sm:$0xff] %v914_v11  ;;  %v918_v13 = vld [vmem:[%s3819_s28 + $0x810] sm:$0xff] }
  0x7c   : > { %917 = vst [vmem:[%s3824_s10 + $0x400] sm:$0xff] %v916_v12  ;;  %v920_v14 = vld [vmem:[%s3819_s28 + $0x820] sm:$0xff]  ;;  %v922_v15 = vld [vmem:[%s3819_s28 + $0x830] sm:$0xff]  ;;  %919 = vst [vmem:[%s3824_s10 + $0x408] sm:$0xff] %v918_v13 }
  0x7d   : > { %921 = vst [vmem:[%s3824_s10 + $0x410] sm:$0xff] %v920_v14  ;;  %923 = vst [vmem:[%s3824_s10 + $0x418] sm:$0xff] %v922_v15  ;;  %v924_v16 = vld [vmem:[%s3819_s28 + $0x840] sm:$0xff]  ;;  %v926_v17 = vld [vmem:[%s3819_s28 + $0x850] sm:$0xff] }
  0x7e   : > { %v928_v18 = vld [vmem:[%s3819_s28 + $0x860] sm:$0xff]  ;;  %925 = vst [vmem:[%s3824_s10 + $0x420] sm:$0xff] %v924_v16  ;;  %927 = vst [vmem:[%s3824_s10 + $0x428] sm:$0xff] %v926_v17  ;;  %v930_v19 = vld [vmem:[%s3819_s28 + $0x870] sm:$0xff] }
  0x7f   : > { %929 = vst [vmem:[%s3824_s10 + $0x430] sm:$0xff] %v928_v18  ;;  %v932_v20 = vld [vmem:[%s3819_s28 + $0x880] sm:$0xff]  ;;  %v934_v21 = vld [vmem:[%s3819_s28 + $0x890] sm:$0xff]  ;;  %931 = vst [vmem:[%s3824_s10 + $0x438] sm:$0xff] %v930_v19 }
  0x80   : > { %933 = vst [vmem:[%s3824_s10 + $0x440] sm:$0xff] %v932_v20  ;;  %935 = vst [vmem:[%s3824_s10 + $0x448] sm:$0xff] %v934_v21  ;;  %v936_v22 = vld [vmem:[%s3819_s28 + $0x8a0] sm:$0xff]  ;;  %v938_v23 = vld [vmem:[%s3819_s28 + $0x8b0] sm:$0xff] }
  0x81   : > { %v940_v24 = vld [vmem:[%s3819_s28 + $0x8c0] sm:$0xff]  ;;  %937 = vst [vmem:[%s3824_s10 + $0x450] sm:$0xff] %v936_v22  ;;  %939 = vst [vmem:[%s3824_s10 + $0x458] sm:$0xff] %v938_v23  ;;  %v942_v25 = vld [vmem:[%s3819_s28 + $0x8d0] sm:$0xff] }
  0x82   : > { %941 = vst [vmem:[%s3824_s10 + $0x460] sm:$0xff] %v940_v24  ;;  %v944_v26 = vld [vmem:[%s3819_s28 + $0x8e0] sm:$0xff]  ;;  %v946_v27 = vld [vmem:[%s3819_s28 + $0x8f0] sm:$0xff]  ;;  %943 = vst [vmem:[%s3824_s10 + $0x468] sm:$0xff] %v942_v25 }
  0x83   : > { %945 = vst [vmem:[%s3824_s10 + $0x470] sm:$0xff] %v944_v26  ;;  %947 = vst [vmem:[%s3824_s10 + $0x478] sm:$0xff] %v946_v27  ;;  %v948_v28 = vld [vmem:[%s3819_s28 + $0x900] sm:$0xff]  ;;  %v950_v29 = vld [vmem:[%s3819_s28 + $0x910] sm:$0xff] }
  0x84   : > { %v952_v30 = vld [vmem:[%s3819_s28 + $0x920] sm:$0xff]  ;;  %949 = vst [vmem:[%s3824_s10 + $0x480] sm:$0xff] %v948_v28  ;;  %951 = vst [vmem:[%s3824_s10 + $0x488] sm:$0xff] %v950_v29  ;;  %v954_v31 = vld [vmem:[%s3819_s28 + $0x930] sm:$0xff] }
  0x85   : > { %953 = vst [vmem:[%s3824_s10 + $0x490] sm:$0xff] %v952_v30  ;;  %v956_v32 = vld [vmem:[%s3819_s28 + $0x940] sm:$0xff]  ;;  %v958_v33 = vld [vmem:[%s3819_s28 + $0x950] sm:$0xff]  ;;  %955 = vst [vmem:[%s3824_s10 + $0x498] sm:$0xff] %v954_v31 }
  0x86   : > { %957 = vst [vmem:[%s3824_s10 + $0x4a0] sm:$0xff] %v956_v32  ;;  %959 = vst [vmem:[%s3824_s10 + $0x4a8] sm:$0xff] %v958_v33  ;;  %v960_v34 = vld [vmem:[%s3819_s28 + $0x960] sm:$0xff]  ;;  %v962_v35 = vld [vmem:[%s3819_s28 + $0x970] sm:$0xff] }
  0x87   : > { %v964_v36 = vld [vmem:[%s3819_s28 + $0x980] sm:$0xff]  ;;  %961 = vst [vmem:[%s3824_s10 + $0x4b0] sm:$0xff] %v960_v34  ;;  %963 = vst [vmem:[%s3824_s10 + $0x4b8] sm:$0xff] %v962_v35  ;;  %v966_v37 = vld [vmem:[%s3819_s28 + $0x990] sm:$0xff] }
  0x88   : > { %965 = vst [vmem:[%s3824_s10 + $0x4c0] sm:$0xff] %v964_v36  ;;  %v968_v38 = vld [vmem:[%s3819_s28 + $0x9a0] sm:$0xff]  ;;  %v970_v39 = vld [vmem:[%s3819_s28 + $0x9b0] sm:$0xff]  ;;  %967 = vst [vmem:[%s3824_s10 + $0x4c8] sm:$0xff] %v966_v37 }
  0x89   : > { %969 = vst [vmem:[%s3824_s10 + $0x4d0] sm:$0xff] %v968_v38  ;;  %971 = vst [vmem:[%s3824_s10 + $0x4d8] sm:$0xff] %v970_v39  ;;  %v972_v40 = vld [vmem:[%s3819_s28 + $0x9c0] sm:$0xff]  ;;  %v974_v41 = vld [vmem:[%s3819_s28 + $0x9d0] sm:$0xff] }
  0x8a   : > { %v976_v42 = vld [vmem:[%s3819_s28 + $0x9e0] sm:$0xff]  ;;  %973 = vst [vmem:[%s3824_s10 + $0x4e0] sm:$0xff] %v972_v40  ;;  %975 = vst [vmem:[%s3824_s10 + $0x4e8] sm:$0xff] %v974_v41  ;;  %v978_v43 = vld [vmem:[%s3819_s28 + $0x9f0] sm:$0xff] }
  0x8b   : > { %977 = vst [vmem:[%s3824_s10 + $0x4f0] sm:$0xff] %v976_v42  ;;  %v980_v44 = vld [vmem:[%s3819_s28 + $0xa00] sm:$0xff]  ;;  %v982_v45 = vld [vmem:[%s3819_s28 + $0xa10] sm:$0xff]  ;;  %979 = vst [vmem:[%s3824_s10 + $0x4f8] sm:$0xff] %v978_v43 }
  0x8c   : > { %981 = vst [vmem:[%s3824_s10 + $0x500] sm:$0xff] %v980_v44  ;;  %983 = vst [vmem:[%s3824_s10 + $0x508] sm:$0xff] %v982_v45  ;;  %v984_v46 = vld [vmem:[%s3819_s28 + $0xa20] sm:$0xff]  ;;  %v986_v47 = vld [vmem:[%s3819_s28 + $0xa30] sm:$0xff] }
  0x8d   : > { %v988_v48 = vld [vmem:[%s3819_s28 + $0xa40] sm:$0xff]  ;;  %985 = vst [vmem:[%s3824_s10 + $0x510] sm:$0xff] %v984_v46  ;;  %987 = vst [vmem:[%s3824_s10 + $0x518] sm:$0xff] %v986_v47  ;;  %v990_v49 = vld [vmem:[%s3819_s28 + $0xa50] sm:$0xff] }
  0x8e   : > { %989 = vst [vmem:[%s3824_s10 + $0x520] sm:$0xff] %v988_v48  ;;  %v992_v50 = vld [vmem:[%s3819_s28 + $0xa60] sm:$0xff]  ;;  %v994_v51 = vld [vmem:[%s3819_s28 + $0xa70] sm:$0xff]  ;;  %991 = vst [vmem:[%s3824_s10 + $0x528] sm:$0xff] %v990_v49 }
  0x8f   : > { %993 = vst [vmem:[%s3824_s10 + $0x530] sm:$0xff] %v992_v50  ;;  %995 = vst [vmem:[%s3824_s10 + $0x538] sm:$0xff] %v994_v51  ;;  %v996_v52 = vld [vmem:[%s3819_s28 + $0xa80] sm:$0xff]  ;;  %v998_v53 = vld [vmem:[%s3819_s28 + $0xa90] sm:$0xff] }
  0x90   : > { %v1000_v54 = vld [vmem:[%s3819_s28 + $0xaa0] sm:$0xff]  ;;  %997 = vst [vmem:[%s3824_s10 + $0x540] sm:$0xff] %v996_v52  ;;  %999 = vst [vmem:[%s3824_s10 + $0x548] sm:$0xff] %v998_v53  ;;  %v1002_v55 = vld [vmem:[%s3819_s28 + $0xab0] sm:$0xff] }
  0x91   : > { %1001 = vst [vmem:[%s3824_s10 + $0x550] sm:$0xff] %v1000_v54  ;;  %v1004_v56 = vld [vmem:[%s3819_s28 + $0xac0] sm:$0xff]  ;;  %v1006_v57 = vld [vmem:[%s3819_s28 + $0xad0] sm:$0xff]  ;;  %1003 = vst [vmem:[%s3824_s10 + $0x558] sm:$0xff] %v1002_v55 }
  0x92   : > { %1005 = vst [vmem:[%s3824_s10 + $0x560] sm:$0xff] %v1004_v56  ;;  %1007 = vst [vmem:[%s3824_s10 + $0x568] sm:$0xff] %v1006_v57  ;;  %v1008_v58 = vld [vmem:[%s3819_s28 + $0xae0] sm:$0xff]  ;;  %v1010_v59 = vld [vmem:[%s3819_s28 + $0xaf0] sm:$0xff] }
  0x93   : > { %v1012_v60 = vld [vmem:[%s3819_s28 + $0xb00] sm:$0xff]  ;;  %1009 = vst [vmem:[%s3824_s10 + $0x570] sm:$0xff] %v1008_v58  ;;  %1011 = vst [vmem:[%s3824_s10 + $0x578] sm:$0xff] %v1010_v59  ;;  %v1014_v61 = vld [vmem:[%s3819_s28 + $0xb10] sm:$0xff] }
  0x94   : > { %1013 = vst [vmem:[%s3824_s10 + $0x580] sm:$0xff] %v1012_v60  ;;  %v1016_v62 = vld [vmem:[%s3819_s28 + $0xb20] sm:$0xff]  ;;  %v1018_v63 = vld [vmem:[%s3819_s28 + $0xb30] sm:$0xff]  ;;  %1015 = vst [vmem:[%s3824_s10 + $0x588] sm:$0xff] %v1014_v61 }
  0x95   : > { %1017 = vst [vmem:[%s3824_s10 + $0x590] sm:$0xff] %v1016_v62  ;;  %1019 = vst [vmem:[%s3824_s10 + $0x598] sm:$0xff] %v1018_v63  ;;  %v1020_v0 = vld [vmem:[%s3819_s28 + $0xb40] sm:$0xff]  ;;  %v1022_v1 = vld [vmem:[%s3819_s28 + $0xb50] sm:$0xff] }
  0x96   : > { %v1024_v2 = vld [vmem:[%s3819_s28 + $0xb60] sm:$0xff]  ;;  %1021 = vst [vmem:[%s3824_s10 + $0x5a0] sm:$0xff] %v1020_v0  ;;  %1023 = vst [vmem:[%s3824_s10 + $0x5a8] sm:$0xff] %v1022_v1  ;;  %v1026_v3 = vld [vmem:[%s3819_s28 + $0xb70] sm:$0xff] }
  0x97   : > { %1025 = vst [vmem:[%s3824_s10 + $0x5b0] sm:$0xff] %v1024_v2  ;;  %v1028_v4 = vld [vmem:[%s3819_s28 + $0xb80] sm:$0xff]  ;;  %v1030_v5 = vld [vmem:[%s3819_s28 + $0xb90] sm:$0xff]  ;;  %1027 = vst [vmem:[%s3824_s10 + $0x5b8] sm:$0xff] %v1026_v3 }
  0x98   : > { %1029 = vst [vmem:[%s3824_s10 + $0x5c0] sm:$0xff] %v1028_v4  ;;  %1031 = vst [vmem:[%s3824_s10 + $0x5c8] sm:$0xff] %v1030_v5  ;;  %v1032_v6 = vld [vmem:[%s3819_s28 + $0xba0] sm:$0xff]  ;;  %v1034_v7 = vld [vmem:[%s3819_s28 + $0xbb0] sm:$0xff] }
  0x99   : > { %v1036_v8 = vld [vmem:[%s3819_s28 + $0xbc0] sm:$0xff]  ;;  %1033 = vst [vmem:[%s3824_s10 + $0x5d0] sm:$0xff] %v1032_v6  ;;  %1035 = vst [vmem:[%s3824_s10 + $0x5d8] sm:$0xff] %v1034_v7  ;;  %v1038_v9 = vld [vmem:[%s3819_s28 + $0xbd0] sm:$0xff] }
  0x9a   : > { %1037 = vst [vmem:[%s3824_s10 + $0x5e0] sm:$0xff] %v1036_v8  ;;  %v1040_v10 = vld [vmem:[%s3819_s28 + $0xbe0] sm:$0xff]  ;;  %v1042_v11 = vld [vmem:[%s3819_s28 + $0xbf0] sm:$0xff]  ;;  %1039 = vst [vmem:[%s3824_s10 + $0x5e8] sm:$0xff] %v1038_v9 }
  0x9b   : > { %1041 = vst [vmem:[%s3824_s10 + $0x5f0] sm:$0xff] %v1040_v10  ;;  %1043 = vst [vmem:[%s3824_s10 + $0x5f8] sm:$0xff] %v1042_v11 }
  0x9c PF: > { %1057 = sbr.rel (!%p3795_p11) target bundleno = 163 (0xa3), region = 85  ;;  %s1059_s0 = sand.u32 (%p3795_p11), 1, %s3631_s16  }
  0x9d   : > { %s3136_s27 = sshll.u32 (%p3795_p11), %s3663_s24, 4  ;;  %s2916_s26 = sshll.u32 (%p3795_p11), %s1059_s0, 5 }
  0x9e   : > { %s1067_s6 = scalar_lea.vmem (%p3795_p11), %s4499_s3, %s3136_s27  ;;  %s1061_s8 = scalar_lea.vmem (%p3795_p11), [#allocation5], %s2916_s26 }
  0x9f   : > { %v1080_v12 = vld [vmem:[%s1067_s6] sm:$0xff] (%p3795_p11)  ;;  %v1082_v13 = vld [vmem:[%s1067_s6 + $0x8] sm:$0xff] (%p3795_p11) }
  0xa0   : > { %v1084_v14 = vld [vmem:[%s1067_s6 + $0x20] sm:$0xff] (%p3795_p11)  ;;  %1081 = vst [vmem:[%s1061_s8] sm:$0xff] (%p3795_p11), %v1080_v12  ;;  %1083 = vst [vmem:[%s1061_s8 + $0x8] sm:$0xff] (%p3795_p11), %v1082_v13  ;;  %v1086_v15 = vld [vmem:[%s1067_s6 + $0x28] sm:$0xff] (%p3795_p11) }
  0xa1   : > { %1085 = vst [vmem:[%s1061_s8 + $0x10] sm:$0xff] (%p3795_p11), %v1084_v14  ;;  %1087 = vst [vmem:[%s1061_s8 + $0x18] sm:$0xff] (%p3795_p11), %v1086_v15 }
  0xa3 PF: > { %p2919_p1 = scmp.ge.s32.totalorder %s3667_s25, 1  ;;  %p1092_p2 = scmp.lt.s32.totalorder %s3667_s25, 7 }
  0xa5   : > { %p1093_p3 = pnand %p2919_p1, %p1092_p2 }
  0xa6   : > { %s1099_s14 = sand.u32 (!%p1093_p3), 1, %s3643_s19   ;;  %s1106_s9 = sand.u32 (!%p1093_p3), 1, %s3635_s17  }
  0xa7   : > { %1096 = sbr.rel (%p1093_p3) target bundleno = 662 (0x296), region = 108  ;;  %s1113_s28 = sand.u32 (!%p1093_p3), 1, %s3627_s15  }
  0xa8   : > { %s3160_s11 = smul.u32 (!%p1093_p3), 96, %s1099_s14  ;;  %s2920_s0 = sshll.u32 (!%p1093_p3), %s1113_s28, 5 }
  0xa9   : > { %s3161_s10 = smul.u32 (!%p1093_p3), 1536, %s1106_s9  ;;  %s2922_s27 = sshll.u32 (!%p1093_p3), %s3655_s22, 1 }
  0xaa   : > { %p1154_p4 = scmp.lt.s32.totalorder (!%p1093_p3), %s2922_s27, 3  ;;  %s4226_s6 = scalar_lea.vmem (!%p1093_p3), [#allocation3], %s3160_s11 }
  0xab   : > { %s4228_s8 = scalar_lea.vmem (!%p1093_p3), [#allocation4], %s3161_s10  ;;  %s4230_s1 = scalar_lea.vmem (!%p1093_p3), [#allocation5], %s2920_s0 }
  0xac   : > { %s4232_s17 = scalar_lea.vmem (!%p1093_p3), [#allocation6], %s2920_s0  ;;  %p2923_p5 = scmp.ne.s32.totalorder (!%p1093_p3), %s3651_s21, 0 }
  0xae   : > { %s4532_s27 = smov (!%p1154_p4, %s2922_s27), 3  ;;  %1165 = sbr.rel (%p2923_p5) target bundleno = 181 (0xb5), region = 124 }
  0xaf   : > { %s1156_s30 = scalar_lea.vmem %s4498_s2, %s4532_s27  ;;  %v3669_v16 = vmov (!%p2923_p5), 0.0  }
  0xb0   : > { %1166 = vst [vmem:[#allocation2] sm:$0xff] (!%p2923_p5), %v3669_v16  ;;  %1167 = vst [vmem:[#allocation2 + $0x8] sm:$0xff] (!%p2923_p5), %v3669_v16 }
  0xb1   : > { %1168 = vst [vmem:[#allocation2 + $0x10] sm:$0xff] (!%p2923_p5), %v3669_v16  ;;  %1169 = vst [vmem:[#allocation2 + $0x18] sm:$0xff] (!%p2923_p5), %v3669_v16 }
  0xb5 PF: > { %v3251_v17 = vld [vmem:[%s4228_s8 + $0x4] ss:$8 sps:$4 sm:$0xff]   ;;  %v3255_v19 = vld [vmem:[%s4228_s8] ss:$8 sps:$4 sm:$0xff]   ;;  %v3257_v21 = vld [vmem:[%s4228_s8 + $0x14] ss:$8 sps:$4 sm:$0xff]  }
  0xb6   : > { %v3253_v18 = vld [vmem:[%s4228_s8 + $0x304] ss:$8 sps:$4 sm:$0xff]   ;;  %2398 = vmatprep.subr.bf16.mxu1 %v3251_v17  ;;  %v3256_v20 = vld [vmem:[%s4228_s8 + $0x300] ss:$8 sps:$4 sm:$0xff]   ;;  %v3259_v22 = vld [vmem:[%s4228_s8 + $0x314] ss:$8 sps:$4 sm:$0xff]  }
  0xb7   : > { %2527 = vmatprep.subr.bf16.mxu0 %v3253_v18  ;;  %2399 = vmatpush1.bf16.msra.mxu1 %v3255_v19  ;;  %v3261_v23 = vld [vmem:[%s4228_s8 + $0x10] ss:$8 sps:$4 sm:$0xff]   ;;  %v3263_v25 = vld [vmem:[%s4228_s8 + $0x24] ss:$8 sps:$4 sm:$0xff]   ;;  %v3267_v27 = vld [vmem:[%s4228_s8 + $0x20] ss:$8 sps:$4 sm:$0xff]  }
  0xb8   : > { %2528 = vmatpush1.bf16.msra.mxu0 %v3256_v20  ;;  %2400 = vmatprep.subr.bf16.mxu1 %v3257_v21  ;;  %v3262_v24 = vld [vmem:[%s4228_s8 + $0x310] ss:$8 sps:$4 sm:$0xff]   ;;  %v3265_v26 = vld [vmem:[%s4228_s8 + $0x324] ss:$8 sps:$4 sm:$0xff]   ;;  %v3268_v28 = vld [vmem:[%s4228_s8 + $0x320] ss:$8 sps:$4 sm:$0xff]  }
  0xb9   : > { %2529 = vmatprep.subr.bf16.mxu0 %v3259_v22  ;;  %v3269_v29 = vld [vmem:[%s4228_s8 + $0x34] ss:$8 sps:$4 sm:$0xff]   ;;  %v3273_v31 = vld [vmem:[%s4228_s8 + $0x30] ss:$8 sps:$4 sm:$0xff]   ;;  %v3275_v33 = vld [vmem:[%s4228_s8 + $0x44] ss:$8 sps:$4 sm:$0xff]  }
  0xba   : > { %v3271_v30 = vld [vmem:[%s4228_s8 + $0x334] ss:$8 sps:$4 sm:$0xff]   ;;  %v3274_v32 = vld [vmem:[%s4228_s8 + $0x330] ss:$8 sps:$4 sm:$0xff]   ;;  %v3277_v34 = vld [vmem:[%s4228_s8 + $0x344] ss:$8 sps:$4 sm:$0xff]  }
  0xbb   : > { %2401 = vmatpush1.bf16.msra.mxu1 %v3261_v23  ;;  %v3279_v35 = vld [vmem:[%s4228_s8 + $0x40] ss:$8 sps:$4 sm:$0xff]   ;;  %v3281_v37 = vld [vmem:[%s4228_s8 + $0x54] ss:$8 sps:$4 sm:$0xff]   ;;  %v3285_v39 = vld [vmem:[%s4228_s8 + $0x50] ss:$8 sps:$4 sm:$0xff]  }
  0xbc   : > { %2530 = vmatpush1.bf16.msra.mxu0 %v3262_v24  ;;  %2402 = vmatprep.subr.bf16.mxu1 %v3263_v25  ;;  %v3280_v36 = vld [vmem:[%s4228_s8 + $0x340] ss:$8 sps:$4 sm:$0xff]   ;;  %v3283_v38 = vld [vmem:[%s4228_s8 + $0x354] ss:$8 sps:$4 sm:$0xff]   ;;  %v3286_v40 = vld [vmem:[%s4228_s8 + $0x350] ss:$8 sps:$4 sm:$0xff]  }
  0xbd   : > { %2531 = vmatprep.subr.bf16.mxu0 %v3265_v26  ;;  %v3287_v41 = vld [vmem:[%s4228_s8 + $0x64] ss:$8 sps:$4 sm:$0xff]   ;;  %v3291_v43 = vld [vmem:[%s4228_s8 + $0x60] ss:$8 sps:$4 sm:$0xff]   ;;  %v3293_v45 = vld [vmem:[%s4228_s8 + $0x74] ss:$8 sps:$4 sm:$0xff]  }
  0xbe   : > { %v3289_v42 = vld [vmem:[%s4228_s8 + $0x364] ss:$8 sps:$4 sm:$0xff]   ;;  %v3292_v44 = vld [vmem:[%s4228_s8 + $0x360] ss:$8 sps:$4 sm:$0xff]   ;;  %v3295_v46 = vld [vmem:[%s4228_s8 + $0x374] ss:$8 sps:$4 sm:$0xff]  }
  0xbf   : > { %2403 = vmatpush1.bf16.msra.mxu1 %v3267_v27  ;;  %v3297_v47 = vld [vmem:[%s4228_s8 + $0x70] ss:$8 sps:$4 sm:$0xff]   ;;  %v3299_v49 = vld [vmem:[%s4228_s8 + $0x84] ss:$8 sps:$4 sm:$0xff]   ;;  %v3303_v51 = vld [vmem:[%s4228_s8 + $0x80] ss:$8 sps:$4 sm:$0xff]  }
  0xc0   : > { %2532 = vmatpush1.bf16.msra.mxu0 %v3268_v28  ;;  %2404 = vmatprep.subr.bf16.mxu1 %v3269_v29  ;;  %v3298_v48 = vld [vmem:[%s4228_s8 + $0x370] ss:$8 sps:$4 sm:$0xff]   ;;  %v3301_v50 = vld [vmem:[%s4228_s8 + $0x384] ss:$8 sps:$4 sm:$0xff]   ;;  %v3304_v52 = vld [vmem:[%s4228_s8 + $0x380] ss:$8 sps:$4 sm:$0xff]  }
  0xc1   : > { %2533 = vmatprep.subr.bf16.mxu0 %v3271_v30  ;;  %v3305_v53 = vld [vmem:[%s4228_s8 + $0x94] ss:$8 sps:$4 sm:$0xff]   ;;  %v3309_v55 = vld [vmem:[%s4228_s8 + $0x90] ss:$8 sps:$4 sm:$0xff]   ;;  %v3311_v57 = vld [vmem:[%s4228_s8 + $0xa4] ss:$8 sps:$4 sm:$0xff]  }
  0xc2   : > { %v3307_v54 = vld [vmem:[%s4228_s8 + $0x394] ss:$8 sps:$4 sm:$0xff]   ;;  %v3310_v56 = vld [vmem:[%s4228_s8 + $0x390] ss:$8 sps:$4 sm:$0xff]   ;;  %v3313_v58 = vld [vmem:[%s4228_s8 + $0x3a4] ss:$8 sps:$4 sm:$0xff]  }
  0xc3   : > { %2405 = vmatpush1.bf16.msra.mxu1 %v3273_v31  ;;  %v3315_v59 = vld [vmem:[%s4228_s8 + $0xa0] ss:$8 sps:$4 sm:$0xff]   ;;  %v3317_v61 = vld [vmem:[%s4228_s8 + $0xb4] ss:$8 sps:$4 sm:$0xff]   ;;  %v3321_v63 = vld [vmem:[%s4228_s8 + $0xb0] ss:$8 sps:$4 sm:$0xff]  }
  0xc4   : > { %2534 = vmatpush1.bf16.msra.mxu0 %v3274_v32  ;;  %2406 = vmatprep.subr.bf16.mxu1 %v3275_v33  ;;  %v3316_v60 = vld [vmem:[%s4228_s8 + $0x3a0] ss:$8 sps:$4 sm:$0xff]   ;;  %v3319_v62 = vld [vmem:[%s4228_s8 + $0x3b4] ss:$8 sps:$4 sm:$0xff]   ;;  %v3322_v0 = vld [vmem:[%s4228_s8 + $0x3b0] ss:$8 sps:$4 sm:$0xff]  }
  0xc5   : > { %2535 = vmatprep.subr.bf16.mxu0 %v3277_v34  ;;  %v3349_v1 = vld [vmem:[%s4226_s6 + $0x4] ss:$48 sps:$4 sm:$0xff]   ;;  %v3355_v4 = vld [vmem:[%s4226_s6 + $0x1c] ss:$48 sps:$4 sm:$0xff]   ;;  %v3327_v5 = vld [vmem:[%s4228_s8 + $0xc0] ss:$8 sps:$4 sm:$0xff]  }
  0xc6   : > { %v3323_v2 = vld [vmem:[%s4228_s8 + $0xc4] ss:$8 sps:$4 sm:$0xff]   ;;  %2430 = vmatprep.mubr.bf16.mxu1 %v3349_v1  ;;  %v3328_v6 = vld [vmem:[%s4228_s8 + $0x3c0] ss:$8 sps:$4 sm:$0xff]   ;;  %v3329_v7 = vld [vmem:[%s4228_s8 + $0xd4] ss:$8 sps:$4 sm:$0xff]   ;;  %2559 = vmatprep.mubr.bf16.mxu0 %v3355_v4 }
  0xc7   : > { %2407 = vmatpush1.bf16.msra.mxu1 %v3279_v35  ;;  %v3325_v3 = vld [vmem:[%s4228_s8 + $0x3c4] ss:$8 sps:$4 sm:$0xff]   ;;  %v3331_v8 = vld [vmem:[%s4228_s8 + $0x3d4] ss:$8 sps:$4 sm:$0xff]   ;;  %v3333_v9 = vld [vmem:[%s4228_s8 + $0xd0] ss:$8 sps:$4 sm:$0xff]  }
  0xc8   : > { %2536 = vmatpush1.bf16.msra.mxu0 %v3280_v36  ;;  %2408 = vmatprep.subr.bf16.mxu1 %v3281_v37  ;;  %v3334_v10 = vld [vmem:[%s4228_s8 + $0x3d0] ss:$8 sps:$4 sm:$0xff]   ;;  %v3335_v11 = vld [vmem:[%s4228_s8 + $0xe4] ss:$8 sps:$4 sm:$0xff]   ;;  %v3339_v13 = vld [vmem:[%s4228_s8 + $0xe0] ss:$8 sps:$4 sm:$0xff]  }
  0xc9   : > { %2537 = vmatprep.subr.bf16.mxu0 %v3283_v38  ;;  %v3337_v12 = vld [vmem:[%s4228_s8 + $0x3e4] ss:$8 sps:$4 sm:$0xff]   ;;  %v3340_v14 = vld [vmem:[%s4228_s8 + $0x3e0] ss:$8 sps:$4 sm:$0xff]   ;;  %v3341_v15 = vld [vmem:[%s4228_s8 + $0xf4] ss:$8 sps:$4 sm:$0xff]  }
  0xca   : > { %v3343_v16 = vld [vmem:[%s4228_s8 + $0x3f4] ss:$8 sps:$4 sm:$0xff]   ;;  %v3345_v17 = vld [vmem:[%s4228_s8 + $0xf0] ss:$8 sps:$4 sm:$0xff]   ;;  %v3352_v19 = vld [vmem:[%s4228_s8 + $0x104] ss:$8 sps:$4 sm:$0xff]  }
  0xcb   : > { %2409 = vmatpush1.bf16.msra.mxu1 %v3285_v39  ;;  %v3346_v18 = vld [vmem:[%s4228_s8 + $0x3f0] ss:$8 sps:$4 sm:$0xff]   ;;  %v3358_v20 = vld [vmem:[%s4228_s8 + $0x404] ss:$8 sps:$4 sm:$0xff]   ;;  %v3350_v22 = vld [vmem:[%s4228_s8 + $0x100] ss:$8 sps:$4 sm:$0xff]  }
  0xcc   : > { %2538 = vmatpush1.bf16.msra.mxu0 %v3286_v40  ;;  %2410 = vmatprep.subr.bf16.mxu1 %v3287_v41  ;;  %v3347_v21 = vld [vmem:[%s4226_s6] ss:$48 sps:$4 sm:$0xff]   ;;  %v3353_v23 = vld [vmem:[%s4226_s6 + $0x18] ss:$48 sps:$4 sm:$0xff]   ;;  %v3361_v25 = vld [vmem:[%s4228_s8 + $0x114] ss:$8 sps:$4 sm:$0xff]  }
  0xcd   : > { %2539 = vmatprep.subr.bf16.mxu0 %v3289_v42  ;;  %v3356_v24 = vld [vmem:[%s4228_s8 + $0x400] ss:$8 sps:$4 sm:$0xff]   ;;  %v3364_v26 = vld [vmem:[%s4228_s8 + $0x414] ss:$8 sps:$4 sm:$0xff]   ;;  %v3359_v27 = vld [vmem:[%s4228_s8 + $0x110] ss:$8 sps:$4 sm:$0xff]  }
  0xce   : > { %v3362_v28 = vld [vmem:[%s4228_s8 + $0x410] ss:$8 sps:$4 sm:$0xff]   ;;  %v3367_v29 = vld [vmem:[%s4228_s8 + $0x124] ss:$8 sps:$4 sm:$0xff]   ;;  %v3365_v31 = vld [vmem:[%s4228_s8 + $0x120] ss:$8 sps:$4 sm:$0xff]  }
  0xcf   : > { %2411 = vmatpush1.bf16.msra.mxu1 %v3291_v43  ;;  %v3370_v30 = vld [vmem:[%s4228_s8 + $0x424] ss:$8 sps:$4 sm:$0xff]   ;;  %v3368_v32 = vld [vmem:[%s4228_s8 + $0x420] ss:$8 sps:$4 sm:$0xff]   ;;  %v3373_v33 = vld [vmem:[%s4228_s8 + $0x134] ss:$8 sps:$4 sm:$0xff]  }
  0xd0   : > { %2540 = vmatpush1.bf16.msra.mxu0 %v3292_v44  ;;  %2412 = vmatprep.subr.bf16.mxu1 %v3293_v45  ;;  %v3376_v34 = vld [vmem:[%s4228_s8 + $0x434] ss:$8 sps:$4 sm:$0xff]   ;;  %v3371_v35 = vld [vmem:[%s4228_s8 + $0x130] ss:$8 sps:$4 sm:$0xff]   ;;  %v3379_v37 = vld [vmem:[%s4228_s8 + $0x144] ss:$8 sps:$4 sm:$0xff]  }
  0xd1   : > { %2541 = vmatprep.subr.bf16.mxu0 %v3295_v46  ;;  %v3374_v36 = vld [vmem:[%s4228_s8 + $0x430] ss:$8 sps:$4 sm:$0xff]   ;;  %v3382_v38 = vld [vmem:[%s4228_s8 + $0x444] ss:$8 sps:$4 sm:$0xff]   ;;  %v3377_v39 = vld [vmem:[%s4228_s8 + $0x140] ss:$8 sps:$4 sm:$0xff]  }
  0xd2   : > { %v3380_v40 = vld [vmem:[%s4228_s8 + $0x440] ss:$8 sps:$4 sm:$0xff]   ;;  %v3385_v41 = vld [vmem:[%s4228_s8 + $0x154] ss:$8 sps:$4 sm:$0xff]   ;;  %v3383_v43 = vld [vmem:[%s4228_s8 + $0x150] ss:$8 sps:$4 sm:$0xff]  }
  0xd3   : > { %2413 = vmatpush1.bf16.msra.mxu1 %v3297_v47  ;;  %v3388_v42 = vld [vmem:[%s4228_s8 + $0x454] ss:$8 sps:$4 sm:$0xff]   ;;  %v3386_v44 = vld [vmem:[%s4228_s8 + $0x450] ss:$8 sps:$4 sm:$0xff]   ;;  %v3391_v45 = vld [vmem:[%s4228_s8 + $0x164] ss:$8 sps:$4 sm:$0xff]  }
  0xd4   : > { %2542 = vmatpush1.bf16.msra.mxu0 %v3298_v48  ;;  %2414 = vmatprep.subr.bf16.mxu1 %v3299_v49  ;;  %v3394_v46 = vld [vmem:[%s4228_s8 + $0x464] ss:$8 sps:$4 sm:$0xff]   ;;  %v3389_v47 = vld [vmem:[%s4228_s8 + $0x160] ss:$8 sps:$4 sm:$0xff]   ;;  %v3397_v49 = vld [vmem:[%s4228_s8 + $0x174] ss:$8 sps:$4 sm:$0xff]  }
  0xd5   : > { %2543 = vmatprep.subr.bf16.mxu0 %v3301_v50  ;;  %v3392_v48 = vld [vmem:[%s4228_s8 + $0x460] ss:$8 sps:$4 sm:$0xff]   ;;  %v3400_v50 = vld [vmem:[%s4228_s8 + $0x474] ss:$8 sps:$4 sm:$0xff]   ;;  %p3128_p6 = scmp.ne.s32.totalorder %s3651_s21, 2 }
  0xd6   : > { %v3413_v1 = vld [vmem:[%s4228_s8 + $0x1a0] ss:$8 sps:$4 sm:$0xff]   ;;  %v3424_v4 = vld [vmem:[%s4228_s8 + $0x4b4] ss:$8 sps:$4 sm:$0xff]  }
  0xd7   : > { %2415 = vmatpush1.bf16.msra.mxu1 %v3303_v51  ;;  %v3451_v51 = vld [vmem:[%s4226_s6 + $0xc] ss:$48 sps:$4 sm:$0xff]  }
  0xd8   : > { %2544 = vmatpush1.bf16.msra.mxu0 %v3304_v52  ;;  %2416 = vmatprep.subr.bf16.mxu1 %v3305_v53  ;;  %v3395_v52 = vld [vmem:[%s4228_s8 + $0x170] ss:$8 sps:$4 sm:$0xff]  }
  0xd9   : > { %2545 = vmatprep.subr.bf16.mxu0 %v3307_v54  ;;  %v3398_v53 = vld [vmem:[%s4228_s8 + $0x470] ss:$8 sps:$4 sm:$0xff]   ;;  %v3457_v54 = vld [vmem:[%s4226_s6 + $0x24] ss:$48 sps:$4 sm:$0xff]  }
  0xdb   : > { %2417 = vmatpush1.bf16.msra.mxu1 %v3309_v55  ;;  %v3403_v55 = vld [vmem:[%s4228_s8 + $0x184] ss:$8 sps:$4 sm:$0xff]  }
  0xdc   : > { %2546 = vmatpush1.bf16.msra.mxu0 %v3310_v56  ;;  %2418 = vmatprep.subr.bf16.mxu1 %v3311_v57  ;;  %v3406_v56 = vld [vmem:[%s4228_s8 + $0x484] ss:$8 sps:$4 sm:$0xff]   ;;  %v3401_v57 = vld [vmem:[%s4228_s8 + $0x180] ss:$8 sps:$4 sm:$0xff]  }
  0xdd   : > { %2547 = vmatprep.subr.bf16.mxu0 %v3313_v58  ;;  %v3404_v58 = vld [vmem:[%s4228_s8 + $0x480] ss:$8 sps:$4 sm:$0xff]  }
  0xdf   : > { %2419 = vmatpush1.bf16.msra.mxu1 %v3315_v59  ;;  %v3409_v59 = vld [vmem:[%s4228_s8 + $0x194] ss:$8 sps:$4 sm:$0xff]  }
  0xe0   : > { %2548 = vmatpush1.bf16.msra.mxu0 %v3316_v60  ;;  %2420 = vmatprep.subr.bf16.mxu1 %v3317_v61  ;;  %v3412_v60 = vld [vmem:[%s4228_s8 + $0x494] ss:$8 sps:$4 sm:$0xff]   ;;  %v3407_v61 = vld [vmem:[%s4228_s8 + $0x190] ss:$8 sps:$4 sm:$0xff]  }
  0xe1   : > { %2549 = vmatprep.subr.bf16.mxu0 %v3319_v62  ;;  %v3410_v62 = vld [vmem:[%s4228_s8 + $0x490] ss:$8 sps:$4 sm:$0xff]  }
  0xe3   : > { %2421 = vmatpush1.bf16.msra.mxu1 %v3321_v63  ;;  %v3415_v63 = vld [vmem:[%s4228_s8 + $0x1a4] ss:$8 sps:$4 sm:$0xff]  }
  0xe4   : > { %2550 = vmatpush1.bf16.msra.mxu0 %v3322_v0  ;;  %2422 = vmatprep.subr.bf16.mxu1 %v3323_v2  ;;  %v3418_v0 = vld [vmem:[%s4228_s8 + $0x4a4] ss:$8 sps:$4 sm:$0xff]   ;;  %v3416_v2 = vld [vmem:[%s4228_s8 + $0x4a0] ss:$8 sps:$4 sm:$0xff]  }
  0xe5   : > { %2551 = vmatprep.subr.bf16.mxu0 %v3325_v3  ;;  %v3421_v3 = vld [vmem:[%s4228_s8 + $0x1b4] ss:$8 sps:$4 sm:$0xff]  }
  0xe7   : > { %2423 = vmatpush1.bf16.msra.mxu1 %v3327_v5  ;;  %v3419_v5 = vld [vmem:[%s4228_s8 + $0x1b0] ss:$8 sps:$4 sm:$0xff]  }
  0xe8   : > { %2552 = vmatpush1.bf16.msra.mxu0 %v3328_v6  ;;  %2424 = vmatprep.subr.bf16.mxu1 %v3329_v7  ;;  %v3422_v6 = vld [vmem:[%s4228_s8 + $0x4b0] ss:$8 sps:$4 sm:$0xff]   ;;  %v3427_v7 = vld [vmem:[%s4228_s8 + $0x1c4] ss:$8 sps:$4 sm:$0xff]  }
  0xe9   : > { %2553 = vmatprep.subr.bf16.mxu0 %v3331_v8  ;;  %v3430_v8 = vld [vmem:[%s4228_s8 + $0x4c4] ss:$8 sps:$4 sm:$0xff]  }
  0xeb   : > { %2425 = vmatpush1.bf16.msra.mxu1 %v3333_v9  ;;  %v3425_v9 = vld [vmem:[%s4228_s8 + $0x1c0] ss:$8 sps:$4 sm:$0xff]  }
  0xec   : > { %2554 = vmatpush1.bf16.msra.mxu0 %v3334_v10  ;;  %2426 = vmatprep.subr.bf16.mxu1 %v3335_v11  ;;  %v3428_v10 = vld [vmem:[%s4228_s8 + $0x4c0] ss:$8 sps:$4 sm:$0xff]   ;;  %v3433_v11 = vld [vmem:[%s4228_s8 + $0x1d4] ss:$8 sps:$4 sm:$0xff]  }
  0xed   : > { %2555 = vmatprep.subr.bf16.mxu0 %v3337_v12  ;;  %v3436_v12 = vld [vmem:[%s4228_s8 + $0x4d4] ss:$8 sps:$4 sm:$0xff]  }
  0xef   : > { %2427 = vmatpush1.bf16.msra.mxu1 %v3339_v13  ;;  %v3431_v13 = vld [vmem:[%s4228_s8 + $0x1d0] ss:$8 sps:$4 sm:$0xff]  }
  0xf0   : > { %2556 = vmatpush1.bf16.msra.mxu0 %v3340_v14  ;;  %2428 = vmatprep.subr.bf16.mxu1 %v3341_v15  ;;  %v3434_v14 = vld [vmem:[%s4228_s8 + $0x4d0] ss:$8 sps:$4 sm:$0xff]   ;;  %v3439_v15 = vld [vmem:[%s4228_s8 + $0x1e4] ss:$8 sps:$4 sm:$0xff]  }
  0xf1   : > { %2557 = vmatprep.subr.bf16.mxu0 %v3343_v16  ;;  %v3442_v16 = vld [vmem:[%s4228_s8 + $0x4e4] ss:$8 sps:$4 sm:$0xff]  }
  0xf3   : > { %2429 = vmatpush1.bf16.msra.mxu1 %v3345_v17  ;;  %v3437_v17 = vld [vmem:[%s4228_s8 + $0x1e0] ss:$8 sps:$4 sm:$0xff]  }
  0xf4   : > { %2558 = vmatpush1.bf16.msra.mxu0 %v3346_v18  ;;  %2441 = vmatprep.subr.bf16.mxu1 %v3352_v19  ;;  %v3440_v18 = vld [vmem:[%s4228_s8 + $0x4e0] ss:$8 sps:$4 sm:$0xff]   ;;  %v3445_v19 = vld [vmem:[%s4228_s8 + $0x1f4] ss:$8 sps:$4 sm:$0xff]  }
  0xf5   : > { %2570 = vmatprep.subr.bf16.mxu0 %v3358_v20  ;;  %v3448_v20 = vld [vmem:[%s4228_s8 + $0x4f4] ss:$8 sps:$4 sm:$0xff]  }
  0xf6   : > { %2431 = vmatmul.mubr.bf16.vlgmr.msra.gmra.mrb[0].mxu1 %v3347_v21  ;;  %v3443_v21 = vld [vmem:[%s4228_s8 + $0x1f0] ss:$8 sps:$4 sm:$0xff]  }
  0xf7   : > { %2560 = vmatmul.mubr.bf16.vlgmr.msra.gmra.mrb[0].mxu0 %v3353_v23  ;;  %2442 = vmatpush1.bf16.msra.mxu1 %v3350_v22  ;;  %v3446_v22 = vld [vmem:[%s4228_s8 + $0x4f0] ss:$8 sps:$4 sm:$0xff]   ;;  %v3454_v23 = vld [vmem:[%s4228_s8 + $0x204] ss:$8 sps:$4 sm:$0xff]  }
  0xf8   : > { %2571 = vmatpush1.bf16.msra.mxu0 %v3356_v24  ;;  %2443 = vmatprep.subr.bf16.mxu1 %v3361_v25  ;;  %v3460_v24 = vld [vmem:[%s4228_s8 + $0x504] ss:$8 sps:$4 sm:$0xff]   ;;  %v3449_v25 = vld [vmem:[%s4226_s6 + $0x8] ss:$48 sps:$4 sm:$0xff]  }
  0xf9   : > { %2572 = vmatprep.subr.bf16.mxu0 %v3364_v26  ;;  %2473 = vmatprep.mubr.bf16.mxu1 %v3451_v51  ;;  %v3452_v26 = vld [vmem:[%s4228_s8 + $0x200] ss:$8 sps:$4 sm:$0xff]   ;;  %v3493_v51 = vld [vmem:[%s4228_s8 + $0x264] ss:$8 sps:$4 sm:$0xff]  }
  0xfa   : > { %2602 = vmatprep.mubr.bf16.mxu0 %v3457_v54  ;;  %v3494_v54 = vld [vmem:[%s4228_s8 + $0x560] ss:$8 sps:$4 sm:$0xff]  }
  0xfb   : > { %2444 = vmatpush1.bf16.msra.mxu1 %v3359_v27  ;;  %v3455_v27 = vld [vmem:[%s4226_s6 + $0x20] ss:$48 sps:$4 sm:$0xff]  }
  0xfc   : > { %2573 = vmatpush1.bf16.msra.mxu0 %v3362_v28  ;;  %2445 = vmatprep.subr.bf16.mxu1 %v3367_v29  ;;  %v3458_v28 = vld [vmem:[%s4228_s8 + $0x500] ss:$8 sps:$4 sm:$0xff]   ;;  %v3463_v29 = vld [vmem:[%s4228_s8 + $0x214] ss:$8 sps:$4 sm:$0xff]  }
  0xfd   : > { %2574 = vmatprep.subr.bf16.mxu0 %v3370_v30  ;;  %v3466_v30 = vld [vmem:[%s4228_s8 + $0x514] ss:$8 sps:$4 sm:$0xff]  }
  0xff   : > { %2446 = vmatpush1.bf16.msra.mxu1 %v3365_v31  ;;  %v3461_v31 = vld [vmem:[%s4228_s8 + $0x210] ss:$8 sps:$4 sm:$0xff]  }
 0x100   : > { %2575 = vmatpush1.bf16.msra.mxu0 %v3368_v32  ;;  %2447 = vmatprep.subr.bf16.mxu1 %v3373_v33  ;;  %v3464_v32 = vld [vmem:[%s4228_s8 + $0x510] ss:$8 sps:$4 sm:$0xff]   ;;  %v3469_v33 = vld [vmem:[%s4228_s8 + $0x224] ss:$8 sps:$4 sm:$0xff]  }
 0x101   : > { %2576 = vmatprep.subr.bf16.mxu0 %v3376_v34  ;;  %v3472_v34 = vld [vmem:[%s4228_s8 + $0x524] ss:$8 sps:$4 sm:$0xff]  }
 0x103   : > { %2448 = vmatpush1.bf16.msra.mxu1 %v3371_v35  ;;  %v3553_v35 = vld [vmem:[%s4226_s6 + $0x14] ss:$48 sps:$4 sm:$0xff]  }
 0x104   : > { %2577 = vmatpush1.bf16.msra.mxu0 %v3374_v36  ;;  %2449 = vmatprep.subr.bf16.mxu1 %v3379_v37  ;;  %v3556_v36 = vld [vmem:[%s4226_s6 + $0x2c] ss:$48 sps:$4 sm:$0xff]   ;;  %v3467_v37 = vld [vmem:[%s4228_s8 + $0x220] ss:$8 sps:$4 sm:$0xff]  }
 0x105   : > { %2578 = vmatprep.subr.bf16.mxu0 %v3382_v38  ;;  %v3470_v38 = vld [vmem:[%s4228_s8 + $0x520] ss:$8 sps:$4 sm:$0xff]  }
 0x107   : > { %2450 = vmatpush1.bf16.msra.mxu1 %v3377_v39  ;;  %v3475_v39 = vld [vmem:[%s4228_s8 + $0x234] ss:$8 sps:$4 sm:$0xff]  }
 0x108   : > { %2579 = vmatpush1.bf16.msra.mxu0 %v3380_v40  ;;  %2451 = vmatprep.subr.bf16.mxu1 %v3385_v41  ;;  %v3478_v40 = vld [vmem:[%s4228_s8 + $0x534] ss:$8 sps:$4 sm:$0xff]   ;;  %v3473_v41 = vld [vmem:[%s4228_s8 + $0x230] ss:$8 sps:$4 sm:$0xff]  }
 0x109   : > { %2580 = vmatprep.subr.bf16.mxu0 %v3388_v42  ;;  %v3476_v42 = vld [vmem:[%s4228_s8 + $0x530] ss:$8 sps:$4 sm:$0xff]  }
 0x10b   : > { %2452 = vmatpush1.bf16.msra.mxu1 %v3383_v43  ;;  %v3481_v43 = vld [vmem:[%s4228_s8 + $0x244] ss:$8 sps:$4 sm:$0xff]  }
 0x10c   : > { %2581 = vmatpush1.bf16.msra.mxu0 %v3386_v44  ;;  %2453 = vmatprep.subr.bf16.mxu1 %v3391_v45  ;;  %v3484_v44 = vld [vmem:[%s4228_s8 + $0x544] ss:$8 sps:$4 sm:$0xff]   ;;  %v3479_v45 = vld [vmem:[%s4228_s8 + $0x240] ss:$8 sps:$4 sm:$0xff]  }
 0x10d   : > { %2582 = vmatprep.subr.bf16.mxu0 %v3394_v46  ;;  %v3482_v46 = vld [vmem:[%s4228_s8 + $0x540] ss:$8 sps:$4 sm:$0xff]  }
 0x10f   : > { %2454 = vmatpush1.bf16.msra.mxu1 %v3389_v47  ;;  %v3487_v47 = vld [vmem:[%s4228_s8 + $0x254] ss:$8 sps:$4 sm:$0xff]  }
 0x110   : > { %2583 = vmatpush1.bf16.msra.mxu0 %v3392_v48  ;;  %2455 = vmatprep.subr.bf16.mxu1 %v3397_v49  ;;  %v3490_v48 = vld [vmem:[%s4228_s8 + $0x554] ss:$8 sps:$4 sm:$0xff]   ;;  %v3485_v49 = vld [vmem:[%s4228_s8 + $0x250] ss:$8 sps:$4 sm:$0xff]  }
 0x111   : > { %2584 = vmatprep.subr.bf16.mxu0 %v3400_v50  ;;  %v3488_v50 = vld [vmem:[%s4228_s8 + $0x550] ss:$8 sps:$4 sm:$0xff]  }
 0x113   : > { %2456 = vmatpush1.bf16.msra.mxu1 %v3395_v52  ;;  %v3496_v52 = vld [vmem:[%s4228_s8 + $0x564] ss:$8 sps:$4 sm:$0xff]  }
 0x114   : > { %2585 = vmatpush1.bf16.msra.mxu0 %v3398_v53  ;;  %2457 = vmatprep.subr.bf16.mxu1 %v3403_v55  ;;  %v3491_v53 = vld [vmem:[%s4228_s8 + $0x260] ss:$8 sps:$4 sm:$0xff]   ;;  %v3499_v55 = vld [vmem:[%s4228_s8 + $0x274] ss:$8 sps:$4 sm:$0xff]  }
 0x115   : > { %2586 = vmatprep.subr.bf16.mxu0 %v3406_v56  ;;  %v3502_v56 = vld [vmem:[%s4228_s8 + $0x574] ss:$8 sps:$4 sm:$0xff]  }
 0x117   : > { %2458 = vmatpush1.bf16.msra.mxu1 %v3401_v57  ;;  %v3497_v57 = vld [vmem:[%s4228_s8 + $0x270] ss:$8 sps:$4 sm:$0xff]  }
 0x118   : > { %2587 = vmatpush1.bf16.msra.mxu0 %v3404_v58  ;;  %2459 = vmatprep.subr.bf16.mxu1 %v3409_v59  ;;  %v3500_v58 = vld [vmem:[%s4228_s8 + $0x570] ss:$8 sps:$4 sm:$0xff]   ;;  %v3505_v59 = vld [vmem:[%s4228_s8 + $0x284] ss:$8 sps:$4 sm:$0xff]  }
 0x119   : > { %2588 = vmatprep.subr.bf16.mxu0 %v3412_v60  ;;  %v3508_v60 = vld [vmem:[%s4228_s8 + $0x584] ss:$8 sps:$4 sm:$0xff]  }
 0x11b   : > { %2460 = vmatpush1.bf16.msra.mxu1 %v3407_v61  ;;  %v3503_v61 = vld [vmem:[%s4228_s8 + $0x280] ss:$8 sps:$4 sm:$0xff]  }
 0x11c   : > { %2589 = vmatpush1.bf16.msra.mxu0 %v3410_v62  ;;  %2461 = vmatprep.subr.bf16.mxu1 %v3415_v63  ;;  %v3506_v62 = vld [vmem:[%s4228_s8 + $0x580] ss:$8 sps:$4 sm:$0xff]   ;;  %v3511_v63 = vld [vmem:[%s4228_s8 + $0x294] ss:$8 sps:$4 sm:$0xff]  }
 0x11d   : > { %2590 = vmatprep.subr.bf16.mxu0 %v3418_v0  ;;  %v3514_v0 = vld [vmem:[%s4228_s8 + $0x594] ss:$8 sps:$4 sm:$0xff]  }
 0x11f   : > { %2462 = vmatpush1.bf16.msra.mxu1 %v3413_v1  ;;  %v3509_v1 = vld [vmem:[%s4228_s8 + $0x290] ss:$8 sps:$4 sm:$0xff]  }
 0x120   : > { %2591 = vmatpush1.bf16.msra.mxu0 %v3416_v2  ;;  %2463 = vmatprep.subr.bf16.mxu1 %v3421_v3  ;;  %v3512_v2 = vld [vmem:[%s4228_s8 + $0x590] ss:$8 sps:$4 sm:$0xff]   ;;  %v3517_v3 = vld [vmem:[%s4228_s8 + $0x2a4] ss:$8 sps:$4 sm:$0xff]  }
 0x121   : > { %2592 = vmatprep.subr.bf16.mxu0 %v3424_v4  ;;  %v3520_v4 = vld [vmem:[%s4228_s8 + $0x5a4] ss:$8 sps:$4 sm:$0xff]  }
 0x123   : > { %2464 = vmatpush1.bf16.msra.mxu1 %v3419_v5  ;;  %v3515_v5 = vld [vmem:[%s4228_s8 + $0x2a0] ss:$8 sps:$4 sm:$0xff]  }
 0x124   : > { %2593 = vmatpush1.bf16.msra.mxu0 %v3422_v6  ;;  %2465 = vmatprep.subr.bf16.mxu1 %v3427_v7  ;;  %v3518_v6 = vld [vmem:[%s4228_s8 + $0x5a0] ss:$8 sps:$4 sm:$0xff]   ;;  %v3523_v7 = vld [vmem:[%s4228_s8 + $0x2b4] ss:$8 sps:$4 sm:$0xff]  }
 0x125   : > { %2594 = vmatprep.subr.bf16.mxu0 %v3430_v8  ;;  %v3526_v8 = vld [vmem:[%s4228_s8 + $0x5b4] ss:$8 sps:$4 sm:$0xff]  }
 0x127   : > { %2466 = vmatpush1.bf16.msra.mxu1 %v3425_v9  ;;  %v3521_v9 = vld [vmem:[%s4228_s8 + $0x2b0] ss:$8 sps:$4 sm:$0xff]  }
 0x128   : > { %2595 = vmatpush1.bf16.msra.mxu0 %v3428_v10  ;;  %2467 = vmatprep.subr.bf16.mxu1 %v3433_v11  ;;  %v3524_v10 = vld [vmem:[%s4228_s8 + $0x5b0] ss:$8 sps:$4 sm:$0xff]   ;;  %v3529_v11 = vld [vmem:[%s4228_s8 + $0x2c4] ss:$8 sps:$4 sm:$0xff]  }
 0x129   : > { %2596 = vmatprep.subr.bf16.mxu0 %v3436_v12  ;;  %v3532_v12 = vld [vmem:[%s4228_s8 + $0x5c4] ss:$8 sps:$4 sm:$0xff]  }
 0x12b   : > { %2468 = vmatpush1.bf16.msra.mxu1 %v3431_v13  ;;  %v3527_v13 = vld [vmem:[%s4228_s8 + $0x2c0] ss:$8 sps:$4 sm:$0xff]  }
 0x12c   : > { %2597 = vmatpush1.bf16.msra.mxu0 %v3434_v14  ;;  %2469 = vmatprep.subr.bf16.mxu1 %v3439_v15  ;;  %v3530_v14 = vld [vmem:[%s4228_s8 + $0x5c0] ss:$8 sps:$4 sm:$0xff]   ;;  %v3535_v15 = vld [vmem:[%s4228_s8 + $0x2d4] ss:$8 sps:$4 sm:$0xff]  }
 0x12d   : > { %2598 = vmatprep.subr.bf16.mxu0 %v3442_v16  ;;  %v3538_v16 = vld [vmem:[%s4228_s8 + $0x5d4] ss:$8 sps:$4 sm:$0xff]  }
 0x12f   : > { %2470 = vmatpush1.bf16.msra.mxu1 %v3437_v17  ;;  %v3533_v17 = vld [vmem:[%s4228_s8 + $0x2d0] ss:$8 sps:$4 sm:$0xff]  }
 0x130   : > { %2599 = vmatpush1.bf16.msra.mxu0 %v3440_v18  ;;  %2471 = vmatprep.subr.bf16.mxu1 %v3445_v19  ;;  %v3536_v18 = vld [vmem:[%s4228_s8 + $0x5d0] ss:$8 sps:$4 sm:$0xff]   ;;  %v3541_v19 = vld [vmem:[%s4228_s8 + $0x2e4] ss:$8 sps:$4 sm:$0xff]  }
 0x131   : > { %2600 = vmatprep.subr.bf16.mxu0 %v3448_v20  ;;  %v3544_v20 = vld [vmem:[%s4228_s8 + $0x5e4] ss:$8 sps:$4 sm:$0xff]  }
 0x133   : > { %2472 = vmatpush1.bf16.msra.mxu1 %v3443_v21  ;;  %v3539_v21 = vld [vmem:[%s4228_s8 + $0x2e0] ss:$8 sps:$4 sm:$0xff]  }
 0x134   : > { %2601 = vmatpush1.bf16.msra.mxu0 %v3446_v22  ;;  %2484 = vmatprep.subr.bf16.mxu1 %v3454_v23  ;;  %v3542_v22 = vld [vmem:[%s4228_s8 + $0x5e0] ss:$8 sps:$4 sm:$0xff]   ;;  %v3547_v23 = vld [vmem:[%s4228_s8 + $0x2f4] ss:$8 sps:$4 sm:$0xff]  }
 0x135   : > { %2613 = vmatprep.subr.bf16.mxu0 %v3460_v24  ;;  %v3550_v24 = vld [vmem:[%s4228_s8 + $0x5f4] ss:$8 sps:$4 sm:$0xff]  }
 0x136   : > { %2474 = vmatmul.mubr.bf16.vlgmr.msra.gmra.mrb[0].mxu1 %v3449_v25  ;;  %v3545_v25 = vld [vmem:[%s4228_s8 + $0x2f0] ss:$8 sps:$4 sm:$0xff]  }
 0x137   : > { %2603 = vmatmul.mubr.bf16.vlgmr.msra.gmra.mrb[0].mxu0 %v3455_v27  ;;  %2485 = vmatpush1.bf16.msra.mxu1 %v3452_v26  ;;  %v3548_v26 = vld [vmem:[%s4228_s8 + $0x5f0] ss:$8 sps:$4 sm:$0xff]  }
 0x138   : > { %2614 = vmatpush1.bf16.msra.mxu0 %v3458_v28  ;;  %2486 = vmatprep.subr.bf16.mxu1 %v3463_v29  ;;  %v3551_v27 = vld [vmem:[%s4226_s6 + $0x10] ss:$48 sps:$4 sm:$0xff]   ;;  %v3554_v28 = vld [vmem:[%s4226_s6 + $0x28] ss:$48 sps:$4 sm:$0xff]  }
 0x139   : > { %2615 = vmatprep.subr.bf16.mxu0 %v3466_v30  ;;  %2516 = vmatprep.mubr.bf16.mxu1 %v3553_v35  ;;  %v1170_v30 = vld [vmem:[#allocation2] sm:$0xff] }
 0x13a   : > { %2645 = vmatprep.mubr.bf16.mxu0 %v3556_v36 }
 0x13b   : > { %2487 = vmatpush1.bf16.msra.mxu1 %v3461_v31 }
 0x13c   : > { %2616 = vmatpush1.bf16.msra.mxu0 %v3464_v32  ;;  %2488 = vmatprep.subr.bf16.mxu1 %v3469_v33 }
 0x13d   : > { %2617 = vmatprep.subr.bf16.mxu0 %v3472_v34  ;;  %v1171_v34 = vld [vmem:[#allocation2 + $0x8] sm:$0xff] }
 0x13f   : > { %2489 = vmatpush1.bf16.msra.mxu1 %v3467_v37 }
 0x140   : > { %2618 = vmatpush1.bf16.msra.mxu0 %v3470_v38  ;;  %2490 = vmatprep.subr.bf16.mxu1 %v3475_v39  ;;  %v1172_v38 = vld [vmem:[#allocation2 + $0x10] sm:$0xff] }
 0x141   : > { %2619 = vmatprep.subr.bf16.mxu0 %v3478_v40 }
 0x143   : > { %2491 = vmatpush1.bf16.msra.mxu1 %v3473_v41 }
 0x144   : > { %2620 = vmatpush1.bf16.msra.mxu0 %v3476_v42  ;;  %2492 = vmatprep.subr.bf16.mxu1 %v3481_v43  ;;  %v1173_v43 = vld [vmem:[#allocation2 + $0x18] sm:$0xff] }
 0x145   : > { %2621 = vmatprep.subr.bf16.mxu0 %v3484_v44 }
 0x147   : > { %2493 = vmatpush1.bf16.msra.mxu1 %v3479_v45 }
 0x148   : > { %2622 = vmatpush1.bf16.msra.mxu0 %v3482_v46  ;;  %2494 = vmatprep.subr.bf16.mxu1 %v3487_v47 }
 0x149   : > { %2623 = vmatprep.subr.bf16.mxu0 %v3490_v48 }
 0x14b   : > { %2495 = vmatpush1.bf16.msra.mxu1 %v3485_v49  ;;  %v2674_v49 = vlaneseq (!%p3128_p6) }
 0x14c   : > { %2624 = vmatpush1.bf16.msra.mxu0 %v3488_v50  ;;  %2496 = vmatprep.subr.bf16.mxu1 %v3493_v51  ;;  %v2672_v51 = vld [vmem:[%s1156_s30] sm:$0x3] (!%p3128_p6) }
 0x14d   : > { %2625 = vmatprep.subr.bf16.mxu0 %v3496_v52  ;;  %v2675_v50 = vshrl.u32 (!%p3128_p6), %v2674_v49, 7 }
 0x14f   : > { %2497 = vmatpush1.bf16.msra.mxu1 %v3491_v53  ;;  %v2676_v53 = vsub.s32 (!%p3128_p6), 0, %v2675_v50 }
 0x150   : > { %2626 = vmatpush1.bf16.msra.mxu0 %v3494_v54  ;;  %2498 = vmatprep.subr.bf16.mxu1 %v3499_v55  ;;  %v2680_v54 = vsub.s32 (!%p3128_p6), 1, %v2675_v50 }
 0x151   : > { %2627 = vmatprep.subr.bf16.mxu0 %v3502_v56 }
 0x153   : > { %2499 = vmatpush1.bf16.msra.mxu1 %v3497_v57 }
 0x154   : > { %2628 = vmatpush1.bf16.msra.mxu0 %v3500_v58  ;;  %2500 = vmatprep.subr.bf16.mxu1 %v3505_v59  ;;  %v2677_v58 = vrot.slane (!%p3128_p6), %v2672_v51, %v2676_v53  ;;  %v2681_v59 = vrot.slane (!%p3128_p6), %v2672_v51, %v2680_v54 }
 0x155   : > { %2629 = vmatprep.subr.bf16.mxu0 %v3508_v60 }
 0x157   : > { %2501 = vmatpush1.bf16.msra.mxu1 %v3503_v61 }
 0x158   : > { %2630 = vmatpush1.bf16.msra.mxu0 %v3506_v62  ;;  %2502 = vmatprep.subr.bf16.mxu1 %v3511_v63 }
 0x159   : > { %2631 = vmatprep.subr.bf16.mxu0 %v3514_v0 }
 0x15b   : > { %2503 = vmatpush1.bf16.msra.mxu1 %v3509_v1 }
 0x15c   : > { %2632 = vmatpush1.bf16.msra.mxu0 %v3512_v2  ;;  %2504 = vmatprep.subr.bf16.mxu1 %v3517_v3 }
 0x15d   : > { %2633 = vmatprep.subr.bf16.mxu0 %v3520_v4 }
 0x15f   : > { %2505 = vmatpush1.bf16.msra.mxu1 %v3515_v5 }
 0x160   : > { %2634 = vmatpush1.bf16.msra.mxu0 %v3518_v6  ;;  %2506 = vmatprep.subr.bf16.mxu1 %v3523_v7 }
 0x161   : > { %2635 = vmatprep.subr.bf16.mxu0 %v3526_v8 }
 0x163   : > { %2507 = vmatpush1.bf16.msra.mxu1 %v3521_v9 }
 0x164   : > { %2636 = vmatpush1.bf16.msra.mxu0 %v3524_v10  ;;  %2508 = vmatprep.subr.bf16.mxu1 %v3529_v11 }
 0x165   : > { %2637 = vmatprep.subr.bf16.mxu0 %v3532_v12 }
 0x167   : > { %2509 = vmatpush1.bf16.msra.mxu1 %v3527_v13 }
 0x168   : > { %2638 = vmatpush1.bf16.msra.mxu0 %v3530_v14  ;;  %2510 = vmatprep.subr.bf16.mxu1 %v3535_v15 }
 0x169   : > { %2639 = vmatprep.subr.bf16.mxu0 %v3538_v16 }
 0x16b   : > { %2511 = vmatpush1.bf16.msra.mxu1 %v3533_v17 }
 0x16c   : > { %2640 = vmatpush1.bf16.msra.mxu0 %v3536_v18  ;;  %2512 = vmatprep.subr.bf16.mxu1 %v3541_v19 }
 0x16d   : > { %2641 = vmatprep.subr.bf16.mxu0 %v3544_v20 }
 0x16f   : > { %2513 = vmatpush1.bf16.msra.mxu1 %v3539_v21 }
 0x170   : > { %2642 = vmatpush1.bf16.msra.mxu0 %v3542_v22  ;;  %2514 = vmatprep.subr.bf16.mxu1 %v3547_v23 }
 0x171   : > { %2643 = vmatprep.subr.bf16.mxu0 %v3550_v24 }
 0x173   : > { %2515 = vmatpush1.bf16.msra.mxu1 %v3545_v25 }
 0x174   : > { %2644 = vmatpush1.bf16.msra.mxu0 %v3548_v26 }
 0x176   : > { %2517 = vmatmul.mubr.bf16.vlgmr.msra.gmra.mrb[0].mxu1 %v3551_v27 }
 0x177   : > { %2646 = vmatmul.mubr.bf16.vlgmr.msra.gmra.mrb[0].mxu0 %v3554_v28 }
 0x249   : > { %v2518_v29 = vpop.f32.mrb[0].mxu1 }
 0x24a   : > { %v2647_v31 = vpop.f32.mrb[0].mxu0  ;;  %v2520_v33 = vpop.f32.mrb[1].mxu1 }
 0x24b   : > { %v3138_v32 = vadd.f32 %v2647_v31, %v2518_v29  ;;  %v2649_v35 = vpop.f32.mrb[1].mxu0  ;;  %v2522_v37 = vpop.f32.mrb[2].mxu1 }
 0x24c   : > { %v3139_v36 = vadd.f32 %v2649_v35, %v2520_v33  ;;  %v2651_v39 = vpop.f32.mrb[2].mxu0  ;;  %v2524_v42 = vpop.f32.mrb[3].mxu1  ;;  %2667 = sbr.rel (%p3128_p6) target bundleno = 654 (0x28e), region = 128 }
 0x24d   : > { %v2656_v40 = vadd.f32 %v3138_v32, %v1170_v30  ;;  %v3140_v41 = vadd.f32 %v2651_v39, %v2522_v37  ;;  %v2653_v44 = vpop.f32.mrb[3].mxu0  ;;  %v2732_v37 = vld [vmem:[%s4230_s1] sm:$0xff] (!%p3128_p6) }
 0x24e   : > { %v2657_v45 = vadd.f32 %v3139_v36, %v1171_v34  ;;  %v3141_v46 = vadd.f32 %v2653_v44, %v2524_v42 }
 0x24f   : > { %2660 = vst [vmem:[#allocation2] sm:$0xff] %v2656_v40  ;;  %v2658_v47 = vadd.f32 %v3140_v41, %v1172_v38  ;;  %v2733_v40 = vld [vmem:[%s4230_s1 + $0x8] sm:$0xff] (!%p3128_p6) }
 0x250   : > { %2661 = vst [vmem:[#allocation2 + $0x8] sm:$0xff] %v2657_v45  ;;  %v2659_v48 = vadd.f32 %v3141_v46, %v1173_v43  ;;  %v2734_v43 = vld [vmem:[%s4230_s1 + $0x10] sm:$0xff] (!%p3128_p6) }
 0x251   : > { %2662 = vst [vmem:[#allocation2 + $0x10] sm:$0xff] %v2658_v47  ;;  %v2735_v47 = vld [vmem:[%s4230_s1 + $0x18] sm:$0xff] (!%p3128_p6) }
 0x252   : > { %2663 = vst [vmem:[#allocation2 + $0x18] sm:$0xff] %v2659_v48 }
 0x256   : > { %v2668_v52 = vld [vmem:[#allocation2] sm:$0xff] }
 0x257   : > { %v2669_v55 = vld [vmem:[#allocation2 + $0x8] sm:$0xff]  ;;  %v2684_v60 = vadd.f32 %v2677_v58, %v2668_v52 }
 0x258   : > { %v2670_v56 = vld [vmem:[#allocation2 + $0x10] sm:$0xff]  ;;  %v2685_v61 = vadd.f32 %v2681_v59, %v2669_v55 }
 0x259   : > { %v2671_v57 = vld [vmem:[#allocation2 + $0x18] sm:$0xff]  ;;  %v2686_v62 = vadd.f32 %v2677_v58, %v2670_v56  ;;  %v2692_v0 = vand.u32 2147483647, %v2684_v60  ;;  %v2688_v20 = vmax.f32 %v2684_v60, 0.0 }
 0x25a   : > { %v2687_v63 = vadd.f32 %v2681_v59, %v2671_v57  ;;  %v2693_v1 = vand.u32 2147483647, %v2685_v61  ;;  %v2689_v22 = vmax.f32 %v2685_v61, 0.0 }
 0x25b   : > { %v2694_v2 = vand.u32 2147483647, %v2686_v62  ;;  %v2696_v4 = vsub.f32 0.0, %v2692_v0  ;;  %v2690_v25 = vmax.f32 %v2686_v62, 0.0 }
 0x25c   : > { %v2695_v3 = vand.u32 2147483647, %v2687_v63  ;;  %v2697_v5 = vsub.f32 0.0, %v2693_v1  ;;  %v2691_v28 = vmax.f32 %v2687_v63, 0.0 }
 0x25d   : > { %v2698_v6 = vsub.f32 0.0, %v2694_v2  ;;  %v2700_v8 = vmul.f32 1.442695, %v2696_v4 }
 0x25e   : > { %v2699_v7 = vsub.f32 0.0, %v2695_v3  ;;  %v2702_v9 = vmul.f32 1.442695, %v2697_v5 }
 0x25f   : > { %v2704_v10 = vmul.f32 1.442695, %v2698_v6  ;;  %3557 = vpow2.f32 %v2700_v8 }
 0x260   : > { %v2706_v11 = vmul.f32 1.442695, %v2699_v7  ;;  %3559 = vpow2.f32 %v2702_v9 }
 0x261   : > { %3561 = vpow2.f32 %v2704_v10 }
 0x262   : > { %3563 = vpow2.f32 %v2706_v11 }
 0x269   : > { %v3558_v12 = vpop.eup %3557 }
 0x26a   : > { %v3560_v13 = vpop.eup %3559  ;;  %v2708_v14 = vadd.f32 1.0, %v3558_v12 }
 0x26b   : > { %v3562_v15 = vpop.eup %3561  ;;  %v2709_v16 = vadd.f32 1.0, %v3560_v13 }
 0x26c   : > { %v3564_v17 = vpop.eup %3563  ;;  %3565 = vlog2.f32 %v2708_v14  ;;  %v2710_v18 = vadd.f32 1.0, %v3562_v15 }
 0x26d   : > { %3567 = vlog2.f32 %v2709_v16  ;;  %v2711_v19 = vadd.f32 1.0, %v3564_v17 }
 0x26e   : > { %3569 = vlog2.f32 %v2710_v18 }
 0x26f   : > { %3571 = vlog2.f32 %v2711_v19 }
 0x276   : > { %v3566_v21 = vpop.eup %3565 }
 0x277   : > { %v3568_v23 = vpop.eup %3567  ;;  %v2713_v24 = vmul.f32 0.6931472, %v3566_v21 }
 0x278   : > { %v3570_v26 = vpop.eup %3569  ;;  %v2715_v27 = vmul.f32 0.6931472, %v3568_v23 }
 0x279   : > { %v3572_v29 = vpop.eup %3571  ;;  %v2720_v30 = vadd.f32 %v2713_v24, %v2688_v20  ;;  %v2717_v31 = vmul.f32 0.6931472, %v3570_v26 }
 0x27a   : > { %v2721_v32 = vadd.f32 %v2715_v27, %v2689_v22  ;;  %v2719_v33 = vmul.f32 0.6931472, %v3572_v29 }
 0x27b   : > { %3573 = vtanh.f32 %v2720_v30  ;;  %v2722_v34 = vadd.f32 %v2717_v31, %v2690_v25 }
 0x27c   : > { %3575 = vtanh.f32 %v2721_v32  ;;  %v2723_v35 = vadd.f32 %v2719_v33, %v2691_v28 }
 0x27d   : > { %3577 = vtanh.f32 %v2722_v34 }
 0x27e   : > { %3579 = vtanh.f32 %v2723_v35 }
 0x285   : > { %v3574_v36 = vpop.eup %3573 }
 0x286   : > { %v3576_v38 = vpop.eup %3575  ;;  %v2728_v39 = vmul.f32 %v3574_v36, %v2684_v60 }
 0x287   : > { %v3578_v41 = vpop.eup %3577  ;;  %v2729_v42 = vmul.f32 %v3576_v38, %v2685_v61 }
 0x288   : > { %v3580_v44 = vpop.eup %3579  ;;  %v2736_v45 = vadd.f32 %v2732_v37, %v2728_v39  ;;  %v2730_v46 = vmul.f32 %v3578_v41, %v2686_v62 }
 0x289   : > { %v2737_v48 = vadd.f32 %v2733_v40, %v2729_v42  ;;  %v2731_v49 = vmul.f32 %v3580_v44, %v2687_v63 }
 0x28a   : > { %2740 = vst [vmem:[%s4232_s17] sm:$0xff] %v2736_v45  ;;  %v2738_v50 = vadd.f32 %v2734_v43, %v2730_v46 }
 0x28b   : > { %2741 = vst [vmem:[%s4232_s17 + $0x8] sm:$0xff] %v2737_v48  ;;  %v2739_v51 = vadd.f32 %v2735_v47, %v2731_v49 }
 0x28c   : > { %2742 = vst [vmem:[%s4232_s17 + $0x10] sm:$0xff] %v2738_v50 }
 0x28d   : > { %2743 = vst [vmem:[%s4232_s17 + $0x18] sm:$0xff] %v2739_v51 }
 0x28e PF: > { %2750 = sbr.rel (!%p3799_p13) target bundleno = 662 (0x296), region = 132  ;;  %s3137_s21 = sshll.u32 (%p3799_p13), %s3655_s22, 4 }
 0x28f   : > { %s2756_s9 = scalar_lea.vmem (%p3799_p13), %s4500_s4, %s3137_s21 }
 0x291   : > { %v2769_v52 = vld [vmem:[%s4232_s17] sm:$0xff] (%p3799_p13) }
 0x292   : > { %v2771_v53 = vld [vmem:[%s4232_s17 + $0x8] sm:$0xff] (%p3799_p13)  ;;  %2770 = vst [vmem:[%s2756_s9] sm:$0xff] (%p3799_p13), %v2769_v52 }
 0x293   : > { %v2773_v54 = vld [vmem:[%s4232_s17 + $0x10] sm:$0xff] (%p3799_p13)  ;;  %2772 = vst [vmem:[%s2756_s9 + $0x8] sm:$0xff] (%p3799_p13), %v2771_v53 }
 0x294   : > { %v2775_v55 = vld [vmem:[%s4232_s17 + $0x18] sm:$0xff] (%p3799_p13)  ;;  %2774 = vst [vmem:[%s2756_s9 + $0x20] sm:$0xff] (%p3799_p13), %v2773_v54 }
 0x295   : > { %2776 = vst [vmem:[%s2756_s9 + $0x28] sm:$0xff] %v2775_v55 }
 0x296 PF: > { %s14_s25 = sadd.s32 1, %s3667_s25   ;;  %s4513_s29 = sld [smem:[#allocation7_spill]] }
 0x297   : > { %p11_p7 = scmp.ge.s32.totalorder %s14_s25, 8   ;;  %s4514_s11 = sld [smem:[#allocation8_spill]] }
 0x298   : > { %s4515_s15 = smov %s3631_s16  ;;  %s4516_s16 = smov %s3791_s13 }
 0x299   : > { %s4517_s17 = smov %s3639_s18  ;;  %s4518_s18 = smov %s3788_s12 }
 0x29a   : > { %s4519_s19 = smov %s3647_s20  ;;  %s4520_s20 = smov %s3772_s7 }
 0x29b   : > { %s4521_s21 = smov %s3659_s23  ;;  %s4522_s22 = smov %s3663_s24 }
 0x29c   : > { %s4523_s23 = smov %s4513_s29  ;;  %13 = sbr.rel (!%p11_p7) target bundleno = 9 (0x9), region = 205 }
 0x29d   : > { %s4524_s24 = smov %s4514_s11 }

// kernel: downsample5_forward.23
= control target key start
LH: loop header
LB: loop body
LE: loop exit
PB: predicated region body
PF: predicated region fallthrough
CT: control target
= control target key end

     0   :  { %s4107_s18 = smov 0   ;;  %s4109_s19 = smov 0   ;;  %s5066_s0 = inlined_call_operand.vmem [shape: bf16[16,512], index: 0, kind: input, shape index: {}]   ;;  %s5067_s1 = inlined_call_operand.vmem [shape: bf16[512,1024], index: 1, kind: input, shape index: {}]   ;;  %s5068_s2 = inlined_call_operand.vmem [shape: bf16[16,512], index: 2, kind: input, shape index: {}]   ;;  %s5069_s3 = inlined_call_operand.vmem [shape: bf16[512,1024], index: 3, kind: input, shape index: {}]   ;;  %s5070_s4 = inlined_call_operand.vmem [shape: f32[1,1024], index: 4, kind: input, shape index: {}]   ;;  %s5071_s5 = inlined_call_operand.vmem [shape: f32[16,1024], index: 5, kind: output, shape index: {}]  }
   0x1   :  { %s4111_s20 = smov 0   ;;  %s4113_s21 = smov 0  }
   0x2   :  { %s4115_s22 = smov 0  }
   0x3 LB: > { %s30_s23 = sadd.s32 1, %s4071_s21  ;;  %s3240_s24 = sadd.s32 4294967295, %s4075_s22   ;;  %s4075_s22 = sphi %s4115_s22, %s15_s22   ;;  %s4071_s21 = sphi %s4113_s21, %s5077_s21   ;;  %s4067_s20 = sphi %s4111_s20, %s5076_s20   ;;  %s4063_s19 = sphi %s4109_s19, %s5075_s19   ;;  %s4059_s18 = sphi %s4107_s18, %s5074_s18  }
   0x4   : > { %p32_p0 = scmp.ge.s32.totalorder %s30_s23, 2  ;;  %p78_p1 = scmp.ne.s32.totalorder %s4063_s19, %s4059_s18 }
   0x5   : > { %p79_p2 = scmp.eq.s32.totalorder %s4075_s22, 0  ;;  %p192_p4 = scmp.eq.s32.totalorder %s3240_s24, 1 }
   0x6   : > { %s5079_s23 = smov (%p32_p0, %s30_s23), 0  ;;  %s71_s27 = sadd.s32 1, %s4063_s19 }
   0x7   : > { %p4139_p3 = por %p79_p2, %p78_p1  ;;  %s67_s26 = ssub.s32 %s4071_s21, %s5079_s23 }
   0x8   : > { %p69_p5 = scmp.eq.s32.totalorder %s67_s26, 0  ;;  %p4146_p6 = por %p192_p4, %p78_p1 }
   0x9   : > { %p3245_p7 = scmp.ge.s32.totalorder %s4075_s22, 2 }
   0xa   : > { %s4151_s29 = scalar_select %p69_p5, %s4063_s19, %s71_s27  }
   0xb   : > { %244 = sbr.rel (%p3245_p7) target bundleno = 154 (0x9a), region = 24 }
  0x12   : > { %247 = sbr.rel (!%p4139_p3) target bundleno = 86 (0x56), region = 28  ;;  %s249_s30 = sand.u32 (%p4139_p3), 1, %s4063_s19  }
  0x13   : > { %s3526_s6 = sshll.u32 (%p4139_p3), %s4071_s21, 4  ;;  %s3246_s7 = sshll.u32 (%p4139_p3), %s249_s30, 10 }
  0x14   : > { %s4161_s10 = scalar_lea.vmem (%p4139_p3), %s5067_s1, %s3526_s6  ;;  %s4166_s11 = scalar_lea.vmem (%p4139_p3), [#allocation3], %s3246_s7 }
  0x15   : > { %v270_v0 = vld [vmem:[%s4161_s10] sm:$0xff] (%p4139_p3)  ;;  %v272_v1 = vld [vmem:[%s4161_s10 + $0x8] sm:$0xff] (%p4139_p3) }
  0x16   : > { %v274_v2 = vld [vmem:[%s4161_s10 + $0x20] sm:$0xff] (%p4139_p3)  ;;  %271 = vst [vmem:[%s4166_s11] sm:$0xff] (%p4139_p3), %v270_v0  ;;  %273 = vst [vmem:[%s4166_s11 + $0x8] sm:$0xff] (%p4139_p3), %v272_v1  ;;  %v276_v3 = vld [vmem:[%s4161_s10 + $0x28] sm:$0xff] (%p4139_p3) }
  0x17   : > { %275 = vst [vmem:[%s4166_s11 + $0x10] sm:$0xff] (%p4139_p3), %v274_v2  ;;  %v278_v4 = vld [vmem:[%s4161_s10 + $0x40] sm:$0xff] (%p4139_p3)  ;;  %v280_v5 = vld [vmem:[%s4161_s10 + $0x48] sm:$0xff] (%p4139_p3)  ;;  %277 = vst [vmem:[%s4166_s11 + $0x18] sm:$0xff] (%p4139_p3), %v276_v3 }
  0x18   : > { %279 = vst [vmem:[%s4166_s11 + $0x20] sm:$0xff] (%p4139_p3), %v278_v4  ;;  %281 = vst [vmem:[%s4166_s11 + $0x28] sm:$0xff] (%p4139_p3), %v280_v5  ;;  %v282_v6 = vld [vmem:[%s4161_s10 + $0x60] sm:$0xff] (%p4139_p3)  ;;  %v284_v7 = vld [vmem:[%s4161_s10 + $0x68] sm:$0xff] (%p4139_p3) }
  0x19   : > { %v286_v8 = vld [vmem:[%s4161_s10 + $0x80] sm:$0xff]  ;;  %283 = vst [vmem:[%s4166_s11 + $0x30] sm:$0xff] %v282_v6  ;;  %285 = vst [vmem:[%s4166_s11 + $0x38] sm:$0xff] %v284_v7  ;;  %v288_v9 = vld [vmem:[%s4161_s10 + $0x88] sm:$0xff] }
  0x1a   : > { %287 = vst [vmem:[%s4166_s11 + $0x40] sm:$0xff] %v286_v8  ;;  %v290_v10 = vld [vmem:[%s4161_s10 + $0xa0] sm:$0xff]  ;;  %v292_v11 = vld [vmem:[%s4161_s10 + $0xa8] sm:$0xff]  ;;  %289 = vst [vmem:[%s4166_s11 + $0x48] sm:$0xff] %v288_v9 }
  0x1b   : > { %291 = vst [vmem:[%s4166_s11 + $0x50] sm:$0xff] %v290_v10  ;;  %293 = vst [vmem:[%s4166_s11 + $0x58] sm:$0xff] %v292_v11  ;;  %v294_v12 = vld [vmem:[%s4161_s10 + $0xc0] sm:$0xff]  ;;  %v296_v13 = vld [vmem:[%s4161_s10 + $0xc8] sm:$0xff] }
  0x1c   : > { %v298_v14 = vld [vmem:[%s4161_s10 + $0xe0] sm:$0xff]  ;;  %295 = vst [vmem:[%s4166_s11 + $0x60] sm:$0xff] %v294_v12  ;;  %297 = vst [vmem:[%s4166_s11 + $0x68] sm:$0xff] %v296_v13  ;;  %v300_v15 = vld [vmem:[%s4161_s10 + $0xe8] sm:$0xff] }
  0x1d   : > { %299 = vst [vmem:[%s4166_s11 + $0x70] sm:$0xff] %v298_v14  ;;  %v302_v16 = vld [vmem:[%s4161_s10 + $0x100] sm:$0xff]  ;;  %v304_v17 = vld [vmem:[%s4161_s10 + $0x108] sm:$0xff]  ;;  %301 = vst [vmem:[%s4166_s11 + $0x78] sm:$0xff] %v300_v15 }
  0x1e   : > { %303 = vst [vmem:[%s4166_s11 + $0x80] sm:$0xff] %v302_v16  ;;  %305 = vst [vmem:[%s4166_s11 + $0x88] sm:$0xff] %v304_v17  ;;  %v306_v18 = vld [vmem:[%s4161_s10 + $0x120] sm:$0xff]  ;;  %v308_v19 = vld [vmem:[%s4161_s10 + $0x128] sm:$0xff] }
  0x1f   : > { %v310_v20 = vld [vmem:[%s4161_s10 + $0x140] sm:$0xff]  ;;  %307 = vst [vmem:[%s4166_s11 + $0x90] sm:$0xff] %v306_v18  ;;  %309 = vst [vmem:[%s4166_s11 + $0x98] sm:$0xff] %v308_v19  ;;  %v312_v21 = vld [vmem:[%s4161_s10 + $0x148] sm:$0xff] }
  0x20   : > { %311 = vst [vmem:[%s4166_s11 + $0xa0] sm:$0xff] %v310_v20  ;;  %v314_v22 = vld [vmem:[%s4161_s10 + $0x160] sm:$0xff]  ;;  %v316_v23 = vld [vmem:[%s4161_s10 + $0x168] sm:$0xff]  ;;  %313 = vst [vmem:[%s4166_s11 + $0xa8] sm:$0xff] %v312_v21 }
  0x21   : > { %315 = vst [vmem:[%s4166_s11 + $0xb0] sm:$0xff] %v314_v22  ;;  %317 = vst [vmem:[%s4166_s11 + $0xb8] sm:$0xff] %v316_v23  ;;  %v318_v24 = vld [vmem:[%s4161_s10 + $0x180] sm:$0xff]  ;;  %v320_v25 = vld [vmem:[%s4161_s10 + $0x188] sm:$0xff] }
  0x22   : > { %v322_v26 = vld [vmem:[%s4161_s10 + $0x1a0] sm:$0xff]  ;;  %319 = vst [vmem:[%s4166_s11 + $0xc0] sm:$0xff] %v318_v24  ;;  %321 = vst [vmem:[%s4166_s11 + $0xc8] sm:$0xff] %v320_v25  ;;  %v324_v27 = vld [vmem:[%s4161_s10 + $0x1a8] sm:$0xff] }
  0x23   : > { %323 = vst [vmem:[%s4166_s11 + $0xd0] sm:$0xff] %v322_v26  ;;  %v326_v28 = vld [vmem:[%s4161_s10 + $0x1c0] sm:$0xff]  ;;  %v328_v29 = vld [vmem:[%s4161_s10 + $0x1c8] sm:$0xff]  ;;  %325 = vst [vmem:[%s4166_s11 + $0xd8] sm:$0xff] %v324_v27 }
  0x24   : > { %327 = vst [vmem:[%s4166_s11 + $0xe0] sm:$0xff] %v326_v28  ;;  %329 = vst [vmem:[%s4166_s11 + $0xe8] sm:$0xff] %v328_v29  ;;  %v330_v30 = vld [vmem:[%s4161_s10 + $0x1e0] sm:$0xff]  ;;  %v332_v31 = vld [vmem:[%s4161_s10 + $0x1e8] sm:$0xff] }
  0x25   : > { %v334_v32 = vld [vmem:[%s4161_s10 + $0x200] sm:$0xff]  ;;  %331 = vst [vmem:[%s4166_s11 + $0xf0] sm:$0xff] %v330_v30  ;;  %333 = vst [vmem:[%s4166_s11 + $0xf8] sm:$0xff] %v332_v31  ;;  %v336_v33 = vld [vmem:[%s4161_s10 + $0x208] sm:$0xff] }
  0x26   : > { %335 = vst [vmem:[%s4166_s11 + $0x100] sm:$0xff] %v334_v32  ;;  %v338_v34 = vld [vmem:[%s4161_s10 + $0x220] sm:$0xff]  ;;  %v340_v35 = vld [vmem:[%s4161_s10 + $0x228] sm:$0xff]  ;;  %337 = vst [vmem:[%s4166_s11 + $0x108] sm:$0xff] %v336_v33 }
  0x27   : > { %339 = vst [vmem:[%s4166_s11 + $0x110] sm:$0xff] %v338_v34  ;;  %341 = vst [vmem:[%s4166_s11 + $0x118] sm:$0xff] %v340_v35  ;;  %v342_v36 = vld [vmem:[%s4161_s10 + $0x240] sm:$0xff]  ;;  %v344_v37 = vld [vmem:[%s4161_s10 + $0x248] sm:$0xff] }
  0x28   : > { %v346_v38 = vld [vmem:[%s4161_s10 + $0x260] sm:$0xff]  ;;  %343 = vst [vmem:[%s4166_s11 + $0x120] sm:$0xff] %v342_v36  ;;  %345 = vst [vmem:[%s4166_s11 + $0x128] sm:$0xff] %v344_v37  ;;  %v348_v39 = vld [vmem:[%s4161_s10 + $0x268] sm:$0xff] }
  0x29   : > { %347 = vst [vmem:[%s4166_s11 + $0x130] sm:$0xff] %v346_v38  ;;  %v350_v40 = vld [vmem:[%s4161_s10 + $0x280] sm:$0xff]  ;;  %v352_v41 = vld [vmem:[%s4161_s10 + $0x288] sm:$0xff]  ;;  %349 = vst [vmem:[%s4166_s11 + $0x138] sm:$0xff] %v348_v39 }
  0x2a   : > { %351 = vst [vmem:[%s4166_s11 + $0x140] sm:$0xff] %v350_v40  ;;  %353 = vst [vmem:[%s4166_s11 + $0x148] sm:$0xff] %v352_v41  ;;  %v354_v42 = vld [vmem:[%s4161_s10 + $0x2a0] sm:$0xff]  ;;  %v356_v43 = vld [vmem:[%s4161_s10 + $0x2a8] sm:$0xff] }
  0x2b   : > { %v358_v44 = vld [vmem:[%s4161_s10 + $0x2c0] sm:$0xff]  ;;  %355 = vst [vmem:[%s4166_s11 + $0x150] sm:$0xff] %v354_v42  ;;  %357 = vst [vmem:[%s4166_s11 + $0x158] sm:$0xff] %v356_v43  ;;  %v360_v45 = vld [vmem:[%s4161_s10 + $0x2c8] sm:$0xff] }
  0x2c   : > { %359 = vst [vmem:[%s4166_s11 + $0x160] sm:$0xff] %v358_v44  ;;  %v362_v46 = vld [vmem:[%s4161_s10 + $0x2e0] sm:$0xff]  ;;  %v364_v47 = vld [vmem:[%s4161_s10 + $0x2e8] sm:$0xff]  ;;  %361 = vst [vmem:[%s4166_s11 + $0x168] sm:$0xff] %v360_v45 }
  0x2d   : > { %363 = vst [vmem:[%s4166_s11 + $0x170] sm:$0xff] %v362_v46  ;;  %365 = vst [vmem:[%s4166_s11 + $0x178] sm:$0xff] %v364_v47  ;;  %v366_v48 = vld [vmem:[%s4161_s10 + $0x300] sm:$0xff]  ;;  %v368_v49 = vld [vmem:[%s4161_s10 + $0x308] sm:$0xff] }
  0x2e   : > { %v370_v50 = vld [vmem:[%s4161_s10 + $0x320] sm:$0xff]  ;;  %367 = vst [vmem:[%s4166_s11 + $0x180] sm:$0xff] %v366_v48  ;;  %369 = vst [vmem:[%s4166_s11 + $0x188] sm:$0xff] %v368_v49  ;;  %v372_v51 = vld [vmem:[%s4161_s10 + $0x328] sm:$0xff] }
  0x2f   : > { %371 = vst [vmem:[%s4166_s11 + $0x190] sm:$0xff] %v370_v50  ;;  %v374_v52 = vld [vmem:[%s4161_s10 + $0x340] sm:$0xff]  ;;  %v376_v53 = vld [vmem:[%s4161_s10 + $0x348] sm:$0xff]  ;;  %373 = vst [vmem:[%s4166_s11 + $0x198] sm:$0xff] %v372_v51 }
  0x30   : > { %375 = vst [vmem:[%s4166_s11 + $0x1a0] sm:$0xff] %v374_v52  ;;  %377 = vst [vmem:[%s4166_s11 + $0x1a8] sm:$0xff] %v376_v53  ;;  %v378_v54 = vld [vmem:[%s4161_s10 + $0x360] sm:$0xff]  ;;  %v380_v55 = vld [vmem:[%s4161_s10 + $0x368] sm:$0xff] }
  0x31   : > { %v382_v56 = vld [vmem:[%s4161_s10 + $0x380] sm:$0xff]  ;;  %379 = vst [vmem:[%s4166_s11 + $0x1b0] sm:$0xff] %v378_v54  ;;  %381 = vst [vmem:[%s4166_s11 + $0x1b8] sm:$0xff] %v380_v55  ;;  %v384_v57 = vld [vmem:[%s4161_s10 + $0x388] sm:$0xff] }
  0x32   : > { %383 = vst [vmem:[%s4166_s11 + $0x1c0] sm:$0xff] %v382_v56  ;;  %v386_v58 = vld [vmem:[%s4161_s10 + $0x3a0] sm:$0xff]  ;;  %v388_v59 = vld [vmem:[%s4161_s10 + $0x3a8] sm:$0xff]  ;;  %385 = vst [vmem:[%s4166_s11 + $0x1c8] sm:$0xff] %v384_v57 }
  0x33   : > { %387 = vst [vmem:[%s4166_s11 + $0x1d0] sm:$0xff] %v386_v58  ;;  %389 = vst [vmem:[%s4166_s11 + $0x1d8] sm:$0xff] %v388_v59  ;;  %v390_v60 = vld [vmem:[%s4161_s10 + $0x3c0] sm:$0xff]  ;;  %v392_v61 = vld [vmem:[%s4161_s10 + $0x3c8] sm:$0xff] }
  0x34   : > { %v394_v62 = vld [vmem:[%s4161_s10 + $0x3e0] sm:$0xff]  ;;  %391 = vst [vmem:[%s4166_s11 + $0x1e0] sm:$0xff] %v390_v60  ;;  %393 = vst [vmem:[%s4166_s11 + $0x1e8] sm:$0xff] %v392_v61  ;;  %v396_v63 = vld [vmem:[%s4161_s10 + $0x3e8] sm:$0xff] }
  0x35   : > { %395 = vst [vmem:[%s4166_s11 + $0x1f0] sm:$0xff] %v394_v62  ;;  %v398_v0 = vld [vmem:[%s4161_s10 + $0x400] sm:$0xff]  ;;  %v400_v1 = vld [vmem:[%s4161_s10 + $0x408] sm:$0xff]  ;;  %397 = vst [vmem:[%s4166_s11 + $0x1f8] sm:$0xff] %v396_v63 }
  0x36   : > { %399 = vst [vmem:[%s4166_s11 + $0x200] sm:$0xff] %v398_v0  ;;  %401 = vst [vmem:[%s4166_s11 + $0x208] sm:$0xff] %v400_v1  ;;  %v402_v2 = vld [vmem:[%s4161_s10 + $0x420] sm:$0xff]  ;;  %v404_v3 = vld [vmem:[%s4161_s10 + $0x428] sm:$0xff] }
  0x37   : > { %v406_v4 = vld [vmem:[%s4161_s10 + $0x440] sm:$0xff]  ;;  %403 = vst [vmem:[%s4166_s11 + $0x210] sm:$0xff] %v402_v2  ;;  %405 = vst [vmem:[%s4166_s11 + $0x218] sm:$0xff] %v404_v3  ;;  %v408_v5 = vld [vmem:[%s4161_s10 + $0x448] sm:$0xff] }
  0x38   : > { %407 = vst [vmem:[%s4166_s11 + $0x220] sm:$0xff] %v406_v4  ;;  %v410_v6 = vld [vmem:[%s4161_s10 + $0x460] sm:$0xff]  ;;  %v412_v7 = vld [vmem:[%s4161_s10 + $0x468] sm:$0xff]  ;;  %409 = vst [vmem:[%s4166_s11 + $0x228] sm:$0xff] %v408_v5 }
  0x39   : > { %411 = vst [vmem:[%s4166_s11 + $0x230] sm:$0xff] %v410_v6  ;;  %413 = vst [vmem:[%s4166_s11 + $0x238] sm:$0xff] %v412_v7  ;;  %v414_v8 = vld [vmem:[%s4161_s10 + $0x480] sm:$0xff]  ;;  %v416_v9 = vld [vmem:[%s4161_s10 + $0x488] sm:$0xff] }
  0x3a   : > { %v418_v10 = vld [vmem:[%s4161_s10 + $0x4a0] sm:$0xff]  ;;  %415 = vst [vmem:[%s4166_s11 + $0x240] sm:$0xff] %v414_v8  ;;  %417 = vst [vmem:[%s4166_s11 + $0x248] sm:$0xff] %v416_v9  ;;  %v420_v11 = vld [vmem:[%s4161_s10 + $0x4a8] sm:$0xff] }
  0x3b   : > { %419 = vst [vmem:[%s4166_s11 + $0x250] sm:$0xff] %v418_v10  ;;  %v422_v12 = vld [vmem:[%s4161_s10 + $0x4c0] sm:$0xff]  ;;  %v424_v13 = vld [vmem:[%s4161_s10 + $0x4c8] sm:$0xff]  ;;  %421 = vst [vmem:[%s4166_s11 + $0x258] sm:$0xff] %v420_v11 }
  0x3c   : > { %423 = vst [vmem:[%s4166_s11 + $0x260] sm:$0xff] %v422_v12  ;;  %425 = vst [vmem:[%s4166_s11 + $0x268] sm:$0xff] %v424_v13  ;;  %v426_v14 = vld [vmem:[%s4161_s10 + $0x4e0] sm:$0xff]  ;;  %v428_v15 = vld [vmem:[%s4161_s10 + $0x4e8] sm:$0xff] }
  0x3d   : > { %v430_v16 = vld [vmem:[%s4161_s10 + $0x500] sm:$0xff]  ;;  %427 = vst [vmem:[%s4166_s11 + $0x270] sm:$0xff] %v426_v14  ;;  %429 = vst [vmem:[%s4166_s11 + $0x278] sm:$0xff] %v428_v15  ;;  %v432_v17 = vld [vmem:[%s4161_s10 + $0x508] sm:$0xff] }
  0x3e   : > { %431 = vst [vmem:[%s4166_s11 + $0x280] sm:$0xff] %v430_v16  ;;  %v434_v18 = vld [vmem:[%s4161_s10 + $0x520] sm:$0xff]  ;;  %v436_v19 = vld [vmem:[%s4161_s10 + $0x528] sm:$0xff]  ;;  %433 = vst [vmem:[%s4166_s11 + $0x288] sm:$0xff] %v432_v17 }
  0x3f   : > { %435 = vst [vmem:[%s4166_s11 + $0x290] sm:$0xff] %v434_v18  ;;  %437 = vst [vmem:[%s4166_s11 + $0x298] sm:$0xff] %v436_v19  ;;  %v438_v20 = vld [vmem:[%s4161_s10 + $0x540] sm:$0xff]  ;;  %v440_v21 = vld [vmem:[%s4161_s10 + $0x548] sm:$0xff] }
  0x40   : > { %v442_v22 = vld [vmem:[%s4161_s10 + $0x560] sm:$0xff]  ;;  %439 = vst [vmem:[%s4166_s11 + $0x2a0] sm:$0xff] %v438_v20  ;;  %441 = vst [vmem:[%s4166_s11 + $0x2a8] sm:$0xff] %v440_v21  ;;  %v444_v23 = vld [vmem:[%s4161_s10 + $0x568] sm:$0xff] }
  0x41   : > { %443 = vst [vmem:[%s4166_s11 + $0x2b0] sm:$0xff] %v442_v22  ;;  %v446_v24 = vld [vmem:[%s4161_s10 + $0x580] sm:$0xff]  ;;  %v448_v25 = vld [vmem:[%s4161_s10 + $0x588] sm:$0xff]  ;;  %445 = vst [vmem:[%s4166_s11 + $0x2b8] sm:$0xff] %v444_v23 }
  0x42   : > { %447 = vst [vmem:[%s4166_s11 + $0x2c0] sm:$0xff] %v446_v24  ;;  %449 = vst [vmem:[%s4166_s11 + $0x2c8] sm:$0xff] %v448_v25  ;;  %v450_v26 = vld [vmem:[%s4161_s10 + $0x5a0] sm:$0xff]  ;;  %v452_v27 = vld [vmem:[%s4161_s10 + $0x5a8] sm:$0xff] }
  0x43   : > { %v454_v28 = vld [vmem:[%s4161_s10 + $0x5c0] sm:$0xff]  ;;  %451 = vst [vmem:[%s4166_s11 + $0x2d0] sm:$0xff] %v450_v26  ;;  %453 = vst [vmem:[%s4166_s11 + $0x2d8] sm:$0xff] %v452_v27  ;;  %v456_v29 = vld [vmem:[%s4161_s10 + $0x5c8] sm:$0xff] }
  0x44   : > { %455 = vst [vmem:[%s4166_s11 + $0x2e0] sm:$0xff] %v454_v28  ;;  %v458_v30 = vld [vmem:[%s4161_s10 + $0x5e0] sm:$0xff]  ;;  %v460_v31 = vld [vmem:[%s4161_s10 + $0x5e8] sm:$0xff]  ;;  %457 = vst [vmem:[%s4166_s11 + $0x2e8] sm:$0xff] %v456_v29 }
  0x45   : > { %459 = vst [vmem:[%s4166_s11 + $0x2f0] sm:$0xff] %v458_v30  ;;  %461 = vst [vmem:[%s4166_s11 + $0x2f8] sm:$0xff] %v460_v31  ;;  %v462_v32 = vld [vmem:[%s4161_s10 + $0x600] sm:$0xff]  ;;  %v464_v33 = vld [vmem:[%s4161_s10 + $0x608] sm:$0xff] }
  0x46   : > { %v466_v34 = vld [vmem:[%s4161_s10 + $0x620] sm:$0xff]  ;;  %463 = vst [vmem:[%s4166_s11 + $0x300] sm:$0xff] %v462_v32  ;;  %465 = vst [vmem:[%s4166_s11 + $0x308] sm:$0xff] %v464_v33  ;;  %v468_v35 = vld [vmem:[%s4161_s10 + $0x628] sm:$0xff] }
  0x47   : > { %467 = vst [vmem:[%s4166_s11 + $0x310] sm:$0xff] %v466_v34  ;;  %v470_v36 = vld [vmem:[%s4161_s10 + $0x640] sm:$0xff]  ;;  %v472_v37 = vld [vmem:[%s4161_s10 + $0x648] sm:$0xff]  ;;  %469 = vst [vmem:[%s4166_s11 + $0x318] sm:$0xff] %v468_v35 }
  0x48   : > { %471 = vst [vmem:[%s4166_s11 + $0x320] sm:$0xff] %v470_v36  ;;  %473 = vst [vmem:[%s4166_s11 + $0x328] sm:$0xff] %v472_v37  ;;  %v474_v38 = vld [vmem:[%s4161_s10 + $0x660] sm:$0xff]  ;;  %v476_v39 = vld [vmem:[%s4161_s10 + $0x668] sm:$0xff] }
  0x49   : > { %v478_v40 = vld [vmem:[%s4161_s10 + $0x680] sm:$0xff]  ;;  %475 = vst [vmem:[%s4166_s11 + $0x330] sm:$0xff] %v474_v38  ;;  %477 = vst [vmem:[%s4166_s11 + $0x338] sm:$0xff] %v476_v39  ;;  %v480_v41 = vld [vmem:[%s4161_s10 + $0x688] sm:$0xff] }
  0x4a   : > { %479 = vst [vmem:[%s4166_s11 + $0x340] sm:$0xff] %v478_v40  ;;  %v482_v42 = vld [vmem:[%s4161_s10 + $0x6a0] sm:$0xff]  ;;  %v484_v43 = vld [vmem:[%s4161_s10 + $0x6a8] sm:$0xff]  ;;  %481 = vst [vmem:[%s4166_s11 + $0x348] sm:$0xff] %v480_v41 }
  0x4b   : > { %483 = vst [vmem:[%s4166_s11 + $0x350] sm:$0xff] %v482_v42  ;;  %485 = vst [vmem:[%s4166_s11 + $0x358] sm:$0xff] %v484_v43  ;;  %v486_v44 = vld [vmem:[%s4161_s10 + $0x6c0] sm:$0xff]  ;;  %v488_v45 = vld [vmem:[%s4161_s10 + $0x6c8] sm:$0xff] }
  0x4c   : > { %v490_v46 = vld [vmem:[%s4161_s10 + $0x6e0] sm:$0xff]  ;;  %487 = vst [vmem:[%s4166_s11 + $0x360] sm:$0xff] %v486_v44  ;;  %489 = vst [vmem:[%s4166_s11 + $0x368] sm:$0xff] %v488_v45  ;;  %v492_v47 = vld [vmem:[%s4161_s10 + $0x6e8] sm:$0xff] }
  0x4d   : > { %491 = vst [vmem:[%s4166_s11 + $0x370] sm:$0xff] %v490_v46  ;;  %v494_v48 = vld [vmem:[%s4161_s10 + $0x700] sm:$0xff]  ;;  %v496_v49 = vld [vmem:[%s4161_s10 + $0x708] sm:$0xff]  ;;  %493 = vst [vmem:[%s4166_s11 + $0x378] sm:$0xff] %v492_v47 }
  0x4e   : > { %495 = vst [vmem:[%s4166_s11 + $0x380] sm:$0xff] %v494_v48  ;;  %497 = vst [vmem:[%s4166_s11 + $0x388] sm:$0xff] %v496_v49  ;;  %v498_v50 = vld [vmem:[%s4161_s10 + $0x720] sm:$0xff]  ;;  %v500_v51 = vld [vmem:[%s4161_s10 + $0x728] sm:$0xff] }
  0x4f   : > { %v502_v52 = vld [vmem:[%s4161_s10 + $0x740] sm:$0xff]  ;;  %499 = vst [vmem:[%s4166_s11 + $0x390] sm:$0xff] %v498_v50  ;;  %501 = vst [vmem:[%s4166_s11 + $0x398] sm:$0xff] %v500_v51  ;;  %v504_v53 = vld [vmem:[%s4161_s10 + $0x748] sm:$0xff] }
  0x50   : > { %503 = vst [vmem:[%s4166_s11 + $0x3a0] sm:$0xff] %v502_v52  ;;  %v506_v54 = vld [vmem:[%s4161_s10 + $0x760] sm:$0xff]  ;;  %v508_v55 = vld [vmem:[%s4161_s10 + $0x768] sm:$0xff]  ;;  %505 = vst [vmem:[%s4166_s11 + $0x3a8] sm:$0xff] %v504_v53 }
  0x51   : > { %507 = vst [vmem:[%s4166_s11 + $0x3b0] sm:$0xff] %v506_v54  ;;  %509 = vst [vmem:[%s4166_s11 + $0x3b8] sm:$0xff] %v508_v55  ;;  %v510_v56 = vld [vmem:[%s4161_s10 + $0x780] sm:$0xff]  ;;  %v512_v57 = vld [vmem:[%s4161_s10 + $0x788] sm:$0xff] }
  0x52   : > { %v514_v58 = vld [vmem:[%s4161_s10 + $0x7a0] sm:$0xff]  ;;  %511 = vst [vmem:[%s4166_s11 + $0x3c0] sm:$0xff] %v510_v56  ;;  %513 = vst [vmem:[%s4166_s11 + $0x3c8] sm:$0xff] %v512_v57  ;;  %v516_v59 = vld [vmem:[%s4161_s10 + $0x7a8] sm:$0xff] }
  0x53   : > { %515 = vst [vmem:[%s4166_s11 + $0x3d0] sm:$0xff] %v514_v58  ;;  %v518_v60 = vld [vmem:[%s4161_s10 + $0x7c0] sm:$0xff]  ;;  %v520_v61 = vld [vmem:[%s4161_s10 + $0x7c8] sm:$0xff]  ;;  %517 = vst [vmem:[%s4166_s11 + $0x3d8] sm:$0xff] %v516_v59 }
  0x54   : > { %519 = vst [vmem:[%s4166_s11 + $0x3e0] sm:$0xff] %v518_v60  ;;  %521 = vst [vmem:[%s4166_s11 + $0x3e8] sm:$0xff] %v520_v61  ;;  %v522_v62 = vld [vmem:[%s4161_s10 + $0x7e0] sm:$0xff]  ;;  %v524_v63 = vld [vmem:[%s4161_s10 + $0x7e8] sm:$0xff] }
  0x55   : > { %523 = vst [vmem:[%s4166_s11 + $0x3f0] sm:$0xff] %v522_v62  ;;  %525 = vst [vmem:[%s4166_s11 + $0x3f8] sm:$0xff] %v524_v63 }
  0x56 PF: > { %531 = sbr.rel (!%p4139_p3) target bundleno = 154 (0x9a), region = 51  ;;  %s533_s12 = sand.u32 (%p4139_p3), 1, %s4063_s19  }
  0x57   : > { %s3527_s13 = sshll.u32 (%p4139_p3), %s4071_s21, 4  ;;  %s3249_s14 = sshll.u32 (%p4139_p3), %s533_s12, 10 }
  0x58   : > { %s4428_s17 = scalar_lea.vmem (%p4139_p3), %s5069_s3, %s3527_s13  ;;  %s4433_s24 = scalar_lea.vmem (%p4139_p3), [#allocation4], %s3249_s14 }
  0x59   : > { %v554_v0 = vld [vmem:[%s4428_s17] sm:$0xff] (%p4139_p3)  ;;  %v556_v1 = vld [vmem:[%s4428_s17 + $0x8] sm:$0xff] (%p4139_p3) }
  0x5a   : > { %v558_v2 = vld [vmem:[%s4428_s17 + $0x20] sm:$0xff] (%p4139_p3)  ;;  %555 = vst [vmem:[%s4433_s24] sm:$0xff] (%p4139_p3), %v554_v0  ;;  %557 = vst [vmem:[%s4433_s24 + $0x8] sm:$0xff] (%p4139_p3), %v556_v1  ;;  %v560_v3 = vld [vmem:[%s4428_s17 + $0x28] sm:$0xff] (%p4139_p3) }
  0x5b   : > { %559 = vst [vmem:[%s4433_s24 + $0x10] sm:$0xff] (%p4139_p3), %v558_v2  ;;  %v562_v4 = vld [vmem:[%s4428_s17 + $0x40] sm:$0xff] (%p4139_p3)  ;;  %v564_v5 = vld [vmem:[%s4428_s17 + $0x48] sm:$0xff] (%p4139_p3)  ;;  %561 = vst [vmem:[%s4433_s24 + $0x18] sm:$0xff] (%p4139_p3), %v560_v3 }
  0x5c   : > { %563 = vst [vmem:[%s4433_s24 + $0x20] sm:$0xff] (%p4139_p3), %v562_v4  ;;  %565 = vst [vmem:[%s4433_s24 + $0x28] sm:$0xff] (%p4139_p3), %v564_v5  ;;  %v566_v6 = vld [vmem:[%s4428_s17 + $0x60] sm:$0xff] (%p4139_p3)  ;;  %v568_v7 = vld [vmem:[%s4428_s17 + $0x68] sm:$0xff] (%p4139_p3) }
  0x5d   : > { %v570_v8 = vld [vmem:[%s4428_s17 + $0x80] sm:$0xff]  ;;  %567 = vst [vmem:[%s4433_s24 + $0x30] sm:$0xff] %v566_v6  ;;  %569 = vst [vmem:[%s4433_s24 + $0x38] sm:$0xff] %v568_v7  ;;  %v572_v9 = vld [vmem:[%s4428_s17 + $0x88] sm:$0xff] }
  0x5e   : > { %571 = vst [vmem:[%s4433_s24 + $0x40] sm:$0xff] %v570_v8  ;;  %v574_v10 = vld [vmem:[%s4428_s17 + $0xa0] sm:$0xff]  ;;  %v576_v11 = vld [vmem:[%s4428_s17 + $0xa8] sm:$0xff]  ;;  %573 = vst [vmem:[%s4433_s24 + $0x48] sm:$0xff] %v572_v9 }
  0x5f   : > { %575 = vst [vmem:[%s4433_s24 + $0x50] sm:$0xff] %v574_v10  ;;  %577 = vst [vmem:[%s4433_s24 + $0x58] sm:$0xff] %v576_v11  ;;  %v578_v12 = vld [vmem:[%s4428_s17 + $0xc0] sm:$0xff]  ;;  %v580_v13 = vld [vmem:[%s4428_s17 + $0xc8] sm:$0xff] }
  0x60   : > { %v582_v14 = vld [vmem:[%s4428_s17 + $0xe0] sm:$0xff]  ;;  %579 = vst [vmem:[%s4433_s24 + $0x60] sm:$0xff] %v578_v12  ;;  %581 = vst [vmem:[%s4433_s24 + $0x68] sm:$0xff] %v580_v13  ;;  %v584_v15 = vld [vmem:[%s4428_s17 + $0xe8] sm:$0xff] }
  0x61   : > { %583 = vst [vmem:[%s4433_s24 + $0x70] sm:$0xff] %v582_v14  ;;  %v586_v16 = vld [vmem:[%s4428_s17 + $0x100] sm:$0xff]  ;;  %v588_v17 = vld [vmem:[%s4428_s17 + $0x108] sm:$0xff]  ;;  %585 = vst [vmem:[%s4433_s24 + $0x78] sm:$0xff] %v584_v15 }
  0x62   : > { %587 = vst [vmem:[%s4433_s24 + $0x80] sm:$0xff] %v586_v16  ;;  %589 = vst [vmem:[%s4433_s24 + $0x88] sm:$0xff] %v588_v17  ;;  %v590_v18 = vld [vmem:[%s4428_s17 + $0x120] sm:$0xff]  ;;  %v592_v19 = vld [vmem:[%s4428_s17 + $0x128] sm:$0xff] }
  0x63   : > { %v594_v20 = vld [vmem:[%s4428_s17 + $0x140] sm:$0xff]  ;;  %591 = vst [vmem:[%s4433_s24 + $0x90] sm:$0xff] %v590_v18  ;;  %593 = vst [vmem:[%s4433_s24 + $0x98] sm:$0xff] %v592_v19  ;;  %v596_v21 = vld [vmem:[%s4428_s17 + $0x148] sm:$0xff] }
  0x64   : > { %595 = vst [vmem:[%s4433_s24 + $0xa0] sm:$0xff] %v594_v20  ;;  %v598_v22 = vld [vmem:[%s4428_s17 + $0x160] sm:$0xff]  ;;  %v600_v23 = vld [vmem:[%s4428_s17 + $0x168] sm:$0xff]  ;;  %597 = vst [vmem:[%s4433_s24 + $0xa8] sm:$0xff] %v596_v21 }
  0x65   : > { %599 = vst [vmem:[%s4433_s24 + $0xb0] sm:$0xff] %v598_v22  ;;  %601 = vst [vmem:[%s4433_s24 + $0xb8] sm:$0xff] %v600_v23  ;;  %v602_v24 = vld [vmem:[%s4428_s17 + $0x180] sm:$0xff]  ;;  %v604_v25 = vld [vmem:[%s4428_s17 + $0x188] sm:$0xff] }
  0x66   : > { %v606_v26 = vld [vmem:[%s4428_s17 + $0x1a0] sm:$0xff]  ;;  %603 = vst [vmem:[%s4433_s24 + $0xc0] sm:$0xff] %v602_v24  ;;  %605 = vst [vmem:[%s4433_s24 + $0xc8] sm:$0xff] %v604_v25  ;;  %v608_v27 = vld [vmem:[%s4428_s17 + $0x1a8] sm:$0xff] }
  0x67   : > { %607 = vst [vmem:[%s4433_s24 + $0xd0] sm:$0xff] %v606_v26  ;;  %v610_v28 = vld [vmem:[%s4428_s17 + $0x1c0] sm:$0xff]  ;;  %v612_v29 = vld [vmem:[%s4428_s17 + $0x1c8] sm:$0xff]  ;;  %609 = vst [vmem:[%s4433_s24 + $0xd8] sm:$0xff] %v608_v27 }
  0x68   : > { %611 = vst [vmem:[%s4433_s24 + $0xe0] sm:$0xff] %v610_v28  ;;  %613 = vst [vmem:[%s4433_s24 + $0xe8] sm:$0xff] %v612_v29  ;;  %v614_v30 = vld [vmem:[%s4428_s17 + $0x1e0] sm:$0xff]  ;;  %v616_v31 = vld [vmem:[%s4428_s17 + $0x1e8] sm:$0xff] }
  0x69   : > { %v618_v32 = vld [vmem:[%s4428_s17 + $0x200] sm:$0xff]  ;;  %615 = vst [vmem:[%s4433_s24 + $0xf0] sm:$0xff] %v614_v30  ;;  %617 = vst [vmem:[%s4433_s24 + $0xf8] sm:$0xff] %v616_v31  ;;  %v620_v33 = vld [vmem:[%s4428_s17 + $0x208] sm:$0xff] }
  0x6a   : > { %619 = vst [vmem:[%s4433_s24 + $0x100] sm:$0xff] %v618_v32  ;;  %v622_v34 = vld [vmem:[%s4428_s17 + $0x220] sm:$0xff]  ;;  %v624_v35 = vld [vmem:[%s4428_s17 + $0x228] sm:$0xff]  ;;  %621 = vst [vmem:[%s4433_s24 + $0x108] sm:$0xff] %v620_v33 }
  0x6b   : > { %623 = vst [vmem:[%s4433_s24 + $0x110] sm:$0xff] %v622_v34  ;;  %625 = vst [vmem:[%s4433_s24 + $0x118] sm:$0xff] %v624_v35  ;;  %v626_v36 = vld [vmem:[%s4428_s17 + $0x240] sm:$0xff]  ;;  %v628_v37 = vld [vmem:[%s4428_s17 + $0x248] sm:$0xff] }
  0x6c   : > { %v630_v38 = vld [vmem:[%s4428_s17 + $0x260] sm:$0xff]  ;;  %627 = vst [vmem:[%s4433_s24 + $0x120] sm:$0xff] %v626_v36  ;;  %629 = vst [vmem:[%s4433_s24 + $0x128] sm:$0xff] %v628_v37  ;;  %v632_v39 = vld [vmem:[%s4428_s17 + $0x268] sm:$0xff] }
  0x6d   : > { %631 = vst [vmem:[%s4433_s24 + $0x130] sm:$0xff] %v630_v38  ;;  %v634_v40 = vld [vmem:[%s4428_s17 + $0x280] sm:$0xff]  ;;  %v636_v41 = vld [vmem:[%s4428_s17 + $0x288] sm:$0xff]  ;;  %633 = vst [vmem:[%s4433_s24 + $0x138] sm:$0xff] %v632_v39 }
  0x6e   : > { %635 = vst [vmem:[%s4433_s24 + $0x140] sm:$0xff] %v634_v40  ;;  %637 = vst [vmem:[%s4433_s24 + $0x148] sm:$0xff] %v636_v41  ;;  %v638_v42 = vld [vmem:[%s4428_s17 + $0x2a0] sm:$0xff]  ;;  %v640_v43 = vld [vmem:[%s4428_s17 + $0x2a8] sm:$0xff] }
  0x6f   : > { %v642_v44 = vld [vmem:[%s4428_s17 + $0x2c0] sm:$0xff]  ;;  %639 = vst [vmem:[%s4433_s24 + $0x150] sm:$0xff] %v638_v42  ;;  %641 = vst [vmem:[%s4433_s24 + $0x158] sm:$0xff] %v640_v43  ;;  %v644_v45 = vld [vmem:[%s4428_s17 + $0x2c8] sm:$0xff] }
  0x70   : > { %643 = vst [vmem:[%s4433_s24 + $0x160] sm:$0xff] %v642_v44  ;;  %v646_v46 = vld [vmem:[%s4428_s17 + $0x2e0] sm:$0xff]  ;;  %v648_v47 = vld [vmem:[%s4428_s17 + $0x2e8] sm:$0xff]  ;;  %645 = vst [vmem:[%s4433_s24 + $0x168] sm:$0xff] %v644_v45 }
  0x71   : > { %647 = vst [vmem:[%s4433_s24 + $0x170] sm:$0xff] %v646_v46  ;;  %649 = vst [vmem:[%s4433_s24 + $0x178] sm:$0xff] %v648_v47  ;;  %v650_v48 = vld [vmem:[%s4428_s17 + $0x300] sm:$0xff]  ;;  %v652_v49 = vld [vmem:[%s4428_s17 + $0x308] sm:$0xff] }
  0x72   : > { %v654_v50 = vld [vmem:[%s4428_s17 + $0x320] sm:$0xff]  ;;  %651 = vst [vmem:[%s4433_s24 + $0x180] sm:$0xff] %v650_v48  ;;  %653 = vst [vmem:[%s4433_s24 + $0x188] sm:$0xff] %v652_v49  ;;  %v656_v51 = vld [vmem:[%s4428_s17 + $0x328] sm:$0xff] }
  0x73   : > { %655 = vst [vmem:[%s4433_s24 + $0x190] sm:$0xff] %v654_v50  ;;  %v658_v52 = vld [vmem:[%s4428_s17 + $0x340] sm:$0xff]  ;;  %v660_v53 = vld [vmem:[%s4428_s17 + $0x348] sm:$0xff]  ;;  %657 = vst [vmem:[%s4433_s24 + $0x198] sm:$0xff] %v656_v51 }
  0x74   : > { %659 = vst [vmem:[%s4433_s24 + $0x1a0] sm:$0xff] %v658_v52  ;;  %661 = vst [vmem:[%s4433_s24 + $0x1a8] sm:$0xff] %v660_v53  ;;  %v662_v54 = vld [vmem:[%s4428_s17 + $0x360] sm:$0xff]  ;;  %v664_v55 = vld [vmem:[%s4428_s17 + $0x368] sm:$0xff] }
  0x75   : > { %v666_v56 = vld [vmem:[%s4428_s17 + $0x380] sm:$0xff]  ;;  %663 = vst [vmem:[%s4433_s24 + $0x1b0] sm:$0xff] %v662_v54  ;;  %665 = vst [vmem:[%s4433_s24 + $0x1b8] sm:$0xff] %v664_v55  ;;  %v668_v57 = vld [vmem:[%s4428_s17 + $0x388] sm:$0xff] }
  0x76   : > { %667 = vst [vmem:[%s4433_s24 + $0x1c0] sm:$0xff] %v666_v56  ;;  %v670_v58 = vld [vmem:[%s4428_s17 + $0x3a0] sm:$0xff]  ;;  %v672_v59 = vld [vmem:[%s4428_s17 + $0x3a8] sm:$0xff]  ;;  %669 = vst [vmem:[%s4433_s24 + $0x1c8] sm:$0xff] %v668_v57 }
  0x77   : > { %671 = vst [vmem:[%s4433_s24 + $0x1d0] sm:$0xff] %v670_v58  ;;  %673 = vst [vmem:[%s4433_s24 + $0x1d8] sm:$0xff] %v672_v59  ;;  %v674_v60 = vld [vmem:[%s4428_s17 + $0x3c0] sm:$0xff]  ;;  %v676_v61 = vld [vmem:[%s4428_s17 + $0x3c8] sm:$0xff] }
  0x78   : > { %v678_v62 = vld [vmem:[%s4428_s17 + $0x3e0] sm:$0xff]  ;;  %675 = vst [vmem:[%s4433_s24 + $0x1e0] sm:$0xff] %v674_v60  ;;  %677 = vst [vmem:[%s4433_s24 + $0x1e8] sm:$0xff] %v676_v61  ;;  %v680_v63 = vld [vmem:[%s4428_s17 + $0x3e8] sm:$0xff] }
  0x79   : > { %679 = vst [vmem:[%s4433_s24 + $0x1f0] sm:$0xff] %v678_v62  ;;  %v682_v0 = vld [vmem:[%s4428_s17 + $0x400] sm:$0xff]  ;;  %v684_v1 = vld [vmem:[%s4428_s17 + $0x408] sm:$0xff]  ;;  %681 = vst [vmem:[%s4433_s24 + $0x1f8] sm:$0xff] %v680_v63 }
  0x7a   : > { %683 = vst [vmem:[%s4433_s24 + $0x200] sm:$0xff] %v682_v0  ;;  %685 = vst [vmem:[%s4433_s24 + $0x208] sm:$0xff] %v684_v1  ;;  %v686_v2 = vld [vmem:[%s4428_s17 + $0x420] sm:$0xff]  ;;  %v688_v3 = vld [vmem:[%s4428_s17 + $0x428] sm:$0xff] }
  0x7b   : > { %v690_v4 = vld [vmem:[%s4428_s17 + $0x440] sm:$0xff]  ;;  %687 = vst [vmem:[%s4433_s24 + $0x210] sm:$0xff] %v686_v2  ;;  %689 = vst [vmem:[%s4433_s24 + $0x218] sm:$0xff] %v688_v3  ;;  %v692_v5 = vld [vmem:[%s4428_s17 + $0x448] sm:$0xff] }
  0x7c   : > { %691 = vst [vmem:[%s4433_s24 + $0x220] sm:$0xff] %v690_v4  ;;  %v694_v6 = vld [vmem:[%s4428_s17 + $0x460] sm:$0xff]  ;;  %v696_v7 = vld [vmem:[%s4428_s17 + $0x468] sm:$0xff]  ;;  %693 = vst [vmem:[%s4433_s24 + $0x228] sm:$0xff] %v692_v5 }
  0x7d   : > { %695 = vst [vmem:[%s4433_s24 + $0x230] sm:$0xff] %v694_v6  ;;  %697 = vst [vmem:[%s4433_s24 + $0x238] sm:$0xff] %v696_v7  ;;  %v698_v8 = vld [vmem:[%s4428_s17 + $0x480] sm:$0xff]  ;;  %v700_v9 = vld [vmem:[%s4428_s17 + $0x488] sm:$0xff] }
  0x7e   : > { %v702_v10 = vld [vmem:[%s4428_s17 + $0x4a0] sm:$0xff]  ;;  %699 = vst [vmem:[%s4433_s24 + $0x240] sm:$0xff] %v698_v8  ;;  %701 = vst [vmem:[%s4433_s24 + $0x248] sm:$0xff] %v700_v9  ;;  %v704_v11 = vld [vmem:[%s4428_s17 + $0x4a8] sm:$0xff] }
  0x7f   : > { %703 = vst [vmem:[%s4433_s24 + $0x250] sm:$0xff] %v702_v10  ;;  %v706_v12 = vld [vmem:[%s4428_s17 + $0x4c0] sm:$0xff]  ;;  %v708_v13 = vld [vmem:[%s4428_s17 + $0x4c8] sm:$0xff]  ;;  %705 = vst [vmem:[%s4433_s24 + $0x258] sm:$0xff] %v704_v11 }
  0x80   : > { %707 = vst [vmem:[%s4433_s24 + $0x260] sm:$0xff] %v706_v12  ;;  %709 = vst [vmem:[%s4433_s24 + $0x268] sm:$0xff] %v708_v13  ;;  %v710_v14 = vld [vmem:[%s4428_s17 + $0x4e0] sm:$0xff]  ;;  %v712_v15 = vld [vmem:[%s4428_s17 + $0x4e8] sm:$0xff] }
  0x81   : > { %v714_v16 = vld [vmem:[%s4428_s17 + $0x500] sm:$0xff]  ;;  %711 = vst [vmem:[%s4433_s24 + $0x270] sm:$0xff] %v710_v14  ;;  %713 = vst [vmem:[%s4433_s24 + $0x278] sm:$0xff] %v712_v15  ;;  %v716_v17 = vld [vmem:[%s4428_s17 + $0x508] sm:$0xff] }
  0x82   : > { %715 = vst [vmem:[%s4433_s24 + $0x280] sm:$0xff] %v714_v16  ;;  %v718_v18 = vld [vmem:[%s4428_s17 + $0x520] sm:$0xff]  ;;  %v720_v19 = vld [vmem:[%s4428_s17 + $0x528] sm:$0xff]  ;;  %717 = vst [vmem:[%s4433_s24 + $0x288] sm:$0xff] %v716_v17 }
  0x83   : > { %719 = vst [vmem:[%s4433_s24 + $0x290] sm:$0xff] %v718_v18  ;;  %721 = vst [vmem:[%s4433_s24 + $0x298] sm:$0xff] %v720_v19  ;;  %v722_v20 = vld [vmem:[%s4428_s17 + $0x540] sm:$0xff]  ;;  %v724_v21 = vld [vmem:[%s4428_s17 + $0x548] sm:$0xff] }
  0x84   : > { %v726_v22 = vld [vmem:[%s4428_s17 + $0x560] sm:$0xff]  ;;  %723 = vst [vmem:[%s4433_s24 + $0x2a0] sm:$0xff] %v722_v20  ;;  %725 = vst [vmem:[%s4433_s24 + $0x2a8] sm:$0xff] %v724_v21  ;;  %v728_v23 = vld [vmem:[%s4428_s17 + $0x568] sm:$0xff] }
  0x85   : > { %727 = vst [vmem:[%s4433_s24 + $0x2b0] sm:$0xff] %v726_v22  ;;  %v730_v24 = vld [vmem:[%s4428_s17 + $0x580] sm:$0xff]  ;;  %v732_v25 = vld [vmem:[%s4428_s17 + $0x588] sm:$0xff]  ;;  %729 = vst [vmem:[%s4433_s24 + $0x2b8] sm:$0xff] %v728_v23 }
  0x86   : > { %731 = vst [vmem:[%s4433_s24 + $0x2c0] sm:$0xff] %v730_v24  ;;  %733 = vst [vmem:[%s4433_s24 + $0x2c8] sm:$0xff] %v732_v25  ;;  %v734_v26 = vld [vmem:[%s4428_s17 + $0x5a0] sm:$0xff]  ;;  %v736_v27 = vld [vmem:[%s4428_s17 + $0x5a8] sm:$0xff] }
  0x87   : > { %v738_v28 = vld [vmem:[%s4428_s17 + $0x5c0] sm:$0xff]  ;;  %735 = vst [vmem:[%s4433_s24 + $0x2d0] sm:$0xff] %v734_v26  ;;  %737 = vst [vmem:[%s4433_s24 + $0x2d8] sm:$0xff] %v736_v27  ;;  %v740_v29 = vld [vmem:[%s4428_s17 + $0x5c8] sm:$0xff] }
  0x88   : > { %739 = vst [vmem:[%s4433_s24 + $0x2e0] sm:$0xff] %v738_v28  ;;  %v742_v30 = vld [vmem:[%s4428_s17 + $0x5e0] sm:$0xff]  ;;  %v744_v31 = vld [vmem:[%s4428_s17 + $0x5e8] sm:$0xff]  ;;  %741 = vst [vmem:[%s4433_s24 + $0x2e8] sm:$0xff] %v740_v29 }
  0x89   : > { %743 = vst [vmem:[%s4433_s24 + $0x2f0] sm:$0xff] %v742_v30  ;;  %745 = vst [vmem:[%s4433_s24 + $0x2f8] sm:$0xff] %v744_v31  ;;  %v746_v32 = vld [vmem:[%s4428_s17 + $0x600] sm:$0xff]  ;;  %v748_v33 = vld [vmem:[%s4428_s17 + $0x608] sm:$0xff] }
  0x8a   : > { %v750_v34 = vld [vmem:[%s4428_s17 + $0x620] sm:$0xff]  ;;  %747 = vst [vmem:[%s4433_s24 + $0x300] sm:$0xff] %v746_v32  ;;  %749 = vst [vmem:[%s4433_s24 + $0x308] sm:$0xff] %v748_v33  ;;  %v752_v35 = vld [vmem:[%s4428_s17 + $0x628] sm:$0xff] }
  0x8b   : > { %751 = vst [vmem:[%s4433_s24 + $0x310] sm:$0xff] %v750_v34  ;;  %v754_v36 = vld [vmem:[%s4428_s17 + $0x640] sm:$0xff]  ;;  %v756_v37 = vld [vmem:[%s4428_s17 + $0x648] sm:$0xff]  ;;  %753 = vst [vmem:[%s4433_s24 + $0x318] sm:$0xff] %v752_v35 }
  0x8c   : > { %755 = vst [vmem:[%s4433_s24 + $0x320] sm:$0xff] %v754_v36  ;;  %757 = vst [vmem:[%s4433_s24 + $0x328] sm:$0xff] %v756_v37  ;;  %v758_v38 = vld [vmem:[%s4428_s17 + $0x660] sm:$0xff]  ;;  %v760_v39 = vld [vmem:[%s4428_s17 + $0x668] sm:$0xff] }
  0x8d   : > { %v762_v40 = vld [vmem:[%s4428_s17 + $0x680] sm:$0xff]  ;;  %759 = vst [vmem:[%s4433_s24 + $0x330] sm:$0xff] %v758_v38  ;;  %761 = vst [vmem:[%s4433_s24 + $0x338] sm:$0xff] %v760_v39  ;;  %v764_v41 = vld [vmem:[%s4428_s17 + $0x688] sm:$0xff] }
  0x8e   : > { %763 = vst [vmem:[%s4433_s24 + $0x340] sm:$0xff] %v762_v40  ;;  %v766_v42 = vld [vmem:[%s4428_s17 + $0x6a0] sm:$0xff]  ;;  %v768_v43 = vld [vmem:[%s4428_s17 + $0x6a8] sm:$0xff]  ;;  %765 = vst [vmem:[%s4433_s24 + $0x348] sm:$0xff] %v764_v41 }
  0x8f   : > { %767 = vst [vmem:[%s4433_s24 + $0x350] sm:$0xff] %v766_v42  ;;  %769 = vst [vmem:[%s4433_s24 + $0x358] sm:$0xff] %v768_v43  ;;  %v770_v44 = vld [vmem:[%s4428_s17 + $0x6c0] sm:$0xff]  ;;  %v772_v45 = vld [vmem:[%s4428_s17 + $0x6c8] sm:$0xff] }
  0x90   : > { %v774_v46 = vld [vmem:[%s4428_s17 + $0x6e0] sm:$0xff]  ;;  %771 = vst [vmem:[%s4433_s24 + $0x360] sm:$0xff] %v770_v44  ;;  %773 = vst [vmem:[%s4433_s24 + $0x368] sm:$0xff] %v772_v45  ;;  %v776_v47 = vld [vmem:[%s4428_s17 + $0x6e8] sm:$0xff] }
  0x91   : > { %775 = vst [vmem:[%s4433_s24 + $0x370] sm:$0xff] %v774_v46  ;;  %v778_v48 = vld [vmem:[%s4428_s17 + $0x700] sm:$0xff]  ;;  %v780_v49 = vld [vmem:[%s4428_s17 + $0x708] sm:$0xff]  ;;  %777 = vst [vmem:[%s4433_s24 + $0x378] sm:$0xff] %v776_v47 }
  0x92   : > { %779 = vst [vmem:[%s4433_s24 + $0x380] sm:$0xff] %v778_v48  ;;  %781 = vst [vmem:[%s4433_s24 + $0x388] sm:$0xff] %v780_v49  ;;  %v782_v50 = vld [vmem:[%s4428_s17 + $0x720] sm:$0xff]  ;;  %v784_v51 = vld [vmem:[%s4428_s17 + $0x728] sm:$0xff] }
  0x93   : > { %v786_v52 = vld [vmem:[%s4428_s17 + $0x740] sm:$0xff]  ;;  %783 = vst [vmem:[%s4433_s24 + $0x390] sm:$0xff] %v782_v50  ;;  %785 = vst [vmem:[%s4433_s24 + $0x398] sm:$0xff] %v784_v51  ;;  %v788_v53 = vld [vmem:[%s4428_s17 + $0x748] sm:$0xff] }
  0x94   : > { %787 = vst [vmem:[%s4433_s24 + $0x3a0] sm:$0xff] %v786_v52  ;;  %v790_v54 = vld [vmem:[%s4428_s17 + $0x760] sm:$0xff]  ;;  %v792_v55 = vld [vmem:[%s4428_s17 + $0x768] sm:$0xff]  ;;  %789 = vst [vmem:[%s4433_s24 + $0x3a8] sm:$0xff] %v788_v53 }
  0x95   : > { %791 = vst [vmem:[%s4433_s24 + $0x3b0] sm:$0xff] %v790_v54  ;;  %793 = vst [vmem:[%s4433_s24 + $0x3b8] sm:$0xff] %v792_v55  ;;  %v794_v56 = vld [vmem:[%s4428_s17 + $0x780] sm:$0xff]  ;;  %v796_v57 = vld [vmem:[%s4428_s17 + $0x788] sm:$0xff] }
  0x96   : > { %v798_v58 = vld [vmem:[%s4428_s17 + $0x7a0] sm:$0xff]  ;;  %795 = vst [vmem:[%s4433_s24 + $0x3c0] sm:$0xff] %v794_v56  ;;  %797 = vst [vmem:[%s4433_s24 + $0x3c8] sm:$0xff] %v796_v57  ;;  %v800_v59 = vld [vmem:[%s4428_s17 + $0x7a8] sm:$0xff] }
  0x97   : > { %799 = vst [vmem:[%s4433_s24 + $0x3d0] sm:$0xff] %v798_v58  ;;  %v802_v60 = vld [vmem:[%s4428_s17 + $0x7c0] sm:$0xff]  ;;  %v804_v61 = vld [vmem:[%s4428_s17 + $0x7c8] sm:$0xff]  ;;  %801 = vst [vmem:[%s4433_s24 + $0x3d8] sm:$0xff] %v800_v59 }
  0x98   : > { %803 = vst [vmem:[%s4433_s24 + $0x3e0] sm:$0xff] %v802_v60  ;;  %805 = vst [vmem:[%s4433_s24 + $0x3e8] sm:$0xff] %v804_v61  ;;  %v806_v62 = vld [vmem:[%s4428_s17 + $0x7e0] sm:$0xff]  ;;  %v808_v63 = vld [vmem:[%s4428_s17 + $0x7e8] sm:$0xff] }
  0x99   : > { %807 = vst [vmem:[%s4433_s24 + $0x3f0] sm:$0xff] %v806_v62  ;;  %809 = vst [vmem:[%s4433_s24 + $0x3f8] sm:$0xff] %v808_v63 }
  0x9a PF: > { %p3252_p8 = scmp.ge.s32.totalorder %s4075_s22, 1  ;;  %p822_p9 = scmp.lt.s32.totalorder %s4075_s22, 3 }
  0x9c   : > { %p823_p10 = pnand %p3252_p8, %p822_p9 }
  0x9d   : > { %s829_s25 = sand.u32 (!%p823_p10), 1, %s4059_s18   ;;  %v3691_v0 = vld [vmem:[%s5066_s0 + $0x4] ss:$16 sps:$4 sm:$0xff] (!%p823_p10)  }
  0x9e   : > { %826 = sbr.rel (%p823_p10) target bundleno = 694 (0x2b6), region = 78  ;;  %s4693_s26 = sshll.u32 (!%p823_p10), %s829_s25, 10  ;;  %1769 = vmatprep.mubr.bf16.mxu0 (!%p823_p10), %v3691_v0  ;;  %1855 = vmatprep.mubr.bf16.mxu1 (!%p823_p10), %v3691_v0 }
  0x9f   : > { %s4699_s6 = scalar_lea.vmem (!%p823_p10), [#allocation3], %s4693_s26  ;;  %s4798_s11 = scalar_lea.vmem (!%p823_p10), [#allocation4], %s4693_s26 }
  0xa0   : > { %v3593_v1 = vld [vmem:[%s4699_s6 + $0x4] ss:$16 sps:$4 sm:$0xff] (!%p823_p10)   ;;  %v3595_v2 = vld [vmem:[%s4699_s6 + $0xc] ss:$16 sps:$4 sm:$0xff] (!%p823_p10)   ;;  %v3597_v3 = vld [vmem:[%s4699_s6] ss:$16 sps:$4 sm:$0xff] (!%p823_p10)  }
  0xa1   : > { %1737 = vmatprep.subr.bf16.mxu0 (!%p823_p10), %v3593_v1  ;;  %v3598_v4 = vld [vmem:[%s4699_s6 + $0x8] ss:$16 sps:$4 sm:$0xff] (!%p823_p10)   ;;  %1823 = vmatprep.subr.bf16.mxu1 (!%p823_p10), %v3595_v2  ;;  %v3599_v5 = vld [vmem:[%s4699_s6 + $0x24] ss:$16 sps:$4 sm:$0xff] (!%p823_p10)   ;;  %v3601_v6 = vld [vmem:[%s4699_s6 + $0x2c] ss:$16 sps:$4 sm:$0xff] (!%p823_p10)  }
  0xa2   : > { %1738 = vmatpush1.bf16.msra.mxu0 (!%p823_p10), %v3597_v3  ;;  %1824 = vmatpush1.bf16.msra.mxu1 (!%p823_p10), %v3598_v4  ;;  %v3603_v7 = vld [vmem:[%s4699_s6 + $0x20] ss:$16 sps:$4 sm:$0xff] (!%p823_p10)   ;;  %v3604_v8 = vld [vmem:[%s4699_s6 + $0x28] ss:$16 sps:$4 sm:$0xff] (!%p823_p10)   ;;  %v3605_v9 = vld [vmem:[%s4699_s6 + $0x44] ss:$16 sps:$4 sm:$0xff] (!%p823_p10)  }
  0xa3   : > { %1739 = vmatprep.subr.bf16.mxu0 (!%p823_p10), %v3599_v5  ;;  %1825 = vmatprep.subr.bf16.mxu1 (!%p823_p10), %v3601_v6  ;;  %v3607_v10 = vld [vmem:[%s4699_s6 + $0x4c] ss:$16 sps:$4 sm:$0xff] (!%p823_p10)   ;;  %v3609_v11 = vld [vmem:[%s4699_s6 + $0x40] ss:$16 sps:$4 sm:$0xff] (!%p823_p10)   ;;  %v3610_v12 = vld [vmem:[%s4699_s6 + $0x48] ss:$16 sps:$4 sm:$0xff] (!%p823_p10)  }
  0xa4   : > { %v3611_v13 = vld [vmem:[%s4699_s6 + $0x64] ss:$16 sps:$4 sm:$0xff] (!%p823_p10)   ;;  %v3613_v14 = vld [vmem:[%s4699_s6 + $0x6c] ss:$16 sps:$4 sm:$0xff] (!%p823_p10)   ;;  %v3615_v15 = vld [vmem:[%s4699_s6 + $0x60] ss:$16 sps:$4 sm:$0xff] (!%p823_p10)  }
  0xa5   : > { %v3616_v16 = vld [vmem:[%s4699_s6 + $0x68] ss:$16 sps:$4 sm:$0xff]   ;;  %v3617_v17 = vld [vmem:[%s4699_s6 + $0x84] ss:$16 sps:$4 sm:$0xff]   ;;  %v3619_v18 = vld [vmem:[%s4699_s6 + $0x8c] ss:$16 sps:$4 sm:$0xff]  }
  0xa6   : > { %1740 = vmatpush1.bf16.msra.mxu0 %v3603_v7  ;;  %1826 = vmatpush1.bf16.msra.mxu1 %v3604_v8  ;;  %v3621_v19 = vld [vmem:[%s4699_s6 + $0x80] ss:$16 sps:$4 sm:$0xff]   ;;  %v3622_v20 = vld [vmem:[%s4699_s6 + $0x88] ss:$16 sps:$4 sm:$0xff]   ;;  %v3623_v21 = vld [vmem:[%s4699_s6 + $0xa4] ss:$16 sps:$4 sm:$0xff]  }
  0xa7   : > { %1741 = vmatprep.subr.bf16.mxu0 %v3605_v9  ;;  %1827 = vmatprep.subr.bf16.mxu1 %v3607_v10  ;;  %v3625_v22 = vld [vmem:[%s4699_s6 + $0xac] ss:$16 sps:$4 sm:$0xff]   ;;  %v3627_v23 = vld [vmem:[%s4699_s6 + $0xa0] ss:$16 sps:$4 sm:$0xff]   ;;  %v3628_v24 = vld [vmem:[%s4699_s6 + $0xa8] ss:$16 sps:$4 sm:$0xff]  }
  0xa8   : > { %v3629_v25 = vld [vmem:[%s4699_s6 + $0xc4] ss:$16 sps:$4 sm:$0xff]   ;;  %v3631_v26 = vld [vmem:[%s4699_s6 + $0xcc] ss:$16 sps:$4 sm:$0xff]   ;;  %v3633_v27 = vld [vmem:[%s4699_s6 + $0xc0] ss:$16 sps:$4 sm:$0xff]  }
  0xa9   : > { %v3634_v28 = vld [vmem:[%s4699_s6 + $0xc8] ss:$16 sps:$4 sm:$0xff]   ;;  %v3635_v29 = vld [vmem:[%s4699_s6 + $0xe4] ss:$16 sps:$4 sm:$0xff]   ;;  %v3637_v30 = vld [vmem:[%s4699_s6 + $0xec] ss:$16 sps:$4 sm:$0xff]  }
  0xaa   : > { %1742 = vmatpush1.bf16.msra.mxu0 %v3609_v11  ;;  %1828 = vmatpush1.bf16.msra.mxu1 %v3610_v12  ;;  %v3639_v31 = vld [vmem:[%s4699_s6 + $0xe0] ss:$16 sps:$4 sm:$0xff]   ;;  %v3640_v32 = vld [vmem:[%s4699_s6 + $0xe8] ss:$16 sps:$4 sm:$0xff]   ;;  %v3641_v33 = vld [vmem:[%s4699_s6 + $0x104] ss:$16 sps:$4 sm:$0xff]  }
  0xab   : > { %1743 = vmatprep.subr.bf16.mxu0 %v3611_v13  ;;  %1829 = vmatprep.subr.bf16.mxu1 %v3613_v14  ;;  %v3643_v34 = vld [vmem:[%s4699_s6 + $0x10c] ss:$16 sps:$4 sm:$0xff]   ;;  %v3645_v35 = vld [vmem:[%s4699_s6 + $0x100] ss:$16 sps:$4 sm:$0xff]   ;;  %v3646_v36 = vld [vmem:[%s4699_s6 + $0x108] ss:$16 sps:$4 sm:$0xff]  }
  0xac   : > { %v3647_v37 = vld [vmem:[%s4699_s6 + $0x124] ss:$16 sps:$4 sm:$0xff]   ;;  %v3649_v38 = vld [vmem:[%s4699_s6 + $0x12c] ss:$16 sps:$4 sm:$0xff]   ;;  %v3651_v39 = vld [vmem:[%s4699_s6 + $0x120] ss:$16 sps:$4 sm:$0xff]  }
  0xad   : > { %v3652_v40 = vld [vmem:[%s4699_s6 + $0x128] ss:$16 sps:$4 sm:$0xff]   ;;  %v3653_v41 = vld [vmem:[%s4699_s6 + $0x144] ss:$16 sps:$4 sm:$0xff]   ;;  %v3655_v42 = vld [vmem:[%s4699_s6 + $0x14c] ss:$16 sps:$4 sm:$0xff]  }
  0xae   : > { %1744 = vmatpush1.bf16.msra.mxu0 %v3615_v15  ;;  %1830 = vmatpush1.bf16.msra.mxu1 %v3616_v16  ;;  %v3657_v43 = vld [vmem:[%s4699_s6 + $0x140] ss:$16 sps:$4 sm:$0xff]   ;;  %v3658_v44 = vld [vmem:[%s4699_s6 + $0x148] ss:$16 sps:$4 sm:$0xff]   ;;  %v3659_v45 = vld [vmem:[%s4699_s6 + $0x164] ss:$16 sps:$4 sm:$0xff]  }
  0xaf   : > { %1745 = vmatprep.subr.bf16.mxu0 %v3617_v17  ;;  %1831 = vmatprep.subr.bf16.mxu1 %v3619_v18  ;;  %v3661_v46 = vld [vmem:[%s4699_s6 + $0x16c] ss:$16 sps:$4 sm:$0xff]   ;;  %v3663_v47 = vld [vmem:[%s4699_s6 + $0x160] ss:$16 sps:$4 sm:$0xff]   ;;  %v3664_v48 = vld [vmem:[%s4699_s6 + $0x168] ss:$16 sps:$4 sm:$0xff]  }
  0xb0   : > { %v3665_v49 = vld [vmem:[%s4699_s6 + $0x184] ss:$16 sps:$4 sm:$0xff]   ;;  %v3667_v50 = vld [vmem:[%s4699_s6 + $0x18c] ss:$16 sps:$4 sm:$0xff]   ;;  %v3669_v51 = vld [vmem:[%s4699_s6 + $0x180] ss:$16 sps:$4 sm:$0xff]  }
  0xb1   : > { %v3670_v52 = vld [vmem:[%s4699_s6 + $0x188] ss:$16 sps:$4 sm:$0xff]   ;;  %v3671_v53 = vld [vmem:[%s4699_s6 + $0x1a4] ss:$16 sps:$4 sm:$0xff]   ;;  %v3673_v54 = vld [vmem:[%s4699_s6 + $0x1ac] ss:$16 sps:$4 sm:$0xff]  }
  0xb2   : > { %1746 = vmatpush1.bf16.msra.mxu0 %v3621_v19  ;;  %1832 = vmatpush1.bf16.msra.mxu1 %v3622_v20  ;;  %v3675_v55 = vld [vmem:[%s4699_s6 + $0x1a0] ss:$16 sps:$4 sm:$0xff]   ;;  %v3676_v56 = vld [vmem:[%s4699_s6 + $0x1a8] ss:$16 sps:$4 sm:$0xff]   ;;  %v3677_v57 = vld [vmem:[%s4699_s6 + $0x1c4] ss:$16 sps:$4 sm:$0xff]  }
  0xb3   : > { %1747 = vmatprep.subr.bf16.mxu0 %v3623_v21  ;;  %1833 = vmatprep.subr.bf16.mxu1 %v3625_v22  ;;  %v3679_v58 = vld [vmem:[%s4699_s6 + $0x1cc] ss:$16 sps:$4 sm:$0xff]   ;;  %v3681_v59 = vld [vmem:[%s4699_s6 + $0x1c0] ss:$16 sps:$4 sm:$0xff]   ;;  %v3682_v60 = vld [vmem:[%s4699_s6 + $0x1c8] ss:$16 sps:$4 sm:$0xff]  }
  0xb4   : > { %v3683_v61 = vld [vmem:[%s4699_s6 + $0x1e4] ss:$16 sps:$4 sm:$0xff]   ;;  %v3685_v62 = vld [vmem:[%s4699_s6 + $0x1ec] ss:$16 sps:$4 sm:$0xff]   ;;  %v3687_v63 = vld [vmem:[%s4699_s6 + $0x1e0] ss:$16 sps:$4 sm:$0xff]  }
  0xb5   : > { %v3688_v0 = vld [vmem:[%s4699_s6 + $0x1e8] ss:$16 sps:$4 sm:$0xff]   ;;  %v3694_v1 = vld [vmem:[%s4699_s6 + $0x204] ss:$16 sps:$4 sm:$0xff]   ;;  %v3697_v2 = vld [vmem:[%s4699_s6 + $0x20c] ss:$16 sps:$4 sm:$0xff]  }
  0xb6   : > { %1748 = vmatpush1.bf16.msra.mxu0 %v3627_v23  ;;  %1834 = vmatpush1.bf16.msra.mxu1 %v3628_v24  ;;  %v3689_v3 = vld [vmem:[%s5066_s0] ss:$16 sps:$4 sm:$0xff]   ;;  %v3695_v5 = vld [vmem:[%s4699_s6 + $0x208] ss:$16 sps:$4 sm:$0xff]   ;;  %v3700_v6 = vld [vmem:[%s4699_s6 + $0x224] ss:$16 sps:$4 sm:$0xff]  }
  0xb7   : > { %1749 = vmatprep.subr.bf16.mxu0 %v3629_v25  ;;  %1835 = vmatprep.subr.bf16.mxu1 %v3631_v26  ;;  %v3692_v4 = vld [vmem:[%s4699_s6 + $0x200] ss:$16 sps:$4 sm:$0xff]   ;;  %v3703_v7 = vld [vmem:[%s4699_s6 + $0x22c] ss:$16 sps:$4 sm:$0xff]   ;;  %v3701_v9 = vld [vmem:[%s4699_s6 + $0x228] ss:$16 sps:$4 sm:$0xff]  }
  0xb8   : > { %v3698_v8 = vld [vmem:[%s4699_s6 + $0x220] ss:$16 sps:$4 sm:$0xff]   ;;  %v3706_v10 = vld [vmem:[%s4699_s6 + $0x244] ss:$16 sps:$4 sm:$0xff]   ;;  %v3709_v11 = vld [vmem:[%s4699_s6 + $0x24c] ss:$16 sps:$4 sm:$0xff]  }
  0xb9   : > { %v3704_v12 = vld [vmem:[%s4699_s6 + $0x240] ss:$16 sps:$4 sm:$0xff]   ;;  %v3707_v13 = vld [vmem:[%s4699_s6 + $0x248] ss:$16 sps:$4 sm:$0xff]   ;;  %v3712_v14 = vld [vmem:[%s4699_s6 + $0x264] ss:$16 sps:$4 sm:$0xff]  }
  0xba   : > { %1750 = vmatpush1.bf16.msra.mxu0 %v3633_v27  ;;  %1836 = vmatpush1.bf16.msra.mxu1 %v3634_v28  ;;  %v3715_v15 = vld [vmem:[%s4699_s6 + $0x26c] ss:$16 sps:$4 sm:$0xff]   ;;  %v3710_v16 = vld [vmem:[%s4699_s6 + $0x260] ss:$16 sps:$4 sm:$0xff]   ;;  %v3713_v17 = vld [vmem:[%s4699_s6 + $0x268] ss:$16 sps:$4 sm:$0xff]  }
  0xbb   : > { %1751 = vmatprep.subr.bf16.mxu0 %v3635_v29  ;;  %1837 = vmatprep.subr.bf16.mxu1 %v3637_v30  ;;  %v3718_v18 = vld [vmem:[%s4699_s6 + $0x284] ss:$16 sps:$4 sm:$0xff]   ;;  %v3721_v19 = vld [vmem:[%s4699_s6 + $0x28c] ss:$16 sps:$4 sm:$0xff]   ;;  %v3716_v20 = vld [vmem:[%s4699_s6 + $0x280] ss:$16 sps:$4 sm:$0xff]  }
  0xbc   : > { %v3719_v21 = vld [vmem:[%s4699_s6 + $0x288] ss:$16 sps:$4 sm:$0xff]   ;;  %v3724_v22 = vld [vmem:[%s4699_s6 + $0x2a4] ss:$16 sps:$4 sm:$0xff]   ;;  %v3727_v23 = vld [vmem:[%s4699_s6 + $0x2ac] ss:$16 sps:$4 sm:$0xff]  }
  0xbd   : > { %v3722_v24 = vld [vmem:[%s4699_s6 + $0x2a0] ss:$16 sps:$4 sm:$0xff]   ;;  %v3725_v25 = vld [vmem:[%s4699_s6 + $0x2a8] ss:$16 sps:$4 sm:$0xff]   ;;  %v3730_v26 = vld [vmem:[%s4699_s6 + $0x2c4] ss:$16 sps:$4 sm:$0xff]  }
  0xbe   : > { %1752 = vmatpush1.bf16.msra.mxu0 %v3639_v31  ;;  %1838 = vmatpush1.bf16.msra.mxu1 %v3640_v32  ;;  %v3733_v27 = vld [vmem:[%s4699_s6 + $0x2cc] ss:$16 sps:$4 sm:$0xff]   ;;  %v3728_v29 = vld [vmem:[%s4699_s6 + $0x2c0] ss:$16 sps:$4 sm:$0xff]   ;;  %v3731_v30 = vld [vmem:[%s4699_s6 + $0x2c8] ss:$16 sps:$4 sm:$0xff]  }
  0xbf   : > { %1753 = vmatprep.subr.bf16.mxu0 %v3641_v33  ;;  %1839 = vmatprep.subr.bf16.mxu1 %v3643_v34  ;;  %v3790_v28 = vld [vmem:[%s5066_s0 + $0xc] ss:$16 sps:$4 sm:$0xff]   ;;  %v3736_v31 = vld [vmem:[%s4699_s6 + $0x2e4] ss:$16 sps:$4 sm:$0xff]   ;;  %v3734_v33 = vld [vmem:[%s4699_s6 + $0x2e0] ss:$16 sps:$4 sm:$0xff]  }
  0xc0   : > { %v3739_v32 = vld [vmem:[%s4699_s6 + $0x2ec] ss:$16 sps:$4 sm:$0xff]   ;;  %v3737_v34 = vld [vmem:[%s4699_s6 + $0x2e8] ss:$16 sps:$4 sm:$0xff]   ;;  %s3255_s10 = sshll.u32 %s829_s25, 6  ;;  %s3528_s18 = sshll.u32 (%p4146_p6), %s4067_s20, 5 }
  0xc1   : > { %s3062_s13 = scalar_lea.vmem (%p4146_p6), %s5071_s5, %s3528_s18 }
  0xc2   : > { %1754 = vmatpush1.bf16.msra.mxu0 %v3645_v35  ;;  %1840 = vmatpush1.bf16.msra.mxu1 %v3646_v36  ;;  %v3742_v35 = vld [vmem:[%s4699_s6 + $0x304] ss:$16 sps:$4 sm:$0xff]   ;;  %v3745_v36 = vld [vmem:[%s4699_s6 + $0x30c] ss:$16 sps:$4 sm:$0xff]  }
  0xc3   : > { %1755 = vmatprep.subr.bf16.mxu0 %v3647_v37  ;;  %1841 = vmatprep.subr.bf16.mxu1 %v3649_v38  ;;  %v3740_v37 = vld [vmem:[%s4699_s6 + $0x300] ss:$16 sps:$4 sm:$0xff]   ;;  %v3743_v38 = vld [vmem:[%s4699_s6 + $0x308] ss:$16 sps:$4 sm:$0xff]  }
  0xc6   : > { %1756 = vmatpush1.bf16.msra.mxu0 %v3651_v39  ;;  %1842 = vmatpush1.bf16.msra.mxu1 %v3652_v40  ;;  %v3748_v39 = vld [vmem:[%s4699_s6 + $0x324] ss:$16 sps:$4 sm:$0xff]   ;;  %v3751_v40 = vld [vmem:[%s4699_s6 + $0x32c] ss:$16 sps:$4 sm:$0xff]  }
  0xc7   : > { %1757 = vmatprep.subr.bf16.mxu0 %v3653_v41  ;;  %1843 = vmatprep.subr.bf16.mxu1 %v3655_v42  ;;  %v3746_v41 = vld [vmem:[%s4699_s6 + $0x320] ss:$16 sps:$4 sm:$0xff]   ;;  %v3749_v42 = vld [vmem:[%s4699_s6 + $0x328] ss:$16 sps:$4 sm:$0xff]  }
  0xca   : > { %1758 = vmatpush1.bf16.msra.mxu0 %v3657_v43  ;;  %1844 = vmatpush1.bf16.msra.mxu1 %v3658_v44  ;;  %v3754_v43 = vld [vmem:[%s4699_s6 + $0x344] ss:$16 sps:$4 sm:$0xff]   ;;  %v3757_v44 = vld [vmem:[%s4699_s6 + $0x34c] ss:$16 sps:$4 sm:$0xff]  }
  0xcb   : > { %1759 = vmatprep.subr.bf16.mxu0 %v3659_v45  ;;  %1845 = vmatprep.subr.bf16.mxu1 %v3661_v46  ;;  %v3752_v45 = vld [vmem:[%s4699_s6 + $0x340] ss:$16 sps:$4 sm:$0xff]   ;;  %v3755_v46 = vld [vmem:[%s4699_s6 + $0x348] ss:$16 sps:$4 sm:$0xff]  }
  0xce   : > { %1760 = vmatpush1.bf16.msra.mxu0 %v3663_v47  ;;  %1846 = vmatpush1.bf16.msra.mxu1 %v3664_v48  ;;  %v3760_v47 = vld [vmem:[%s4699_s6 + $0x364] ss:$16 sps:$4 sm:$0xff]   ;;  %v3763_v48 = vld [vmem:[%s4699_s6 + $0x36c] ss:$16 sps:$4 sm:$0xff]  }
  0xcf   : > { %1761 = vmatprep.subr.bf16.mxu0 %v3665_v49  ;;  %1847 = vmatprep.subr.bf16.mxu1 %v3667_v50  ;;  %v3758_v49 = vld [vmem:[%s4699_s6 + $0x360] ss:$16 sps:$4 sm:$0xff]   ;;  %v3761_v50 = vld [vmem:[%s4699_s6 + $0x368] ss:$16 sps:$4 sm:$0xff]  }
  0xd2   : > { %1762 = vmatpush1.bf16.msra.mxu0 %v3669_v51  ;;  %1848 = vmatpush1.bf16.msra.mxu1 %v3670_v52  ;;  %v3766_v51 = vld [vmem:[%s4699_s6 + $0x384] ss:$16 sps:$4 sm:$0xff]   ;;  %v3769_v52 = vld [vmem:[%s4699_s6 + $0x38c] ss:$16 sps:$4 sm:$0xff]  }
  0xd3   : > { %1763 = vmatprep.subr.bf16.mxu0 %v3671_v53  ;;  %1849 = vmatprep.subr.bf16.mxu1 %v3673_v54  ;;  %v3764_v53 = vld [vmem:[%s4699_s6 + $0x380] ss:$16 sps:$4 sm:$0xff]   ;;  %v3767_v54 = vld [vmem:[%s4699_s6 + $0x388] ss:$16 sps:$4 sm:$0xff]  }
  0xd6   : > { %1764 = vmatpush1.bf16.msra.mxu0 %v3675_v55  ;;  %1850 = vmatpush1.bf16.msra.mxu1 %v3676_v56  ;;  %v3772_v55 = vld [vmem:[%s4699_s6 + $0x3a4] ss:$16 sps:$4 sm:$0xff]   ;;  %v3775_v56 = vld [vmem:[%s4699_s6 + $0x3ac] ss:$16 sps:$4 sm:$0xff]  }
  0xd7   : > { %1765 = vmatprep.subr.bf16.mxu0 %v3677_v57  ;;  %1851 = vmatprep.subr.bf16.mxu1 %v3679_v58  ;;  %v3770_v57 = vld [vmem:[%s4699_s6 + $0x3a0] ss:$16 sps:$4 sm:$0xff]   ;;  %v3773_v58 = vld [vmem:[%s4699_s6 + $0x3a8] ss:$16 sps:$4 sm:$0xff]  }
  0xda   : > { %1766 = vmatpush1.bf16.msra.mxu0 %v3681_v59  ;;  %1852 = vmatpush1.bf16.msra.mxu1 %v3682_v60  ;;  %v3778_v59 = vld [vmem:[%s4699_s6 + $0x3c4] ss:$16 sps:$4 sm:$0xff]   ;;  %v3781_v60 = vld [vmem:[%s4699_s6 + $0x3cc] ss:$16 sps:$4 sm:$0xff]  }
  0xdb   : > { %1767 = vmatprep.subr.bf16.mxu0 %v3683_v61  ;;  %1853 = vmatprep.subr.bf16.mxu1 %v3685_v62  ;;  %v3776_v61 = vld [vmem:[%s4699_s6 + $0x3c0] ss:$16 sps:$4 sm:$0xff]   ;;  %v3779_v62 = vld [vmem:[%s4699_s6 + $0x3c8] ss:$16 sps:$4 sm:$0xff]  }
  0xde   : > { %1768 = vmatpush1.bf16.msra.mxu0 %v3687_v63  ;;  %1854 = vmatpush1.bf16.msra.mxu1 %v3688_v0  ;;  %v3784_v63 = vld [vmem:[%s4699_s6 + $0x3e4] ss:$16 sps:$4 sm:$0xff]   ;;  %v3787_v0 = vld [vmem:[%s4699_s6 + $0x3ec] ss:$16 sps:$4 sm:$0xff]  }
  0xdf   : > { %1780 = vmatprep.subr.bf16.mxu0 %v3694_v1  ;;  %1866 = vmatprep.subr.bf16.mxu1 %v3697_v2  ;;  %v3782_v1 = vld [vmem:[%s4699_s6 + $0x3e0] ss:$16 sps:$4 sm:$0xff]   ;;  %v3785_v2 = vld [vmem:[%s4699_s6 + $0x3e8] ss:$16 sps:$4 sm:$0xff]   ;;  %s3256_s6 = sshll.u32 %s4067_s20, 2 }
  0xe0   : > { %p919_p11 = scmp.lt.s32.totalorder %s3256_s6, 7 }
  0xe1   : > { %1770 = vmatmul.mubr.bf16.vlgmr.msra.gmra.mrb[0].mxu0 %v3689_v3  ;;  %1856 = vmatmul.mubr.bf16.vlgmr.msra.gmra.mrb[0].mxu1 %v3689_v3  ;;  %v3793_v3 = vld [vmem:[%s4798_s11 + $0x4] ss:$16 sps:$4 sm:$0xff]  }
  0xe2   : > { %1781 = vmatpush1.bf16.msra.mxu0 %v3692_v4  ;;  %1867 = vmatpush1.bf16.msra.mxu1 %v3695_v5  ;;  %v3796_v4 = vld [vmem:[%s4798_s11 + $0xc] ss:$16 sps:$4 sm:$0xff]   ;;  %v3788_v5 = vld [vmem:[%s5066_s0 + $0x8] ss:$16 sps:$4 sm:$0xff]   ;;  %s5081_s6 = smov (!%p919_p11, %s3256_s6), 7 }
  0xe3   : > { %1782 = vmatprep.subr.bf16.mxu0 %v3700_v6  ;;  %1868 = vmatprep.subr.bf16.mxu1 %v3703_v7  ;;  %v3791_v6 = vld [vmem:[%s4798_s11] ss:$16 sps:$4 sm:$0xff]   ;;  %v3794_v7 = vld [vmem:[%s4798_s11 + $0x8] ss:$16 sps:$4 sm:$0xff]   ;;  %s921_s9 = scalar_lea.vmem %s5070_s4, %s5081_s6 }
  0xe4   : > { %1812 = vmatprep.mubr.bf16.mxu0 %v3790_v28  ;;  %1898 = vmatprep.mubr.bf16.mxu1 %v3790_v28  ;;  %v3824_v28 = vld [vmem:[%s4798_s11 + $0xa8] ss:$16 sps:$4 sm:$0xff]  }
  0xe6   : > { %1783 = vmatpush1.bf16.msra.mxu0 %v3698_v8  ;;  %1869 = vmatpush1.bf16.msra.mxu1 %v3701_v9  ;;  %v3799_v8 = vld [vmem:[%s4798_s11 + $0x24] ss:$16 sps:$4 sm:$0xff]   ;;  %v3802_v9 = vld [vmem:[%s4798_s11 + $0x2c] ss:$16 sps:$4 sm:$0xff]  }
  0xe7   : > { %1784 = vmatprep.subr.bf16.mxu0 %v3706_v10  ;;  %1870 = vmatprep.subr.bf16.mxu1 %v3709_v11  ;;  %v3889_v10 = vld [vmem:[%s5068_s2 + $0x4] ss:$16 sps:$4 sm:$0xff]   ;;  %v3797_v11 = vld [vmem:[%s4798_s11 + $0x20] ss:$16 sps:$4 sm:$0xff]  }
  0xea   : > { %1785 = vmatpush1.bf16.msra.mxu0 %v3704_v12  ;;  %1871 = vmatpush1.bf16.msra.mxu1 %v3707_v13  ;;  %v3800_v12 = vld [vmem:[%s4798_s11 + $0x28] ss:$16 sps:$4 sm:$0xff]   ;;  %v3805_v13 = vld [vmem:[%s4798_s11 + $0x44] ss:$16 sps:$4 sm:$0xff]  }
  0xeb   : > { %1786 = vmatprep.subr.bf16.mxu0 %v3712_v14  ;;  %1872 = vmatprep.subr.bf16.mxu1 %v3715_v15  ;;  %v3808_v14 = vld [vmem:[%s4798_s11 + $0x4c] ss:$16 sps:$4 sm:$0xff]   ;;  %v3803_v15 = vld [vmem:[%s4798_s11 + $0x40] ss:$16 sps:$4 sm:$0xff]  }
  0xee   : > { %1787 = vmatpush1.bf16.msra.mxu0 %v3710_v16  ;;  %1873 = vmatpush1.bf16.msra.mxu1 %v3713_v17  ;;  %v3806_v16 = vld [vmem:[%s4798_s11 + $0x48] ss:$16 sps:$4 sm:$0xff]   ;;  %v3811_v17 = vld [vmem:[%s4798_s11 + $0x64] ss:$16 sps:$4 sm:$0xff]  }
  0xef   : > { %1788 = vmatprep.subr.bf16.mxu0 %v3718_v18  ;;  %1874 = vmatprep.subr.bf16.mxu1 %v3721_v19  ;;  %v3814_v18 = vld [vmem:[%s4798_s11 + $0x6c] ss:$16 sps:$4 sm:$0xff]   ;;  %v3809_v19 = vld [vmem:[%s4798_s11 + $0x60] ss:$16 sps:$4 sm:$0xff]  }
  0xf2   : > { %1789 = vmatpush1.bf16.msra.mxu0 %v3716_v20  ;;  %1875 = vmatpush1.bf16.msra.mxu1 %v3719_v21  ;;  %v3812_v20 = vld [vmem:[%s4798_s11 + $0x68] ss:$16 sps:$4 sm:$0xff]   ;;  %v3817_v21 = vld [vmem:[%s4798_s11 + $0x84] ss:$16 sps:$4 sm:$0xff]  }
  0xf3   : > { %1790 = vmatprep.subr.bf16.mxu0 %v3724_v22  ;;  %1876 = vmatprep.subr.bf16.mxu1 %v3727_v23  ;;  %v3820_v22 = vld [vmem:[%s4798_s11 + $0x8c] ss:$16 sps:$4 sm:$0xff]   ;;  %v3815_v23 = vld [vmem:[%s4798_s11 + $0x80] ss:$16 sps:$4 sm:$0xff]  }
  0xf6   : > { %1791 = vmatpush1.bf16.msra.mxu0 %v3722_v24  ;;  %1877 = vmatpush1.bf16.msra.mxu1 %v3725_v25  ;;  %v3818_v24 = vld [vmem:[%s4798_s11 + $0x88] ss:$16 sps:$4 sm:$0xff]   ;;  %v3823_v25 = vld [vmem:[%s4798_s11 + $0xa4] ss:$16 sps:$4 sm:$0xff]  }
  0xf7   : > { %1792 = vmatprep.subr.bf16.mxu0 %v3730_v26  ;;  %1878 = vmatprep.subr.bf16.mxu1 %v3733_v27  ;;  %v3826_v26 = vld [vmem:[%s4798_s11 + $0xac] ss:$16 sps:$4 sm:$0xff]   ;;  %v3821_v27 = vld [vmem:[%s4798_s11 + $0xa0] ss:$16 sps:$4 sm:$0xff]  }
  0xfa   : > { %1793 = vmatpush1.bf16.msra.mxu0 %v3728_v29  ;;  %1879 = vmatpush1.bf16.msra.mxu1 %v3731_v30  ;;  %v3829_v29 = vld [vmem:[%s4798_s11 + $0xc4] ss:$16 sps:$4 sm:$0xff]   ;;  %v3832_v30 = vld [vmem:[%s4798_s11 + $0xcc] ss:$16 sps:$4 sm:$0xff]  }
  0xfb   : > { %1794 = vmatprep.subr.bf16.mxu0 %v3736_v31  ;;  %1880 = vmatprep.subr.bf16.mxu1 %v3739_v32  ;;  %v3827_v31 = vld [vmem:[%s4798_s11 + $0xc0] ss:$16 sps:$4 sm:$0xff]   ;;  %v3830_v32 = vld [vmem:[%s4798_s11 + $0xc8] ss:$16 sps:$4 sm:$0xff]  }
  0xfe   : > { %1795 = vmatpush1.bf16.msra.mxu0 %v3734_v33  ;;  %1881 = vmatpush1.bf16.msra.mxu1 %v3737_v34  ;;  %v3835_v33 = vld [vmem:[%s4798_s11 + $0xe4] ss:$16 sps:$4 sm:$0xff]   ;;  %v3838_v34 = vld [vmem:[%s4798_s11 + $0xec] ss:$16 sps:$4 sm:$0xff]  }
  0xff   : > { %1796 = vmatprep.subr.bf16.mxu0 %v3742_v35  ;;  %1882 = vmatprep.subr.bf16.mxu1 %v3745_v36  ;;  %v3833_v35 = vld [vmem:[%s4798_s11 + $0xe0] ss:$16 sps:$4 sm:$0xff]   ;;  %v3836_v36 = vld [vmem:[%s4798_s11 + $0xe8] ss:$16 sps:$4 sm:$0xff]  }
 0x102   : > { %1797 = vmatpush1.bf16.msra.mxu0 %v3740_v37  ;;  %1883 = vmatpush1.bf16.msra.mxu1 %v3743_v38  ;;  %v3841_v37 = vld [vmem:[%s4798_s11 + $0x104] ss:$16 sps:$4 sm:$0xff]   ;;  %v3844_v38 = vld [vmem:[%s4798_s11 + $0x10c] ss:$16 sps:$4 sm:$0xff]  }
 0x103   : > { %1798 = vmatprep.subr.bf16.mxu0 %v3748_v39  ;;  %1884 = vmatprep.subr.bf16.mxu1 %v3751_v40  ;;  %v3839_v39 = vld [vmem:[%s4798_s11 + $0x100] ss:$16 sps:$4 sm:$0xff]   ;;  %v3842_v40 = vld [vmem:[%s4798_s11 + $0x108] ss:$16 sps:$4 sm:$0xff]  }
 0x106   : > { %1799 = vmatpush1.bf16.msra.mxu0 %v3746_v41  ;;  %1885 = vmatpush1.bf16.msra.mxu1 %v3749_v42  ;;  %v3847_v41 = vld [vmem:[%s4798_s11 + $0x124] ss:$16 sps:$4 sm:$0xff]   ;;  %v3850_v42 = vld [vmem:[%s4798_s11 + $0x12c] ss:$16 sps:$4 sm:$0xff]  }
 0x107   : > { %1800 = vmatprep.subr.bf16.mxu0 %v3754_v43  ;;  %1886 = vmatprep.subr.bf16.mxu1 %v3757_v44  ;;  %v3845_v43 = vld [vmem:[%s4798_s11 + $0x120] ss:$16 sps:$4 sm:$0xff]   ;;  %v3848_v44 = vld [vmem:[%s4798_s11 + $0x128] ss:$16 sps:$4 sm:$0xff]  }
 0x10a   : > { %1801 = vmatpush1.bf16.msra.mxu0 %v3752_v45  ;;  %1887 = vmatpush1.bf16.msra.mxu1 %v3755_v46  ;;  %v3853_v45 = vld [vmem:[%s4798_s11 + $0x144] ss:$16 sps:$4 sm:$0xff]   ;;  %v3856_v46 = vld [vmem:[%s4798_s11 + $0x14c] ss:$16 sps:$4 sm:$0xff]  }
 0x10b   : > { %1802 = vmatprep.subr.bf16.mxu0 %v3760_v47  ;;  %1888 = vmatprep.subr.bf16.mxu1 %v3763_v48  ;;  %v3851_v47 = vld [vmem:[%s4798_s11 + $0x140] ss:$16 sps:$4 sm:$0xff]   ;;  %v3854_v48 = vld [vmem:[%s4798_s11 + $0x148] ss:$16 sps:$4 sm:$0xff]  }
 0x10e   : > { %1803 = vmatpush1.bf16.msra.mxu0 %v3758_v49  ;;  %1889 = vmatpush1.bf16.msra.mxu1 %v3761_v50  ;;  %v3859_v49 = vld [vmem:[%s4798_s11 + $0x164] ss:$16 sps:$4 sm:$0xff]   ;;  %v3862_v50 = vld [vmem:[%s4798_s11 + $0x16c] ss:$16 sps:$4 sm:$0xff]  }
 0x10f   : > { %1804 = vmatprep.subr.bf16.mxu0 %v3766_v51  ;;  %1890 = vmatprep.subr.bf16.mxu1 %v3769_v52  ;;  %v3857_v51 = vld [vmem:[%s4798_s11 + $0x160] ss:$16 sps:$4 sm:$0xff]   ;;  %v3860_v52 = vld [vmem:[%s4798_s11 + $0x168] ss:$16 sps:$4 sm:$0xff]  }
 0x112   : > { %1805 = vmatpush1.bf16.msra.mxu0 %v3764_v53  ;;  %1891 = vmatpush1.bf16.msra.mxu1 %v3767_v54  ;;  %v3865_v53 = vld [vmem:[%s4798_s11 + $0x184] ss:$16 sps:$4 sm:$0xff]   ;;  %v3868_v54 = vld [vmem:[%s4798_s11 + $0x18c] ss:$16 sps:$4 sm:$0xff]  }
 0x113   : > { %1806 = vmatprep.subr.bf16.mxu0 %v3772_v55  ;;  %1892 = vmatprep.subr.bf16.mxu1 %v3775_v56  ;;  %v3863_v55 = vld [vmem:[%s4798_s11 + $0x180] ss:$16 sps:$4 sm:$0xff]   ;;  %v3866_v56 = vld [vmem:[%s4798_s11 + $0x188] ss:$16 sps:$4 sm:$0xff]  }
 0x116   : > { %1807 = vmatpush1.bf16.msra.mxu0 %v3770_v57  ;;  %1893 = vmatpush1.bf16.msra.mxu1 %v3773_v58  ;;  %v3871_v57 = vld [vmem:[%s4798_s11 + $0x1a4] ss:$16 sps:$4 sm:$0xff]   ;;  %v3874_v58 = vld [vmem:[%s4798_s11 + $0x1ac] ss:$16 sps:$4 sm:$0xff]  }
 0x117   : > { %1808 = vmatprep.subr.bf16.mxu0 %v3778_v59  ;;  %1894 = vmatprep.subr.bf16.mxu1 %v3781_v60  ;;  %v3869_v59 = vld [vmem:[%s4798_s11 + $0x1a0] ss:$16 sps:$4 sm:$0xff]   ;;  %v3872_v60 = vld [vmem:[%s4798_s11 + $0x1a8] ss:$16 sps:$4 sm:$0xff]  }
 0x11a   : > { %1809 = vmatpush1.bf16.msra.mxu0 %v3776_v61  ;;  %1895 = vmatpush1.bf16.msra.mxu1 %v3779_v62  ;;  %v3877_v61 = vld [vmem:[%s4798_s11 + $0x1c4] ss:$16 sps:$4 sm:$0xff]   ;;  %v3880_v62 = vld [vmem:[%s4798_s11 + $0x1cc] ss:$16 sps:$4 sm:$0xff]  }
 0x11b   : > { %1810 = vmatprep.subr.bf16.mxu0 %v3784_v63  ;;  %1896 = vmatprep.subr.bf16.mxu1 %v3787_v0  ;;  %v3875_v63 = vld [vmem:[%s4798_s11 + $0x1c0] ss:$16 sps:$4 sm:$0xff]   ;;  %v3878_v0 = vld [vmem:[%s4798_s11 + $0x1c8] ss:$16 sps:$4 sm:$0xff]  }
 0x11e   : > { %1811 = vmatpush1.bf16.msra.mxu0 %v3782_v1  ;;  %1897 = vmatpush1.bf16.msra.mxu1 %v3785_v2  ;;  %v3883_v1 = vld [vmem:[%s4798_s11 + $0x1e4] ss:$16 sps:$4 sm:$0xff]   ;;  %v3886_v2 = vld [vmem:[%s4798_s11 + $0x1ec] ss:$16 sps:$4 sm:$0xff]  }
 0x11f   : > { %2725 = vmatprep.subr.bf16.mxu0 %v3793_v3  ;;  %2811 = vmatprep.subr.bf16.mxu1 %v3796_v4  ;;  %v3881_v3 = vld [vmem:[%s4798_s11 + $0x1e0] ss:$16 sps:$4 sm:$0xff]   ;;  %v3884_v4 = vld [vmem:[%s4798_s11 + $0x1e8] ss:$16 sps:$4 sm:$0xff]  }
 0x121   : > { %1813 = vmatmul.mubr.bf16.vlgmr.msra.gmra.mrb[0].mxu0 %v3788_v5  ;;  %1899 = vmatmul.mubr.bf16.vlgmr.msra.gmra.mrb[0].mxu1 %v3788_v5  ;;  %v3892_v5 = vld [vmem:[%s4798_s11 + $0x204] ss:$16 sps:$4 sm:$0xff]  }
 0x122   : > { %2726 = vmatpush1.bf16.msra.mxu0 %v3791_v6  ;;  %2812 = vmatpush1.bf16.msra.mxu1 %v3794_v7  ;;  %v3895_v6 = vld [vmem:[%s4798_s11 + $0x20c] ss:$16 sps:$4 sm:$0xff]   ;;  %v3887_v7 = vld [vmem:[%s5068_s2] ss:$16 sps:$4 sm:$0xff]  }
 0x123   : > { %2727 = vmatprep.subr.bf16.mxu0 %v3799_v8  ;;  %2813 = vmatprep.subr.bf16.mxu1 %v3802_v9  ;;  %v3890_v8 = vld [vmem:[%s4798_s11 + $0x200] ss:$16 sps:$4 sm:$0xff]   ;;  %v3893_v9 = vld [vmem:[%s4798_s11 + $0x208] ss:$16 sps:$4 sm:$0xff]  }
 0x124   : > { %2757 = vmatprep.mubr.bf16.mxu0 %v3889_v10  ;;  %2843 = vmatprep.mubr.bf16.mxu1 %v3889_v10  ;;  %v3898_v10 = vld [vmem:[%s4798_s11 + $0x224] ss:$16 sps:$4 sm:$0xff]  }
 0x126   : > { %2728 = vmatpush1.bf16.msra.mxu0 %v3797_v11  ;;  %2814 = vmatpush1.bf16.msra.mxu1 %v3800_v12  ;;  %v3901_v11 = vld [vmem:[%s4798_s11 + $0x22c] ss:$16 sps:$4 sm:$0xff]  }
 0x127   : > { %2729 = vmatprep.subr.bf16.mxu0 %v3805_v13  ;;  %2815 = vmatprep.subr.bf16.mxu1 %v3808_v14  ;;  %v3988_v12 = vld [vmem:[%s5068_s2 + $0xc] ss:$16 sps:$4 sm:$0xff]   ;;  %v3896_v13 = vld [vmem:[%s4798_s11 + $0x220] ss:$16 sps:$4 sm:$0xff]   ;;  %v3899_v14 = vld [vmem:[%s4798_s11 + $0x228] ss:$16 sps:$4 sm:$0xff]  }
 0x12a   : > { %2730 = vmatpush1.bf16.msra.mxu0 %v3803_v15  ;;  %2816 = vmatpush1.bf16.msra.mxu1 %v3806_v16  ;;  %v3904_v15 = vld [vmem:[%s4798_s11 + $0x244] ss:$16 sps:$4 sm:$0xff]   ;;  %v3907_v16 = vld [vmem:[%s4798_s11 + $0x24c] ss:$16 sps:$4 sm:$0xff]  }
 0x12b   : > { %2731 = vmatprep.subr.bf16.mxu0 %v3811_v17  ;;  %2817 = vmatprep.subr.bf16.mxu1 %v3814_v18  ;;  %v3902_v17 = vld [vmem:[%s4798_s11 + $0x240] ss:$16 sps:$4 sm:$0xff]   ;;  %v3905_v18 = vld [vmem:[%s4798_s11 + $0x248] ss:$16 sps:$4 sm:$0xff]  }
 0x12e   : > { %2732 = vmatpush1.bf16.msra.mxu0 %v3809_v19  ;;  %2818 = vmatpush1.bf16.msra.mxu1 %v3812_v20  ;;  %v3910_v19 = vld [vmem:[%s4798_s11 + $0x264] ss:$16 sps:$4 sm:$0xff]   ;;  %v3913_v20 = vld [vmem:[%s4798_s11 + $0x26c] ss:$16 sps:$4 sm:$0xff]  }
 0x12f   : > { %2733 = vmatprep.subr.bf16.mxu0 %v3817_v21  ;;  %2819 = vmatprep.subr.bf16.mxu1 %v3820_v22  ;;  %v3908_v21 = vld [vmem:[%s4798_s11 + $0x260] ss:$16 sps:$4 sm:$0xff]   ;;  %v3911_v22 = vld [vmem:[%s4798_s11 + $0x268] ss:$16 sps:$4 sm:$0xff]  }
 0x132   : > { %2734 = vmatpush1.bf16.msra.mxu0 %v3815_v23  ;;  %2820 = vmatpush1.bf16.msra.mxu1 %v3818_v24  ;;  %v3916_v23 = vld [vmem:[%s4798_s11 + $0x284] ss:$16 sps:$4 sm:$0xff]   ;;  %v3919_v24 = vld [vmem:[%s4798_s11 + $0x28c] ss:$16 sps:$4 sm:$0xff]  }
 0x133   : > { %2735 = vmatprep.subr.bf16.mxu0 %v3823_v25  ;;  %2821 = vmatprep.subr.bf16.mxu1 %v3826_v26  ;;  %v3914_v25 = vld [vmem:[%s4798_s11 + $0x280] ss:$16 sps:$4 sm:$0xff]   ;;  %v3917_v26 = vld [vmem:[%s4798_s11 + $0x288] ss:$16 sps:$4 sm:$0xff]  }
 0x136   : > { %2736 = vmatpush1.bf16.msra.mxu0 %v3821_v27  ;;  %2822 = vmatpush1.bf16.msra.mxu1 %v3824_v28  ;;  %v3922_v27 = vld [vmem:[%s4798_s11 + $0x2a4] ss:$16 sps:$4 sm:$0xff]   ;;  %v3925_v28 = vld [vmem:[%s4798_s11 + $0x2ac] ss:$16 sps:$4 sm:$0xff]  }
 0x137   : > { %2737 = vmatprep.subr.bf16.mxu0 %v3829_v29  ;;  %2823 = vmatprep.subr.bf16.mxu1 %v3832_v30  ;;  %v3920_v29 = vld [vmem:[%s4798_s11 + $0x2a0] ss:$16 sps:$4 sm:$0xff]   ;;  %v3923_v30 = vld [vmem:[%s4798_s11 + $0x2a8] ss:$16 sps:$4 sm:$0xff]  }
 0x13a   : > { %2738 = vmatpush1.bf16.msra.mxu0 %v3827_v31  ;;  %2824 = vmatpush1.bf16.msra.mxu1 %v3830_v32  ;;  %v3928_v31 = vld [vmem:[%s4798_s11 + $0x2c4] ss:$16 sps:$4 sm:$0xff]   ;;  %v3931_v32 = vld [vmem:[%s4798_s11 + $0x2cc] ss:$16 sps:$4 sm:$0xff]  }
 0x13b   : > { %2739 = vmatprep.subr.bf16.mxu0 %v3835_v33  ;;  %2825 = vmatprep.subr.bf16.mxu1 %v3838_v34  ;;  %v3926_v33 = vld [vmem:[%s4798_s11 + $0x2c0] ss:$16 sps:$4 sm:$0xff]   ;;  %v3929_v34 = vld [vmem:[%s4798_s11 + $0x2c8] ss:$16 sps:$4 sm:$0xff]  }
 0x13e   : > { %2740 = vmatpush1.bf16.msra.mxu0 %v3833_v35  ;;  %2826 = vmatpush1.bf16.msra.mxu1 %v3836_v36  ;;  %v3934_v35 = vld [vmem:[%s4798_s11 + $0x2e4] ss:$16 sps:$4 sm:$0xff]   ;;  %v3937_v36 = vld [vmem:[%s4798_s11 + $0x2ec] ss:$16 sps:$4 sm:$0xff]  }
 0x13f   : > { %2741 = vmatprep.subr.bf16.mxu0 %v3841_v37  ;;  %2827 = vmatprep.subr.bf16.mxu1 %v3844_v38  ;;  %v3932_v37 = vld [vmem:[%s4798_s11 + $0x2e0] ss:$16 sps:$4 sm:$0xff]   ;;  %v3935_v38 = vld [vmem:[%s4798_s11 + $0x2e8] ss:$16 sps:$4 sm:$0xff]  }
 0x142   : > { %2742 = vmatpush1.bf16.msra.mxu0 %v3839_v39  ;;  %2828 = vmatpush1.bf16.msra.mxu1 %v3842_v40  ;;  %v3940_v39 = vld [vmem:[%s4798_s11 + $0x304] ss:$16 sps:$4 sm:$0xff]   ;;  %v3943_v40 = vld [vmem:[%s4798_s11 + $0x30c] ss:$16 sps:$4 sm:$0xff]  }
 0x143   : > { %2743 = vmatprep.subr.bf16.mxu0 %v3847_v41  ;;  %2829 = vmatprep.subr.bf16.mxu1 %v3850_v42  ;;  %v3938_v41 = vld [vmem:[%s4798_s11 + $0x300] ss:$16 sps:$4 sm:$0xff]   ;;  %v3941_v42 = vld [vmem:[%s4798_s11 + $0x308] ss:$16 sps:$4 sm:$0xff]  }
 0x146   : > { %2744 = vmatpush1.bf16.msra.mxu0 %v3845_v43  ;;  %2830 = vmatpush1.bf16.msra.mxu1 %v3848_v44  ;;  %v3946_v43 = vld [vmem:[%s4798_s11 + $0x324] ss:$16 sps:$4 sm:$0xff]   ;;  %v3949_v44 = vld [vmem:[%s4798_s11 + $0x32c] ss:$16 sps:$4 sm:$0xff]  }
 0x147   : > { %2745 = vmatprep.subr.bf16.mxu0 %v3853_v45  ;;  %2831 = vmatprep.subr.bf16.mxu1 %v3856_v46  ;;  %v3944_v45 = vld [vmem:[%s4798_s11 + $0x320] ss:$16 sps:$4 sm:$0xff]   ;;  %v3947_v46 = vld [vmem:[%s4798_s11 + $0x328] ss:$16 sps:$4 sm:$0xff]  }
 0x14a   : > { %2746 = vmatpush1.bf16.msra.mxu0 %v3851_v47  ;;  %2832 = vmatpush1.bf16.msra.mxu1 %v3854_v48  ;;  %v3952_v47 = vld [vmem:[%s4798_s11 + $0x344] ss:$16 sps:$4 sm:$0xff]   ;;  %v3955_v48 = vld [vmem:[%s4798_s11 + $0x34c] ss:$16 sps:$4 sm:$0xff]  }
 0x14b   : > { %2747 = vmatprep.subr.bf16.mxu0 %v3859_v49  ;;  %2833 = vmatprep.subr.bf16.mxu1 %v3862_v50  ;;  %v3950_v49 = vld [vmem:[%s4798_s11 + $0x340] ss:$16 sps:$4 sm:$0xff]   ;;  %v3953_v50 = vld [vmem:[%s4798_s11 + $0x348] ss:$16 sps:$4 sm:$0xff]  }
 0x14e   : > { %2748 = vmatpush1.bf16.msra.mxu0 %v3857_v51  ;;  %2834 = vmatpush1.bf16.msra.mxu1 %v3860_v52  ;;  %v3958_v51 = vld [vmem:[%s4798_s11 + $0x364] ss:$16 sps:$4 sm:$0xff]   ;;  %v3961_v52 = vld [vmem:[%s4798_s11 + $0x36c] ss:$16 sps:$4 sm:$0xff]  }
 0x14f   : > { %2749 = vmatprep.subr.bf16.mxu0 %v3865_v53  ;;  %2835 = vmatprep.subr.bf16.mxu1 %v3868_v54  ;;  %v3956_v53 = vld [vmem:[%s4798_s11 + $0x360] ss:$16 sps:$4 sm:$0xff]   ;;  %v3959_v54 = vld [vmem:[%s4798_s11 + $0x368] ss:$16 sps:$4 sm:$0xff]  }
 0x152   : > { %2750 = vmatpush1.bf16.msra.mxu0 %v3863_v55  ;;  %2836 = vmatpush1.bf16.msra.mxu1 %v3866_v56  ;;  %v3964_v55 = vld [vmem:[%s4798_s11 + $0x384] ss:$16 sps:$4 sm:$0xff]   ;;  %v3967_v56 = vld [vmem:[%s4798_s11 + $0x38c] ss:$16 sps:$4 sm:$0xff]  }
 0x153   : > { %2751 = vmatprep.subr.bf16.mxu0 %v3871_v57  ;;  %2837 = vmatprep.subr.bf16.mxu1 %v3874_v58  ;;  %v3962_v57 = vld [vmem:[%s4798_s11 + $0x380] ss:$16 sps:$4 sm:$0xff]   ;;  %v3965_v58 = vld [vmem:[%s4798_s11 + $0x388] ss:$16 sps:$4 sm:$0xff]  }
 0x156   : > { %2752 = vmatpush1.bf16.msra.mxu0 %v3869_v59  ;;  %2838 = vmatpush1.bf16.msra.mxu1 %v3872_v60  ;;  %v3970_v59 = vld [vmem:[%s4798_s11 + $0x3a4] ss:$16 sps:$4 sm:$0xff]   ;;  %v3973_v60 = vld [vmem:[%s4798_s11 + $0x3ac] ss:$16 sps:$4 sm:$0xff]  }
 0x157   : > { %2753 = vmatprep.subr.bf16.mxu0 %v3877_v61  ;;  %2839 = vmatprep.subr.bf16.mxu1 %v3880_v62  ;;  %v3968_v61 = vld [vmem:[%s4798_s11 + $0x3a0] ss:$16 sps:$4 sm:$0xff]   ;;  %v3971_v62 = vld [vmem:[%s4798_s11 + $0x3a8] ss:$16 sps:$4 sm:$0xff]  }
 0x15a   : > { %2754 = vmatpush1.bf16.msra.mxu0 %v3875_v63  ;;  %2840 = vmatpush1.bf16.msra.mxu1 %v3878_v0  ;;  %v3976_v63 = vld [vmem:[%s4798_s11 + $0x3c4] ss:$16 sps:$4 sm:$0xff]   ;;  %v3979_v0 = vld [vmem:[%s4798_s11 + $0x3cc] ss:$16 sps:$4 sm:$0xff]  }
 0x15b   : > { %2755 = vmatprep.subr.bf16.mxu0 %v3883_v1  ;;  %2841 = vmatprep.subr.bf16.mxu1 %v3886_v2  ;;  %v3974_v1 = vld [vmem:[%s4798_s11 + $0x3c0] ss:$16 sps:$4 sm:$0xff]   ;;  %v3977_v2 = vld [vmem:[%s4798_s11 + $0x3c8] ss:$16 sps:$4 sm:$0xff]  }
 0x15e   : > { %2756 = vmatpush1.bf16.msra.mxu0 %v3881_v3  ;;  %2842 = vmatpush1.bf16.msra.mxu1 %v3884_v4  ;;  %v3982_v3 = vld [vmem:[%s4798_s11 + $0x3e4] ss:$16 sps:$4 sm:$0xff]   ;;  %v3985_v4 = vld [vmem:[%s4798_s11 + $0x3ec] ss:$16 sps:$4 sm:$0xff]  }
 0x15f   : > { %2768 = vmatprep.subr.bf16.mxu0 %v3892_v5  ;;  %2854 = vmatprep.subr.bf16.mxu1 %v3895_v6  ;;  %v3980_v5 = vld [vmem:[%s4798_s11 + $0x3e0] ss:$16 sps:$4 sm:$0xff]   ;;  %v3983_v6 = vld [vmem:[%s4798_s11 + $0x3e8] ss:$16 sps:$4 sm:$0xff]   ;;  %s5021_s11 = scalar_lea.vmem [#allocation5], %s3255_s10 }
 0x161   : > { %2758 = vmatmul.mubr.bf16.vlgmr.msra.gmra.mrb[0].mxu0 %v3887_v7  ;;  %2844 = vmatmul.mubr.bf16.vlgmr.msra.gmra.mrb[0].mxu1 %v3887_v7  ;;  %v3986_v7 = vld [vmem:[%s5068_s2 + $0x8] ss:$16 sps:$4 sm:$0xff]  }
 0x162   : > { %2769 = vmatpush1.bf16.msra.mxu0 %v3890_v8  ;;  %2855 = vmatpush1.bf16.msra.mxu1 %v3893_v9  ;;  %v2926_v8 = vlaneseq }
 0x163   : > { %2770 = vmatprep.subr.bf16.mxu0 %v3898_v10  ;;  %2856 = vmatprep.subr.bf16.mxu1 %v3901_v11 }
 0x164   : > { %2800 = vmatprep.mubr.bf16.mxu0 %v3988_v12  ;;  %2886 = vmatprep.mubr.bf16.mxu1 %v3988_v12  ;;  %v2927_v9 = vshrl.u32 %v2926_v8, 7  ;;  %v2924_v12 = vld [vmem:[%s921_s9] sm:$0xf] }
 0x166   : > { %2771 = vmatpush1.bf16.msra.mxu0 %v3896_v13  ;;  %2857 = vmatpush1.bf16.msra.mxu1 %v3899_v14  ;;  %v2928_v10 = vsub.s32 0, %v2927_v9  ;;  %v2936_v11 = vsub.s32 2, %v2927_v9  ;;  %v2932_v13 = vsub.s32 1, %v2927_v9  ;;  %v2940_v14 = vsub.s32 3, %v2927_v9 }
 0x167   : > { %2772 = vmatprep.subr.bf16.mxu0 %v3904_v15  ;;  %2858 = vmatprep.subr.bf16.mxu1 %v3907_v16 }
 0x168   : > { %v2929_v15 = vrot.slane %v2924_v12, %v2928_v10  ;;  %v2937_v16 = vrot.slane %v2924_v12, %v2936_v11 }
 0x16a   : > { %2773 = vmatpush1.bf16.msra.mxu0 %v3902_v17  ;;  %2859 = vmatpush1.bf16.msra.mxu1 %v3905_v18  ;;  %v2933_v17 = vrot.slane %v2924_v12, %v2932_v13  ;;  %v2941_v18 = vrot.slane %v2924_v12, %v2940_v14 }
 0x16b   : > { %2774 = vmatprep.subr.bf16.mxu0 %v3910_v19  ;;  %2860 = vmatprep.subr.bf16.mxu1 %v3913_v20 }
 0x16e   : > { %2775 = vmatpush1.bf16.msra.mxu0 %v3908_v21  ;;  %2861 = vmatpush1.bf16.msra.mxu1 %v3911_v22 }
 0x16f   : > { %2776 = vmatprep.subr.bf16.mxu0 %v3916_v23  ;;  %2862 = vmatprep.subr.bf16.mxu1 %v3919_v24 }
 0x172   : > { %2777 = vmatpush1.bf16.msra.mxu0 %v3914_v25  ;;  %2863 = vmatpush1.bf16.msra.mxu1 %v3917_v26 }
 0x173   : > { %2778 = vmatprep.subr.bf16.mxu0 %v3922_v27  ;;  %2864 = vmatprep.subr.bf16.mxu1 %v3925_v28 }
 0x176   : > { %2779 = vmatpush1.bf16.msra.mxu0 %v3920_v29  ;;  %2865 = vmatpush1.bf16.msra.mxu1 %v3923_v30 }
 0x177   : > { %2780 = vmatprep.subr.bf16.mxu0 %v3928_v31  ;;  %2866 = vmatprep.subr.bf16.mxu1 %v3931_v32 }
 0x17a   : > { %2781 = vmatpush1.bf16.msra.mxu0 %v3926_v33  ;;  %2867 = vmatpush1.bf16.msra.mxu1 %v3929_v34 }
 0x17b   : > { %2782 = vmatprep.subr.bf16.mxu0 %v3934_v35  ;;  %2868 = vmatprep.subr.bf16.mxu1 %v3937_v36 }
 0x17e   : > { %2783 = vmatpush1.bf16.msra.mxu0 %v3932_v37  ;;  %2869 = vmatpush1.bf16.msra.mxu1 %v3935_v38 }
 0x17f   : > { %2784 = vmatprep.subr.bf16.mxu0 %v3940_v39  ;;  %2870 = vmatprep.subr.bf16.mxu1 %v3943_v40 }
 0x182   : > { %2785 = vmatpush1.bf16.msra.mxu0 %v3938_v41  ;;  %2871 = vmatpush1.bf16.msra.mxu1 %v3941_v42 }
 0x183   : > { %2786 = vmatprep.subr.bf16.mxu0 %v3946_v43  ;;  %2872 = vmatprep.subr.bf16.mxu1 %v3949_v44 }
 0x186   : > { %2787 = vmatpush1.bf16.msra.mxu0 %v3944_v45  ;;  %2873 = vmatpush1.bf16.msra.mxu1 %v3947_v46 }
 0x187   : > { %2788 = vmatprep.subr.bf16.mxu0 %v3952_v47  ;;  %2874 = vmatprep.subr.bf16.mxu1 %v3955_v48 }
 0x18a   : > { %2789 = vmatpush1.bf16.msra.mxu0 %v3950_v49  ;;  %2875 = vmatpush1.bf16.msra.mxu1 %v3953_v50 }
 0x18b   : > { %2790 = vmatprep.subr.bf16.mxu0 %v3958_v51  ;;  %2876 = vmatprep.subr.bf16.mxu1 %v3961_v52 }
 0x18e   : > { %2791 = vmatpush1.bf16.msra.mxu0 %v3956_v53  ;;  %2877 = vmatpush1.bf16.msra.mxu1 %v3959_v54 }
 0x18f   : > { %2792 = vmatprep.subr.bf16.mxu0 %v3964_v55  ;;  %2878 = vmatprep.subr.bf16.mxu1 %v3967_v56 }
 0x192   : > { %2793 = vmatpush1.bf16.msra.mxu0 %v3962_v57  ;;  %2879 = vmatpush1.bf16.msra.mxu1 %v3965_v58 }
 0x193   : > { %2794 = vmatprep.subr.bf16.mxu0 %v3970_v59  ;;  %2880 = vmatprep.subr.bf16.mxu1 %v3973_v60 }
 0x196   : > { %2795 = vmatpush1.bf16.msra.mxu0 %v3968_v61  ;;  %2881 = vmatpush1.bf16.msra.mxu1 %v3971_v62 }
 0x197   : > { %2796 = vmatprep.subr.bf16.mxu0 %v3976_v63  ;;  %2882 = vmatprep.subr.bf16.mxu1 %v3979_v0 }
 0x19a   : > { %2797 = vmatpush1.bf16.msra.mxu0 %v3974_v1  ;;  %2883 = vmatpush1.bf16.msra.mxu1 %v3977_v2 }
 0x19b   : > { %2798 = vmatprep.subr.bf16.mxu0 %v3982_v3  ;;  %2884 = vmatprep.subr.bf16.mxu1 %v3985_v4 }
 0x19e   : > { %2799 = vmatpush1.bf16.msra.mxu0 %v3980_v5  ;;  %2885 = vmatpush1.bf16.msra.mxu1 %v3983_v6 }
 0x1a1   : > { %2801 = vmatmul.mubr.bf16.vlgmr.msra.gmra.mrb[0].mxu0 %v3986_v7  ;;  %2887 = vmatmul.mubr.bf16.vlgmr.msra.gmra.mrb[0].mxu1 %v3986_v7 }
 0x274   : > { %v2802_v19 = vpop.f32.mrb[0].mxu0  ;;  %v2888_v20 = vpop.f32.mrb[0].mxu1 }
 0x275   : > { %v4985_v21 = vadd.f32 %v2929_v15, %v2802_v19  ;;  %v4987_v22 = vadd.f32 %v2937_v16, %v2888_v20  ;;  %v2804_v23 = vpop.f32.mrb[1].mxu0  ;;  %v2890_v24 = vpop.f32.mrb[1].mxu1 }
 0x276   : > { %v4989_v25 = vadd.f32 %v2933_v17, %v2804_v23  ;;  %v4991_v26 = vadd.f32 %v2941_v18, %v2890_v24  ;;  %v2806_v27 = vpop.f32.mrb[2].mxu0  ;;  %v2892_v28 = vpop.f32.mrb[2].mxu1 }
 0x277   : > { %v2962_v29 = vand.u32 2147483647, %v4985_v21  ;;  %v2964_v30 = vand.u32 2147483647, %v4987_v22  ;;  %v4997_v35 = vadd.f32 %v2929_v15, %v2806_v27  ;;  %v4999_v36 = vadd.f32 %v2937_v16, %v2892_v28  ;;  %v2808_v37 = vpop.f32.mrb[3].mxu0  ;;  %v2894_v38 = vpop.f32.mrb[3].mxu1 }
 0x278   : > { %v2963_v31 = vand.u32 2147483647, %v4989_v25  ;;  %v2965_v32 = vand.u32 2147483647, %v4991_v26  ;;  %v5001_v41 = vadd.f32 %v2933_v17, %v2808_v37  ;;  %v5003_v42 = vadd.f32 %v2941_v18, %v2894_v38 }
 0x279   : > { %v2970_v33 = vsub.f32 0.0, %v2962_v29  ;;  %v2972_v34 = vsub.f32 0.0, %v2964_v30  ;;  %v2966_v47 = vand.u32 2147483647, %v4997_v35  ;;  %v2968_v48 = vand.u32 2147483647, %v4999_v36 }
 0x27a   : > { %v2971_v39 = vsub.f32 0.0, %v2963_v31  ;;  %v2973_v40 = vsub.f32 0.0, %v2965_v32  ;;  %v2967_v49 = vand.u32 2147483647, %v5001_v41  ;;  %v2969_v51 = vand.u32 2147483647, %v5003_v42 }
 0x27b   : > { %v2978_v43 = vmul.f32 1.442695, %v2970_v33  ;;  %v2982_v44 = vmul.f32 1.442695, %v2972_v34  ;;  %v2974_v50 = vsub.f32 0.0, %v2966_v47  ;;  %v2976_v52 = vsub.f32 0.0, %v2968_v48 }
 0x27c   : > { %v2980_v45 = vmul.f32 1.442695, %v2971_v39  ;;  %v2984_v46 = vmul.f32 1.442695, %v2973_v40  ;;  %v2975_v53 = vsub.f32 0.0, %v2967_v49  ;;  %v2977_v55 = vsub.f32 0.0, %v2969_v51 }
 0x27d   : > { %3989 = vpow2.f32 %v2978_v43  ;;  %v2986_v54 = vmul.f32 1.442695, %v2974_v50  ;;  %v2990_v56 = vmul.f32 1.442695, %v2976_v52  ;;  %v2954_v13 = vmax.f32 %v4985_v21, 0.0 }
 0x27e   : > { %3991 = vpow2.f32 %v2982_v44  ;;  %v2988_v57 = vmul.f32 1.442695, %v2975_v53  ;;  %v2992_v58 = vmul.f32 1.442695, %v2977_v55  ;;  %v2956_v16 = vmax.f32 %v4987_v22, 0.0 }
 0x27f   : > { %3993 = vpow2.f32 %v2980_v45  ;;  %v2955_v20 = vmax.f32 %v4989_v25, 0.0  ;;  %v2957_v27 = vmax.f32 %v4991_v26, 0.0  ;;  %v2958_v33 = vmax.f32 %v4997_v35, 0.0 }
 0x280   : > { %3995 = vpow2.f32 %v2984_v46  ;;  %v2960_v38 = vmax.f32 %v4999_v36, 0.0  ;;  %v2959_v44 = vmax.f32 %v5001_v41, 0.0  ;;  %v2961_v47 = vmax.f32 %v5003_v42, 0.0 }
 0x281   : > { %3997 = vpow2.f32 %v2986_v54 }
 0x282   : > { %3999 = vpow2.f32 %v2990_v56 }
 0x283   : > { %4001 = vpow2.f32 %v2988_v57 }
 0x284   : > { %4003 = vpow2.f32 %v2992_v58 }
 0x287   : > { %v3990_v59 = vpop.eup %3989 }
 0x288   : > { %v3992_v60 = vpop.eup %3991  ;;  %v2994_v61 = vadd.f32 1.0, %v3990_v59 }
 0x289   : > { %v3994_v62 = vpop.eup %3993  ;;  %v2996_v63 = vadd.f32 1.0, %v3992_v60 }
 0x28a   : > { %v3996_v0 = vpop.eup %3995  ;;  %4005 = vlog2.f32 %v2994_v61  ;;  %v2995_v1 = vadd.f32 1.0, %v3994_v62 }
 0x28b   : > { %4007 = vlog2.f32 %v2996_v63  ;;  %v2997_v2 = vadd.f32 1.0, %v3996_v0  ;;  %v3998_v3 = vpop.eup %3997 }
 0x28c   : > { %4009 = vlog2.f32 %v2995_v1  ;;  %v4000_v4 = vpop.eup %3999  ;;  %v2998_v5 = vadd.f32 1.0, %v3998_v3 }
 0x28d   : > { %4011 = vlog2.f32 %v2997_v2  ;;  %v4002_v6 = vpop.eup %4001  ;;  %v3000_v7 = vadd.f32 1.0, %v4000_v4 }
 0x28e   : > { %v4004_v8 = vpop.eup %4003  ;;  %4013 = vlog2.f32 %v2998_v5  ;;  %v2999_v9 = vadd.f32 1.0, %v4002_v6 }
 0x28f   : > { %4015 = vlog2.f32 %v3000_v7  ;;  %v3001_v10 = vadd.f32 1.0, %v4004_v8 }
 0x290   : > { %4017 = vlog2.f32 %v2999_v9 }
 0x291   : > { %4019 = vlog2.f32 %v3001_v10 }
 0x294   : > { %v4006_v11 = vpop.eup %4005 }
 0x295   : > { %v4008_v12 = vpop.eup %4007  ;;  %v3003_v14 = vmul.f32 0.6931472, %v4006_v11 }
 0x296   : > { %v4010_v15 = vpop.eup %4009  ;;  %v3007_v17 = vmul.f32 0.6931472, %v4008_v12 }
 0x297   : > { %v4012_v18 = vpop.eup %4011  ;;  %v3018_v19 = vadd.f32 %v3003_v14, %v2954_v13  ;;  %v3005_v23 = vmul.f32 0.6931472, %v4010_v15 }
 0x298   : > { %v3020_v24 = vadd.f32 %v3007_v17, %v2956_v16  ;;  %v3009_v28 = vmul.f32 0.6931472, %v4012_v18  ;;  %v4014_v29 = vpop.eup %4013 }
 0x299   : > { %4021 = vtanh.f32 %v3018_v19  ;;  %v3019_v30 = vadd.f32 %v3005_v23, %v2955_v20  ;;  %v4016_v31 = vpop.eup %4015  ;;  %v3011_v34 = vmul.f32 0.6931472, %v4014_v29 }
 0x29a   : > { %4023 = vtanh.f32 %v3020_v24  ;;  %v3021_v32 = vadd.f32 %v3009_v28, %v2957_v27  ;;  %v4018_v37 = vpop.eup %4017  ;;  %v3015_v39 = vmul.f32 0.6931472, %v4016_v31 }
 0x29b   : > { %4025 = vtanh.f32 %v3019_v30  ;;  %v4020_v40 = vpop.eup %4019  ;;  %v3022_v43 = vadd.f32 %v3011_v34, %v2958_v33  ;;  %v3013_v45 = vmul.f32 0.6931472, %v4018_v37 }
 0x29c   : > { %4027 = vtanh.f32 %v3021_v32  ;;  %v3024_v46 = vadd.f32 %v3015_v39, %v2960_v38  ;;  %v3017_v48 = vmul.f32 0.6931472, %v4020_v40 }
 0x29d   : > { %4029 = vtanh.f32 %v3022_v43  ;;  %v3023_v49 = vadd.f32 %v3013_v45, %v2959_v44 }
 0x29e   : > { %4031 = vtanh.f32 %v3024_v46  ;;  %v3025_v50 = vadd.f32 %v3017_v48, %v2961_v47 }
 0x29f   : > { %4033 = vtanh.f32 %v3023_v49 }
 0x2a0   : > { %4035 = vtanh.f32 %v3025_v50 }
 0x2a3   : > { %v4022_v51 = vpop.eup %4021 }
 0x2a4   : > { %v4024_v52 = vpop.eup %4023  ;;  %v3034_v53 = vmul.f32 %v4022_v51, %v4985_v21 }
 0x2a5   : > { %v4026_v54 = vpop.eup %4025  ;;  %v3036_v55 = vmul.f32 %v4024_v52, %v4987_v22 }
 0x2a6   : > { %v4028_v56 = vpop.eup %4027  ;;  %3042 = vst [vmem:[%s5021_s11] sm:$0xff] %v3034_v53  ;;  %v3035_v57 = vmul.f32 %v4026_v54, %v4989_v25 }
 0x2a7   : > { %3044 = vst [vmem:[%s5021_s11 + $0x10] sm:$0xff] %v3036_v55  ;;  %v3037_v21 = vmul.f32 %v4028_v56, %v4991_v26  ;;  %v4030_v58 = vpop.eup %4029  ;;  %3056 = sbr.rel (!%p4146_p6) target bundleno = 694 (0x2b6), region = 98 }
 0x2a8   : > { %3043 = vst [vmem:[%s5021_s11 + $0x8] sm:$0xff] %v3035_v57  ;;  %v4032_v22 = vpop.eup %4031  ;;  %v3038_v59 = vmul.f32 %v4030_v58, %v4997_v35 }
 0x2a9   : > { %3045 = vst [vmem:[%s5021_s11 + $0x18] sm:$0xff] %v3037_v21  ;;  %v4034_v60 = vpop.eup %4033  ;;  %v3040_v61 = vmul.f32 %v4032_v22, %v4999_v36 }
 0x2aa   : > { %v4036_v62 = vpop.eup %4035  ;;  %3046 = vst [vmem:[%s5021_s11 + $0x20] sm:$0xff] %v3038_v59  ;;  %v3039_v63 = vmul.f32 %v4034_v60, %v5001_v41 }
 0x2ab   : > { %3048 = vst [vmem:[%s5021_s11 + $0x30] sm:$0xff] %v3040_v61  ;;  %v3041_v25 = vmul.f32 %v4036_v62, %v5003_v42 }
 0x2ac   : > { %3047 = vst [vmem:[%s5021_s11 + $0x28] sm:$0xff] %v3039_v63 }
 0x2ad   : > { %3049 = vst [vmem:[%s5021_s11 + $0x38] sm:$0xff] %v3041_v25  ;;  %v3075_v26 = vld [vmem:[%s5021_s11] sm:$0xff] (%p4146_p6) }
 0x2ae   : > { %v3079_v36 = vld [vmem:[%s5021_s11 + $0x10] sm:$0xff]  ;;  %3076 = vst [vmem:[%s3062_s13] sm:$0xff] %v3075_v26 }
 0x2af   : > { %v3077_v35 = vld [vmem:[%s5021_s11 + $0x8] sm:$0xff]  ;;  %3080 = vst [vmem:[%s3062_s13 + $0x10] sm:$0xff] %v3079_v36 }
 0x2b0   : > { %v3081_v41 = vld [vmem:[%s5021_s11 + $0x18] sm:$0xff]  ;;  %3078 = vst [vmem:[%s3062_s13 + $0x8] sm:$0xff] %v3077_v35 }
 0x2b1   : > { %v3083_v42 = vld [vmem:[%s5021_s11 + $0x20] sm:$0xff]  ;;  %3082 = vst [vmem:[%s3062_s13 + $0x18] sm:$0xff] %v3081_v41 }
 0x2b2   : > { %3084 = vst [vmem:[%s3062_s13 + $0x40] sm:$0xff] %v3083_v42  ;;  %v3087_v1 = vld [vmem:[%s5021_s11 + $0x30] sm:$0xff] }
 0x2b3   : > { %v3085_v0 = vld [vmem:[%s5021_s11 + $0x28] sm:$0xff]  ;;  %3088 = vst [vmem:[%s3062_s13 + $0x50] sm:$0xff] %v3087_v1 }
 0x2b4   : > { %3086 = vst [vmem:[%s3062_s13 + $0x48] sm:$0xff] %v3085_v0  ;;  %v3089_v2 = vld [vmem:[%s5021_s11 + $0x38] sm:$0xff] }
 0x2b5   : > { %3090 = vst [vmem:[%s3062_s13 + $0x58] sm:$0xff] %v3089_v2 }
 0x2b6 PF: > { %s15_s22 = sadd.s32 1, %s4075_s22   ;;  %s5074_s18 = smov %s4063_s19 }
 0x2b7   : > { %p12_p12 = scmp.ge.s32.totalorder %s15_s22, 4   ;;  %s5075_s19 = smov %s4151_s29 }
 0x2b8   : > { %s5076_s20 = smov %s4071_s21  ;;  %s5077_s21 = smov %s5079_s23 }
 0x2b9   :  { %14 = sbr.rel (!%p12_p12) target bundleno = 3 (0x3), region = 169 }

</bundles_post_ra>
